<compile_context>
chip_gen: v5e
topology: v5e:2x2
jax: 0.10.0
libtpu: 0.0.40
codegen_flags: <defaults>
</compile_context>

<pallas_src>
import functools
import math

import jax
import jax.numpy as jnp
from jax.experimental import pallas as pl
from jax.experimental.pallas import tpu as pltpu


# ---------------------------------------------------------------------------
# In-kernel helpers
# ---------------------------------------------------------------------------

def _layernorm(x, g, b, eps=1e-5):
    mean = jnp.mean(x, axis=-1, keepdims=True)
    var = jnp.mean(jnp.square(x - mean), axis=-1, keepdims=True)
    return (x - mean) * jax.lax.rsqrt(var + eps) * g + b


# ---------------------------------------------------------------------------
# Fused Pallas kernels (one per sub-block of the decoder layer)
# ---------------------------------------------------------------------------

def _self_attn_ln_kernel(x_ref, pos_ref, mask_ref,
                         wq_ref, bq_ref, wk_ref, bk_ref, wv_ref, bv_ref,
                         wo_ref, bo_ref, g_ref, b_ref, o_ref,
                         *, n_heads, head_dim, batch, seq):
    """norm2(x + MHA(x+pos, x+pos, x)) — projections, all heads and LN fused."""
    f32 = jnp.float32
    d_model = n_heads * head_dim
    rows = batch * seq
    scale = 1.0 / math.sqrt(head_dim)

    x = x_ref[...].astype(f32)                          # (rows, d_model)
    qk_in = x + pos_ref[...].astype(f32)
    mask = mask_ref[...].astype(f32)                    # (seq, seq) additive

    acc = jnp.zeros((rows, d_model), f32)
    for h in range(n_heads):                            # static unroll (n_heads small)
        q = jnp.dot(qk_in, wq_ref[h].astype(f32), preferred_element_type=f32) + bq_ref[h].astype(f32)
        k = jnp.dot(qk_in, wk_ref[h].astype(f32), preferred_element_type=f32) + bk_ref[h].astype(f32)
        v = jnp.dot(x, wv_ref[h].astype(f32), preferred_element_type=f32) + bv_ref[h].astype(f32)
        q3 = q.reshape(batch, seq, head_dim)
        k3 = k.reshape(batch, seq, head_dim)
        v3 = v.reshape(batch, seq, head_dim)
        s = jnp.einsum('bld,bmd->blm', q3, k3, preferred_element_type=f32) * scale
        s = s + mask[None, :, :]
        s = s - jnp.max(s, axis=-1, keepdims=True)
        p = jnp.exp(s)
        p = p / jnp.sum(p, axis=-1, keepdims=True)
        o3 = jnp.einsum('blm,bmd->bld', p, v3, preferred_element_type=f32)
        acc = acc + jnp.dot(o3.reshape(rows, head_dim), wo_ref[h].astype(f32),
                            preferred_element_type=f32)

    y = acc + bo_ref[...].astype(f32)
    res = x + y                                         # residual uses x (not x+pos)
    o_ref[...] = _layernorm(res, g_ref[...].astype(f32),
                            b_ref[...].astype(f32)).astype(o_ref.dtype)


def _cross_proj_kernel(src_ref, x_ref, pos_ref, wv_ref, bv_ref, wq_ref, bq_ref,
                       val_ref, q_ref):
    """value_proj(src) and [sampling_offsets | attention_weights]((x+pos)) in one call."""
    f32 = jnp.float32
    val = jnp.dot(src_ref[...].astype(f32), wv_ref[...].astype(f32),
                  preferred_element_type=f32) + bv_ref[...].astype(f32)
    val_ref[...] = val.astype(val_ref.dtype)
    q_in = x_ref[...].astype(f32) + pos_ref[...].astype(f32)
    q = jnp.dot(q_in, wq_ref[...].astype(f32), preferred_element_type=f32) + bq_ref[...].astype(f32)
    q_ref[...] = q.astype(q_ref.dtype)


def _deform_tail_ln_kernel(sv_ref, wl_ref, res_ref, wo_ref, bo_ref, g_ref, b_ref, o_ref,
                           *, n_heads, head_dim, lp):
    """softmax over levels*points, weighted sum of sampled values, output_proj,
    residual add and LayerNorm(norm1) — fused."""
    f32 = jnp.float32
    rows = res_ref.shape[0]
    d_model = n_heads * head_dim
    acc = jnp.zeros((rows, d_model), f32)
    for h in range(n_heads):
        wl = wl_ref[h].astype(f32)                      # (rows, lp)
        wl = wl - jnp.max(wl, axis=-1, keepdims=True)
        p = jnp.exp(wl)
        p = p / jnp.sum(p, axis=-1, keepdims=True)
        sv = sv_ref[h].astype(f32)                      # (rows, lp, head_dim)
        oh = jnp.sum(sv * p[:, :, None], axis=1)        # (rows, head_dim)
        acc = acc + jnp.dot(oh, wo_ref[h].astype(f32), preferred_element_type=f32)
    y = acc + bo_ref[...].astype(f32)
    res = res_ref[...].astype(f32) + y
    o_ref[...] = _layernorm(res, g_ref[...].astype(f32),
                            b_ref[...].astype(f32)).astype(o_ref.dtype)


def _ffn_ln_kernel(x_ref, w1_ref, b1_ref, w2_ref, b2_ref, g_ref, b_ref, o_ref):
    """norm3(x + linear2(relu(linear1(x)))) — fused."""
    f32 = jnp.float32
    x = x_ref[...].astype(f32)
    h = jnp.dot(x, w1_ref[...].astype(f32), preferred_element_type=f32) + b1_ref[...].astype(f32)
    h = jnp.maximum(h, 0.0)
    y = jnp.dot(h, w2_ref[...].astype(f32), preferred_element_type=f32) + b2_ref[...].astype(f32)
    o_ref[...] = _layernorm(x + y, g_ref[...].astype(f32),
                            b_ref[...].astype(f32)).astype(o_ref.dtype)


# ---------------------------------------------------------------------------
# pallas_call wrapper (demo shapes are tiny -> whole-array VMEM blocks, no grid)
# ---------------------------------------------------------------------------

_VMEM = pl.BlockSpec(memory_space=pltpu.MemorySpace.VMEM)


def _nbytes(x):
    return math.prod(x.shape) * jnp.dtype(x.dtype).itemsize


def _pcall(kernel, out_shape, *args, flops=0, transcendentals=0):
    multi = isinstance(out_shape, (tuple, list))
    out_list = list(out_shape) if multi else [out_shape]
    bytes_accessed = sum(_nbytes(a) for a in args) + sum(_nbytes(o) for o in out_list)
    cost = pl.CostEstimate(flops=int(flops), transcendentals=int(transcendentals),
                           bytes_accessed=int(bytes_accessed))
    return pl.pallas_call(
        kernel,
        out_shape=tuple(out_list) if multi else out_shape,
        in_specs=[_VMEM] * len(args),
        out_specs=tuple(_VMEM for _ in out_list) if multi else _VMEM,
        cost_estimate=cost,
    )(*args)


# ---------------------------------------------------------------------------
# Full decoder layer forward (both streams batched through one kernel set)
# ---------------------------------------------------------------------------

def boltzformer_decoder_layer(params, tgt, query_pos, reference_points, src,
                              src_spatial_shapes, level_start_index, tgt_mask,
                              attn_mask, *, n_heads, n_levels, n_points):
    # src_spatial_shapes must be a static tuple of (H_l, W_l); level_start_index
    # is implied by it and kept only for signature parity with the PyTorch module.
    del level_start_index
    B, Lq, E = tgt.shape
    hd = E // n_heads
    lp = n_levels * n_points
    B2 = 2 * B                       # both streams batched together
    rows = B2 * Lq
    Len_in = src.shape[1]
    dt = tgt.dtype
    f32 = jnp.float32

    # additive attention mask (the module multiplies a float mask by -1e9)
    k_neg = jnp.float32(-1000000000.0)
    if jnp.issubdtype(attn_mask.dtype, jnp.floating):
        mask_add = attn_mask.astype(f32) * k_neg
    else:
        mask_add = jnp.where(attn_mask, k_neg, jnp.float32(0.0))

    # batch the two streams (tgt first, tgt_mask second)
    x0 = jnp.concatenate([tgt, tgt_mask], axis=0).reshape(rows, E)
    pos2 = jnp.concatenate([query_pos, query_pos], axis=0).reshape(rows, E)
    ref2 = jnp.concatenate([reference_points, reference_points], axis=0)

    # --- 1. fused self-attention + norm2 --------------------------------------
    sa = params['self_attn']
    x1 = _pcall(
        functools.partial(_self_attn_ln_kernel, n_heads=n_heads, head_dim=hd,
                          batch=B2, seq=Lq),
        jax.ShapeDtypeStruct((rows, E), dt),
        x0, pos2, mask_add,
        sa['wq'], sa['bq'], sa['wk'], sa['bk'], sa['wv'], sa['bv'],
        sa['wo'], sa['bo'], params['norm2']['g'], params['norm2']['b'],
        flops=8 * rows * E * E + 4 * B2 * n_heads * Lq * Lq * hd,
        transcendentals=B2 * n_heads * Lq * Lq)

    # --- 2. fused cross-attention projections ----------------------------------
    ca = params['cross_attn']
    nq = n_heads * n_levels * n_points * 3          # offsets (2) + weights (1)
    n_off = n_heads * n_levels * n_points * 2
    value2d, qproj = _pcall(
        _cross_proj_kernel,
        (jax.ShapeDtypeStruct((B * Len_in, E), dt),
         jax.ShapeDtypeStruct((rows, nq), dt)),
        src.reshape(B * Len_in, E), x1, pos2, ca['wv'], ca['bv'], ca['wq'], ca['bq'],
        flops=2 * B * Len_in * E * E + 2 * rows * E * nq)

    # --- deformable sampling locations + bilinear gather (plain JAX) -----------
    # TODO(synk): the data-dependent gather has no clean Pallas equivalent here;
    # it stays as a single XLA take_along_axis on the tiny flattened value.
    h_list = [int(h) for h, _ in src_spatial_shapes]
    w_list = [int(w) for _, w in src_spatial_shapes]
    starts, acc_ = [], 0
    for hl, wl in zip(h_list, w_list):
        starts.append(acc_)
        acc_ += hl * wl
    bshape = (1, 1, 1, n_levels, 1)
    h_f = jnp.asarray(h_list, f32).reshape(bshape)
    w_f = jnp.asarray(w_list, f32).reshape(bshape)
    w_i = jnp.asarray(w_list, jnp.int32).reshape(bshape)
    start_i = jnp.asarray(starts, jnp.int32).reshape(bshape)
    offset_normalizer = jnp.stack(
        [jnp.asarray(w_list, f32), jnp.asarray(h_list, f32)], axis=-1)   # (L, 2)

    off = qproj[:, :n_off].astype(f32).reshape(B2, Lq, n_heads, n_levels, n_points, 2)
    wlog = qproj[:, n_off:]                                              # (rows, H*lp)

    loc = (ref2[:, :, None, :, None, :].astype(f32)
           + off / offset_normalizer[None, None, None, :, None, :])     # (B2,Lq,H,L,P,2)
    ix = loc[..., 0] * w_f - 0.5            # grid_sample, align_corners=False
    iy = loc[..., 1] * h_f - 0.5
    x0f = jnp.floor(ix)
    y0f = jnp.floor(iy)
    x1f = x0f + 1.0
    y1f = y0f + 1.0
    wx1 = ix - x0f
    wx0 = 1.0 - wx1
    wy1 = iy - y0f
    wy0 = 1.0 - wy1

    def corner(xf, yf, w):
        valid = ((xf >= 0.0) & (xf <= w_f - 1.0) & (yf >= 0.0) & (yf <= h_f - 1.0))
        xi = jnp.clip(xf, 0.0, w_f - 1.0).astype(jnp.int32)
        yi = jnp.clip(yf, 0.0, h_f - 1.0).astype(jnp.int32)
        idx = start_i + yi * w_i + xi
        return idx, jnp.where(valid, w, 0.0)           # zeros padding mode

    corners = [corner(x0f, y0f, wx0 * wy0), corner(x1f, y0f, wx1 * wy0),
               corner(x0f, y1f, wx0 * wy1), corner(x1f, y1f, wx1 * wy1)]
    idx_all = jnp.stack([c[0] for c in corners], axis=-1)    # (B2,Lq,H,L,P,4)
    w_all = jnp.stack([c[1] for c in corners], axis=-1)

    s4 = Lq * n_levels * n_points * 4
    idx_g = jnp.transpose(idx_all, (0, 2, 1, 3, 4, 5)).reshape(B2, n_heads, s4)
    w_g = jnp.transpose(w_all, (0, 2, 1, 3, 4, 5)).reshape(B2, n_heads, s4)

    value = value2d.reshape(B, Len_in, n_heads, hd).transpose(0, 2, 1, 3)  # (B,H,N,hd)
    value = jnp.concatenate([value, value], axis=0)          # src shared by both streams

    gathered = jnp.take_along_axis(value, idx_g[..., None], axis=2)        # (B2,H,s4,hd)
    sv = gathered.astype(f32) * w_g[..., None]
    sv = sv.reshape(B2, n_heads, Lq, lp, 4, hd).sum(axis=4)                # bilinear corners
    sv = jnp.transpose(sv, (1, 0, 2, 3, 4)).reshape(n_heads, rows, lp, hd).astype(dt)
    wl_h = wlog.reshape(B2, Lq, n_heads, lp).transpose(2, 0, 1, 3).reshape(n_heads, rows, lp)

    # --- 3. fused deformable-attn tail + norm1 ---------------------------------
    x2 = _pcall(
        functools.partial(_deform_tail_ln_kernel, n_heads=n_heads, head_dim=hd, lp=lp),
        jax.ShapeDtypeStruct((rows, E), dt),
        sv, wl_h, x1, ca['wo'], ca['bo'], params['norm1']['g'], params['norm1']['b'],
        flops=2 * rows * E * E + 2 * rows * n_heads * lp * hd,
        transcendentals=rows * n_heads * lp)

    # --- 4. fused FFN + norm3 ---------------------------------------------------
    d_ffn = params['linear1']['w'].shape[1]
    out2d = _pcall(
        _ffn_ln_kernel, jax.ShapeDtypeStruct((rows, E), dt),
        x2, params['linear1']['w'], params['linear1']['b'],
        params['linear2']['w'], params['linear2']['b'],
        params['norm3']['g'], params['norm3']['b'],
        flops=4 * rows * E * d_ffn)

    out = out2d.reshape(B2, Lq, E)
    return out[:B], out[B:]


# ---------------------------------------------------------------------------
# Deterministic parameter init (shapes from the module __init__) + hoisted prep
# ---------------------------------------------------------------------------

def init_params(key, d_model, d_ffn, n_levels, n_heads, n_points):
    keys = iter(jax.random.split(key, 32))

    def lin(din, dout, scale=0.05):
        w = jax.random.normal(next(keys), (din, dout), jnp.float32) * scale
        b = jax.random.normal(next(keys), (dout,), jnp.float32) * scale
        return {'w': w, 'b': b}

    def ln(dim):
        return {'g': jnp.ones((dim,), jnp.float32), 'b': jnp.zeros((dim,), jnp.float32)}

    E = d_model
    return {
        'self_attn': {'q': lin(E, E), 'k': lin(E, E), 'v': lin(E, E), 'o': lin(E, E)},
        'cross_attn': {
            'sampling_offsets': lin(E, n_heads * n_levels * n_points * 2, scale=0.01),
            'attention_weights': lin(E, n_heads * n_levels * n_points),
            'value_proj': lin(E, E),
            'output_proj': lin(E, E),
        },
        'linear1': lin(E, d_ffn),
        'linear2': lin(d_ffn, E),
        'norm1': ln(E), 'norm2': ln(E), 'norm3': ln(E),
    }


def prepare_params(raw, n_heads):
    """Hoist all weight/bias reshapes & concatenations out of the traced hot path:
    per-head weight tensors indexed on a leading axis, (1, N) bias rows, and the
    two deformable query-side projections fused into one GEMM weight."""
    E = raw['self_attn']['q']['w'].shape[0]
    hd = E // n_heads

    def head_in(p):    # (E, E) -> (H, E, hd);  (E,) -> (H, 1, hd)
        w = p['w'].reshape(E, n_heads, hd).transpose(1, 0, 2)
        b = p['b'].reshape(n_heads, 1, hd)
        return w, b

    def head_out(p):   # (E, E) -> (H, hd, E);  (E,) -> (1, E)
        return p['w'].reshape(n_heads, hd, E), p['b'].reshape(1, E)

    def row(p):
        return {'w': p['w'], 'b': p['b'].reshape(1, -1)}

    def ln(p):
        return {'g': p['g'].reshape(1, -1), 'b': p['b'].reshape(1, -1)}

    sa = raw['self_attn']
    wq, bq = head_in(sa['q'])
    wk, bk = head_in(sa['k'])
    wv, bv = head_in(sa['v'])
    wo, bo = head_out(sa['o'])

    ca = raw['cross_attn']
    wq_c = jnp.concatenate([ca['sampling_offsets']['w'], ca['attention_weights']['w']], axis=1)
    bq_c = jnp.concatenate([ca['sampling_offsets']['b'], ca['attention_weights']['b']]).reshape(1, -1)
    wo_c, bo_c = head_out(ca['output_proj'])

    return {
        'self_attn': {'wq': wq, 'bq': bq, 'wk': wk, 'bk': bk, 'wv': wv, 'bv': bv,
                      'wo': wo, 'bo': bo},
        'cross_attn': {'wq': wq_c, 'bq': bq_c,
                       'wv': ca['value_proj']['w'],
                       'bv': ca['value_proj']['b'].reshape(1, -1),
                       'wo': wo_c, 'bo': bo_c},
        'linear1': row(raw['linear1']),
        'linear2': row(raw['linear2']),
        'norm1': ln(raw['norm1']), 'norm2': ln(raw['norm2']), 'norm3': ln(raw['norm3']),
    }


# ---------------------------------------------------------------------------
# Demo
# ---------------------------------------------------------------------------

if __name__ == "__main__":
    d_model, d_ffn, n_levels, n_heads, n_points = 32, 64, 2, 4, 2
    B, Lq = 2, 8
    spatial_shapes = ((8, 8), (4, 4))               # static per-level (H, W)
    Len_in = sum(h * w for h, w in spatial_shapes)

    key = jax.random.PRNGKey(0)
    kp, k1, k2, k3, k4, k5, k6 = jax.random.split(key, 7)

    raw_params = init_params(kp, d_model, d_ffn, n_levels, n_heads, n_points)
    params = prepare_params(raw_params, n_heads)

    tgt = jax.random.normal(k1, (B, Lq, d_model), jnp.float32)
    tgt_mask = jax.random.normal(k2, (B, Lq, d_model), jnp.float32)
    query_pos = jax.random.normal(k3, (B, Lq, d_model), jnp.float32)
    src = jax.random.normal(k4, (B, Len_in, d_model), jnp.float32)
    reference_points = jax.random.uniform(k5, (B, Lq, n_levels, 2), jnp.float32,
                                          minval=0.1, maxval=0.9)
    attn_mask = (jax.random.uniform(k6, (Lq, Lq)) > 0.7).astype(jnp.float32)
    attn_mask = attn_mask * (1.0 - jnp.eye(Lq, dtype=jnp.float32))   # keep diagonal open
    level_start_index = jnp.array([0, spatial_shapes[0][0] * spatial_shapes[0][1]],
                                  jnp.int32)

    @jax.jit
    def run(params, tgt, query_pos, reference_points, src, tgt_mask, attn_mask):
        return boltzformer_decoder_layer(
            params, tgt, query_pos, reference_points, src,
            spatial_shapes, level_start_index, tgt_mask, attn_mask,
            n_heads=n_heads, n_levels=n_levels, n_points=n_points)

    out_tgt, out_tgt_mask = run(params, tgt, query_pos, reference_points,
                                src, tgt_mask, attn_mask)
    jax.block_until_ready((out_tgt, out_tgt_mask))
    assert out_tgt.shape == (B, Lq, d_model) and out_tgt_mask.shape == (B, Lq, d_model)
    assert bool(jnp.all(jnp.isfinite(out_tgt))) and bool(jnp.all(jnp.isfinite(out_tgt_mask)))
    print("KERNEL_OK")
</pallas_src>

<mosaic_0001>
module attributes {stable_mosaic.version = 11 : i64} {
  func.func @_cross_proj_kernel(%arg0: memref<160x32xf32, #tpu.memory_space<vmem>>, %arg1: memref<32x32xf32, #tpu.memory_space<vmem>>, %arg2: memref<32x32xf32, #tpu.memory_space<vmem>>, %arg3: memref<32x32xf32, #tpu.memory_space<vmem>>, %arg4: memref<1x32xf32, #tpu.memory_space<vmem>>, %arg5: memref<32x48xf32, #tpu.memory_space<vmem>>, %arg6: memref<1x48xf32, #tpu.memory_space<vmem>>, %arg7: memref<160x32xf32, #tpu.memory_space<vmem>>, %arg8: memref<32x48xf32, #tpu.memory_space<vmem>>) attributes {dimension_semantics = [], scalar_prefetch = 0 : i64, scratch_operands = 0 : i64, tpu.core_type = #tpu.core_type<tc>} {
    %c0 = arith.constant 0 : index
    %c0_0 = arith.constant 0 : index
    %0 = vector.load %arg0[%c0, %c0_0] : memref<160x32xf32, #tpu.memory_space<vmem>>, vector<160x32xf32>
    %c0_1 = arith.constant 0 : index
    %c0_2 = arith.constant 0 : index
    %1 = vector.load %arg3[%c0_1, %c0_2] : memref<32x32xf32, #tpu.memory_space<vmem>>, vector<32x32xf32>
    %cst = arith.constant dense<0.000000e+00> : vector<160x32xf32>
    %2 = tpu.matmul %0, %1, %cst {dimension_numbers = #tpu.dot_dimension_numbers<[1], [0], [0], [1], [0, 0, 1, 1], [], []>} : vector<160x32xf32>, vector<32x32xf32>, vector<160x32xf32> -> vector<160x32xf32>
    %c0_3 = arith.constant 0 : index
    %c0_4 = arith.constant 0 : index
    %3 = vector.load %arg4[%c0_3, %c0_4] : memref<1x32xf32, #tpu.memory_space<vmem>>, vector<1x32xf32>
    %4 = vector.broadcast %3 : vector<1x32xf32> to vector<160x32xf32>
    %5 = arith.addf %2, %4 : vector<160x32xf32>
    %c0_5 = arith.constant 0 : index
    %c0_6 = arith.constant 0 : index
    %6 = vector.load %arg7[%c0_5, %c0_6] : memref<160x32xf32, #tpu.memory_space<vmem>>, vector<160x32xf32>
    tpu.vector_store %arg7[%c0_5, %c0_6], %5 {strides = array<i32>} : memref<160x32xf32, #tpu.memory_space<vmem>>, vector<160x32xf32>,
    %c0_7 = arith.constant 0 : index
    %c0_8 = arith.constant 0 : index
    %7 = vector.load %arg1[%c0_7, %c0_8] : memref<32x32xf32, #tpu.memory_space<vmem>>, vector<32x32xf32>
    %c0_9 = arith.constant 0 : index
    %c0_10 = arith.constant 0 : index
    %8 = vector.load %arg2[%c0_9, %c0_10] : memref<32x32xf32, #tpu.memory_space<vmem>>, vector<32x32xf32>
    %9 = arith.addf %7, %8 : vector<32x32xf32>
    %c0_11 = arith.constant 0 : index
    %c0_12 = arith.constant 0 : index
    %10 = vector.load %arg5[%c0_11, %c0_12] : memref<32x48xf32, #tpu.memory_space<vmem>>, vector<32x48xf32>
    %cst_13 = arith.constant dense<0.000000e+00> : vector<32x48xf32>
    %11 = tpu.matmul %9, %10, %cst_13 {dimension_numbers = #tpu.dot_dimension_numbers<[1], [0], [0], [1], [0, 0, 1, 1], [], []>} : vector<32x32xf32>, vector<32x48xf32>, vector<32x48xf32> -> vector<32x48xf32>
    %c0_14 = arith.constant 0 : index
    %c0_15 = arith.constant 0 : index
    %12 = vector.load %arg6[%c0_14, %c0_15] : memref<1x48xf32, #tpu.memory_space<vmem>>, vector<1x48xf32>
    %13 = vector.broadcast %12 : vector<1x48xf32> to vector<32x48xf32>
    %14 = arith.addf %11, %13 : vector<32x48xf32>
    %c0_16 = arith.constant 0 : index
    %c0_17 = arith.constant 0 : index
    %15 = vector.load %arg8[%c0_16, %c0_17] : memref<32x48xf32, #tpu.memory_space<vmem>>, vector<32x48xf32>
    tpu.vector_store %arg8[%c0_16, %c0_17], %14 {strides = array<i32>} : memref<32x48xf32, #tpu.memory_space<vmem>>, vector<32x48xf32>,
    return
  }
}

module attributes {stable_mosaic.version = 11 : i64} {
  func.func @_self_attn_ln_kernel(%arg0: memref<32x32xf32, #tpu.memory_space<vmem>>, %arg1: memref<32x32xf32, #tpu.memory_space<vmem>>, %arg2: memref<8x8xf32, #tpu.memory_space<vmem>>, %arg3: memref<4x32x8xf32, #tpu.memory_space<vmem>>, %arg4: memref<4x1x8xf32, #tpu.memory_space<vmem>>, %arg5: memref<4x32x8xf32, #tpu.memory_space<vmem>>, %arg6: memref<4x1x8xf32, #tpu.memory_space<vmem>>, %arg7: memref<4x32x8xf32, #tpu.memory_space<vmem>>, %arg8: memref<4x1x8xf32, #tpu.memory_space<vmem>>, %arg9: memref<4x8x32xf32, #tpu.memory_space<vmem>>, %arg10: memref<1x32xf32, #tpu.memory_space<vmem>>, %arg11: memref<1x32xf32, #tpu.memory_space<vmem>>, %arg12: memref<1x32xf32, #tpu.memory_space<vmem>>, %arg13: memref<32x32xf32, #tpu.memory_space<vmem>>) attributes {dimension_semantics = [], scalar_prefetch = 0 : i64, scratch_operands = 0 : i64, tpu.core_type = #tpu.core_type<tc>} {
    %c0 = arith.constant 0 : index
    %c0_0 = arith.constant 0 : index
    %0 = vector.load %arg0[%c0, %c0_0] : memref<32x32xf32, #tpu.memory_space<vmem>>, vector<32x32xf32>
    %c0_1 = arith.constant 0 : index
    %c0_2 = arith.constant 0 : index
    %1 = vector.load %arg1[%c0_1, %c0_2] : memref<32x32xf32, #tpu.memory_space<vmem>>, vector<32x32xf32>
    %2 = arith.addf %0, %1 : vector<32x32xf32>
    %c0_3 = arith.constant 0 : index
    %c0_4 = arith.constant 0 : index
    %3 = vector.load %arg2[%c0_3, %c0_4] : memref<8x8xf32, #tpu.memory_space<vmem>>, vector<8x8xf32>
    %cst = arith.constant 0.000000e+00 : f32
    %4 = vector.broadcast %cst : f32 to vector<32x32xf32>
    %c0_5 = arith.constant 0 : index
    %c0_6 = arith.constant 0 : index
    %c0_7 = arith.constant 0 : index
    %5 = vector.load %arg3[%c0_5, %c0_6, %c0_7] : memref<4x32x8xf32, #tpu.memory_space<vmem>>, vector<1x32x8xf32>
    %6 = vector.shape_cast %5 : vector<1x32x8xf32> to vector<32x8xf32>
    %cst_8 = arith.constant dense<0.000000e+00> : vector<32x8xf32>
    %7 = tpu.matmul %2, %6, %cst_8 {dimension_numbers = #tpu.dot_dimension_numbers<[1], [0], [0], [1], [0, 0, 1, 1], [], []>} : vector<32x32xf32>, vector<32x8xf32>, vector<32x8xf32> -> vector<32x8xf32>
    %c0_9 = arith.constant 0 : index
    %c0_10 = arith.constant 0 : index
    %c0_11 = arith.constant 0 : index
    %8 = vector.load %arg4[%c0_9, %c0_10, %c0_11] : memref<4x1x8xf32, #tpu.memory_space<vmem>>, vector<1x1x8xf32>
    %9 = vector.shape_cast %8 : vector<1x1x8xf32> to vector<1x8xf32>
    %10 = vector.broadcast %9 : vector<1x8xf32> to vector<32x8xf32>
    %11 = arith.addf %7, %10 : vector<32x8xf32>
    %c0_12 = arith.constant 0 : index
    %c0_13 = arith.constant 0 : index
    %c0_14 = arith.constant 0 : index
    %12 = vector.load %arg5[%c0_12, %c0_13, %c0_14] : memref<4x32x8xf32, #tpu.memory_space<vmem>>, vector<1x32x8xf32>
    %13 = vector.shape_cast %12 : vector<1x32x8xf32> to vector<32x8xf32>
    %cst_15 = arith.constant dense<0.000000e+00> : vector<32x8xf32>
    %14 = tpu.matmul %2, %13, %cst_15 {dimension_numbers = #tpu.dot_dimension_numbers<[1], [0], [0], [1], [0, 0, 1, 1], [], []>} : vector<32x32xf32>, vector<32x8xf32>, vector<32x8xf32> -> vector<32x8xf32>
    %c0_16 = arith.constant 0 : index
    %c0_17 = arith.constant 0 : index
    %c0_18 = arith.constant 0 : index
    %15 = vector.load %arg6[%c0_16, %c0_17, %c0_18] : memref<4x1x8xf32, #tpu.memory_space<vmem>>, vector<1x1x8xf32>
    %16 = vector.shape_cast %15 : vector<1x1x8xf32> to vector<1x8xf32>
    %17 = vector.broadcast %16 : vector<1x8xf32> to vector<32x8xf32>
    %18 = arith.addf %14, %17 : vector<32x8xf32>
    %c0_19 = arith.constant 0 : index
    %c0_20 = arith.constant 0 : index
    %c0_21 = arith.constant 0 : index
    %19 = vector.load %arg7[%c0_19, %c0_20, %c0_21] : memref<4x32x8xf32, #tpu.memory_space<vmem>>, vector<1x32x8xf32>
    %20 = vector.shape_cast %19 : vector<1x32x8xf32> to vector<32x8xf32>
    %cst_22 = arith.constant dense<0.000000e+00> : vector<32x8xf32>
    %21 = tpu.matmul %0, %20, %cst_22 {dimension_numbers = #tpu.dot_dimension_numbers<[1], [0], [0], [1], [0, 0, 1, 1], [], []>} : vector<32x32xf32>, vector<32x8xf32>, vector<32x8xf32> -> vector<32x8xf32>
    %c0_23 = arith.constant 0 : index
    %c0_24 = arith.constant 0 : index
    %c0_25 = arith.constant 0 : index
    %22 = vector.load %arg8[%c0_23, %c0_24, %c0_25] : memref<4x1x8xf32, #tpu.memory_space<vmem>>, vector<1x1x8xf32>
    %23 = vector.shape_cast %22 : vector<1x1x8xf32> to vector<1x8xf32>
    %24 = vector.broadcast %23 : vector<1x8xf32> to vector<32x8xf32>
    %25 = arith.addf %21, %24 : vector<32x8xf32>
    %26 = vector.shape_cast %11 : vector<32x8xf32> to vector<4x8x8xf32>
    %27 = vector.shape_cast %18 : vector<32x8xf32> to vector<4x8x8xf32>
    %28 = vector.shape_cast %25 : vector<32x8xf32> to vector<4x8x8xf32>
    "tpu.trace_start"() <{level = 10 : i32, message = "bld,bmd->blm"}> : () -> ()
    %cst_26 = arith.constant dense<0.000000e+00> : vector<4x8x8xf32>
    %29 = tpu.matmul %26, %27, %cst_26 {dimension_numbers = #tpu.dot_dimension_numbers<[2], [2], [1], [1], [0, 0, 0, 1, 1, 1], [0], [0]>} : vector<4x8x8xf32>, vector<4x8x8xf32>, vector<4x8x8xf32> -> vector<4x8x8xf32>
    "tpu.trace_stop"() : () -> ()
    %cst_27 = arith.constant 0.353553385 : f32
    %30 = vector.broadcast %cst_27 : f32 to vector<4x8x8xf32>
    %31 = arith.mulf %29, %30 : vector<4x8x8xf32>
    %32 = vector.shape_cast %3 : vector<8x8xf32> to vector<1x8x8xf32>
    %33 = vector.broadcast %32 : vector<1x8x8xf32> to vector<4x8x8xf32>
    %34 = arith.addf %31, %33 : vector<4x8x8xf32>
    %cst_28 = arith.constant dense<0xFF800000> : vector<4x8xf32>
    %35 = vector.multi_reduction <maximumf>, %34, %cst_28 [2] : vector<4x8x8xf32> to vector<4x8xf32>
    %36 = vector.shape_cast %35 : vector<4x8xf32> to vector<4x8x1xf32>
    %37 = vector.broadcast %36 : vector<4x8x1xf32> to vector<4x8x8xf32>
    %38 = arith.subf %34, %37 : vector<4x8x8xf32>
    %39 = math.exp %38 : vector<4x8x8xf32>
    %cst_29 = arith.constant dense<0.000000e+00> : vector<4x8xf32>
    %40 = vector.multi_reduction <add>, %39, %cst_29 [2] : vector<4x8x8xf32> to vector<4x8xf32>
    %41 = vector.shape_cast %40 : vector<4x8xf32> to vector<4x8x1xf32>
    %42 = vector.broadcast %41 : vector<4x8x1xf32> to vector<4x8x8xf32>
    %43 = arith.divf %39, %42 : vector<4x8x8xf32>
    "tpu.trace_start"() <{level = 10 : i32, message = "blm,bmd->bld"}> : () -> ()
    %cst_30 = arith.constant dense<0.000000e+00> : vector<4x8x8xf32>
    %44 = tpu.matmul %43, %28, %cst_30 {dimension_numbers = #tpu.dot_dimension_numbers<[2], [1], [1], [2], [0, 0, 0, 1, 1, 2], [0], [0]>} : vector<4x8x8xf32>, vector<4x8x8xf32>, vector<4x8x8xf32> -> vector<4x8x8xf32>
    "tpu.trace_stop"() : () -> ()
    %45 = vector.shape_cast %44 : vector<4x8x8xf32> to vector<32x8xf32>
    %c0_31 = arith.constant 0 : index
    %c0_32 = arith.constant 0 : index
    %c0_33 = arith.constant 0 : index
    %46 = vector.load %arg9[%c0_31, %c0_32, %c0_33] : memref<4x8x32xf32, #tpu.memory_space<vmem>>, vector<1x8x32xf32>
    %47 = vector.shape_cast %46 : vector<1x8x32xf32> to vector<8x32xf32>
    %cst_34 = arith.constant dense<0.000000e+00> : vector<32x32xf32>
    %48 = tpu.matmul %45, %47, %cst_34 {dimension_numbers = #tpu.dot_dimension_numbers<[1], [0], [0], [1], [0, 0, 1, 1], [], []>} : vector<32x8xf32>, vector<8x32xf32>, vector<32x32xf32> -> vector<32x32xf32>
    %49 = arith.addf %4, %48 : vector<32x32xf32>
    %c1 = arith.constant 1 : index
    %c0_35 = arith.constant 0 : index
    %c0_36 = arith.constant 0 : index
    %50 = vector.load %arg3[%c1, %c0_35, %c0_36] : memref<4x32x8xf32, #tpu.memory_space<vmem>>, vector<1x32x8xf32>
    %51 = vector.shape_cast %50 : vector<1x32x8xf32> to vector<32x8xf32>
    %cst_37 = arith.constant dense<0.000000e+00> : vector<32x8xf32>
    %52 = tpu.matmul %2, %51, %cst_37 {dimension_numbers = #tpu.dot_dimension_numbers<[1], [0], [0], [1], [0, 0, 1, 1], [], []>} : vector<32x32xf32>, vector<32x8xf32>, vector<32x8xf32> -> vector<32x8xf32>
    %c1_38 = arith.constant 1 : index
    %c0_39 = arith.constant 0 : index
    %c0_40 = arith.constant 0 : index
    %53 = vector.load %arg4[%c1_38, %c0_39, %c0_40] : memref<4x1x8xf32, #tpu.memory_space<vmem>>, vector<1x1x8xf32>
    %54 = vector.shape_cast %53 : vector<1x1x8xf32> to vector<1x8xf32>
    %55 = vector.broadcast %54 : vector<1x8xf32> to vector<32x8xf32>
    %56 = arith.addf %52, %55 : vector<32x8xf32>
    %c1_41 = arith.constant 1 : index
    %c0_42 = arith.constant 0 : index
    %c0_43 = arith.constant 0 : index
    %57 = vector.load %arg5[%c1_41, %c0_42, %c0_43] : memref<4x32x8xf32, #tpu.memory_space<vmem>>, vector<1x32x8xf32>
    %58 = vector.shape_cast %57 : vector<1x32x8xf32> to vector<32x8xf32>
    %cst_44 = arith.constant dense<0.000000e+00> : vector<32x8xf32>
    %59 = tpu.matmul %2, %58, %cst_44 {dimension_numbers = #tpu.dot_dimension_numbers<[1], [0], [0], [1], [0, 0, 1, 1], [], []>} : vector<32x32xf32>, vector<32x8xf32>, vector<32x8xf32> -> vector<32x8xf32>
    %c1_45 = arith.constant 1 : index
    %c0_46 = arith.constant 0 : index
    %c0_47 = arith.constant 0 : index
    %60 = vector.load %arg6[%c1_45, %c0_46, %c0_47] : memref<4x1x8xf32, #tpu.memory_space<vmem>>, vector<1x1x8xf32>
    %61 = vector.shape_cast %60 : vector<1x1x8xf32> to vector<1x8xf32>
    %62 = vector.broadcast %61 : vector<1x8xf32> to vector<32x8xf32>
    %63 = arith.addf %59, %62 : vector<32x8xf32>
    %c1_48 = arith.constant 1 : index
    %c0_49 = arith.constant 0 : index
    %c0_50 = arith.constant 0 : index
    %64 = vector.load %arg7[%c1_48, %c0_49, %c0_50] : memref<4x32x8xf32, #tpu.memory_space<vmem>>, vector<1x32x8xf32>
    %65 = vector.shape_cast %64 : vector<1x32x8xf32> to vector<32x8xf32>
    %cst_51 = arith.constant dense<0.000000e+00> : vector<32x8xf32>
    %66 = tpu.matmul %0, %65, %cst_51 {dimension_numbers = #tpu.dot_dimension_numbers<[1], [0], [0], [1], [0, 0, 1, 1], [], []>} : vector<32x32xf32>, vector<32x8xf32>, vector<32x8xf32> -> vector<32x8xf32>
    %c1_52 = arith.constant 1 : index
    %c0_53 = arith.constant 0 : index
    %c0_54 = arith.constant 0 : index
    %67 = vector.load %arg8[%c1_52, %c0_53, %c0_54] : memref<4x1x8xf32, #tpu.memory_space<vmem>>, vector<1x1x8xf32>
    %68 = vector.shape_cast %67 : vector<1x1x8xf32> to vector<1x8xf32>
    %69 = vector.broadcast %68 : vector<1x8xf32> to vector<32x8xf32>
    %70 = arith.addf %66, %69 : vector<32x8xf32>
    %71 = vector.shape_cast %56 : vector<32x8xf32> to vector<4x8x8xf32>
    %72 = vector.shape_cast %63 : vector<32x8xf32> to vector<4x8x8xf32>
    %73 = vector.shape_cast %70 : vector<32x8xf32> to vector<4x8x8xf32>
    "tpu.trace_start"() <{level = 10 : i32, message = "bld,bmd->blm"}> : () -> ()
    %cst_55 = arith.constant dense<0.000000e+00> : vector<4x8x8xf32>
    %74 = tpu.matmul %71, %72, %cst_55 {dimension_numbers = #tpu.dot_dimension_numbers<[2], [2], [1], [1], [0, 0, 0, 1, 1, 1], [0], [0]>} : vector<4x8x8xf32>, vector<4x8x8xf32>, vector<4x8x8xf32> -> vector<4x8x8xf32>
    "tpu.trace_stop"() : () -> ()
    %cst_56 = arith.constant 0.353553385 : f32
    %75 = vector.broadcast %cst_56 : f32 to vector<4x8x8xf32>
    %76 = arith.mulf %74, %75 : vector<4x8x8xf32>
    %77 = vector.shape_cast %3 : vector<8x8xf32> to vector<1x8x8xf32>
    %78 = vector.broadcast %77 : vector<1x8x8xf32> to vector<4x8x8xf32>
    %79 = arith.addf %76, %78 : vector<4x8x8xf32>
    %cst_57 = arith.constant dense<0xFF800000> : vector<4x8xf32>
    %80 = vector.multi_reduction <maximumf>, %79, %cst_57 [2] : vector<4x8x8xf32> to vector<4x8xf32>
    %81 = vector.shape_cast %80 : vector<4x8xf32> to vector<4x8x1xf32>
    %82 = vector.broadcast %81 : vector<4x8x1xf32> to vector<4x8x8xf32>
    %83 = arith.subf %79, %82 : vector<4x8x8xf32>
    %84 = math.exp %83 : vector<4x8x8xf32>
    %cst_58 = arith.constant dense<0.000000e+00> : vector<4x8xf32>
    %85 = vector.multi_reduction <add>, %84, %cst_58 [2] : vector<4x8x8xf32> to vector<4x8xf32>
    %86 = vector.shape_cast %85 : vector<4x8xf32> to vector<4x8x1xf32>
    %87 = vector.broadcast %86 : vector<4x8x1xf32> to vector<4x8x8xf32>
    %88 = arith.divf %84, %87 : vector<4x8x8xf32>
    "tpu.trace_start"() <{level = 10 : i32, message = "blm,bmd->bld"}> : () -> ()
    %cst_59 = arith.constant dense<0.000000e+00> : vector<4x8x8xf32>
    %89 = tpu.matmul %88, %73, %cst_59 {dimension_numbers = #tpu.dot_dimension_numbers<[2], [1], [1], [2], [0, 0, 0, 1, 1, 2], [0], [0]>} : vector<4x8x8xf32>, vector<4x8x8xf32>, vector<4x8x8xf32> -> vector<4x8x8xf32>
    "tpu.trace_stop"() : () -> ()
    %90 = vector.shape_cast %89 : vector<4x8x8xf32> to vector<32x8xf32>
    %c1_60 = arith.constant 1 : index
    %c0_61 = arith.constant 0 : index
    %c0_62 = arith.constant 0 : index
    %91 = vector.load %arg9[%c1_60, %c0_61, %c0_62] : memref<4x8x32xf32, #tpu.memory_space<vmem>>, vector<1x8x32xf32>
    %92 = vector.shape_cast %91 : vector<1x8x32xf32> to vector<8x32xf32>
    %cst_63 = arith.constant dense<0.000000e+00> : vector<32x32xf32>
    %93 = tpu.matmul %90, %92, %cst_63 {dimension_numbers = #tpu.dot_dimension_numbers<[1], [0], [0], [1], [0, 0, 1, 1], [], []>} : vector<32x8xf32>, vector<8x32xf32>, vector<32x32xf32> -> vector<32x32xf32>
    %94 = arith.addf %49, %93 : vector<32x32xf32>
    %c2 = arith.constant 2 : index
    %c0_64 = arith.constant 0 : index
    %c0_65 = arith.constant 0 : index
    %95 = vector.load %arg3[%c2, %c0_64, %c0_65] : memref<4x32x8xf32, #tpu.memory_space<vmem>>, vector<1x32x8xf32>
    %96 = vector.shape_cast %95 : vector<1x32x8xf32> to vector<32x8xf32>
    %cst_66 = arith.constant dense<0.000000e+00> : vector<32x8xf32>
    %97 = tpu.matmul %2, %96, %cst_66 {dimension_numbers = #tpu.dot_dimension_numbers<[1], [0], [0], [1], [0, 0, 1, 1], [], []>} : vector<32x32xf32>, vector<32x8xf32>, vector<32x8xf32> -> vector<32x8xf32>
    %c2_67 = arith.constant 2 : index
    %c0_68 = arith.constant 0 : index
    %c0_69 = arith.constant 0 : index
    %98 = vector.load %arg4[%c2_67, %c0_68, %c0_69] : memref<4x1x8xf32, #tpu.memory_space<vmem>>, vector<1x1x8xf32>
    %99 = vector.shape_cast %98 : vector<1x1x8xf32> to vector<1x8xf32>
    %100 = vector.broadcast %99 : vector<1x8xf32> to vector<32x8xf32>
    %101 = arith.addf %97, %100 : vector<32x8xf32>
    %c2_70 = arith.constant 2 : index
    %c0_71 = arith.constant 0 : index
    %c0_72 = arith.constant 0 : index
    %102 = vector.load %arg5[%c2_70, %c0_71, %c0_72] : memref<4x32x8xf32, #tpu.memory_space<vmem>>, vector<1x32x8xf32>
    %103 = vector.shape_cast %102 : vector<1x32x8xf32> to vector<32x8xf32>
    %cst_73 = arith.constant dense<0.000000e+00> : vector<32x8xf32>
    %104 = tpu.matmul %2, %103, %cst_73 {dimension_numbers = #tpu.dot_dimension_numbers<[1], [0], [0], [1], [0, 0, 1, 1], [], []>} : vector<32x32xf32>, vector<32x8xf32>, vector<32x8xf32> -> vector<32x8xf32>
    %c2_74 = arith.constant 2 : index
    %c0_75 = arith.constant 0 : index
    %c0_76 = arith.constant 0 : index
    %105 = vector.load %arg6[%c2_74, %c0_75, %c0_76] : memref<4x1x8xf32, #tpu.memory_space<vmem>>, vector<1x1x8xf32>
    %106 = vector.shape_cast %105 : vector<1x1x8xf32> to vector<1x8xf32>
    %107 = vector.broadcast %106 : vector<1x8xf32> to vector<32x8xf32>
    %108 = arith.addf %104, %107 : vector<32x8xf32>
    %c2_77 = arith.constant 2 : index
    %c0_78 = arith.constant 0 : index
    %c0_79 = arith.constant 0 : index
    %109 = vector.load %arg7[%c2_77, %c0_78, %c0_79] : memref<4x32x8xf32, #tpu.memory_space<vmem>>, vector<1x32x8xf32>
    %110 = vector.shape_cast %109 : vector<1x32x8xf32> to vector<32x8xf32>
    %cst_80 = arith.constant dense<0.000000e+00> : vector<32x8xf32>
    %111 = tpu.matmul %0, %110, %cst_80 {dimension_numbers = #tpu.dot_dimension_numbers<[1], [0], [0], [1], [0, 0, 1, 1], [], []>} : vector<32x32xf32>, vector<32x8xf32>, vector<32x8xf32> -> vector<32x8xf32>
    %c2_81 = arith.constant 2 : index
    %c0_82 = arith.constant 0 : index
    %c0_83 = arith.constant 0 : index
    %112 = vector.load %arg8[%c2_81, %c0_82, %c0_83] : memref<4x1x8xf32, #tpu.memory_space<vmem>>, vector<1x1x8xf32>
    %113 = vector.shape_cast %112 : vector<1x1x8xf32> to vector<1x8xf32>
    %114 = vector.broadcast %113 : vector<1x8xf32> to vector<32x8xf32>
    %115 = arith.addf %111, %114 : vector<32x8xf32>
    %116 = vector.shape_cast %101 : vector<32x8xf32> to vector<4x8x8xf32>
    %117 = vector.shape_cast %108 : vector<32x8xf32> to vector<4x8x8xf32>
    %118 = vector.shape_cast %115 : vector<32x8xf32> to vector<4x8x8xf32>
    "tpu.trace_start"() <{level = 10 : i32, message = "bld,bmd->blm"}> : () -> ()
    %cst_84 = arith.constant dense<0.000000e+00> : vector<4x8x8xf32>
    %119 = tpu.matmul %116, %117, %cst_84 {dimension_numbers = #tpu.dot_dimension_numbers<[2], [2], [1], [1], [0, 0, 0, 1, 1, 1], [0], [0]>} : vector<4x8x8xf32>, vector<4x8x8xf32>, vector<4x8x8xf32> -> vector<4x8x8xf32>
    "tpu.trace_stop"() : () -> ()
    %cst_85 = arith.constant 0.353553385 : f32
    %120 = vector.broadcast %cst_85 : f32 to vector<4x8x8xf32>
    %121 = arith.mulf %119, %120 : vector<4x8x8xf32>
    %122 = vector.shape_cast %3 : vector<8x8xf32> to vector<1x8x8xf32>
    %123 = vector.broadcast %122 : vector<1x8x8xf32> to vector<4x8x8xf32>
    %124 = arith.addf %121, %123 : vector<4x8x8xf32>
    %cst_86 = arith.constant dense<0xFF800000> : vector<4x8xf32>
    %125 = vector.multi_reduction <maximumf>, %124, %cst_86 [2] : vector<4x8x8xf32> to vector<4x8xf32>
    %126 = vector.shape_cast %125 : vector<4x8xf32> to vector<4x8x1xf32>
    %127 = vector.broadcast %126 : vector<4x8x1xf32> to vector<4x8x8xf32>
    %128 = arith.subf %124, %127 : vector<4x8x8xf32>
    %129 = math.exp %128 : vector<4x8x8xf32>
    %cst_87 = arith.constant dense<0.000000e+00> : vector<4x8xf32>
    %130 = vector.multi_reduction <add>, %129, %cst_87 [2] : vector<4x8x8xf32> to vector<4x8xf32>
    %131 = vector.shape_cast %130 : vector<4x8xf32> to vector<4x8x1xf32>
    %132 = vector.broadcast %131 : vector<4x8x1xf32> to vector<4x8x8xf32>
    %133 = arith.divf %129, %132 : vector<4x8x8xf32>
    "tpu.trace_start"() <{level = 10 : i32, message = "blm,bmd->bld"}> : () -> ()
    %cst_88 = arith.constant dense<0.000000e+00> : vector<4x8x8xf32>
    %134 = tpu.matmul %133, %118, %cst_88 {dimension_numbers = #tpu.dot_dimension_numbers<[2], [1], [1], [2], [0, 0, 0, 1, 1, 2], [0], [0]>} : vector<4x8x8xf32>, vector<4x8x8xf32>, vector<4x8x8xf32> -> vector<4x8x8xf32>
    "tpu.trace_stop"() : () -> ()
    %135 = vector.shape_cast %134 : vector<4x8x8xf32> to vector<32x8xf32>
    %c2_89 = arith.constant 2 : index
    %c0_90 = arith.constant 0 : index
    %c0_91 = arith.constant 0 : index
    %136 = vector.load %arg9[%c2_89, %c0_90, %c0_91] : memref<4x8x32xf32, #tpu.memory_space<vmem>>, vector<1x8x32xf32>
    %137 = vector.shape_cast %136 : vector<1x8x32xf32> to vector<8x32xf32>
    %cst_92 = arith.constant dense<0.000000e+00> : vector<32x32xf32>
    %138 = tpu.matmul %135, %137, %cst_92 {dimension_numbers = #tpu.dot_dimension_numbers<[1], [0], [0], [1], [0, 0, 1, 1], [], []>} : vector<32x8xf32>, vector<8x32xf32>, vector<32x32xf32> -> vector<32x32xf32>
    %139 = arith.addf %94, %138 : vector<32x32xf32>
    %c3 = arith.constant 3 : index
    %c0_93 = arith.constant 0 : index
    %c0_94 = arith.constant 0 : index
    %140 = vector.load %arg3[%c3, %c0_93, %c0_94] : memref<4x32x8xf32, #tpu.memory_space<vmem>>, vector<1x32x8xf32>
    %141 = vector.shape_cast %140 : vector<1x32x8xf32> to vector<32x8xf32>
    %cst_95 = arith.constant dense<0.000000e+00> : vector<32x8xf32>
    %142 = tpu.matmul %2, %141, %cst_95 {dimension_numbers = #tpu.dot_dimension_numbers<[1], [0], [0], [1], [0, 0, 1, 1], [], []>} : vector<32x32xf32>, vector<32x8xf32>, vector<32x8xf32> -> vector<32x8xf32>
    %c3_96 = arith.constant 3 : index
    %c0_97 = arith.constant 0 : index
    %c0_98 = arith.constant 0 : index
    %143 = vector.load %arg4[%c3_96, %c0_97, %c0_98] : memref<4x1x8xf32, #tpu.memory_space<vmem>>, vector<1x1x8xf32>
    %144 = vector.shape_cast %143 : vector<1x1x8xf32> to vector<1x8xf32>
    %145 = vector.broadcast %144 : vector<1x8xf32> to vector<32x8xf32>
    %146 = arith.addf %142, %145 : vector<32x8xf32>
    %c3_99 = arith.constant 3 : index
    %c0_100 = arith.constant 0 : index
    %c0_101 = arith.constant 0 : index
    %147 = vector.load %arg5[%c3_99, %c0_100, %c0_101] : memref<4x32x8xf32, #tpu.memory_space<vmem>>, vector<1x32x8xf32>
    %148 = vector.shape_cast %147 : vector<1x32x8xf32> to vector<32x8xf32>
    %cst_102 = arith.constant dense<0.000000e+00> : vector<32x8xf32>
    %149 = tpu.matmul %2, %148, %cst_102 {dimension_numbers = #tpu.dot_dimension_numbers<[1], [0], [0], [1], [0, 0, 1, 1], [], []>} : vector<32x32xf32>, vector<32x8xf32>, vector<32x8xf32> -> vector<32x8xf32>
    %c3_103 = arith.constant 3 : index
    %c0_104 = arith.constant 0 : index
    %c0_105 = arith.constant 0 : index
    %150 = vector.load %arg6[%c3_103, %c0_104, %c0_105] : memref<4x1x8xf32, #tpu.memory_space<vmem>>, vector<1x1x8xf32>
    %151 = vector.shape_cast %150 : vector<1x1x8xf32> to vector<1x8xf32>
    %152 = vector.broadcast %151 : vector<1x8xf32> to vector<32x8xf32>
    %153 = arith.addf %149, %152 : vector<32x8xf32>
    %c3_106 = arith.constant 3 : index
    %c0_107 = arith.constant 0 : index
    %c0_108 = arith.constant 0 : index
    %154 = vector.load %arg7[%c3_106, %c0_107, %c0_108] : memref<4x32x8xf32, #tpu.memory_space<vmem>>, vector<1x32x8xf32>
    %155 = vector.shape_cast %154 : vector<1x32x8xf32> to vector<32x8xf32>
    %cst_109 = arith.constant dense<0.000000e+00> : vector<32x8xf32>
    %156 = tpu.matmul %0, %155, %cst_109 {dimension_numbers = #tpu.dot_dimension_numbers<[1], [0], [0], [1], [0, 0, 1, 1], [], []>} : vector<32x32xf32>, vector<32x8xf32>, vector<32x8xf32> -> vector<32x8xf32>
    %c3_110 = arith.constant 3 : index
    %c0_111 = arith.constant 0 : index
    %c0_112 = arith.constant 0 : index
    %157 = vector.load %arg8[%c3_110, %c0_111, %c0_112] : memref<4x1x8xf32, #tpu.memory_space<vmem>>, vector<1x1x8xf32>
    %158 = vector.shape_cast %157 : vector<1x1x8xf32> to vector<1x8xf32>
    %159 = vector.broadcast %158 : vector<1x8xf32> to vector<32x8xf32>
    %160 = arith.addf %156, %159 : vector<32x8xf32>
    %161 = vector.shape_cast %146 : vector<32x8xf32> to vector<4x8x8xf32>
    %162 = vector.shape_cast %153 : vector<32x8xf32> to vector<4x8x8xf32>
    %163 = vector.shape_cast %160 : vector<32x8xf32> to vector<4x8x8xf32>
    "tpu.trace_start"() <{level = 10 : i32, message = "bld,bmd->blm"}> : () -> ()
    %cst_113 = arith.constant dense<0.000000e+00> : vector<4x8x8xf32>
    %164 = tpu.matmul %161, %162, %cst_113 {dimension_numbers = #tpu.dot_dimension_numbers<[2], [2], [1], [1], [0, 0, 0, 1, 1, 1], [0], [0]>} : vector<4x8x8xf32>, vector<4x8x8xf32>, vector<4x8x8xf32> -> vector<4x8x8xf32>
    "tpu.trace_stop"() : () -> ()
    %cst_114 = arith.constant 0.353553385 : f32
    %165 = vector.broadcast %cst_114 : f32 to vector<4x8x8xf32>
    %166 = arith.mulf %164, %165 : vector<4x8x8xf32>
    %167 = vector.shape_cast %3 : vector<8x8xf32> to vector<1x8x8xf32>
    %168 = vector.broadcast %167 : vector<1x8x8xf32> to vector<4x8x8xf32>
    %169 = arith.addf %166, %168 : vector<4x8x8xf32>
    %cst_115 = arith.constant dense<0xFF800000> : vector<4x8xf32>
    %170 = vector.multi_reduction <maximumf>, %169, %cst_115 [2] : vector<4x8x8xf32> to vector<4x8xf32>
    %171 = vector.shape_cast %170 : vector<4x8xf32> to vector<4x8x1xf32>
    %172 = vector.broadcast %171 : vector<4x8x1xf32> to vector<4x8x8xf32>
    %173 = arith.subf %169, %172 : vector<4x8x8xf32>
    %174 = math.exp %173 : vector<4x8x8xf32>
    %cst_116 = arith.constant dense<0.000000e+00> : vector<4x8xf32>
    %175 = vector.multi_reduction <add>, %174, %cst_116 [2] : vector<4x8x8xf32> to vector<4x8xf32>
    %176 = vector.shape_cast %175 : vector<4x8xf32> to vector<4x8x1xf32>
    %177 = vector.broadcast %176 : vector<4x8x1xf32> to vector<4x8x8xf32>
    %178 = arith.divf %174, %177 : vector<4x8x8xf32>
    "tpu.trace_start"() <{level = 10 : i32, message = "blm,bmd->bld"}> : () -> ()
    %cst_117 = arith.constant dense<0.000000e+00> : vector<4x8x8xf32>
    %179 = tpu.matmul %178, %163, %cst_117 {dimension_numbers = #tpu.dot_dimension_numbers<[2], [1], [1], [2], [0, 0, 0, 1, 1, 2], [0], [0]>} : vector<4x8x8xf32>, vector<4x8x8xf32>, vector<4x8x8xf32> -> vector<4x8x8xf32>
    "tpu.trace_stop"() : () -> ()
    %180 = vector.shape_cast %179 : vector<4x8x8xf32> to vector<32x8xf32>
    %c3_118 = arith.constant 3 : index
    %c0_119 = arith.constant 0 : index
    %c0_120 = arith.constant 0 : index
    %181 = vector.load %arg9[%c3_118, %c0_119, %c0_120] : memref<4x8x32xf32, #tpu.memory_space<vmem>>, vector<1x8x32xf32>
    %182 = vector.shape_cast %181 : vector<1x8x32xf32> to vector<8x32xf32>
    %cst_121 = arith.constant dense<0.000000e+00> : vector<32x32xf32>
    %183 = tpu.matmul %180, %182, %cst_121 {dimension_numbers = #tpu.dot_dimension_numbers<[1], [0], [0], [1], [0, 0, 1, 1], [], []>} : vector<32x8xf32>, vector<8x32xf32>, vector<32x32xf32> -> vector<32x32xf32>
    %184 = arith.addf %139, %183 : vector<32x32xf32>
    %c0_122 = arith.constant 0 : index
    %c0_123 = arith.constant 0 : index
    %185 = vector.load %arg10[%c0_122, %c0_123] : memref<1x32xf32, #tpu.memory_space<vmem>>, vector<1x32xf32>
    %186 = vector.broadcast %185 : vector<1x32xf32> to vector<32x32xf32>
    %187 = arith.addf %184, %186 : vector<32x32xf32>
    %188 = arith.addf %0, %187 : vector<32x32xf32>
    %c0_124 = arith.constant 0 : index
    %c0_125 = arith.constant 0 : index
    %189 = vector.load %arg11[%c0_124, %c0_125] : memref<1x32xf32, #tpu.memory_space<vmem>>, vector<1x32xf32>
    %c0_126 = arith.constant 0 : index
    %c0_127 = arith.constant 0 : index
    %190 = vector.load %arg12[%c0_126, %c0_127] : memref<1x32xf32, #tpu.memory_space<vmem>>, vector<1x32xf32>
    %cst_128 = arith.constant dense<0.000000e+00> : vector<32xf32>
    %191 = vector.multi_reduction <add>, %188, %cst_128 [1] : vector<32x32xf32> to vector<32xf32>
    %192 = vector.shape_cast %191 : vector<32xf32> to vector<32x1xf32>
    %cst_129 = arith.constant 3.200000e+01 : f32
    %193 = vector.broadcast %cst_129 : f32 to vector<32x1xf32>
    %194 = arith.divf %192, %193 : vector<32x1xf32>
    %195 = vector.broadcast %194 : vector<32x1xf32> to vector<32x32xf32>
    %196 = arith.subf %188, %195 : vector<32x32xf32>
    %197 = arith.mulf %196, %196 : vector<32x32xf32>
    %cst_130 = arith.constant dense<0.000000e+00> : vector<32xf32>
    %198 = vector.multi_reduction <add>, %197, %cst_130 [1] : vector<32x32xf32> to vector<32xf32>
    %199 = vector.shape_cast %198 : vector<32xf32> to vector<32x1xf32>
    %cst_131 = arith.constant 3.200000e+01 : f32
    %200 = vector.broadcast %cst_131 : f32 to vector<32x1xf32>
    %201 = arith.divf %199, %200 : vector<32x1xf32>
    %202 = vector.broadcast %194 : vector<32x1xf32> to vector<32x32xf32>
    %203 = arith.subf %188, %202 : vector<32x32xf32>
    %cst_132 = arith.constant 9.99999974E-6 : f32
    %204 = vector.broadcast %cst_132 : f32 to vector<32x1xf32>
    %205 = arith.addf %201, %204 : vector<32x1xf32>
    %206 = math.rsqrt %205 : vector<32x1xf32>
    %207 = vector.broadcast %206 : vector<32x1xf32> to vector<32x32xf32>
    %208 = arith.mulf %203, %207 : vector<32x32xf32>
    %209 = vector.broadcast %189 : vector<1x32xf32> to vector<32x32xf32>
    %210 = arith.mulf %208, %209 : vector<32x32xf32>
    %211 = vector.broadcast %190 : vector<1x32xf32> to vector<32x32xf32>
    %212 = arith.addf %210, %211 : vector<32x32xf32>
    %c0_133 = arith.constant 0 : index
    %c0_134 = arith.constant 0 : index
    %213 = vector.load %arg13[%c0_133, %c0_134] : memref<32x32xf32, #tpu.memory_space<vmem>>, vector<32x32xf32>
    tpu.vector_store %arg13[%c0_133, %c0_134], %212 {strides = array<i32>} : memref<32x32xf32, #tpu.memory_space<vmem>>, vector<32x32xf32>,
    return
  }
}

module attributes {stable_mosaic.version = 11 : i64} {
  func.func @_deform_tail_ln_kernel(%arg0: memref<4x32x4x8xf32, #tpu.memory_space<vmem>>, %arg1: memref<4x32x4xf32, #tpu.memory_space<vmem>>, %arg2: memref<32x32xf32, #tpu.memory_space<vmem>>, %arg3: memref<4x8x32xf32, #tpu.memory_space<vmem>>, %arg4: memref<1x32xf32, #tpu.memory_space<vmem>>, %arg5: memref<1x32xf32, #tpu.memory_space<vmem>>, %arg6: memref<1x32xf32, #tpu.memory_space<vmem>>, %arg7: memref<32x32xf32, #tpu.memory_space<vmem>>) attributes {dimension_semantics = [], scalar_prefetch = 0 : i64, scratch_operands = 0 : i64, tpu.core_type = #tpu.core_type<tc>} {
    %cst = arith.constant 0.000000e+00 : f32
    %0 = vector.broadcast %cst : f32 to vector<32x32xf32>
    %c0 = arith.constant 0 : index
    %c0_0 = arith.constant 0 : index
    %c0_1 = arith.constant 0 : index
    %1 = vector.load %arg1[%c0, %c0_0, %c0_1] : memref<4x32x4xf32, #tpu.memory_space<vmem>>, vector<1x32x4xf32>
    %2 = vector.shape_cast %1 : vector<1x32x4xf32> to vector<32x4xf32>
    %cst_2 = arith.constant dense<0xFF800000> : vector<32xf32>
    %3 = vector.multi_reduction <maximumf>, %2, %cst_2 [1] : vector<32x4xf32> to vector<32xf32>
    %4 = vector.shape_cast %3 : vector<32xf32> to vector<32x1xf32>
    %5 = vector.broadcast %4 : vector<32x1xf32> to vector<32x4xf32>
    %6 = arith.subf %2, %5 : vector<32x4xf32>
    %7 = math.exp %6 : vector<32x4xf32>
    %cst_3 = arith.constant dense<0.000000e+00> : vector<32xf32>
    %8 = vector.multi_reduction <add>, %7, %cst_3 [1] : vector<32x4xf32> to vector<32xf32>
    %9 = vector.shape_cast %8 : vector<32xf32> to vector<32x1xf32>
    %10 = vector.broadcast %9 : vector<32x1xf32> to vector<32x4xf32>
    %11 = arith.divf %7, %10 : vector<32x4xf32>
    %c0_4 = arith.constant 0 : index
    %c0_5 = arith.constant 0 : index
    %c0_6 = arith.constant 0 : index
    %c0_7 = arith.constant 0 : index
    %12 = vector.load %arg0[%c0_4, %c0_5, %c0_6, %c0_7] : memref<4x32x4x8xf32, #tpu.memory_space<vmem>>, vector<1x32x4x8xf32>
    %13 = vector.shape_cast %12 : vector<1x32x4x8xf32> to vector<32x4x8xf32>
    %14 = vector.shape_cast %11 : vector<32x4xf32> to vector<32x4x1xf32>
    %15 = vector.broadcast %14 : vector<32x4x1xf32> to vector<32x4x8xf32>
    %16 = arith.mulf %13, %15 : vector<32x4x8xf32>
    %cst_8 = arith.constant dense<0.000000e+00> : vector<32x8xf32>
    %17 = vector.multi_reduction <add>, %16, %cst_8 [1] : vector<32x4x8xf32> to vector<32x8xf32>
    %c0_9 = arith.constant 0 : index
    %c0_10 = arith.constant 0 : index
    %c0_11 = arith.constant 0 : index
    %18 = vector.load %arg3[%c0_9, %c0_10, %c0_11] : memref<4x8x32xf32, #tpu.memory_space<vmem>>, vector<1x8x32xf32>
    %19 = vector.shape_cast %18 : vector<1x8x32xf32> to vector<8x32xf32>
    %cst_12 = arith.constant dense<0.000000e+00> : vector<32x32xf32>
    %20 = tpu.matmul %17, %19, %cst_12 {dimension_numbers = #tpu.dot_dimension_numbers<[1], [0], [0], [1], [0, 0, 1, 1], [], []>} : vector<32x8xf32>, vector<8x32xf32>, vector<32x32xf32> -> vector<32x32xf32>
    %21 = arith.addf %0, %20 : vector<32x32xf32>
    %c1 = arith.constant 1 : index
    %c0_13 = arith.constant 0 : index
    %c0_14 = arith.constant 0 : index
    %22 = vector.load %arg1[%c1, %c0_13, %c0_14] : memref<4x32x4xf32, #tpu.memory_space<vmem>>, vector<1x32x4xf32>
    %23 = vector.shape_cast %22 : vector<1x32x4xf32> to vector<32x4xf32>
    %cst_15 = arith.constant dense<0xFF800000> : vector<32xf32>
    %24 = vector.multi_reduction <maximumf>, %23, %cst_15 [1] : vector<32x4xf32> to vector<32xf32>
    %25 = vector.shape_cast %24 : vector<32xf32> to vector<32x1xf32>
    %26 = vector.broadcast %25 : vector<32x1xf32> to vector<32x4xf32>
    %27 = arith.subf %23, %26 : vector<32x4xf32>
    %28 = math.exp %27 : vector<32x4xf32>
    %cst_16 = arith.constant dense<0.000000e+00> : vector<32xf32>
    %29 = vector.multi_reduction <add>, %28, %cst_16 [1] : vector<32x4xf32> to vector<32xf32>
    %30 = vector.shape_cast %29 : vector<32xf32> to vector<32x1xf32>
    %31 = vector.broadcast %30 : vector<32x1xf32> to vector<32x4xf32>
    %32 = arith.divf %28, %31 : vector<32x4xf32>
    %c1_17 = arith.constant 1 : index
    %c0_18 = arith.constant 0 : index
    %c0_19 = arith.constant 0 : index
    %c0_20 = arith.constant 0 : index
    %33 = vector.load %arg0[%c1_17, %c0_18, %c0_19, %c0_20] : memref<4x32x4x8xf32, #tpu.memory_space<vmem>>, vector<1x32x4x8xf32>
    %34 = vector.shape_cast %33 : vector<1x32x4x8xf32> to vector<32x4x8xf32>
    %35 = vector.shape_cast %32 : vector<32x4xf32> to vector<32x4x1xf32>
    %36 = vector.broadcast %35 : vector<32x4x1xf32> to vector<32x4x8xf32>
    %37 = arith.mulf %34, %36 : vector<32x4x8xf32>
    %cst_21 = arith.constant dense<0.000000e+00> : vector<32x8xf32>
    %38 = vector.multi_reduction <add>, %37, %cst_21 [1] : vector<32x4x8xf32> to vector<32x8xf32>
    %c1_22 = arith.constant 1 : index
    %c0_23 = arith.constant 0 : index
    %c0_24 = arith.constant 0 : index
    %39 = vector.load %arg3[%c1_22, %c0_23, %c0_24] : memref<4x8x32xf32, #tpu.memory_space<vmem>>, vector<1x8x32xf32>
    %40 = vector.shape_cast %39 : vector<1x8x32xf32> to vector<8x32xf32>
    %cst_25 = arith.constant dense<0.000000e+00> : vector<32x32xf32>
    %41 = tpu.matmul %38, %40, %cst_25 {dimension_numbers = #tpu.dot_dimension_numbers<[1], [0], [0], [1], [0, 0, 1, 1], [], []>} : vector<32x8xf32>, vector<8x32xf32>, vector<32x32xf32> -> vector<32x32xf32>
    %42 = arith.addf %21, %41 : vector<32x32xf32>
    %c2 = arith.constant 2 : index
    %c0_26 = arith.constant 0 : index
    %c0_27 = arith.constant 0 : index
    %43 = vector.load %arg1[%c2, %c0_26, %c0_27] : memref<4x32x4xf32, #tpu.memory_space<vmem>>, vector<1x32x4xf32>
    %44 = vector.shape_cast %43 : vector<1x32x4xf32> to vector<32x4xf32>
    %cst_28 = arith.constant dense<0xFF800000> : vector<32xf32>
    %45 = vector.multi_reduction <maximumf>, %44, %cst_28 [1] : vector<32x4xf32> to vector<32xf32>
    %46 = vector.shape_cast %45 : vector<32xf32> to vector<32x1xf32>
    %47 = vector.broadcast %46 : vector<32x1xf32> to vector<32x4xf32>
    %48 = arith.subf %44, %47 : vector<32x4xf32>
    %49 = math.exp %48 : vector<32x4xf32>
    %cst_29 = arith.constant dense<0.000000e+00> : vector<32xf32>
    %50 = vector.multi_reduction <add>, %49, %cst_29 [1] : vector<32x4xf32> to vector<32xf32>
    %51 = vector.shape_cast %50 : vector<32xf32> to vector<32x1xf32>
    %52 = vector.broadcast %51 : vector<32x1xf32> to vector<32x4xf32>
    %53 = arith.divf %49, %52 : vector<32x4xf32>
    %c2_30 = arith.constant 2 : index
    %c0_31 = arith.constant 0 : index
    %c0_32 = arith.constant 0 : index
    %c0_33 = arith.constant 0 : index
    %54 = vector.load %arg0[%c2_30, %c0_31, %c0_32, %c0_33] : memref<4x32x4x8xf32, #tpu.memory_space<vmem>>, vector<1x32x4x8xf32>
    %55 = vector.shape_cast %54 : vector<1x32x4x8xf32> to vector<32x4x8xf32>
    %56 = vector.shape_cast %53 : vector<32x4xf32> to vector<32x4x1xf32>
    %57 = vector.broadcast %56 : vector<32x4x1xf32> to vector<32x4x8xf32>
    %58 = arith.mulf %55, %57 : vector<32x4x8xf32>
    %cst_34 = arith.constant dense<0.000000e+00> : vector<32x8xf32>
    %59 = vector.multi_reduction <add>, %58, %cst_34 [1] : vector<32x4x8xf32> to vector<32x8xf32>
    %c2_35 = arith.constant 2 : index
    %c0_36 = arith.constant 0 : index
    %c0_37 = arith.constant 0 : index
    %60 = vector.load %arg3[%c2_35, %c0_36, %c0_37] : memref<4x8x32xf32, #tpu.memory_space<vmem>>, vector<1x8x32xf32>
    %61 = vector.shape_cast %60 : vector<1x8x32xf32> to vector<8x32xf32>
    %cst_38 = arith.constant dense<0.000000e+00> : vector<32x32xf32>
    %62 = tpu.matmul %59, %61, %cst_38 {dimension_numbers = #tpu.dot_dimension_numbers<[1], [0], [0], [1], [0, 0, 1, 1], [], []>} : vector<32x8xf32>, vector<8x32xf32>, vector<32x32xf32> -> vector<32x32xf32>
    %63 = arith.addf %42, %62 : vector<32x32xf32>
    %c3 = arith.constant 3 : index
    %c0_39 = arith.constant 0 : index
    %c0_40 = arith.constant 0 : index
    %64 = vector.load %arg1[%c3, %c0_39, %c0_40] : memref<4x32x4xf32, #tpu.memory_space<vmem>>, vector<1x32x4xf32>
    %65 = vector.shape_cast %64 : vector<1x32x4xf32> to vector<32x4xf32>
    %cst_41 = arith.constant dense<0xFF800000> : vector<32xf32>
    %66 = vector.multi_reduction <maximumf>, %65, %cst_41 [1] : vector<32x4xf32> to vector<32xf32>
    %67 = vector.shape_cast %66 : vector<32xf32> to vector<32x1xf32>
    %68 = vector.broadcast %67 : vector<32x1xf32> to vector<32x4xf32>
    %69 = arith.subf %65, %68 : vector<32x4xf32>
    %70 = math.exp %69 : vector<32x4xf32>
    %cst_42 = arith.constant dense<0.000000e+00> : vector<32xf32>
    %71 = vector.multi_reduction <add>, %70, %cst_42 [1] : vector<32x4xf32> to vector<32xf32>
    %72 = vector.shape_cast %71 : vector<32xf32> to vector<32x1xf32>
    %73 = vector.broadcast %72 : vector<32x1xf32> to vector<32x4xf32>
    %74 = arith.divf %70, %73 : vector<32x4xf32>
    %c3_43 = arith.constant 3 : index
    %c0_44 = arith.constant 0 : index
    %c0_45 = arith.constant 0 : index
    %c0_46 = arith.constant 0 : index
    %75 = vector.load %arg0[%c3_43, %c0_44, %c0_45, %c0_46] : memref<4x32x4x8xf32, #tpu.memory_space<vmem>>, vector<1x32x4x8xf32>
    %76 = vector.shape_cast %75 : vector<1x32x4x8xf32> to vector<32x4x8xf32>
    %77 = vector.shape_cast %74 : vector<32x4xf32> to vector<32x4x1xf32>
    %78 = vector.broadcast %77 : vector<32x4x1xf32> to vector<32x4x8xf32>
    %79 = arith.mulf %76, %78 : vector<32x4x8xf32>
    %cst_47 = arith.constant dense<0.000000e+00> : vector<32x8xf32>
    %80 = vector.multi_reduction <add>, %79, %cst_47 [1] : vector<32x4x8xf32> to vector<32x8xf32>
    %c3_48 = arith.constant 3 : index
    %c0_49 = arith.constant 0 : index
    %c0_50 = arith.constant 0 : index
    %81 = vector.load %arg3[%c3_48, %c0_49, %c0_50] : memref<4x8x32xf32, #tpu.memory_space<vmem>>, vector<1x8x32xf32>
    %82 = vector.shape_cast %81 : vector<1x8x32xf32> to vector<8x32xf32>
    %cst_51 = arith.constant dense<0.000000e+00> : vector<32x32xf32>
    %83 = tpu.matmul %80, %82, %cst_51 {dimension_numbers = #tpu.dot_dimension_numbers<[1], [0], [0], [1], [0, 0, 1, 1], [], []>} : vector<32x8xf32>, vector<8x32xf32>, vector<32x32xf32> -> vector<32x32xf32>
    %84 = arith.addf %63, %83 : vector<32x32xf32>
    %c0_52 = arith.constant 0 : index
    %c0_53 = arith.constant 0 : index
    %85 = vector.load %arg4[%c0_52, %c0_53] : memref<1x32xf32, #tpu.memory_space<vmem>>, vector<1x32xf32>
    %86 = vector.broadcast %85 : vector<1x32xf32> to vector<32x32xf32>
    %87 = arith.addf %84, %86 : vector<32x32xf32>
    %c0_54 = arith.constant 0 : index
    %c0_55 = arith.constant 0 : index
    %88 = vector.load %arg2[%c0_54, %c0_55] : memref<32x32xf32, #tpu.memory_space<vmem>>, vector<32x32xf32>
    %89 = arith.addf %88, %87 : vector<32x32xf32>
    %c0_56 = arith.constant 0 : index
    %c0_57 = arith.constant 0 : index
    %90 = vector.load %arg5[%c0_56, %c0_57] : memref<1x32xf32, #tpu.memory_space<vmem>>, vector<1x32xf32>
    %c0_58 = arith.constant 0 : index
    %c0_59 = arith.constant 0 : index
    %91 = vector.load %arg6[%c0_58, %c0_59] : memref<1x32xf32, #tpu.memory_space<vmem>>, vector<1x32xf32>
    %cst_60 = arith.constant dense<0.000000e+00> : vector<32xf32>
    %92 = vector.multi_reduction <add>, %89, %cst_60 [1] : vector<32x32xf32> to vector<32xf32>
    %93 = vector.shape_cast %92 : vector<32xf32> to vector<32x1xf32>
    %cst_61 = arith.constant 3.200000e+01 : f32
    %94 = vector.broadcast %cst_61 : f32 to vector<32x1xf32>
    %95 = arith.divf %93, %94 : vector<32x1xf32>
    %96 = vector.broadcast %95 : vector<32x1xf32> to vector<32x32xf32>
    %97 = arith.subf %89, %96 : vector<32x32xf32>
    %98 = arith.mulf %97, %97 : vector<32x32xf32>
    %cst_62 = arith.constant dense<0.000000e+00> : vector<32xf32>
    %99 = vector.multi_reduction <add>, %98, %cst_62 [1] : vector<32x32xf32> to vector<32xf32>
    %100 = vector.shape_cast %99 : vector<32xf32> to vector<32x1xf32>
    %cst_63 = arith.constant 3.200000e+01 : f32
    %101 = vector.broadcast %cst_63 : f32 to vector<32x1xf32>
    %102 = arith.divf %100, %101 : vector<32x1xf32>
    %103 = vector.broadcast %95 : vector<32x1xf32> to vector<32x32xf32>
    %104 = arith.subf %89, %103 : vector<32x32xf32>
    %cst_64 = arith.constant 9.99999974E-6 : f32
    %105 = vector.broadcast %cst_64 : f32 to vector<32x1xf32>
    %106 = arith.addf %102, %105 : vector<32x1xf32>
    %107 = math.rsqrt %106 : vector<32x1xf32>
    %108 = vector.broadcast %107 : vector<32x1xf32> to vector<32x32xf32>
    %109 = arith.mulf %104, %108 : vector<32x32xf32>
    %110 = vector.broadcast %90 : vector<1x32xf32> to vector<32x32xf32>
    %111 = arith.mulf %109, %110 : vector<32x32xf32>
    %112 = vector.broadcast %91 : vector<1x32xf32> to vector<32x32xf32>
    %113 = arith.addf %111, %112 : vector<32x32xf32>
    %c0_65 = arith.constant 0 : index
    %c0_66 = arith.constant 0 : index
    %114 = vector.load %arg7[%c0_65, %c0_66] : memref<32x32xf32, #tpu.memory_space<vmem>>, vector<32x32xf32>
    tpu.vector_store %arg7[%c0_65, %c0_66], %113 {strides = array<i32>} : memref<32x32xf32, #tpu.memory_space<vmem>>, vector<32x32xf32>,
    return
  }
}

module attributes {stable_mosaic.version = 11 : i64} {
  func.func @_ffn_ln_kernel(%arg0: memref<32x32xf32, #tpu.memory_space<vmem>>, %arg1: memref<32x64xf32, #tpu.memory_space<vmem>>, %arg2: memref<1x64xf32, #tpu.memory_space<vmem>>, %arg3: memref<64x32xf32, #tpu.memory_space<vmem>>, %arg4: memref<1x32xf32, #tpu.memory_space<vmem>>, %arg5: memref<1x32xf32, #tpu.memory_space<vmem>>, %arg6: memref<1x32xf32, #tpu.memory_space<vmem>>, %arg7: memref<32x32xf32, #tpu.memory_space<vmem>>) attributes {dimension_semantics = [], scalar_prefetch = 0 : i64, scratch_operands = 0 : i64, tpu.core_type = #tpu.core_type<tc>} {
    %c0 = arith.constant 0 : index
    %c0_0 = arith.constant 0 : index
    %0 = vector.load %arg0[%c0, %c0_0] : memref<32x32xf32, #tpu.memory_space<vmem>>, vector<32x32xf32>
    %c0_1 = arith.constant 0 : index
    %c0_2 = arith.constant 0 : index
    %1 = vector.load %arg1[%c0_1, %c0_2] : memref<32x64xf32, #tpu.memory_space<vmem>>, vector<32x64xf32>
    %cst = arith.constant dense<0.000000e+00> : vector<32x64xf32>
    %2 = tpu.matmul %0, %1, %cst {dimension_numbers = #tpu.dot_dimension_numbers<[1], [0], [0], [1], [0, 0, 1, 1], [], []>} : vector<32x32xf32>, vector<32x64xf32>, vector<32x64xf32> -> vector<32x64xf32>
    %c0_3 = arith.constant 0 : index
    %c0_4 = arith.constant 0 : index
    %3 = vector.load %arg2[%c0_3, %c0_4] : memref<1x64xf32, #tpu.memory_space<vmem>>, vector<1x64xf32>
    %4 = vector.broadcast %3 : vector<1x64xf32> to vector<32x64xf32>
    %5 = arith.addf %2, %4 : vector<32x64xf32>
    %cst_5 = arith.constant 0.000000e+00 : f32
    %6 = vector.broadcast %cst_5 : f32 to vector<32x64xf32>
    %7 = arith.maximumf %5, %6 : vector<32x64xf32>
    %c0_6 = arith.constant 0 : index
    %c0_7 = arith.constant 0 : index
    %8 = vector.load %arg3[%c0_6, %c0_7] : memref<64x32xf32, #tpu.memory_space<vmem>>, vector<64x32xf32>
    %cst_8 = arith.constant dense<0.000000e+00> : vector<32x32xf32>
    %9 = tpu.matmul %7, %8, %cst_8 {dimension_numbers = #tpu.dot_dimension_numbers<[1], [0], [0], [1], [0, 0, 1, 1], [], []>} : vector<32x64xf32>, vector<64x32xf32>, vector<32x32xf32> -> vector<32x32xf32>
    %c0_9 = arith.constant 0 : index
    %c0_10 = arith.constant 0 : index
    %10 = vector.load %arg4[%c0_9, %c0_10] : memref<1x32xf32, #tpu.memory_space<vmem>>, vector<1x32xf32>
    %11 = vector.broadcast %10 : vector<1x32xf32> to vector<32x32xf32>
    %12 = arith.addf %9, %11 : vector<32x32xf32>
    %13 = arith.addf %0, %12 : vector<32x32xf32>
    %c0_11 = arith.constant 0 : index
    %c0_12 = arith.constant 0 : index
    %14 = vector.load %arg5[%c0_11, %c0_12] : memref<1x32xf32, #tpu.memory_space<vmem>>, vector<1x32xf32>
    %c0_13 = arith.constant 0 : index
    %c0_14 = arith.constant 0 : index
    %15 = vector.load %arg6[%c0_13, %c0_14] : memref<1x32xf32, #tpu.memory_space<vmem>>, vector<1x32xf32>
    %cst_15 = arith.constant dense<0.000000e+00> : vector<32xf32>
    %16 = vector.multi_reduction <add>, %13, %cst_15 [1] : vector<32x32xf32> to vector<32xf32>
    %17 = vector.shape_cast %16 : vector<32xf32> to vector<32x1xf32>
    %cst_16 = arith.constant 3.200000e+01 : f32
    %18 = vector.broadcast %cst_16 : f32 to vector<32x1xf32>
    %19 = arith.divf %17, %18 : vector<32x1xf32>
    %20 = vector.broadcast %19 : vector<32x1xf32> to vector<32x32xf32>
    %21 = arith.subf %13, %20 : vector<32x32xf32>
    %22 = arith.mulf %21, %21 : vector<32x32xf32>
    %cst_17 = arith.constant dense<0.000000e+00> : vector<32xf32>
    %23 = vector.multi_reduction <add>, %22, %cst_17 [1] : vector<32x32xf32> to vector<32xf32>
    %24 = vector.shape_cast %23 : vector<32xf32> to vector<32x1xf32>
    %cst_18 = arith.constant 3.200000e+01 : f32
    %25 = vector.broadcast %cst_18 : f32 to vector<32x1xf32>
    %26 = arith.divf %24, %25 : vector<32x1xf32>
    %27 = vector.broadcast %19 : vector<32x1xf32> to vector<32x32xf32>
    %28 = arith.subf %13, %27 : vector<32x32xf32>
    %cst_19 = arith.constant 9.99999974E-6 : f32
    %29 = vector.broadcast %cst_19 : f32 to vector<32x1xf32>
    %30 = arith.addf %26, %29 : vector<32x1xf32>
    %31 = math.rsqrt %30 : vector<32x1xf32>
    %32 = vector.broadcast %31 : vector<32x1xf32> to vector<32x32xf32>
    %33 = arith.mulf %28, %32 : vector<32x32xf32>
    %34 = vector.broadcast %14 : vector<1x32xf32> to vector<32x32xf32>
    %35 = arith.mulf %33, %34 : vector<32x32xf32>
    %36 = vector.broadcast %15 : vector<1x32xf32> to vector<32x32xf32>
    %37 = arith.addf %35, %36 : vector<32x32xf32>
    %c0_20 = arith.constant 0 : index
    %c0_21 = arith.constant 0 : index
    %38 = vector.load %arg7[%c0_20, %c0_21] : memref<32x32xf32, #tpu.memory_space<vmem>>, vector<32x32xf32>
    tpu.vector_store %arg7[%c0_20, %c0_21], %37 {strides = array<i32>} : memref<32x32xf32, #tpu.memory_space<vmem>>, vector<32x32xf32>,
    return
  }
}

</mosaic_0001>

<bundles_post_ra>
// kernel: run.5
= control target key start
LH: loop header
LB: loop body
LE: loop exit
PB: predicated region body
PF: predicated region fallthrough
CT: control target
= control target key end

     0   :  { %vm56_vm0 = vcmask 261120   ;;  %vm275_vm1 = vcmask 392192   ;;  %s627_s3 = inlined_call_operand.vmem [shape: f32[32,32], index: 3, kind: input, shape index: {}]   ;;  %s628_s0 = inlined_call_operand.vmem [shape: f32[160,32], index: 0, kind: input, shape index: {}]   ;;  %s629_s5 = inlined_call_operand.vmem [shape: f32[32,48], index: 5, kind: input, shape index: {}]   ;;  %s630_s4 = inlined_call_operand.vmem [shape: f32[1,32], index: 4, kind: input, shape index: {}]   ;;  %s631_s1 = inlined_call_operand.vmem [shape: f32[32,32], index: 1, kind: input, shape index: {}]   ;;  %s632_s2 = inlined_call_operand.vmem [shape: f32[32,32], index: 2, kind: input, shape index: {}]   ;;  %s633_s6 = inlined_call_operand.vmem [shape: f32[1,48], index: 6, kind: input, shape index: {}]   ;;  %s634_s7 = inlined_call_operand.vmem [shape: f32[160,32], index: 7, kind: output, shape index: {0}]   ;;  %s635_s8 = inlined_call_operand.vmem [shape: f32[32,48], index: 8, kind: output, shape index: {1}]  }
   0x1   :  { %v51_v0 = vld [vmem:[%s627_s3 + $0x18] sm:$0xff]  ;;  %v50_v1 = vld [vmem:[%s627_s3 + $0x10] sm:$0xff]  ;;  %v49_v2 = vld [vmem:[%s627_s3 + $0x8] sm:$0xff] }
   0x2   :  { %313 = vmatpush.msra.mxu2 %v51_v0  ;;  %314 = vmatpush.msra.mxu3 %v51_v0  ;;  %v48_v3 = vld [vmem:[%s627_s3] sm:$0xff]  ;;  %v42_v5 = vld [vmem:[%s628_s0 + $0x70] sm:$0xff]  ;;  %v229_v8 = vld [vmem:[%s629_s5 + $0x18] sm:$0xff] }
   0x3   :  { %129 = vmatpush.msra.mxu0 %v51_v0  ;;  %312 = vmatpush.msra.mxu1 %v51_v0  ;;  %v36_v4 = vld [vmem:[%s628_s0 + $0x40] sm:$0xff]  ;;  %v34_v7 = vld [vmem:[%s628_s0 + $0x30] sm:$0xff]  ;;  %v227_v10 = vld [vmem:[%s629_s5 + $0x8] sm:$0xff] }
   0x4   :  { %316 = vmatpush.msra.mxu2 %v50_v1  ;;  %317 = vmatpush.msra.mxu3 %v50_v1  ;;  %v28_v6 = vld [vmem:[%s628_s0] sm:$0xff]  ;;  %v228_v9 = vld [vmem:[%s629_s5 + $0x10] sm:$0xff]  ;;  %v37_v11 = vld [vmem:[%s628_s0 + $0x48] sm:$0xff] }
   0x5   :  { %130 = vmatpush.msra.mxu0 %v50_v1  ;;  %315 = vmatpush.msra.mxu1 %v50_v1  ;;  %v43_v12 = vld [vmem:[%s628_s0 + $0x78] sm:$0xff]  ;;  %v226_v13 = vld [vmem:[%s629_s5] sm:$0xff]  ;;  %v29_v14 = vld [vmem:[%s628_s0 + $0x8] sm:$0xff] }
   0x6   :  { %319 = vmatpush.msra.mxu2 %v49_v2  ;;  %320 = vmatpush.msra.mxu3 %v49_v2  ;;  %v35_v15 = vld [vmem:[%s628_s0 + $0x38] sm:$0xff]  ;;  %v214_v16 = vld [vmem:[%s631_s1] sm:$0xff]  ;;  %v38_v18 = vld [vmem:[%s628_s0 + $0x50] sm:$0xff] }
   0x7   :  { %131 = vmatpush.msra.mxu0 %v49_v2  ;;  %318 = vmatpush.msra.mxu1 %v49_v2  ;;  %v218_v17 = vld [vmem:[%s632_s2] sm:$0xff]  ;;  %v30_v21 = vld [vmem:[%s628_s0 + $0x10] sm:$0xff]  ;;  %v215_v22 = vld [vmem:[%s631_s1 + $0x8] sm:$0xff] }
   0x8   :  { %322 = vmatpush.msra.mxu2 %v48_v3  ;;  %323 = vmatpush.msra.mxu3 %v48_v3  ;;  %v44_v19 = vld [vmem:[%s628_s0 + $0x80] sm:$0xff]  ;;  %v222_v20 = vadd.f32 %v218_v17, %v214_v16  ;;  %v219_v23 = vld [vmem:[%s632_s2 + $0x8] sm:$0xff]  ;;  %v39_v24 = vld [vmem:[%s628_s0 + $0x58] sm:$0xff] }
   0x9   :  { %296 = vmatmul.msk.f32.vlgmr.msra.gmra.mxu2 %vm56_vm0, %v36_v4  ;;  %302 = vmatmul.msk.f32.vlgmr.msra.gmra.mxu3 %vm56_vm0, %v42_v5  ;;  %v45_v25 = vld [vmem:[%s628_s0 + $0x88] sm:$0xff]  ;;  %v223_v26 = vadd.f32 %v219_v23, %v215_v22  ;;  %v31_v27 = vld [vmem:[%s628_s0 + $0x18] sm:$0xff]  ;;  %v216_v28 = vld [vmem:[%s631_s1 + $0x10] sm:$0xff] }
   0xa   :  { %132 = vmatpush.msra.mxu0 %v48_v3  ;;  %321 = vmatpush.msra.mxu1 %v48_v3  ;;  %v220_v29 = vld [vmem:[%s632_s2 + $0x10] sm:$0xff]  ;;  %v40_v30 = vld [vmem:[%s628_s0 + $0x60] sm:$0xff]  ;;  %v217_v34 = vld [vmem:[%s631_s1 + $0x18] sm:$0xff] }
   0xb   :  { %288 = vmatmul.msk.f32.vlgmr.msra.gmra.mxu0 %vm56_vm0, %v28_v6  ;;  %294 = vmatmul.msk.f32.vlgmr.msra.gmra.mxu1 %vm56_vm0, %v34_v7  ;;  %v46_v31 = vld [vmem:[%s628_s0 + $0x90] sm:$0xff]  ;;  %v224_v32 = vadd.f32 %v220_v29, %v216_v28  ;;  %v32_v33 = vld [vmem:[%s628_s0 + $0x20] sm:$0xff]  ;;  %v221_v35 = vld [vmem:[%s632_s2 + $0x18] sm:$0xff] }
   0xc   :  { %258 = vmatpush.msrb.mxu1 %v229_v8  ;;  %v41_v36 = vld [vmem:[%s628_s0 + $0x68] sm:$0xff]  ;;  %v47_v37 = vld [vmem:[%s628_s0 + $0x98] sm:$0xff]  ;;  %v225_v38 = vadd.f32 %v221_v35, %v217_v34  ;;  %v506_v40 = vld [vmem:[%s630_s4] ss:$0 sm:$0xff] }
   0xd   :  { %v33_v39 = vld [vmem:[%s628_s0 + $0x28] sm:$0xff]  ;;  %v325_v57 = vld [vmem:[%s633_s6] ss:$0 sm:$0xff] }
   0xe   :  { %259 = vmatpush.msrb.mxu1 %v228_v9 }
  0x10   :  { %260 = vmatpush.msrb.mxu1 %v227_v10 }
  0x11   :  { %297 = vmatmul.msk.f32.gmra.mxu2 %vm56_vm0, %v37_v11  ;;  %303 = vmatmul.msk.f32.gmra.mxu3 %vm56_vm0, %v43_v12 }
  0x12   :  { %261 = vmatpush.msrb.mxu1 %v226_v13 }
  0x13   :  { %289 = vmatmul.msk.f32.gmra.mxu0 %vm56_vm0, %v29_v14  ;;  %295 = vmatmul.msk.f32.gmra.mxu1 %vm56_vm0, %v35_v15 }
  0x19   :  { %298 = vmatmul.msk.f32.gmra.mxu2 %vm56_vm0, %v38_v18  ;;  %304 = vmatmul.msk.f32.gmra.mxu3 %vm56_vm0, %v44_v19 }
  0x1b   :  { %290 = vmatmul.msk.f32.gmra.mxu0 %vm56_vm0, %v30_v21  ;;  %308 = vmatmul.msk.f32.vlgmr.msrb.gmra.mxu1 %vm56_vm0, %v222_v20 }
  0x21   :  { %299 = vmatmul.msk.f32.gmra.mxu2 %vm56_vm0, %v39_v24  ;;  %305 = vmatmul.msk.f32.gmra.mxu3 %vm56_vm0, %v45_v25 }
  0x23   :  { %291 = vmatmul.msk.f32.gmra.mxu0 %vm56_vm0, %v31_v27  ;;  %309 = vmatmul.msk.f32.gmra.mxu1 %vm56_vm0, %v223_v26 }
  0x29   :  { %300 = vmatmul.msk.f32.gmra.mxu2 %vm56_vm0, %v40_v30  ;;  %306 = vmatmul.msk.f32.gmra.mxu3 %vm56_vm0, %v46_v31 }
  0x2b   :  { %292 = vmatmul.msk.f32.gmra.mxu0 %vm56_vm0, %v32_v33  ;;  %310 = vmatmul.msk.f32.gmra.mxu1 %vm56_vm0, %v224_v32 }
  0x31   :  { %301 = vmatmul.msk.f32.gmra.mxu2 %vm56_vm0, %v41_v36  ;;  %307 = vmatmul.msk.f32.gmra.mxu3 %vm56_vm0, %v47_v37 }
  0x33   :  { %293 = vmatmul.msk.f32.gmra.mxu0 %vm56_vm0, %v33_v39  ;;  %311 = vmatmul.msk.f32.gmra.mxu1 %vm56_vm0, %v225_v38 }
  0x88   :  { %v134_v41 = vpop.f32.mrf.mxu0  ;;  %v152_v42 = vpop.f32.mrf.mxu1 }
  0x89   :  { %v135_v43 = vadd.f32 %v506_v40, %v134_v41  ;;  %v153_v44 = vadd.f32 %v506_v40, %v152_v42 }
  0x8b   :  { %194 = vst.msk [vmem:[%s634_s7] sm:$0xff] %vm56_vm0, %v135_v43 }
  0x8c   :  { %200 = vst.msk [vmem:[%s634_s7 + $0x30] sm:$0xff] %vm56_vm0, %v153_v44  ;;  %v158_v45 = vpop.f32.mrf.mxu2  ;;  %v176_v46 = vpop.f32.mrf.mxu3 }
  0x8d   :  { %v159_v47 = vadd.f32 %v506_v40, %v158_v45  ;;  %v177_v48 = vadd.f32 %v506_v40, %v176_v46 }
  0x8f   :  { %202 = vst.msk [vmem:[%s634_s7 + $0x40] sm:$0xff] %vm56_vm0, %v159_v47 }
  0x90   :  { %208 = vst.msk [vmem:[%s634_s7 + $0x70] sm:$0xff] %vm56_vm0, %v177_v48  ;;  %v137_v49 = vpop.f32.mrf.mxu0  ;;  %v155_v50 = vpop.f32.mrf.mxu1 }
  0x91   :  { %v138_v51 = vadd.f32 %v506_v40, %v137_v49  ;;  %v156_v52 = vadd.f32 %v506_v40, %v155_v50 }
  0x93   :  { %195 = vst.msk [vmem:[%s634_s7 + $0x8] sm:$0xff] %vm56_vm0, %v138_v51 }
  0x94   :  { %201 = vst.msk [vmem:[%s634_s7 + $0x38] sm:$0xff] %vm56_vm0, %v156_v52  ;;  %v161_v53 = vpop.f32.mrf.mxu2  ;;  %v179_v54 = vpop.f32.mrf.mxu3 }
  0x95   :  { %v162_v55 = vadd.f32 %v506_v40, %v161_v53  ;;  %v180_v56 = vadd.f32 %v506_v40, %v179_v54 }
  0x97   :  { %203 = vst.msk [vmem:[%s634_s7 + $0x48] sm:$0xff] %vm56_vm0, %v162_v55 }
  0x98   :  { %209 = vst.msk [vmem:[%s634_s7 + $0x78] sm:$0xff] %vm56_vm0, %v180_v56  ;;  %v140_v58 = vpop.f32.mrf.mxu0  ;;  %v263_v59 = vpop.f32.mrf.mxu1 }
  0x99   :  { %v141_v60 = vadd.f32 %v506_v40, %v140_v58  ;;  %v264_v61 = vadd.f32 %v325_v57, %v263_v59 }
  0x9b   :  { %196 = vst.msk [vmem:[%s634_s7 + $0x10] sm:$0xff] %vm56_vm0, %v141_v60 }
  0x9c   :  { %v164_v62 = vpop.f32.mrf.mxu2  ;;  %v182_v63 = vpop.f32.mrf.mxu3  ;;  %276 = vst.msk [vmem:[%s635_s8] sm:$0xff] %vm275_vm1, %v264_v61 }
  0x9d   :  { %v165_v0 = vadd.f32 %v506_v40, %v164_v62  ;;  %v183_v1 = vadd.f32 %v506_v40, %v182_v63 }
  0x9f   :  { %204 = vst.msk [vmem:[%s634_s7 + $0x50] sm:$0xff] %vm56_vm0, %v165_v0 }
  0xa0   :  { %210 = vst.msk [vmem:[%s634_s7 + $0x80] sm:$0xff] %vm56_vm0, %v183_v1  ;;  %v143_v2 = vpop.f32.mrf.mxu0  ;;  %v266_v3 = vpop.f32.mrf.mxu1 }
  0xa1   :  { %v144_v4 = vadd.f32 %v506_v40, %v143_v2  ;;  %v267_v5 = vadd.f32 %v325_v57, %v266_v3 }
  0xa3   :  { %197 = vst.msk [vmem:[%s634_s7 + $0x18] sm:$0xff] %vm56_vm0, %v144_v4 }
  0xa4   :  { %v167_v6 = vpop.f32.mrf.mxu2  ;;  %v185_v7 = vpop.f32.mrf.mxu3  ;;  %277 = vst.msk [vmem:[%s635_s8 + $0x8] sm:$0xff] %vm275_vm1, %v267_v5 }
  0xa5   :  { %v168_v8 = vadd.f32 %v506_v40, %v167_v6  ;;  %v186_v9 = vadd.f32 %v506_v40, %v185_v7 }
  0xa7   :  { %205 = vst.msk [vmem:[%s634_s7 + $0x58] sm:$0xff] %vm56_vm0, %v168_v8 }
  0xa8   :  { %211 = vst.msk [vmem:[%s634_s7 + $0x88] sm:$0xff] %vm56_vm0, %v186_v9  ;;  %v146_v10 = vpop.f32.mrf.mxu0  ;;  %v269_v11 = vpop.f32.mrf.mxu1 }
  0xa9   :  { %v147_v12 = vadd.f32 %v506_v40, %v146_v10  ;;  %v270_v13 = vadd.f32 %v325_v57, %v269_v11 }
  0xab   :  { %198 = vst.msk [vmem:[%s634_s7 + $0x20] sm:$0xff] %vm56_vm0, %v147_v12 }
  0xac   :  { %v170_v14 = vpop.f32.mrf.mxu2  ;;  %v188_v15 = vpop.f32.mrf.mxu3  ;;  %278 = vst.msk [vmem:[%s635_s8 + $0x10] sm:$0xff] %vm275_vm1, %v270_v13 }
  0xad   :  { %v171_v16 = vadd.f32 %v506_v40, %v170_v14  ;;  %v189_v17 = vadd.f32 %v506_v40, %v188_v15 }
  0xaf   :  { %206 = vst.msk [vmem:[%s634_s7 + $0x60] sm:$0xff] %vm56_vm0, %v171_v16 }
  0xb0   :  { %212 = vst.msk [vmem:[%s634_s7 + $0x90] sm:$0xff] %vm56_vm0, %v189_v17  ;;  %v149_v18 = vpop.f32.mrf.mxu0  ;;  %v272_v19 = vpop.f32.mrf.mxu1 }
  0xb1   :  { %v150_v20 = vadd.f32 %v506_v40, %v149_v18  ;;  %v273_v21 = vadd.f32 %v325_v57, %v272_v19 }
  0xb3   :  { %199 = vst.msk [vmem:[%s634_s7 + $0x28] sm:$0xff] %vm56_vm0, %v150_v20 }
  0xb4   :  { %v173_v22 = vpop.f32.mrf.mxu2  ;;  %v191_v23 = vpop.f32.mrf.mxu3  ;;  %279 = vst.msk [vmem:[%s635_s8 + $0x18] sm:$0xff] %vm275_vm1, %v273_v21 }
  0xb5   :  { %v174_v24 = vadd.f32 %v506_v40, %v173_v22  ;;  %v192_v25 = vadd.f32 %v506_v40, %v191_v23 }
  0xb7   :  { %207 = vst.msk [vmem:[%s634_s7 + $0x68] sm:$0xff] %vm56_vm0, %v174_v24 }
  0xb8   :  { %213 = vst.msk [vmem:[%s634_s7 + $0x98] sm:$0xff] %vm56_vm0, %v192_v25 }

// kernel: run.4
= control target key start
LH: loop header
LB: loop body
LE: loop exit
PB: predicated region body
PF: predicated region fallthrough
CT: control target
= control target key end

     0   :  { %vm65_vm0 = vcmask 261120   ;;  %vm193_vm1 = vcmask 64512   ;;  %s3008_s3 = inlined_call_operand.vmem [shape: f32[4,32,8], index: 3, kind: input, shape index: {}]   ;;  %s3009_s0 = inlined_call_operand.vmem [shape: f32[32,32], index: 0, kind: input, shape index: {}]   ;;  %s3010_s1 = inlined_call_operand.vmem [shape: f32[32,32], index: 1, kind: input, shape index: {}]   ;;  %s3011_s5 = inlined_call_operand.vmem [shape: f32[4,32,8], index: 5, kind: input, shape index: {}]   ;;  %s3012_s4 = inlined_call_operand.vmem [shape: f32[4,1,8], index: 4, kind: input, shape index: {}]   ;;  %s3013_s7 = inlined_call_operand.vmem [shape: f32[4,32,8], index: 7, kind: input, shape index: {}]   ;;  %s3014_s6 = inlined_call_operand.vmem [shape: f32[4,1,8], index: 6, kind: input, shape index: {}]   ;;  %s3015_s8 = inlined_call_operand.vmem [shape: f32[4,1,8], index: 8, kind: input, shape index: {}]   ;;  %s3016_s2 = inlined_call_operand.vmem [shape: f32[8,8], index: 2, kind: input, shape index: {}]   ;;  %s3017_s9 = inlined_call_operand.vmem [shape: f32[4,8,32], index: 9, kind: input, shape index: {}]   ;;  %s3018_s10 = inlined_call_operand.vmem [shape: f32[1,32], index: 10, kind: input, shape index: {}]   ;;  %s3019_s11 = inlined_call_operand.vmem [shape: f32[1,32], index: 11, kind: input, shape index: {}]   ;;  %s3020_s12 = inlined_call_operand.vmem [shape: f32[1,32], index: 12, kind: input, shape index: {}]   ;;  %s3021_s13 = inlined_call_operand.vmem [shape: f32[32,32], index: 13, kind: output, shape index: {}]  }
   0x1   :  { %v60_v0 = vld [vmem:[%s3008_s3 + $0x18] sm:$0xff]  ;;  %v59_v1 = vld [vmem:[%s3008_s3 + $0x10] sm:$0xff]  ;;  %v58_v4 = vld [vmem:[%s3008_s3 + $0x8] sm:$0xff] }
   0x2   :  { %2215 = vmatpush.msra.mxu1 %v60_v0  ;;  %v2398_v2 = vld [vmem:[%s3009_s0 + $0x18] sm:$0xff]  ;;  %90 = vmatpush.msra.mxu0 %v60_v0  ;;  %v2409_v5 = vld [vmem:[%s3009_s0] sm:$0xff]  ;;  %v109_v11 = vld [vmem:[%s3011_s5 + $0x10] sm:$0xff] }
   0x3   :  { %v51_v3 = vld [vmem:[%s3010_s1 + $0x18] sm:$0xff]  ;;  %v48_v6 = vld [vmem:[%s3010_s1] sm:$0xff]  ;;  %v146_v13 = vld [vmem:[%s3013_s7 + $0x10] sm:$0xff] }
   0x4   :  { %2216 = vmatpush.msra.mxu1 %v59_v1  ;;  %91 = vmatpush.msra.mxu0 %v59_v1  ;;  %v57_v7 = vld [vmem:[%s3008_s3] sm:$0xff]  ;;  %v2418_v8 = vadd.f32 %v51_v3, %v2398_v2  ;;  %v110_v9 = vld [vmem:[%s3011_s5 + $0x18] sm:$0xff]  ;;  %v2424_v10 = vadd.f32 %v48_v6, %v2409_v5  ;;  %v108_v14 = vld [vmem:[%s3011_s5 + $0x8] sm:$0xff] }
   0x5   :  { %v147_v12 = vld [vmem:[%s3013_s7 + $0x18] sm:$0xff]  ;;  %v145_v15 = vld [vmem:[%s3013_s7 + $0x8] sm:$0xff]  ;;  %v107_v18 = vld [vmem:[%s3011_s5] sm:$0xff] }
   0x6   :  { %2217 = vmatpush.msra.mxu1 %v58_v4  ;;  %92 = vmatpush.msra.mxu0 %v58_v4  ;;  %v2448_v16 = vld [vmem:[%s3009_s0 + $0x8] sm:$0xff]  ;;  %v144_v19 = vld [vmem:[%s3013_s7] sm:$0xff]  ;;  %v2471_v21 = vld [vmem:[%s3009_s0 + $0x10] sm:$0xff] }
   0x7   :  { %176 = vmatpush.msra.mxu2 %v147_v12  ;;  %v49_v17 = vld [vmem:[%s3010_s1 + $0x8] sm:$0xff]  ;;  %v50_v22 = vld [vmem:[%s3010_s1 + $0x10] sm:$0xff]  ;;  %v2225_v26 = vld [vmem:[%s3014_s6] ss:$0 sm:$0xff] }
   0x8   :  { %2218 = vmatpush.msra.mxu1 %v57_v7  ;;  %93 = vmatpush.msra.mxu0 %v57_v7  ;;  %v2460_v20 = vadd.f32 %v49_v17, %v2448_v16  ;;  %v2477_v23 = vadd.f32 %v50_v22, %v2471_v21  ;;  %v2224_v27 = vld [vmem:[%s3012_s4] ss:$0 sm:$0xff] }
   0x9   :  { %2058 = vmatmul.msk.f32.vlgmr.msra.gmra.mxu1 %vm65_vm0, %v2418_v8  ;;  %2055 = vmatmul.msk.f32.vlgmr.msra.gmra.mxu0 %vm65_vm0, %v2424_v10  ;;  %v2226_v36 = vld [vmem:[%s3015_s8] ss:$0 sm:$0xff] }
   0xa   :  { %127 = vmatpush.msrb.mxu1 %v110_v9  ;;  %177 = vmatpush.msra.mxu2 %v146_v13  ;;  %v2513_v54 = vld [vmem:[%s3016_s2] sm:$0xff] }
   0xc   :  { %128 = vmatpush.msrb.mxu1 %v109_v11  ;;  %178 = vmatpush.msra.mxu2 %v145_v15 }
   0xe   :  { %129 = vmatpush.msrb.mxu1 %v108_v14  ;;  %179 = vmatpush.msra.mxu2 %v144_v19 }
   0xf   :  { %2063 = vmatmul.msk.f32.vlgmr.msra.gmra.mxu2 %vm65_vm0, %v2409_v5 }
  0x10   :  { %130 = vmatpush.msrb.mxu1 %v107_v18 }
  0x11   :  { %2059 = vmatmul.msk.f32.vlgmr.msrb.gmra.mxu1 %vm65_vm0, %v2424_v10  ;;  %2056 = vmatmul.msk.f32.gmra.mxu0 %vm65_vm0, %v2460_v20 }
  0x17   :  { %2064 = vmatmul.msk.f32.gmra.mxu2 %vm65_vm0, %v2448_v16 }
  0x19   :  { %2060 = vmatmul.msk.f32.gmra.mxu1 %vm65_vm0, %v2460_v20  ;;  %2057 = vmatmul.msk.f32.gmra.mxu0 %vm65_vm0, %v2477_v23 }
  0x1f   :  { %2065 = vmatmul.msk.f32.gmra.mxu2 %vm65_vm0, %v2471_v21 }
  0x21   :  { %2061 = vmatmul.msk.f32.gmra.mxu1 %vm65_vm0, %v2477_v23 }
  0x27   :  { %2066 = vmatmul.msk.f32.gmra.mxu2 %vm65_vm0, %v2398_v2 }
  0x29   :  { %2062 = vmatmul.msk.f32.gmra.mxu1 %vm65_vm0, %v2418_v8 }
  0x86   :  { %v104_v24 = vpop.f32.mrf.mxu1  ;;  %v95_v25 = vpop.f32.mrf.mxu0 }
  0x87   :  { %v96_v30 = vadd.f32 %v2224_v27, %v95_v25  ;;  %v105_v48 = vadd.f32 %v2224_v27, %v104_v24 }
  0x8e   :  { %v132_v28 = vpop.f32.mrf.mxu1  ;;  %v98_v31 = vpop.f32.mrf.mxu0 }
  0x8f   :  { %v133_v29 = vadd.f32 %v2225_v26, %v132_v28  ;;  %v99_v35 = vadd.f32 %v2224_v27, %v98_v31 }
  0x91   :  { %2067 = vmatpush.xpose.msk.msrb.mxu2 %vm193_vm1, %v133_v29 }
  0x92   :  { %v181_v32 = vpop.f32.mrf.mxu2 }
  0x93   :  { %v182_v45 = vadd.f32 %v2226_v36, %v181_v32  ;;  %v2082_v32 = vld [vmem:[%s3008_s3 + $0x38] sm:$0xff] }
  0x94   :  { %2068 = vmatmul.msk.f32.vlgmr.msrb.gmra.mxu2 %vm193_vm1, %v96_v30 }
  0x96   :  { %v135_v33 = vpop.f32.mrf.mxu1  ;;  %v101_v37 = vpop.f32.mrf.mxu0 }
  0x97   :  { %v136_v34 = vadd.f32 %v2225_v26, %v135_v33  ;;  %v102_v42 = vadd.f32 %v2224_v27, %v101_v37  ;;  %v2081_v33 = vld [vmem:[%s3008_s3 + $0x30] sm:$0xff] }
  0x99   :  { %2069 = vmatpush.xpose.msk.msra.mxu3 %vm193_vm1, %v136_v34  ;;  %v2080_v34 = vld [vmem:[%s3008_s3 + $0x28] sm:$0xff] }
  0x9a   :  { %v184_v38 = vpop.f32.mrf.mxu2 }
  0x9b   :  { %v185_v40 = vadd.f32 %v2226_v36, %v184_v38 }
  0x9c   :  { %2070 = vmatmul.msk.f32.vlgmr.msra.gmra.mxu3 %vm193_vm1, %v99_v35  ;;  %v2079_v35 = vld [vmem:[%s3008_s3 + $0x20] sm:$0xff] }
  0x9d   :  { %443 = vmatpush.msrb.mxu0 %v185_v40 }
  0x9e   :  { %v138_v39 = vpop.f32.mrf.mxu1 }
  0x9f   :  { %v139_v41 = vadd.f32 %v2225_v26, %v138_v39  ;;  %517 = vmatpush.msra.mxu0 %v2082_v32 }
  0xa1   :  { %2071 = vmatpush.xpose.msk.msrb.mxu3 %vm193_vm1, %v139_v41  ;;  %518 = vmatpush.msra.mxu0 %v2081_v33 }
  0xa2   :  { %v187_v43 = vpop.f32.mrf.mxu2 }
  0xa3   :  { %v188_v46 = vadd.f32 %v2226_v36, %v187_v43  ;;  %519 = vmatpush.msra.mxu0 %v2080_v34 }
  0xa4   :  { %2072 = vmatmul.msk.f32.vlgmr.msrb.gmra.mxu3 %vm193_vm1, %v102_v42 }
  0xa5   :  { %466 = vmatpush.msra.mxu1 %v188_v46  ;;  %520 = vmatpush.msra.mxu0 %v2079_v35 }
  0xa6   :  { %v141_v44 = vpop.f32.mrf.mxu1 }
  0xa7   :  { %v142_v47 = vadd.f32 %v2225_v26, %v141_v44 }
  0xa9   :  { %2073 = vmatpush.xpose.msk.msra.mxu3 %vm193_vm1, %v142_v47 }
  0xaa   :  { %v190_v49 = vpop.f32.mrf.mxu2 }
  0xab   :  { %v191_v50 = vadd.f32 %v2226_v36, %v190_v49 }
  0xac   :  { %2074 = vmatmul.msk.f32.vlgmr.msra.gmra.mxu3 %vm193_vm1, %v105_v48 }
  0xad   :  { %420 = vmatpush.msrb.mxu3 %v182_v45  ;;  %489 = vmatpush.msra.mxu2 %v191_v50 }
  0xaf   :  { %2219 = vmatpush.msra.mxu3 %v2082_v32 }
  0xb1   :  { %2220 = vmatpush.msra.mxu3 %v2081_v33 }
  0xb3   :  { %2221 = vmatpush.msra.mxu3 %v2080_v34 }
  0xb5   :  { %2222 = vmatpush.msra.mxu3 %v2079_v35 }
 0x117   :  { %v217_v53 = vpop.f32.mrf.mxu2 }
 0x118   :  { %v298_v56 = vmul.f32 0.35355338, %v217_v53 }
 0x11a   :  { %v302_v59 = vadd.f32 %v298_v56, %v2513_v54 }
 0x11c   :  { %v306_v61 = vsel %vm193_vm1, %v302_v59, -inf }
 0x11f   :  { %v243_v51 = vpop.f32.mrf.mxu3 }
 0x120   :  { %v299_v52 = vmul.f32 0.35355338, %v243_v51 }
 0x122   :  { %v303_v55 = vadd.f32 %v299_v52, %v2513_v54 }
 0x124   :  { %v309_v57 = vsel %vm193_vm1, %v303_v55, -inf }
 0x125   :  { %310 = vmax.xlane.f32.xlu0 %v309_v57 }
 0x127   :  { %v269_v58 = vpop.f32.mrf.mxu3 }
 0x128   :  { %v300_v60 = vmul.f32 0.35355338, %v269_v58  ;;  %v2091_v58 = vld [vmem:[%s3011_s5 + $0x38] sm:$0xff] }
 0x12a   :  { %v304_v62 = vadd.f32 %v300_v60, %v2513_v54  ;;  %v2090_v60 = vld [vmem:[%s3011_s5 + $0x30] sm:$0xff] }
 0x12c   :  { %v312_v3 = vsel %vm193_vm1, %v304_v62, -inf }
 0x12d   :  { %307 = vmax.xlane.f32.xlu0 %v306_v61 }
 0x12f   :  { %v295_v63 = vpop.f32.mrf.mxu3 }
 0x130   :  { %v301_v0 = vmul.f32 0.35355338, %v295_v63 }
 0x132   :  { %v305_v1 = vadd.f32 %v301_v0, %v2513_v54 }
 0x134   :  { %v315_v4 = vsel %vm193_vm1, %v305_v1, -inf }
 0x135   :  { %316 = vmax.xlane.f32.xlu2 %v315_v4  ;;  %313 = vmax.xlane.f32.xlu0 %v312_v3  ;;  %v2089_v3 = vld [vmem:[%s3011_s5 + $0x28] sm:$0xff] }
 0x198   :  { %v311_v6 = vpop.xlane.xlu0 %310 }
 0x199   :  { %v319_v7 = vsub.f32 %v303_v55, %v311_v6 }
 0x19b   :  { %v324_v9 = vmul.f32 1.442695, %v319_v7 }
 0x19d   :  { %2239 = vpow2.f32 %v324_v9 }
 0x1a0   :  { %v308_v11 = vpop.xlane.xlu0 %307 }
 0x1a1   :  { %v318_v12 = vsub.f32 %v302_v59, %v308_v11  ;;  %v2088_v11 = vld [vmem:[%s3011_s5 + $0x20] sm:$0xff] }
 0x1a3   :  { %v2523_v13 = vpop.eup %2239  ;;  %v322_v14 = vmul.f32 1.442695, %v318_v12 }
 0x1a4   :  { %v333_v15 = vsel %vm193_vm1, %v2523_v13, 0.0 }
 0x1a5   :  { %2241 = vpow2.f32 %v322_v14  ;;  %334 = vadd.xlane.f32.xlu1 %v333_v15 }
 0x1a8   :  { %v317_v17 = vpop.xlane.xlu2 %316  ;;  %v314_v18 = vpop.xlane.xlu0 %313 }
 0x1a9   :  { %v321_v19 = vsub.f32 %v305_v1, %v317_v17  ;;  %v320_v22 = vsub.f32 %v304_v62, %v314_v18 }
 0x1ab   :  { %v2527_v24 = vpop.eup %2241  ;;  %v328_v25 = vmul.f32 1.442695, %v321_v19  ;;  %v326_v26 = vmul.f32 1.442695, %v320_v22 }
 0x1ac   :  { %v330_v27 = vsel %vm193_vm1, %v2527_v24, 0.0 }
 0x1ad   :  { %2243 = vpow2.f32 %v328_v25  ;;  %331 = vadd.xlane.f32.xlu1 %v330_v27 }
 0x1ae   :  { %2245 = vpow2.f32 %v326_v26 }
 0x1b3   :  { %v2531_v28 = vpop.eup %2243 }
 0x1b4   :  { %v2533_v29 = vpop.eup %2245  ;;  %v339_v30 = vsel %vm193_vm1, %v2531_v28, 0.0 }
 0x1b5   :  { %340 = vadd.xlane.f32.xlu2 %v339_v30  ;;  %v336_v31 = vsel %vm193_vm1, %v2533_v29, 0.0 }
 0x1b6   :  { %337 = vadd.xlane.f32.xlu1 %v336_v31 }
 0x218   :  { %v335_v36 = vpop.xlane.xlu1 %334 }
 0x219   :  { %2247 = vrcp.f32 %v335_v36  ;;  %v368_v42 = vand.u32 2147483648, %v335_v36  ;;  %vm362_vm3 = vweird.f32 %v335_v36  ;;  %v366_v44 = vand.u32 2147483647, %v335_v36 }
 0x21b   :  { %v369_v49 = vor.u32 1.1754944e-38, %v368_v42  ;;  %vm367_vm5 = vcmp.eq.f32.partialorder %v366_v44, 8.507059e+37 }
 0x21f   :  { %v2248_v37 = vpop.eup %2247 }
 0x220   :  { %v358_v38 = vmul.f32 %v2248_v37, %v335_v36  ;;  %v332_v39 = vpop.xlane.xlu1 %331  ;;  %vm363_vm2 = vweird.f32 %v2248_v37  ;;  %v2228_v36 = vld [vmem:[%s3014_s6 + $0x1] ss:$0 sm:$0xff] }
 0x221   :  { %2249 = vrcp.f32 %v332_v39  ;;  %vm364_vm4 = vmor %vm362_vm3, %vm363_vm2  ;;  %v353_v52 = vand.u32 2147483648, %v332_v39  ;;  %v351_v56 = vand.u32 2147483647, %v332_v39  ;;  %vm347_vm7 = vweird.f32 %v332_v39 }
 0x222   :  { %v359_v40 = vsub.f32 1.0, %v358_v38 }
 0x223   :  { %v354_v62 = vor.u32 1.1754944e-38, %v353_v52  ;;  %vm352_vm9 = vcmp.eq.f32.partialorder %v351_v56, 8.507059e+37  ;;  %v2099_v56 = vld [vmem:[%s3013_s7 + $0x30] sm:$0xff] }
 0x224   :  { %v360_v41 = vmul.f32 %v2248_v37, %v359_v40 }
 0x226   :  { %v361_v43 = vadd.f32 %v2248_v37, %v360_v41 }
 0x227   :  { %v2250_v45 = vpop.eup %2249 }
 0x228   :  { %v343_v46 = vmul.f32 %v2250_v45, %v332_v39  ;;  %v341_v47 = vpop.xlane.xlu2 %340  ;;  %v365_v48 = vsel %vm364_vm4, %v2248_v37, %v361_v43  ;;  %vm348_vm6 = vweird.f32 %v2250_v45  ;;  %v2227_v37 = vld [vmem:[%s3012_s4 + $0x1] ss:$0 sm:$0xff] }
 0x229   :  { %2251 = vrcp.f32 %v341_v47  ;;  %v338_v50 = vpop.xlane.xlu1 %337  ;;  %v370_v53 = vsel %vm367_vm5, %v369_v49, %v365_v48  ;;  %vm349_vm8 = vmor %vm347_vm7, %vm348_vm6  ;;  %v398_v12 = vand.u32 2147483648, %v341_v47  ;;  %v396_v15 = vand.u32 2147483647, %v341_v47 }
 0x22a   :  { %v344_v51 = vsub.f32 1.0, %v343_v46  ;;  %2253 = vrcp.f32 %v338_v50  ;;  %v371_v57 = vmul.f32 %v2523_v13, %v370_v53  ;;  %v383_v17 = vand.u32 2147483648, %v338_v50 }
 0x22b   :  { %vm377_vm11 = vweird.f32 %v338_v50  ;;  %v381_v19 = vand.u32 2147483647, %v338_v50  ;;  %vm392_vm13 = vweird.f32 %v341_v47  ;;  %vm397_vm15 = vcmp.eq.f32.partialorder %v396_v15, 8.507059e+37 }
 0x22c   :  { %v345_v55 = vmul.f32 %v2250_v45, %v344_v51  ;;  %2076 = vmatmul.msk.f32.vlgmr.msrb.gmra.mxu0 %vm193_vm1, %v371_v57  ;;  %v384_v27 = vor.u32 1.1754944e-38, %v383_v17 }
 0x22d   :  { %556 = vmatpush.msrb.mxu0 %v2091_v58  ;;  %vm382_vm3 = vcmp.eq.f32.partialorder %v381_v19, 8.507059e+37  ;;  %v2098_v58 = vld [vmem:[%s3013_s7 + $0x28] sm:$0xff] }
 0x22e   :  { %v346_v59 = vadd.f32 %v2250_v45, %v345_v55  ;;  %v2100_v55 = vld [vmem:[%s3013_s7 + $0x38] sm:$0xff] }
 0x22f   :  { %v2252_v61 = vpop.eup %2251  ;;  %557 = vmatpush.msrb.mxu0 %v2090_v60  ;;  %595 = vmatpush.msrb.mxu1 %v2100_v55 }
 0x230   :  { %v2254_v63 = vpop.eup %2253  ;;  %v350_v0 = vsel %vm349_vm8, %v2250_v45, %v346_v59  ;;  %v388_v1 = vmul.f32 %v2252_v61, %v341_v47  ;;  %vm393_vm10 = vweird.f32 %v2252_v61 }
 0x231   :  { %v355_v4 = vsel %vm352_vm9, %v354_v62, %v350_v0  ;;  %v373_v6 = vmul.f32 %v2254_v63, %v338_v50  ;;  %558 = vmatpush.msrb.mxu0 %v2089_v3  ;;  %vm378_vm12 = vweird.f32 %v2254_v63  ;;  %vm394_vm14 = vmor %vm392_vm13, %vm393_vm10  ;;  %596 = vmatpush.msrb.mxu1 %v2099_v56 }
 0x232   :  { %v389_v7 = vsub.f32 1.0, %v388_v1  ;;  %v356_v9 = vmul.f32 %v2527_v24, %v355_v4  ;;  %v399_v24 = vor.u32 1.1754944e-38, %v398_v12  ;;  %vm379_vm2 = vmor %vm377_vm11, %vm378_vm12 }
 0x233   :  { %v374_v13 = vsub.f32 1.0, %v373_v6  ;;  %559 = vmatpush.msrb.mxu0 %v2088_v11  ;;  %597 = vmatpush.msrb.mxu1 %v2098_v58  ;;  %v2097_v11 = vld [vmem:[%s3013_s7 + $0x20] sm:$0xff] }
 0x234   :  { %v390_v14 = vmul.f32 %v2252_v61, %v389_v7  ;;  %2075 = vmatmul.msk.f32.vlgmr.msrb.gmra.mxu3 %vm193_vm1, %v356_v9  ;;  %2084 = vmatmul.msk.f32.vlgmr.msra.gmra.mxu0 %vm65_vm0, %v2424_v10 }
 0x235   :  { %v375_v18 = vmul.f32 %v2254_v63, %v374_v13  ;;  %598 = vmatpush.msrb.mxu1 %v2097_v11 }
 0x236   :  { %v391_v22 = vadd.f32 %v2252_v61, %v390_v14 }
 0x237   :  { %v376_v25 = vadd.f32 %v2254_v63, %v375_v18 }
 0x238   :  { %v395_v26 = vsel %vm394_vm14, %v2252_v61, %v391_v22 }
 0x239   :  { %v400_v30 = vsel %vm397_vm15, %v399_v24, %v395_v26  ;;  %v380_v31 = vsel %vm379_vm2, %v2254_v63, %v376_v25 }
 0x23a   :  { %v385_v32 = vsel %vm382_vm3, %v384_v27, %v380_v31  ;;  %v401_v33 = vmul.f32 %v2531_v28, %v400_v30 }
 0x23b   :  { %v386_v34 = vmul.f32 %v2533_v29, %v385_v32 }
 0x23c   :  { %2078 = vmatmul.msk.f32.vlgmr.msra.gmra.mxu2 %vm193_vm1, %v401_v33  ;;  %2086 = vmatmul.msk.f32.vlgmr.msra.gmra.mxu3 %vm65_vm0, %v2477_v23 }
 0x23d   :  { %2077 = vmatmul.msk.f32.vlgmr.msra.gmra.mxu1 %vm193_vm1, %v386_v34  ;;  %2085 = vmatmul.msk.f32.gmra.mxu0 %vm65_vm0, %v2460_v20 }
 0x244   :  { %2087 = vmatmul.msk.f32.gmra.mxu3 %vm65_vm0, %v2418_v8 }
 0x245   :  { %2093 = vmatmul.msk.f32.vlgmr.msrb.gmra.mxu0 %vm65_vm0, %v2424_v10  ;;  %2102 = vmatmul.msk.f32.vlgmr.msrb.gmra.mxu1 %vm65_vm0, %v2409_v5 }
 0x24d   :  { %2094 = vmatmul.msk.f32.gmra.mxu0 %vm65_vm0, %v2460_v20  ;;  %2103 = vmatmul.msk.f32.gmra.mxu1 %vm65_vm0, %v2448_v16 }
 0x255   :  { %2095 = vmatmul.msk.f32.gmra.mxu0 %vm65_vm0, %v2477_v23  ;;  %2104 = vmatmul.msk.f32.gmra.mxu1 %vm65_vm0, %v2471_v21 }
 0x25d   :  { %2096 = vmatmul.msk.f32.gmra.mxu0 %vm65_vm0, %v2418_v8  ;;  %2105 = vmatmul.msk.f32.gmra.mxu1 %vm65_vm0, %v2398_v2 }
 0x2a9   :  { %v2587_v28 = vpop.f32.mrf.mxu0 }
 0x2b1   :  { %v522_v29 = vpop.f32.mrf.mxu0 }
 0x2b2   :  { %v523_v40 = vadd.f32 %v2227_v37, %v522_v29  ;;  %v2229_v29 = vld [vmem:[%s3015_s8 + $0x1] ss:$0 sm:$0xff] }
 0x2b7   :  { %v2596_v41 = vpop.f32.mrf.mxu3 }
 0x2ba   :  { %v525_v35 = vpop.f32.mrf.mxu0  ;;  %v2650_v34 = vpop.f32.mrf.mxu1 }
 0x2bb   :  { %v526_v44 = vadd.f32 %v2227_v37, %v525_v35 }
 0x2bf   :  { %v528_v45 = vpop.f32.mrf.mxu3  ;;  %v2605_v53 = vpop.f32.mrf.mxu2 }
 0x2c0   :  { %v529_v48 = vadd.f32 %v2227_v37, %v528_v45  ;;  %v2138_v45 = vld [vmem:[%s3011_s5 + $0x50] sm:$0xff] }
 0x2c2   :  { %v561_v38 = vpop.f32.mrf.mxu0  ;;  %v600_v35 = vpop.f32.mrf.mxu1 }
 0x2c3   :  { %v562_v39 = vadd.f32 %v2228_v36, %v561_v38 }
 0x2c5   :  { %2106 = vmatpush.xpose.msk.msrb.mxu2 %vm193_vm1, %v562_v39 }
 0x2c7   :  { %v531_v49 = vpop.f32.mrf.mxu3 }
 0x2c8   :  { %2107 = vmatmul.msk.f32.vlgmr.msrb.gmra.mxu2 %vm193_vm1, %v523_v40  ;;  %v532_v52 = vadd.f32 %v2227_v37, %v531_v49  ;;  %v2130_v49 = vld [vmem:[%s3008_s3 + $0x58] sm:$0xff] }
 0x2ca   :  { %v564_v42 = vpop.f32.mrf.mxu0  ;;  %v603_v37 = vpop.f32.mrf.mxu1 }
 0x2cb   :  { %v565_v43 = vadd.f32 %v2228_v36, %v564_v42  ;;  %v604_v38 = vadd.f32 %v2229_v29, %v603_v37 }
 0x2cd   :  { %2108 = vmatpush.xpose.msk.msra.mxu2 %vm193_vm1, %v565_v43  ;;  %861 = vmatpush.msra.mxu0 %v604_v38 }
 0x2d0   :  { %2109 = vmatmul.msk.f32.vlgmr.msra.gmra.mxu2 %vm193_vm1, %v526_v44  ;;  %v2139_v44 = vld [vmem:[%s3011_s5 + $0x58] sm:$0xff] }
 0x2d2   :  { %v567_v46 = vpop.f32.mrf.mxu0  ;;  %v606_v39 = vpop.f32.mrf.mxu1 }
 0x2d3   :  { %v568_v47 = vadd.f32 %v2228_v36, %v567_v46  ;;  %v607_v40 = vadd.f32 %v2229_v29, %v606_v39  ;;  %v2137_v46 = vld [vmem:[%s3011_s5 + $0x48] sm:$0xff] }
 0x2d5   :  { %2110 = vmatpush.xpose.msk.msrb.mxu2 %vm193_vm1, %v568_v47  ;;  %884 = vmatpush.msra.mxu1 %v607_v40 }
 0x2d7   :  { %1018 = vmatpush.msrb.mxu1 %v2130_v49 }
 0x2d8   :  { %2111 = vmatmul.msk.f32.vlgmr.msrb.gmra.mxu2 %vm193_vm1, %v529_v48  ;;  %v2136_v48 = vld [vmem:[%s3011_s5 + $0x40] sm:$0xff] }
 0x2da   :  { %v570_v50 = vpop.f32.mrf.mxu0  ;;  %v609_v42 = vpop.f32.mrf.mxu1 }
 0x2db   :  { %v571_v51 = vadd.f32 %v2228_v36, %v570_v50  ;;  %v601_v36 = vadd.f32 %v2229_v29, %v600_v35  ;;  %v610_v43 = vadd.f32 %v2229_v29, %v609_v42  ;;  %v2129_v50 = vld [vmem:[%s3008_s3 + $0x50] sm:$0xff] }
 0x2dc   :  { %1019 = vmatpush.msrb.mxu1 %v2129_v50 }
 0x2dd   :  { %2112 = vmatpush.xpose.msk.msra.mxu2 %vm193_vm1, %v571_v51  ;;  %838 = vmatpush.msrb.mxu3 %v601_v36  ;;  %v2128_v51 = vld [vmem:[%s3008_s3 + $0x48] sm:$0xff] }
 0x2de   :  { %1020 = vmatpush.msrb.mxu1 %v2128_v51 }
 0x2e0   :  { %2113 = vmatmul.msk.f32.vlgmr.msra.gmra.mxu2 %vm193_vm1, %v532_v52 }
 0x2e1   :  { %907 = vmatpush.msrb.mxu2 %v610_v43 }
 0x2e3   :  { %1057 = vmatpush.msra.mxu2 %v2139_v44 }
 0x2e5   :  { %1058 = vmatpush.msra.mxu2 %v2138_v45 }
 0x2e7   :  { %1059 = vmatpush.msra.mxu2 %v2137_v46 }
 0x2e9   :  { %1060 = vmatpush.msra.mxu2 %v2136_v48 }
 0x34b   :  { %v635_v57 = vpop.f32.mrf.mxu2 }
 0x34c   :  { %v716_v63 = vmul.f32 0.35355338, %v635_v57  ;;  %v2127_v57 = vld [vmem:[%s3008_s3 + $0x40] sm:$0xff] }
 0x34d   :  { %1021 = vmatpush.msrb.mxu1 %v2127_v57 }
 0x34e   :  { %v720_v4 = vadd.f32 %v716_v63, %v2513_v54 }
 0x350   :  { %v724_v7 = vsel %vm193_vm1, %v720_v4, -inf }
 0x353   :  { %v661_v59 = vpop.f32.mrf.mxu2 }
 0x354   :  { %v717_v27 = vmul.f32 0.35355338, %v661_v59 }
 0x356   :  { %v2646_v32 = vadd.f32 %v717_v27, %v2513_v54 }
 0x358   :  { %v727_v33 = vsel %vm193_vm1, %v2646_v32, -inf }
 0x35b   :  { %v687_v60 = vpop.f32.mrf.mxu2 }
 0x35c   :  { %v718_v61 = vmul.f32 0.35355338, %v687_v60 }
 0x35e   :  { %v722_v62 = vadd.f32 %v718_v61, %v2513_v54 }
 0x360   :  { %v730_v0 = vsel %vm193_vm1, %v722_v62, -inf }
 0x361   :  { %731 = vmax.xlane.f32.xlu0 %v730_v0 }
 0x363   :  { %v713_v1 = vpop.f32.mrf.mxu2 }
 0x364   :  { %v719_v3 = vmul.f32 0.35355338, %v713_v1 }
 0x366   :  { %v723_v6 = vadd.f32 %v719_v3, %v2513_v54 }
 0x368   :  { %v733_v9 = vsel %vm193_vm1, %v723_v6, -inf }
 0x369   :  { %725 = vmax.xlane.f32.xlu0 %v724_v7  ;;  %734 = vmax.xlane.f32.xlu2 %v733_v9 }
 0x3d4   :  { %v732_v12 = vpop.xlane.xlu0 %731 }
 0x3d5   :  { %v738_v13 = vsub.f32 %v722_v62, %v732_v12 }
 0x3d7   :  { %v744_v14 = vmul.f32 1.442695, %v738_v13 }
 0x3d9   :  { %2255 = vpow2.f32 %v744_v14 }
 0x3dc   :  { %v735_v15 = vpop.xlane.xlu2 %734  ;;  %v726_v17 = vpop.xlane.xlu0 %725 }
 0x3dd   :  { %v739_v18 = vsub.f32 %v723_v6, %v735_v15  ;;  %v736_v19 = vsub.f32 %v720_v4, %v726_v17 }
 0x3df   :  { %v2633_v22 = vpop.eup %2255  ;;  %v746_v5 = vmul.f32 1.442695, %v739_v18  ;;  %v740_v24 = vmul.f32 1.442695, %v736_v19 }
 0x3e0   :  { %v754_v25 = vsel %vm193_vm1, %v2633_v22, 0.0 }
 0x3e1   :  { %2257 = vpow2.f32 %v746_v5  ;;  %755 = vadd.xlane.f32.xlu2 %v754_v25 }
 0x3e2   :  { %2259 = vpow2.f32 %v740_v24 }
 0x3e7   :  { %v2637_v26 = vpop.eup %2257 }
 0x3e8   :  { %v2639_v2 = vpop.eup %2259  ;;  %v757_v30 = vsel %vm193_vm1, %v2637_v26, 0.0 }
 0x3e9   :  { %758 = vadd.xlane.f32.xlu1 %v757_v30  ;;  %v748_v31 = vsel %vm193_vm1, %v2639_v2, 0.0 }
 0x3ea   :  { %749 = vadd.xlane.f32.xlu2 %v748_v31 }
 0x3f1   :  { %728 = vmax.xlane.f32.xlu1 %v727_v33 }
 0x454   :  { %v756_v47 = vpop.xlane.xlu2 %755 }
 0x455   :  { %2261 = vrcp.f32 %v756_v47  ;;  %v801_v60 = vand.u32 2147483648, %v756_v47  ;;  %v799_v62 = vand.u32 2147483647, %v756_v47  ;;  %vm795_vm5 = vweird.f32 %v756_v47 }
 0x457   :  { %v802_v1 = vor.u32 1.1754944e-38, %v801_v60  ;;  %vm800_vm7 = vcmp.eq.f32.partialorder %v799_v62, 8.507059e+37  ;;  %v2230_v60 = vld [vmem:[%s3014_s6 + $0x2] ss:$0 sm:$0xff] }
 0x45b   :  { %v2262_v52 = vpop.eup %2261 }
 0x45c   :  { %v791_v55 = vmul.f32 %v2262_v52, %v756_v47  ;;  %v759_v56 = vpop.xlane.xlu1 %758  ;;  %vm796_vm4 = vweird.f32 %v2262_v52 }
 0x45d   :  { %2263 = vrcp.f32 %v759_v56  ;;  %v750_v58 = vpop.xlane.xlu2 %749  ;;  %vm797_vm6 = vmor %vm795_vm5, %vm796_vm4  ;;  %v816_v15 = vand.u32 2147483648, %v759_v56  ;;  %v814_v5 = vand.u32 2147483647, %v759_v56  ;;  %vm810_vm10 = vweird.f32 %v759_v56 }
 0x45e   :  { %v792_v59 = vsub.f32 1.0, %v791_v55  ;;  %2265 = vrcp.f32 %v750_v58  ;;  %v771_v24 = vand.u32 2147483648, %v750_v58  ;;  %v769_v27 = vand.u32 2147483647, %v750_v58 }
 0x45f   :  { %v817_v31 = vor.u32 1.1754944e-38, %v816_v15  ;;  %vm765_vm12 = vweird.f32 %v750_v58  ;;  %vm815_vm13 = vcmp.eq.f32.partialorder %v814_v5, 8.507059e+37 }
 0x460   :  { %v793_v61 = vmul.f32 %v2262_v52, %v792_v59  ;;  %v772_v33 = vor.u32 1.1754944e-38, %v771_v24  ;;  %vm770_vm15 = vcmp.eq.f32.partialorder %v769_v27, 8.507059e+37 }
 0x462   :  { %v794_v63 = vadd.f32 %v2262_v52, %v793_v61 }
 0x463   :  { %v2264_v0 = vpop.eup %2263 }
 0x464   :  { %v2266_v3 = vpop.eup %2265  ;;  %v798_v4 = vsel %vm797_vm6, %v2262_v52, %v794_v63  ;;  %v806_v6 = vmul.f32 %v2264_v0, %v759_v56  ;;  %v729_v7 = vpop.xlane.xlu1 %728  ;;  %vm811_vm8 = vweird.f32 %v2264_v0 }
 0x465   :  { %v803_v9 = vsel %vm800_vm7, %v802_v1, %v798_v4  ;;  %v761_v11 = vmul.f32 %v2266_v3, %v750_v58  ;;  %v737_v12 = vsub.f32 %v2646_v32, %v729_v7  ;;  %vm766_vm9 = vweird.f32 %v2266_v3  ;;  %vm812_vm11 = vmor %vm810_vm10, %vm811_vm8 }
 0x466   :  { %v807_v13 = vsub.f32 1.0, %v806_v6  ;;  %v804_v14 = vmul.f32 %v2633_v22, %v803_v9  ;;  %vm767_vm14 = vmor %vm765_vm12, %vm766_vm9 }
 0x467   :  { %v762_v17 = vsub.f32 1.0, %v761_v11  ;;  %v742_v18 = vmul.f32 1.442695, %v737_v12 }
 0x468   :  { %v808_v19 = vmul.f32 %v2264_v0, %v807_v13  ;;  %2116 = vmatmul.msk.f32.vlgmr.msra.gmra.mxu1 %vm193_vm1, %v804_v14 }
 0x469   :  { %v763_v25 = vmul.f32 %v2266_v3, %v762_v17  ;;  %2267 = vpow2.f32 %v742_v18 }
 0x46a   :  { %v809_v30 = vadd.f32 %v2264_v0, %v808_v19 }
 0x46b   :  { %v764_v32 = vadd.f32 %v2266_v3, %v763_v25 }
 0x46c   :  { %v813_v22 = vsel %vm812_vm11, %v2264_v0, %v809_v30  ;;  %v2231_v0 = vld [vmem:[%s3012_s4 + $0x2] ss:$0 sm:$0xff] }
 0x46d   :  { %v818_v29 = vsel %vm815_vm13, %v817_v31, %v813_v22  ;;  %v768_v35 = vsel %vm767_vm14, %v2266_v3, %v764_v32 }
 0x46e   :  { %v773_v36 = vsel %vm770_vm15, %v772_v33, %v768_v35  ;;  %v819_v37 = vmul.f32 %v2637_v26, %v818_v29  ;;  %v2118_v26 = vld [vmem:[%s3017_s9 + $0x8] sm:$0xff] }
 0x46f   :  { %v2268_v38 = vpop.eup %2267  ;;  %v774_v39 = vmul.f32 %v2639_v2, %v773_v36  ;;  %941 = vmatpush.msra.mxu3 %v2118_v26  ;;  %v494_v2 = vld [vmem:[%s3017_s9] sm:$0xff]  ;;  %v2147_v26 = vld [vmem:[%s3013_s7 + $0x50] sm:$0xff] }
 0x470   :  { %2117 = vmatmul.msk.f32.vlgmr.msrb.gmra.mxu2 %vm193_vm1, %v819_v37  ;;  %v751_v40 = vsel %vm193_vm1, %v2268_v38, 0.0  ;;  %2132 = vmatmul.msk.f32.vlgmr.msrb.gmra.mxu1 %vm65_vm0, %v2424_v10 }
 0x471   :  { %2114 = vmatmul.msk.f32.vlgmr.msrb.gmra.mxu3 %vm193_vm1, %v774_v39  ;;  %752 = vadd.xlane.f32.xlu0 %v751_v40  ;;  %v2148_v40 = vld [vmem:[%s3013_s7 + $0x58] sm:$0xff] }
 0x472   :  { %982 = vmatpush.msrb.mxu0 %v494_v2  ;;  %1096 = vmatpush.msrb.mxu3 %v2148_v40  ;;  %v2146_v2 = vld [vmem:[%s3013_s7 + $0x48] sm:$0xff] }
 0x474   :  { %1097 = vmatpush.msrb.mxu3 %v2147_v26 }
 0x476   :  { %1098 = vmatpush.msrb.mxu3 %v2146_v2 }
 0x478   :  { %2141 = vmatmul.msk.f32.vlgmr.msra.gmra.mxu2 %vm65_vm0, %v2424_v10  ;;  %2133 = vmatmul.msk.f32.gmra.mxu1 %vm65_vm0, %v2460_v20 }
 0x480   :  { %2142 = vmatmul.msk.f32.gmra.mxu2 %vm65_vm0, %v2460_v20  ;;  %2134 = vmatmul.msk.f32.gmra.mxu1 %vm65_vm0, %v2477_v23 }
 0x488   :  { %2143 = vmatmul.msk.f32.gmra.mxu2 %vm65_vm0, %v2477_v23  ;;  %2135 = vmatmul.msk.f32.gmra.mxu1 %vm65_vm0, %v2418_v8 }
 0x490   :  { %2144 = vmatmul.msk.f32.gmra.mxu2 %vm65_vm0, %v2418_v8 }
 0x4e4   :  { %v753_v42 = vpop.xlane.xlu0 %752 }
 0x4e5   :  { %2269 = vrcp.f32 %v753_v42  ;;  %v886_v46 = vpop.f32.mrf.mxu1  ;;  %v786_v47 = vand.u32 2147483648, %v753_v42  ;;  %v784_v49 = vand.u32 2147483647, %v753_v42  ;;  %vm780_vm3 = vweird.f32 %v753_v42 }
 0x4e7   :  { %v787_v51 = vor.u32 1.1754944e-38, %v786_v47  ;;  %vm785_vm5 = vcmp.eq.f32.partialorder %v784_v49, 8.507059e+37 }
 0x4eb   :  { %v2270_v43 = vpop.eup %2269 }
 0x4ec   :  { %v776_v44 = vmul.f32 %v2270_v43, %v753_v42  ;;  %vm781_vm2 = vweird.f32 %v2270_v43  ;;  %v2767_v42 = vld [vmem:[%s3009_s0] sm:$0xff] }
 0x4ed   :  { %vm782_vm4 = vmor %vm780_vm3, %vm781_vm2  ;;  %v1023_v59 = vpop.f32.mrf.mxu1 }
 0x4ee   :  { %v777_v45 = vsub.f32 1.0, %v776_v44 }
 0x4f0   :  { %v778_v48 = vmul.f32 %v2270_v43, %v777_v45 }
 0x4f2   :  { %v779_v50 = vadd.f32 %v2270_v43, %v778_v48 }
 0x4f3   :  { %v909_v52 = vpop.f32.mrf.mxu2 }
 0x4f4   :  { %v783_v55 = vsel %vm782_vm4, %v2270_v43, %v779_v50  ;;  %v840_v56 = vpop.f32.mrf.mxu3  ;;  %v2778_v43 = vld [vmem:[%s3009_s0 + $0x18] sm:$0xff] }
 0x4f5   :  { %v788_v57 = vsel %vm785_vm5, %v787_v51, %v783_v55  ;;  %2119 = vmatmul.msk.f32.vlgmr.msra.gmra.mxu3 %vm193_vm1, %v840_v56  ;;  %v1026_v63 = vpop.f32.mrf.mxu1 }
 0x4f6   :  { %v789_v58 = vmul.f32 %v2268_v38, %v788_v57  ;;  %v1027_v4 = vadd.f32 %v2231_v0, %v1026_v63 }
 0x4f8   :  { %2115 = vmatmul.msk.f32.vlgmr.msra.gmra.mxu0 %vm193_vm1, %v789_v58 }
 0x4fb   :  { %v1062_v61 = vpop.f32.mrf.mxu2 }
 0x4fc   :  { %v1063_v62 = vadd.f32 %v2230_v60, %v1062_v61 }
 0x4fd   :  { %v1029_v6 = vpop.f32.mrf.mxu1 }
 0x4fe   :  { %2154 = vmatpush.xpose.msk.msra.mxu0 %vm193_vm1, %v1063_v62  ;;  %v1030_v11 = vadd.f32 %v2231_v0, %v1029_v6 }
 0x500   :  { %2123 = vmatmul.msk.f32.vlgmr.msrb.gmra.mxu0 %vm193_vm1, %v2596_v41 }
 0x503   :  { %v1065_v1 = vpop.f32.mrf.mxu2 }
 0x504   :  { %v1066_v3 = vadd.f32 %v2230_v60, %v1065_v1 }
 0x505   :  { %v1032_v13 = vpop.f32.mrf.mxu1 }
 0x506   :  { %2156 = vmatpush.xpose.msk.msra.mxu1 %vm193_vm1, %v1066_v3  ;;  %v1033_v14 = vadd.f32 %v2231_v0, %v1032_v13 }
 0x508   :  { %2124 = vmatmul.msk.f32.gmra.mxu0 %vm193_vm1, %v2587_v28  ;;  %v1024_v28 = vadd.f32 %v2231_v0, %v1023_v59 }
 0x509   :  { %2157 = vmatmul.msk.f32.vlgmr.msra.gmra.mxu1 %vm193_vm1, %v1027_v4 }
 0x50b   :  { %v1068_v7 = vpop.f32.mrf.mxu2 }
 0x50c   :  { %v1069_v9 = vadd.f32 %v2230_v60, %v1068_v7  ;;  %v2232_v7 = vld [vmem:[%s3015_s8 + $0x2] ss:$0 sm:$0xff] }
 0x50e   :  { %2158 = vmatpush.xpose.msk.msrb.mxu2 %vm193_vm1, %v1069_v9 }
 0x510   :  { %2125 = vmatmul.msk.f32.gmra.mxu0 %vm193_vm1, %v2650_v34 }
 0x511   :  { %2159 = vmatmul.msk.f32.vlgmr.msrb.gmra.mxu2 %vm193_vm1, %v1030_v11 }
 0x513   :  { %v1071_v41 = vpop.f32.mrf.mxu2 }
 0x514   :  { %v1072_v12 = vadd.f32 %v2230_v60, %v1071_v41 }
 0x516   :  { %2160 = vmatpush.xpose.msk.msrb.mxu0 %vm193_vm1, %v1072_v12 }
 0x518   :  { %2126 = vmatmul.msk.f32.gmra.mxu0 %vm193_vm1, %v2605_v53 }
 0x520   :  { %2155 = vmatmul.msk.f32.vlgmr.msra.gmra.mxu0 %vm193_vm1, %v1024_v28 }
 0x528   :  { %2161 = vmatmul.msk.f32.vlgmr.msrb.gmra.mxu0 %vm193_vm1, %v1033_v14 }
 0x575   :  { %v863_v15 = vpop.f32.mrf.mxu0 }
 0x576   :  { %2120 = vmatmul.msk.f32.gmra.mxu3 %vm193_vm1, %v863_v15 }
 0x578   :  { %v2795_v0 = vpop.f32.mrf.mxu3 }
 0x57d   :  { %v2734_v34 = vpop.f32.mrf.mxu0 }
 0x57e   :  { %2121 = vmatmul.msk.f32.gmra.mxu3 %vm193_vm1, %v886_v46 }
 0x585   :  { %v2737_v17 = vpop.f32.mrf.mxu0 }
 0x586   :  { %2122 = vmatmul.msk.f32.gmra.mxu3 %vm193_vm1, %v909_v52  ;;  %v1162_v18 = vpop.f32.mrf.mxu1 }
 0x587   :  { %v1218_v53 = vmul.f32 0.35355338, %v1162_v18 }
 0x589   :  { %v1222_v19 = vadd.f32 %v1218_v53, %v2513_v54 }
 0x58b   :  { %v1228_v5 = vsel %vm193_vm1, %v1222_v19, -inf }
 0x58c   :  { %1229 = vmax.xlane.f32.xlu2 %v1228_v5 }
 0x58d   :  { %v2742_v24 = vpop.f32.mrf.mxu0 }
 0x594   :  { %v1188_v25 = vpop.f32.mrf.mxu2 }
 0x595   :  { %v1219_v27 = vmul.f32 0.35355338, %v1188_v25  ;;  %v2744_v30 = vpop.f32.mrf.mxu0 }
 0x597   :  { %v1223_v31 = vadd.f32 %v1219_v27, %v2513_v54 }
 0x599   :  { %v1231_v32 = vsel %vm193_vm1, %v1223_v31, -inf }
 0x59a   :  { %1232 = vmax.xlane.f32.xlu0 %v1231_v32 }
 0x59d   :  { %v1136_v22 = vpop.f32.mrf.mxu0 }
 0x59e   :  { %v1217_v33 = vmul.f32 0.35355338, %v1136_v22 }
 0x5a0   :  { %v1221_v29 = vadd.f32 %v1217_v33, %v2513_v54 }
 0x5a2   :  { %v1225_v35 = vsel %vm193_vm1, %v1221_v29, -inf }
 0x5a3   :  { %1226 = vmax.xlane.f32.xlu1 %v1225_v35 }
 0x5a5   :  { %v1214_v36 = vpop.f32.mrf.mxu0 }
 0x5a6   :  { %v1220_v37 = vmul.f32 0.35355338, %v1214_v36  ;;  %v2174_v36 = vld [vmem:[%s3008_s3 + $0x78] sm:$0xff] }
 0x5a8   :  { %v1224_v38 = vadd.f32 %v1220_v37, %v2513_v54  ;;  %v2145_v54 = vld [vmem:[%s3013_s7 + $0x40] sm:$0xff]  ;;  %v2173_v37 = vld [vmem:[%s3008_s3 + $0x70] sm:$0xff] }
 0x5a9   :  { %1099 = vmatpush.msrb.mxu3 %v2145_v54 }
 0x5aa   :  { %v1234_v39 = vsel %vm193_vm1, %v1224_v38, -inf  ;;  %2150 = vmatmul.msk.f32.vlgmr.msrb.gmra.mxu3 %vm65_vm0, %v2767_v42 }
 0x5ab   :  { %1235 = vmax.xlane.f32.xlu1 %v1234_v39  ;;  %v2172_v39 = vld [vmem:[%s3008_s3 + $0x68] sm:$0xff] }
 0x5b2   :  { %2151 = vmatmul.msk.f32.gmra.mxu3 %vm65_vm0, %v2448_v16 }
 0x5ba   :  { %2152 = vmatmul.msk.f32.gmra.mxu3 %vm65_vm0, %v2471_v21 }
 0x5c2   :  { %2153 = vmatmul.msk.f32.gmra.mxu3 %vm65_vm0, %v2778_v43 }
 0x5f9   :  { %v2797_v1 = vpop.f32.mrf.mxu3 }
 0x5ff   :  { %v1230_v44 = vpop.xlane.xlu2 %1229 }
 0x600   :  { %v1238_v45 = vsub.f32 %v1222_v19, %v1230_v44 }
 0x601   :  { %v2799_v3 = vpop.f32.mrf.mxu3 }
 0x602   :  { %v1243_v46 = vmul.f32 1.442695, %v1238_v45 }
 0x604   :  { %2271 = vpow2.f32 %v1243_v46  ;;  %v2171_v46 = vld [vmem:[%s3008_s3 + $0x60] sm:$0xff] }
 0x609   :  { %v2801_v4 = vpop.f32.mrf.mxu3 }
 0x60a   :  { %v2272_v47 = vpop.eup %2271 }
 0x60b   :  { %v1252_v48 = vsel %vm193_vm1, %v2272_v47, 0.0 }
 0x60c   :  { %1253 = vadd.xlane.f32.xlu0 %v1252_v48 }
 0x60d   :  { %v1233_v16 = vpop.xlane.xlu0 %1232 }
 0x60e   :  { %v1239_v49 = vsub.f32 %v1223_v31, %v1233_v16 }
 0x610   :  { %v1245_v50 = vmul.f32 1.442695, %v1239_v49 }
 0x612   :  { %2273 = vpow2.f32 %v1245_v50 }
 0x616   :  { %v1227_v21 = vpop.xlane.xlu1 %1226 }
 0x617   :  { %v1237_v51 = vsub.f32 %v1221_v29, %v1227_v21 }
 0x618   :  { %v2783_v52 = vpop.eup %2273 }
 0x619   :  { %v1241_v55 = vmul.f32 1.442695, %v1237_v51  ;;  %v1255_v56 = vsel %vm193_vm1, %v2783_v52, 0.0 }
 0x61a   :  { %1256 = vadd.xlane.f32.xlu1 %v1255_v56 }
 0x61b   :  { %2275 = vpow2.f32 %v1241_v55 }
 0x61e   :  { %v1236_v57 = vpop.xlane.xlu1 %1235 }
 0x61f   :  { %v1240_v58 = vsub.f32 %v1224_v38, %v1236_v57 }
 0x621   :  { %v2787_v59 = vpop.eup %2275  ;;  %v1247_v60 = vmul.f32 1.442695, %v1240_v58 }
 0x622   :  { %v1249_v61 = vsel %vm193_vm1, %v2787_v59, 0.0 }
 0x623   :  { %2277 = vpow2.f32 %v1247_v60  ;;  %1250 = vadd.xlane.f32.xlu2 %v1249_v61 }
 0x629   :  { %v2791_v62 = vpop.eup %2277 }
 0x62a   :  { %v1258_v63 = vsel %vm193_vm1, %v2791_v62, 0.0 }
 0x62b   :  { %1259 = vadd.xlane.f32.xlu2 %v1258_v63 }
 0x62d   :  { %v1101_v6 = vpop.f32.mrf.mxu3 }
 0x62e   :  { %v1102_v11 = vadd.f32 %v2232_v7, %v1101_v6 }
 0x630   :  { %1339 = vmatpush.msrb.mxu1 %v1102_v11 }
 0x635   :  { %v1104_v9 = vpop.f32.mrf.mxu3 }
 0x636   :  { %v1105_v41 = vadd.f32 %v2232_v7, %v1104_v9 }
 0x638   :  { %1362 = vmatpush.msra.mxu2 %v1105_v41 }
 0x63d   :  { %v1107_v28 = vpop.f32.mrf.mxu3 }
 0x63e   :  { %v1108_v13 = vadd.f32 %v2232_v7, %v1107_v28 }
 0x640   :  { %1385 = vmatpush.msra.mxu0 %v1108_v13 }
 0x642   :  { %1482 = vmatpush.msrb.mxu0 %v2174_v36 }
 0x644   :  { %1483 = vmatpush.msrb.mxu0 %v2173_v37 }
 0x645   :  { %v1110_v22 = vpop.f32.mrf.mxu3 }
 0x646   :  { %v1111_v29 = vadd.f32 %v2232_v7, %v1110_v22  ;;  %1484 = vmatpush.msrb.mxu0 %v2172_v39 }
 0x648   :  { %1408 = vmatpush.msra.mxu1 %v1111_v29  ;;  %1485 = vmatpush.msrb.mxu0 %v2171_v46 }
 0x67f   :  { %v1254_v12 = vpop.xlane.xlu0 %1253 }
 0x680   :  { %2279 = vrcp.f32 %v1254_v12  ;;  %v1287_v53 = vand.u32 2147483648, %v1254_v12  ;;  %v1285_v5 = vand.u32 2147483647, %v1254_v12  ;;  %vm1281_vm7 = vweird.f32 %v1254_v12 }
 0x682   :  { %v1288_v31 = vor.u32 1.1754944e-38, %v1287_v53  ;;  %vm1286_vm9 = vcmp.eq.f32.partialorder %v1285_v5, 8.507059e+37  ;;  %v2180_v5 = vld [vmem:[%s3011_s5 + $0x60] sm:$0xff] }
 0x686   :  { %v2280_v14 = vpop.eup %2279 }
 0x687   :  { %v1277_v15 = vmul.f32 %v2280_v14, %v1254_v12  ;;  %vm1282_vm6 = vweird.f32 %v2280_v14 }
 0x688   :  { %vm1283_vm8 = vmor %vm1281_vm7, %vm1282_vm6 }
 0x689   :  { %v1278_v18 = vsub.f32 1.0, %v1277_v15  ;;  %v2182_v15 = vld [vmem:[%s3011_s5 + $0x70] sm:$0xff] }
 0x68b   :  { %v1279_v19 = vmul.f32 %v2280_v14, %v1278_v18 }
 0x68d   :  { %v1280_v25 = vadd.f32 %v2280_v14, %v1279_v19  ;;  %v1257_v27 = vpop.xlane.xlu1 %1256 }
 0x68e   :  { %2281 = vrcp.f32 %v1257_v27  ;;  %v1302_v54 = vand.u32 2147483648, %v1257_v27  ;;  %v1300_v45 = vand.u32 2147483647, %v1257_v27  ;;  %vm1296_vm11 = vweird.f32 %v1257_v27 }
 0x68f   :  { %v1284_v32 = vsel %vm1283_vm8, %v2280_v14, %v1280_v25 }
 0x690   :  { %v1289_v33 = vsel %vm1286_vm9, %v1288_v31, %v1284_v32  ;;  %v1303_v48 = vor.u32 1.1754944e-38, %v1302_v54  ;;  %vm1301_vm13 = vcmp.eq.f32.partialorder %v1300_v45, 8.507059e+37 }
 0x691   :  { %v1290_v35 = vmul.f32 %v2272_v47, %v1289_v33 }
 0x693   :  { %2163 = vmatmul.msk.f32.vlgmr.msra.gmra.mxu2 %vm193_vm1, %v1290_v35  ;;  %v2234_v35 = vld [vmem:[%s3012_s4 + $0x3] ss:$0 sm:$0xff] }
 0x694   :  { %v2282_v38 = vpop.eup %2281 }
 0x695   :  { %v1292_v40 = vmul.f32 %v2282_v38, %v1257_v27  ;;  %vm1297_vm10 = vweird.f32 %v2282_v38 }
 0x696   :  { %v1251_v26 = vpop.xlane.xlu2 %1250  ;;  %vm1298_vm12 = vmor %vm1296_vm11, %vm1297_vm10 }
 0x697   :  { %v1293_v2 = vsub.f32 1.0, %v1292_v40  ;;  %2283 = vrcp.f32 %v1251_v26  ;;  %v1272_v57 = vand.u32 2147483648, %v1251_v26  ;;  %v1270_v60 = vand.u32 2147483647, %v1251_v26 }
 0x698   :  { %vm1266_vm15 = vweird.f32 %v1251_v26 }
 0x699   :  { %v1294_v44 = vmul.f32 %v2282_v38, %v1293_v2  ;;  %v1273_v6 = vor.u32 1.1754944e-38, %v1272_v57  ;;  %vm1271_vm3 = vcmp.eq.f32.partialorder %v1270_v60, 8.507059e+37 }
 0x69b   :  { %v1295_v47 = vadd.f32 %v2282_v38, %v1294_v44 }
 0x69d   :  { %v2284_v16 = vpop.eup %2283  ;;  %v1299_v49 = vsel %vm1298_vm12, %v2282_v38, %v1295_v47 }
 0x69e   :  { %v1304_v50 = vsel %vm1301_vm13, %v1303_v48, %v1299_v49  ;;  %v1262_v21 = vmul.f32 %v2284_v16, %v1251_v26  ;;  %v1260_v51 = vpop.xlane.xlu2 %1259  ;;  %vm1267_vm14 = vweird.f32 %v2284_v16  ;;  %v985_v48 = vadd.f32 %v2734_v34, %v2795_v0  ;;  %v2191_v34 = vld [vmem:[%s3013_s7 + $0x70] sm:$0xff] }
 0x69f   :  { %2285 = vrcp.f32 %v1260_v51  ;;  %v1305_v56 = vmul.f32 %v2783_v52, %v1304_v50  ;;  %vm1268_vm2 = vmor %vm1266_vm15, %vm1267_vm14  ;;  %v2183_v52 = vld [vmem:[%s3011_s5 + $0x78] sm:$0xff]  ;;  %v1317_v28 = vand.u32 2147483648, %v1260_v51  ;;  %v1315_v14 = vand.u32 2147483647, %v1260_v51 }
 0x6a0   :  { %v1263_v55 = vsub.f32 1.0, %v1262_v21  ;;  %vm1311_vm5 = vweird.f32 %v1260_v51  ;;  %v988_v50 = vadd.f32 %v2737_v17, %v2797_v1 }
 0x6a1   :  { %2164 = vmatmul.msk.f32.vlgmr.msra.gmra.mxu0 %vm193_vm1, %v1305_v56  ;;  %v1318_v53 = vor.u32 1.1754944e-38, %v1317_v28  ;;  %vm1316_vm7 = vcmp.eq.f32.partialorder %v1315_v14, 8.507059e+37 }
 0x6a2   :  { %v1264_v58 = vmul.f32 %v2284_v16, %v1263_v55  ;;  %v991_v55 = vadd.f32 %v2742_v24, %v2799_v3  ;;  %v2315_v24 = vld [vmem:[%s3016_s2] sm:$0xff] }
 0x6a4   :  { %v1265_v61 = vadd.f32 %v2284_v16, %v1264_v58  ;;  %v2192_v58 = vld [vmem:[%s3013_s7 + $0x78] sm:$0xff] }
 0x6a5   :  { %v2286_v63 = vpop.eup %2285  ;;  %1560 = vmatpush.msra.mxu3 %v2192_v58 }
 0x6a6   :  { %v1269_v7 = vsel %vm1268_vm2, %v2284_v16, %v1265_v61  ;;  %v1307_v9 = vmul.f32 %v2286_v63, %v1260_v51  ;;  %vm1312_vm4 = vweird.f32 %v2286_v63 }
 0x6a7   :  { %v1274_v11 = vsel %vm1271_vm3, %v1273_v6, %v1269_v7  ;;  %vm1313_vm6 = vmor %vm1311_vm5, %vm1312_vm4  ;;  %1561 = vmatpush.msra.mxu3 %v2191_v34 }
 0x6a8   :  { %v1308_v41 = vsub.f32 1.0, %v1307_v9  ;;  %v1275_v12 = vmul.f32 %v2787_v59, %v1274_v11  ;;  %v2181_v59 = vld [vmem:[%s3011_s5 + $0x68] sm:$0xff] }
 0x6a9   :  { %2176 = vmatmul.msk.f32.vlgmr.msrb.gmra.mxu0 %vm65_vm0, %v2424_v10 }
 0x6aa   :  { %v1309_v13 = vmul.f32 %v2286_v63, %v1308_v41  ;;  %2162 = vmatmul.msk.f32.vlgmr.msrb.gmra.mxu1 %vm193_vm1, %v1275_v12 }
 0x6ab   :  { %1521 = vmatpush.msrb.mxu1 %v2183_v52 }
 0x6ac   :  { %v1310_v18 = vadd.f32 %v2286_v63, %v1309_v13 }
 0x6ad   :  { %1522 = vmatpush.msrb.mxu1 %v2182_v15  ;;  %v2190_v15 = vld [vmem:[%s3013_s7 + $0x68] sm:$0xff] }
 0x6ae   :  { %v1314_v19 = vsel %vm1313_vm6, %v2286_v63, %v1310_v18  ;;  %1562 = vmatpush.msra.mxu3 %v2190_v15  ;;  %v2189_v18 = vld [vmem:[%s3013_s7 + $0x60] sm:$0xff] }
 0x6af   :  { %v1319_v25 = vsel %vm1316_vm7, %v1318_v53, %v1314_v19  ;;  %1523 = vmatpush.msrb.mxu1 %v2181_v59  ;;  %v2912_v59 = vld [vmem:[%s3009_s0 + $0x8] sm:$0xff]  ;;  %v2919_v53 = vld [vmem:[%s3009_s0 + $0x10] sm:$0xff] }
 0x6b0   :  { %v1320_v27 = vmul.f32 %v2791_v62, %v1319_v25  ;;  %v2166_v62 = vld [vmem:[%s3017_s9 + $0x10] sm:$0xff]  ;;  %1563 = vmatpush.msra.mxu3 %v2189_v18 }
 0x6b1   :  { %1524 = vmatpush.msrb.mxu1 %v2180_v5  ;;  %2177 = vmatmul.msk.f32.gmra.mxu0 %vm65_vm0, %v2460_v20 }
 0x6b2   :  { %2165 = vmatmul.msk.f32.vlgmr.msra.gmra.mxu1 %vm193_vm1, %v1320_v27  ;;  %1442 = vmatpush.msrb.mxu2 %v2166_v62 }
 0x6b3   :  { %2194 = vmatmul.msk.f32.vlgmr.msra.gmra.mxu3 %vm65_vm0, %v2767_v42 }
 0x6b9   :  { %2178 = vmatmul.msk.f32.gmra.mxu0 %vm65_vm0, %v2477_v23 }
 0x6ba   :  { %2185 = vmatmul.msk.f32.vlgmr.msrb.gmra.mxu1 %vm65_vm0, %v2424_v10 }
 0x6bb   :  { %2195 = vmatmul.msk.f32.gmra.mxu3 %vm65_vm0, %v2912_v59 }
 0x6c1   :  { %2179 = vmatmul.msk.f32.gmra.mxu0 %vm65_vm0, %v2418_v8 }
 0x6c2   :  { %2186 = vmatmul.msk.f32.gmra.mxu1 %vm65_vm0, %v2460_v20 }
 0x6c3   :  { %2196 = vmatmul.msk.f32.gmra.mxu3 %vm65_vm0, %v2919_v53 }
 0x6ca   :  { %2187 = vmatmul.msk.f32.gmra.mxu1 %vm65_vm0, %v2477_v23  ;;  %v2233_v23 = vld [vmem:[%s3014_s6 + $0x3] ss:$0 sm:$0xff] }
 0x6cb   :  { %2197 = vmatmul.msk.f32.gmra.mxu3 %vm65_vm0, %v2778_v43 }
 0x6d2   :  { %2188 = vmatmul.msk.f32.gmra.mxu1 %vm65_vm0, %v2418_v8 }
 0x716   :  { %v1364_v32 = vpop.f32.mrf.mxu2 }
 0x71e   :  { %v1387_v31 = vpop.f32.mrf.mxu0 }
 0x726   :  { %v1487_v22 = vpop.f32.mrf.mxu0 }
 0x727   :  { %v1341_v10 = vpop.f32.mrf.mxu1  ;;  %v1488_v39 = vadd.f32 %v2234_v35, %v1487_v22 }
 0x728   :  { %2167 = vmatmul.msk.f32.vlgmr.msrb.gmra.mxu2 %vm193_vm1, %v1341_v10 }
 0x72e   :  { %v1490_v29 = vpop.f32.mrf.mxu0 }
 0x72f   :  { %v1410_v20 = vpop.f32.mrf.mxu1  ;;  %v1491_v38 = vadd.f32 %v2234_v35, %v1490_v29 }
 0x730   :  { %2168 = vmatmul.msk.f32.gmra.mxu2 %vm193_vm1, %v1364_v32 }
 0x736   :  { %v1493_v40 = vpop.f32.mrf.mxu0 }
 0x737   :  { %v1526_v33 = vpop.f32.mrf.mxu1  ;;  %v1494_v54 = vadd.f32 %v2234_v35, %v1493_v40 }
 0x738   :  { %v1527_v8 = vadd.f32 %v2233_v23, %v1526_v33  ;;  %2169 = vmatmul.msk.f32.gmra.mxu2 %vm193_vm1, %v1387_v31 }
 0x73a   :  { %2198 = vmatpush.xpose.msk.msra.mxu2 %vm193_vm1, %v1527_v8 }
 0x73e   :  { %v1496_v44 = vpop.f32.mrf.mxu0 }
 0x73f   :  { %v1529_v36 = vpop.f32.mrf.mxu1  ;;  %v1497_v47 = vadd.f32 %v2234_v35, %v1496_v44 }
 0x740   :  { %v1530_v37 = vadd.f32 %v2233_v23, %v1529_v36  ;;  %2170 = vmatmul.msk.f32.gmra.mxu2 %vm193_vm1, %v1410_v20 }
 0x742   :  { %2200 = vmatpush.xpose.msk.msra.mxu0 %vm193_vm1, %v1530_v37 }
 0x745   :  { %2201 = vmatmul.msk.f32.vlgmr.msra.gmra.mxu0 %vm193_vm1, %v1491_v38 }
 0x747   :  { %v1532_v26 = vpop.f32.mrf.mxu1 }
 0x748   :  { %v1533_v2 = vadd.f32 %v2233_v23, %v1532_v26  ;;  %2199 = vmatmul.msk.f32.vlgmr.msra.gmra.mxu2 %vm193_vm1, %v1488_v39  ;;  %v1565_v26 = vpop.f32.mrf.mxu3 }
 0x74a   :  { %2202 = vmatpush.xpose.msk.msra.mxu1 %vm193_vm1, %v1533_v2  ;;  %v2235_v2 = vld [vmem:[%s3015_s8 + $0x3] ss:$0 sm:$0xff] }
 0x74b   :  { %v1566_v44 = vadd.f32 %v2235_v2, %v1565_v26 }
 0x74d   :  { %2203 = vmatmul.msk.f32.vlgmr.msra.gmra.mxu1 %vm193_vm1, %v1494_v54  ;;  %1803 = vmatpush.msrb.mxu3 %v1566_v44 }
 0x74f   :  { %v1535_v45 = vpop.f32.mrf.mxu1 }
 0x750   :  { %v1536_v46 = vadd.f32 %v2233_v23, %v1535_v45  ;;  %v1568_v54 = vpop.f32.mrf.mxu3 }
 0x751   :  { %v1569_v45 = vadd.f32 %v2235_v2, %v1568_v54 }
 0x752   :  { %2204 = vmatpush.xpose.msk.msrb.mxu2 %vm193_vm1, %v1536_v46 }
 0x753   :  { %1826 = vmatpush.msrb.mxu0 %v1569_v45  ;;  %v2210_v45 = vld [vmem:[%s3017_s9 + $0x18] sm:$0xff] }
 0x754   :  { %1906 = vmatpush.msra.mxu3 %v2210_v45 }
 0x755   :  { %2205 = vmatmul.msk.f32.vlgmr.msrb.gmra.mxu2 %vm193_vm1, %v1497_v47 }
 0x758   :  { %v1571_v46 = vpop.f32.mrf.mxu3 }
 0x759   :  { %v1572_v47 = vadd.f32 %v2235_v2, %v1571_v46 }
 0x75b   :  { %1849 = vmatpush.msrb.mxu1 %v1572_v47 }
 0x7ab   :  { %v1444_v16 = vpop.f32.mrf.mxu2 }
 0x7ac   :  { %v2876_v49 = vadd.f32 %v1444_v16, %v985_v48 }
 0x7b3   :  { %v1447_v21 = vpop.f32.mrf.mxu2 }
 0x7b4   :  { %v2880_v51 = vadd.f32 %v1447_v21, %v988_v50  ;;  %v1574_v50 = vpop.f32.mrf.mxu3 }
 0x7bb   :  { %v1450_v56 = vpop.f32.mrf.mxu2 }
 0x7bc   :  { %v2884_v57 = vadd.f32 %v1450_v56, %v991_v55  ;;  %v1575_v56 = vadd.f32 %v2235_v2, %v1574_v50 }
 0x7be   :  { %1872 = vmatpush.msra.mxu2 %v1575_v56 }
 0x7c2   :  { %v1626_v17 = vpop.f32.mrf.mxu0 }
 0x7c3   :  { %v1682_v0 = vmul.f32 0.35355338, %v1626_v17  ;;  %v2892_v1 = vpop.f32.mrf.mxu2 }
 0x7c5   :  { %v1686_v3 = vadd.f32 %v2315_v24, %v1682_v0 }
 0x7c7   :  { %v1692_v60 = vsel %vm193_vm1, %v1686_v3, -inf }
 0x7c8   :  { %1693 = vmax.xlane.f32.xlu1 %v1692_v60 }
 0x7ca   :  { %v1652_v61 = vpop.f32.mrf.mxu1 }
 0x7cb   :  { %v1683_v63 = vmul.f32 0.35355338, %v1652_v61  ;;  %v1600_v6 = vpop.f32.mrf.mxu2 }
 0x7cc   :  { %v1681_v7 = vmul.f32 0.35355338, %v1600_v6 }
 0x7cd   :  { %v1687_v9 = vadd.f32 %v2315_v24, %v1683_v63 }
 0x7ce   :  { %v1685_v11 = vadd.f32 %v2315_v24, %v1681_v7 }
 0x7cf   :  { %v1695_v41 = vsel %vm193_vm1, %v1687_v9, -inf }
 0x7d0   :  { %1696 = vmax.xlane.f32.xlu2 %v1695_v41  ;;  %v1689_v12 = vsel %vm193_vm1, %v1685_v11, -inf }
 0x7d1   :  { %1690 = vmax.xlane.f32.xlu0 %v1689_v12 }
 0x7d8   :  { %v1678_v52 = vpop.f32.mrf.mxu2 }
 0x7d9   :  { %v1684_v28 = vmul.f32 0.35355338, %v1678_v52 }
 0x7db   :  { %v1688_v13 = vadd.f32 %v2315_v24, %v1684_v28 }
 0x7dd   :  { %v1698_v14 = vsel %vm193_vm1, %v1688_v13, -inf }
 0x7de   :  { %1699 = vmax.xlane.f32.xlu0 %v1698_v14 }
 0x83b   :  { %v1694_v19 = vpop.xlane.xlu1 %1693 }
 0x83c   :  { %v1702_v5 = vsub.f32 %v1686_v3, %v1694_v19 }
 0x83e   :  { %v1707_v25 = vmul.f32 1.442695, %v1702_v5 }
 0x840   :  { %2287 = vpow2.f32 %v1707_v25 }
 0x843   :  { %v1697_v27 = vpop.xlane.xlu2 %1696 }
 0x844   :  { %v1703_v62 = vsub.f32 %v1687_v9, %v1697_v27  ;;  %v1691_v10 = vpop.xlane.xlu0 %1690 }
 0x845   :  { %v1701_v31 = vsub.f32 %v1685_v11, %v1691_v10 }
 0x846   :  { %v2288_v32 = vpop.eup %2287  ;;  %v1709_v20 = vmul.f32 1.442695, %v1703_v62 }
 0x847   :  { %v1705_v22 = vmul.f32 1.442695, %v1701_v31  ;;  %v1716_v23 = vsel %vm193_vm1, %v2288_v32, 0.0 }
 0x848   :  { %2289 = vpow2.f32 %v1709_v20  ;;  %1717 = vadd.xlane.f32.xlu2 %v1716_v23 }
 0x849   :  { %2291 = vpow2.f32 %v1705_v22 }
 0x84e   :  { %v2926_v33 = vpop.eup %2289 }
 0x84f   :  { %v2928_v8 = vpop.eup %2291  ;;  %v1719_v29 = vsel %vm193_vm1, %v2926_v33, 0.0 }
 0x850   :  { %1720 = vadd.xlane.f32.xlu0 %v1719_v29  ;;  %v1713_v35 = vsel %vm193_vm1, %v2928_v8, 0.0 }
 0x851   :  { %1714 = vadd.xlane.f32.xlu1 %v1713_v35  ;;  %v1700_v36 = vpop.xlane.xlu0 %1699 }
 0x852   :  { %v1704_v37 = vsub.f32 %v1688_v13, %v1700_v36 }
 0x854   :  { %v1711_v38 = vmul.f32 1.442695, %v1704_v37 }
 0x856   :  { %2293 = vpow2.f32 %v1711_v38 }
 0x85c   :  { %v2934_v39 = vpop.eup %2293 }
 0x85d   :  { %v1722_v40 = vsel %vm193_vm1, %v2934_v39, 0.0 }
 0x85e   :  { %1723 = vadd.xlane.f32.xlu1 %v1722_v40 }
 0x8bb   :  { %v1718_v48 = vpop.xlane.xlu2 %1717 }
 0x8bc   :  { %2295 = vrcp.f32 %v1718_v48  ;;  %v1751_v17 = vand.u32 2147483648, %v1718_v48  ;;  %v1749_v24 = vand.u32 2147483647, %v1718_v48  ;;  %vm1745_vm9 = vweird.f32 %v1718_v48 }
 0x8be   :  { %v1752_v61 = vor.u32 1.1754944e-38, %v1751_v17  ;;  %vm1750_vm11 = vcmp.eq.f32.partialorder %v1749_v24, 8.507059e+37 }
 0x8c2   :  { %v2296_v16 = vpop.eup %2295 }
 0x8c3   :  { %v1741_v21 = vmul.f32 %v2296_v16, %v1718_v48  ;;  %v1721_v55 = vpop.xlane.xlu0 %1720  ;;  %vm1746_vm8 = vweird.f32 %v2296_v16 }
 0x8c4   :  { %2297 = vrcp.f32 %v1721_v55  ;;  %v1715_v58 = vpop.xlane.xlu1 %1714  ;;  %vm1747_vm10 = vmor %vm1745_vm9, %vm1746_vm8  ;;  %v1766_v52 = vand.u32 2147483648, %v1721_v55  ;;  %v1764_v14 = vand.u32 2147483647, %v1721_v55  ;;  %vm1760_vm14 = vweird.f32 %v1721_v55 }
 0x8c5   :  { %v1742_v34 = vsub.f32 1.0, %v1741_v21  ;;  %2299 = vrcp.f32 %v1715_v58  ;;  %v1736_v15 = vand.u32 2147483648, %v1715_v58  ;;  %v1734_v19 = vand.u32 2147483647, %v1715_v58 }
 0x8c6   :  { %v1767_v27 = vor.u32 1.1754944e-38, %v1766_v52  ;;  %vm1730_vm2 = vweird.f32 %v1715_v58  ;;  %vm1765_vm3 = vcmp.eq.f32.partialorder %v1764_v14, 8.507059e+37 }
 0x8c7   :  { %v1743_v0 = vmul.f32 %v2296_v16, %v1742_v34  ;;  %v1737_v31 = vor.u32 1.1754944e-38, %v1736_v15  ;;  %vm1735_vm5 = vcmp.eq.f32.partialorder %v1734_v19, 8.507059e+37 }
 0x8c9   :  { %v1744_v3 = vadd.f32 %v2296_v16, %v1743_v0 }
 0x8ca   :  { %v2298_v60 = vpop.eup %2297 }
 0x8cb   :  { %v2300_v63 = vpop.eup %2299  ;;  %v1748_v6 = vsel %vm1747_vm10, %v2296_v16, %v1744_v3  ;;  %v1756_v7 = vmul.f32 %v2298_v60, %v1721_v55  ;;  %vm1761_vm12 = vweird.f32 %v2298_v60 }
 0x8cc   :  { %v1753_v9 = vsel %vm1750_vm11, %v1752_v61, %v1748_v6  ;;  %v1726_v11 = vmul.f32 %v2300_v63, %v1715_v58  ;;  %vm1731_vm13 = vweird.f32 %v2300_v63  ;;  %vm1762_vm15 = vmor %vm1760_vm14, %vm1761_vm12 }
 0x8cd   :  { %v1757_v41 = vsub.f32 1.0, %v1756_v7  ;;  %v1754_v12 = vmul.f32 %v2288_v32, %v1753_v9  ;;  %vm1732_vm4 = vmor %vm1730_vm2, %vm1731_vm13 }
 0x8ce   :  { %v1727_v28 = vsub.f32 1.0, %v1726_v11 }
 0x8cf   :  { %v1758_v13 = vmul.f32 %v2298_v60, %v1757_v41  ;;  %2207 = vmatmul.msk.f32.vlgmr.msrb.gmra.mxu0 %vm193_vm1, %v1754_v12 }
 0x8d0   :  { %v1728_v18 = vmul.f32 %v2300_v63, %v1727_v28 }
 0x8d1   :  { %v1759_v5 = vadd.f32 %v2298_v60, %v1758_v13  ;;  %v1724_v25 = vpop.xlane.xlu1 %1723 }
 0x8d2   :  { %v1729_v62 = vadd.f32 %v2300_v63, %v1728_v18  ;;  %2301 = vrcp.f32 %v1724_v25  ;;  %v1781_v38 = vand.u32 2147483648, %v1724_v25  ;;  %v1779_v26 = vand.u32 2147483647, %v1724_v25 }
 0x8d3   :  { %v1763_v10 = vsel %vm1762_vm15, %v2298_v60, %v1759_v5  ;;  %vm1775_vm7 = vweird.f32 %v1724_v25 }
 0x8d4   :  { %v1768_v32 = vsel %vm1765_vm3, %v1767_v27, %v1763_v10  ;;  %v1733_v20 = vsel %vm1732_vm4, %v2300_v63, %v1729_v62  ;;  %v1782_v54 = vor.u32 1.1754944e-38, %v1781_v38  ;;  %vm1780_vm9 = vcmp.eq.f32.partialorder %v1779_v26, 8.507059e+37 }
 0x8d5   :  { %v1738_v22 = vsel %vm1735_vm5, %v1737_v31, %v1733_v20  ;;  %v1769_v23 = vmul.f32 %v2926_v33, %v1768_v32 }
 0x8d6   :  { %v1739_v29 = vmul.f32 %v2928_v8, %v1738_v22 }
 0x8d7   :  { %2208 = vmatmul.msk.f32.vlgmr.msrb.gmra.mxu1 %vm193_vm1, %v1769_v23 }
 0x8d8   :  { %v2302_v35 = vpop.eup %2301  ;;  %2206 = vmatmul.msk.f32.vlgmr.msrb.gmra.mxu3 %vm193_vm1, %v1739_v29 }
 0x8d9   :  { %v1771_v36 = vmul.f32 %v2302_v35, %v1724_v25  ;;  %vm1776_vm6 = vweird.f32 %v2302_v35 }
 0x8da   :  { %vm1777_vm8 = vmor %vm1775_vm7, %vm1776_vm6 }
 0x8db   :  { %v1772_v37 = vsub.f32 1.0, %v1771_v36 }
 0x8dd   :  { %v1773_v40 = vmul.f32 %v2302_v35, %v1772_v37 }
 0x8df   :  { %v1774_v2 = vadd.f32 %v2302_v35, %v1773_v40 }
 0x8e1   :  { %v1778_v44 = vsel %vm1777_vm8, %v2302_v35, %v1774_v2 }
 0x8e2   :  { %v1783_v33 = vsel %vm1780_vm9, %v1782_v54, %v1778_v44 }
 0x8e3   :  { %v1784_v8 = vmul.f32 %v2934_v39, %v1783_v33  ;;  %v2236_v39 = vld [vmem:[%s3018_s10] ss:$0 sm:$0xff] }
 0x8e5   :  { %2209 = vmatmul.msk.f32.vlgmr.msra.gmra.mxu2 %vm193_vm1, %v1784_v8 }
 0x94c   :  { %v1828_v47 = vpop.f32.mrf.mxu0 }
 0x954   :  { %v1851_v48 = vpop.f32.mrf.mxu1 }
 0x95b   :  { %v1805_v46 = vpop.f32.mrf.mxu3 }
 0x95c   :  { %2211 = vmatmul.msk.f32.vlgmr.msra.gmra.mxu3 %vm193_vm1, %v1805_v46 }
 0x964   :  { %2212 = vmatmul.msk.f32.gmra.mxu3 %vm193_vm1, %v1828_v47 }
 0x968   :  { %v1874_v16 = vpop.f32.mrf.mxu2 }
 0x96c   :  { %2213 = vmatmul.msk.f32.gmra.mxu3 %vm193_vm1, %v1851_v48 }
 0x974   :  { %2214 = vmatmul.msk.f32.gmra.mxu3 %vm193_vm1, %v1874_v16 }
 0x9df   :  { %v1908_v50 = vpop.f32.mrf.mxu3 }
 0x9e0   :  { %v1920_v21 = vadd.f32 %v1908_v50, %v2876_v49  ;;  %v994_v49 = vadd.f32 %v2744_v30, %v2801_v4 }
 0x9e2   :  { %v1928_v55 = vadd.f32 %v2236_v39, %v1920_v21  ;;  %v1459_v6 = vadd.f32 %v2892_v1, %v994_v49 }
 0x9e4   :  { %v1932_v56 = vadd.f32 %v2767_v42, %v1928_v55  ;;  %v2237_v55 = vld [vmem:[%s3019_s11] ss:$0 sm:$0xff] }
 0x9e6   :  { %v1938_v58 = vsel %vm65_vm0, %v1932_v56, 0.0 }
 0x9e7   :  { %1939 = vadd.xlane.f32.xlu2 %v1938_v58  ;;  %v1911_v34 = vpop.f32.mrf.mxu3 }
 0x9e8   :  { %v1921_v17 = vadd.f32 %v1911_v34, %v2880_v51  ;;  %v2238_v34 = vld [vmem:[%s3020_s12] ss:$0 sm:$0xff] }
 0x9ea   :  { %v1929_v0 = vadd.f32 %v2236_v39, %v1921_v17 }
 0x9ec   :  { %v1933_v24 = vadd.f32 %v2912_v59, %v1929_v0 }
 0x9ee   :  { %v1941_v3 = vsel %vm65_vm0, %v1933_v24, 0.0 }
 0x9ef   :  { %1942 = vadd.xlane.f32.xlu0 %v1941_v3  ;;  %v1914_v60 = vpop.f32.mrf.mxu3 }
 0x9f0   :  { %v1922_v61 = vadd.f32 %v1914_v60, %v2884_v57  ;;  %v2318_v57 = vmov 32.0  }
 0x9f1   :  { %2303 = vrcp.f32 %v2318_v57 }
 0x9f2   :  { %v1930_v63 = vadd.f32 %v2236_v39, %v1922_v61 }
 0x9f4   :  { %v1934_v42 = vadd.f32 %v2919_v53, %v1930_v63 }
 0x9f6   :  { %v1944_v7 = vsel %vm65_vm0, %v1934_v42, 0.0 }
 0x9f7   :  { %1945 = vadd.xlane.f32.xlu1 %v1944_v7  ;;  %v1917_v51 = vpop.f32.mrf.mxu3  ;;  %v2304_v12 = vpop.eup %2303 }
 0x9f8   :  { %v1923_v9 = vadd.f32 %v1917_v51, %v1459_v6  ;;  %v1951_v52 = vmul.f32 32.0, %v2304_v12  ;;  %vm1955_vm1 = vweird.f32 %v2304_v12 }
 0x9fa   :  { %v1931_v59 = vadd.f32 %v2236_v39, %v1923_v9  ;;  %v1952_v30 = vsub.f32 1.0, %v1951_v52 }
 0x9fc   :  { %v1935_v11 = vadd.f32 %v2778_v43, %v1931_v59  ;;  %v1953_v4 = vmul.f32 %v2304_v12, %v1952_v30 }
 0x9fe   :  { %v1947_v41 = vsel %vm65_vm0, %v1935_v11, 0.0  ;;  %v1954_v53 = vadd.f32 %v2304_v12, %v1953_v4 }
 0x9ff   :  { %1948 = vadd.xlane.f32.xlu2 %v1947_v41 }
 0xa00   :  { %v1956_v1 = vsel %vm1955_vm1, %v2304_v12, %v1954_v53 }
 0xa5a   :  { %v1940_v28 = vpop.xlane.xlu2 %1939 }
 0xa5b   :  { %v1957_v13 = vmul.f32 %v1956_v1, %v1940_v28 }
 0xa5d   :  { %v1961_v14 = vsub.f32 %v1932_v56, %v1957_v13 }
 0xa5f   :  { %v1965_v15 = vmul.f32 %v1961_v14, %v1961_v14 }
 0xa61   :  { %v1969_v18 = vsel %vm65_vm0, %v1965_v15, 0.0 }
 0xa62   :  { %1970 = vadd.xlane.f32.xlu0 %v1969_v18  ;;  %v1943_v43 = vpop.xlane.xlu0 %1942 }
 0xa63   :  { %v1958_v19 = vmul.f32 %v1956_v1, %v1943_v43 }
 0xa65   :  { %v1962_v5 = vsub.f32 %v1933_v24, %v1958_v19 }
 0xa67   :  { %v1966_v25 = vmul.f32 %v1962_v5, %v1962_v5 }
 0xa69   :  { %v1972_v27 = vsel %vm65_vm0, %v1966_v25, 0.0 }
 0xa6a   :  { %v1946_v62 = vpop.xlane.xlu1 %1945  ;;  %1973 = vadd.xlane.f32.xlu1 %v1972_v27 }
 0xa6b   :  { %v1959_v10 = vmul.f32 %v1956_v1, %v1946_v62 }
 0xa6d   :  { %v2974_v31 = vsub.f32 %v1934_v42, %v1959_v10 }
 0xa6f   :  { %v1967_v32 = vmul.f32 %v2974_v31, %v2974_v31 }
 0xa71   :  { %v1975_v20 = vsel %vm65_vm0, %v1967_v32, 0.0 }
 0xa72   :  { %1976 = vadd.xlane.f32.xlu2 %v1975_v20  ;;  %v1949_v22 = vpop.xlane.xlu2 %1948 }
 0xa73   :  { %v1960_v23 = vmul.f32 %v1956_v1, %v1949_v22 }
 0xa75   :  { %v2979_v29 = vsub.f32 %v1935_v11, %v1960_v23 }
 0xa77   :  { %v1968_v35 = vmul.f32 %v2979_v29, %v2979_v29 }
 0xa79   :  { %v1978_v36 = vsel %vm65_vm0, %v1968_v35, 0.0 }
 0xa7a   :  { %1979 = vadd.xlane.f32.xlu0 %v1978_v36 }
 0xad5   :  { %v1971_v37 = vpop.xlane.xlu0 %1970 }
 0xad6   :  { %v1981_v38 = vmul.f32 %v1971_v37, %v1956_v1 }
 0xad8   :  { %v1985_v40 = vadd.f32 1e-05, %v1981_v38 }
 0xada   :  { %2305 = vrsqrt.f32 %v1985_v40  ;;  %vm1995_vm11 = vweird.f32 %v1985_v40 }
 0xadd   :  { %v1974_v26 = vpop.xlane.xlu1 %1973 }
 0xade   :  { %v1982_v2 = vmul.f32 %v1974_v26, %v1956_v1 }
 0xae0   :  { %v2306_v54 = vpop.eup %2305  ;;  %v1986_v44 = vadd.f32 1e-05, %v1982_v2 }
 0xae1   :  { %v1990_v33 = vmul.f32 %v2306_v54, %v1985_v40  ;;  %vm1996_vm10 = vweird.f32 %v2306_v54 }
 0xae2   :  { %2307 = vrsqrt.f32 %v1986_v44  ;;  %vm1997_vm12 = vmor %vm1995_vm11, %vm1996_vm10  ;;  %vm2005_vm14 = vweird.f32 %v1986_v44 }
 0xae3   :  { %v1991_v8 = vmul.f32 %v2306_v54, %v1990_v33 }
 0xae5   :  { %v1992_v45 = vmul.f32 0.5, %v1991_v8  ;;  %v1977_v46 = vpop.xlane.xlu2 %1976 }
 0xae6   :  { %v1983_v47 = vmul.f32 %v1977_v46, %v1956_v1 }
 0xae7   :  { %v1993_v48 = vsub.f32 1.5, %v1992_v45 }
 0xae8   :  { %v2308_v16 = vpop.eup %2307  ;;  %v1987_v39 = vadd.f32 1e-05, %v1983_v47 }
 0xae9   :  { %v1994_v50 = vmul.f32 %v2306_v54, %v1993_v48  ;;  %v2000_v21 = vmul.f32 %v2308_v16, %v1986_v44  ;;  %vm2006_vm13 = vweird.f32 %v2308_v16 }
 0xaea   :  { %2309 = vrsqrt.f32 %v1987_v39  ;;  %vm2007_vm15 = vmor %vm2005_vm14, %vm2006_vm13  ;;  %vm2015_vm3 = vweird.f32 %v1987_v39 }
 0xaeb   :  { %v1998_v56 = vsel %vm1997_vm12, %v2306_v54, %v1994_v50  ;;  %v2001_v58 = vmul.f32 %v2308_v16, %v2000_v21 }
 0xaec   :  { %v2029_v17 = vmul.f32 %v1998_v56, %v1961_v14 }
 0xaed   :  { %v2002_v0 = vmul.f32 0.5, %v2001_v58  ;;  %v1980_v24 = vpop.xlane.xlu0 %1979 }
 0xaee   :  { %v2036_v3 = vmul.f32 %v2237_v55, %v2029_v17  ;;  %v1984_v60 = vmul.f32 %v1980_v24, %v1956_v1 }
 0xaef   :  { %v2003_v61 = vsub.f32 1.5, %v2002_v0 }
 0xaf0   :  { %v2310_v63 = vpop.eup %2309  ;;  %v2043_v49 = vadd.f32 %v2238_v34, %v2036_v3  ;;  %v1988_v42 = vadd.f32 1e-05, %v1984_v60 }
 0xaf1   :  { %v2004_v6 = vmul.f32 %v2308_v16, %v2003_v61  ;;  %v2010_v7 = vmul.f32 %v2310_v63, %v1987_v39  ;;  %vm2016_vm2 = vweird.f32 %v2310_v63 }
 0xaf2   :  { %2047 = vst.msk [vmem:[%s3021_s13] sm:$0xff] %vm65_vm0, %v2043_v49  ;;  %2311 = vrsqrt.f32 %v1988_v42  ;;  %vm2017_vm4 = vmor %vm2015_vm3, %vm2016_vm2  ;;  %vm2025_vm6 = vweird.f32 %v1988_v42 }
 0xaf3   :  { %v2008_v51 = vsel %vm2007_vm15, %v2308_v16, %v2004_v6  ;;  %v2011_v9 = vmul.f32 %v2310_v63, %v2010_v7 }
 0xaf4   :  { %v2030_v59 = vmul.f32 %v2008_v51, %v1962_v5 }
 0xaf5   :  { %v2012_v11 = vmul.f32 0.5, %v2011_v9 }
 0xaf6   :  { %v2037_v41 = vmul.f32 %v2237_v55, %v2030_v59 }
 0xaf7   :  { %v2013_v57 = vsub.f32 1.5, %v2012_v11 }
 0xaf8   :  { %v2312_v12 = vpop.eup %2311  ;;  %v2044_v52 = vadd.f32 %v2238_v34, %v2037_v41 }
 0xaf9   :  { %v2014_v30 = vmul.f32 %v2310_v63, %v2013_v57  ;;  %v2020_v4 = vmul.f32 %v2312_v12, %v1988_v42  ;;  %vm2026_vm5 = vweird.f32 %v2312_v12 }
 0xafa   :  { %2048 = vst.msk [vmem:[%s3021_s13 + $0x8] sm:$0xff] %vm65_vm0, %v2044_v52  ;;  %vm2027_vm7 = vmor %vm2025_vm6, %vm2026_vm5 }
 0xafb   :  { %v2018_v53 = vsel %vm2017_vm4, %v2310_v63, %v2014_v30  ;;  %v2021_v1 = vmul.f32 %v2312_v12, %v2020_v4 }
 0xafc   :  { %v2031_v28 = vmul.f32 %v2018_v53, %v2974_v31 }
 0xafd   :  { %v2022_v13 = vmul.f32 0.5, %v2021_v1 }
 0xafe   :  { %v2038_v14 = vmul.f32 %v2237_v55, %v2031_v28 }
 0xaff   :  { %v2023_v15 = vsub.f32 1.5, %v2022_v13 }
 0xb00   :  { %v2045_v18 = vadd.f32 %v2238_v34, %v2038_v14 }
 0xb01   :  { %v2024_v43 = vmul.f32 %v2312_v12, %v2023_v15 }
 0xb02   :  { %2049 = vst.msk [vmem:[%s3021_s13 + $0x10] sm:$0xff] %vm65_vm0, %v2045_v18 }
 0xb03   :  { %v2028_v19 = vsel %vm2027_vm7, %v2312_v12, %v2024_v43 }
 0xb04   :  { %v2032_v5 = vmul.f32 %v2028_v19, %v2979_v29 }
 0xb06   :  { %v2039_v25 = vmul.f32 %v2237_v55, %v2032_v5 }
 0xb08   :  { %v2046_v27 = vadd.f32 %v2238_v34, %v2039_v25 }
 0xb0a   :  { %2050 = vst.msk [vmem:[%s3021_s13 + $0x18] sm:$0xff] %vm65_vm0, %v2046_v27 }

// kernel: run.7
= control target key start
LH: loop header
LB: loop body
LE: loop exit
PB: predicated region body
PF: predicated region fallthrough
CT: control target
= control target key end

     0   :  { %vm38_vm0 = vcmask 261120   ;;  %vm96_vm1 = vcmask 523264   ;;  %v296_v46 = vmov 32.0   ;;  %s445_s1 = inlined_call_operand.vmem [shape: f32[32,64], index: 1, kind: input, shape index: {}]   ;;  %s446_s3 = inlined_call_operand.vmem [shape: f32[64,32], index: 3, kind: input, shape index: {}]   ;;  %s447_s0 = inlined_call_operand.vmem [shape: f32[32,32], index: 0, kind: input, shape index: {}]   ;;  %s448_s2 = inlined_call_operand.vmem [shape: f32[1,64], index: 2, kind: input, shape index: {}]   ;;  %s449_s4 = inlined_call_operand.vmem [shape: f32[1,32], index: 4, kind: input, shape index: {}]   ;;  %s450_s5 = inlined_call_operand.vmem [shape: f32[1,32], index: 5, kind: input, shape index: {}]   ;;  %s451_s6 = inlined_call_operand.vmem [shape: f32[1,32], index: 6, kind: input, shape index: {}]   ;;  %s452_s7 = inlined_call_operand.vmem [shape: f32[32,32], index: 7, kind: output, shape index: {}]  }
   0x1   :  { %v33_v0 = vld [vmem:[%s445_s1 + $0x18] sm:$0xff]  ;;  %v32_v1 = vld [vmem:[%s445_s1 + $0x10] sm:$0xff]  ;;  %v31_v2 = vld [vmem:[%s445_s1 + $0x8] sm:$0xff]  ;;  %286 = vrcp.f32 %v296_v46 }
   0x2   :  { %63 = vmatpush.msra.mxu0 %v33_v0  ;;  %269 = vmatpush.msra.mxu3 %v33_v0  ;;  %v91_v3 = vld [vmem:[%s446_s3 + $0x38] sm:$0xff]  ;;  %v90_v4 = vld [vmem:[%s446_s3 + $0x30] sm:$0xff]  ;;  %v30_v5 = vld [vmem:[%s445_s1] sm:$0xff] }
   0x3   :  { %117 = vmatpush.msra.mxu1 %v91_v3  ;;  %273 = vmatpush.msra.mxu2 %v91_v3  ;;  %v26_v6 = vld [vmem:[%s447_s0] sm:$0xff]  ;;  %v27_v7 = vld [vmem:[%s447_s0 + $0x8] sm:$0xff]  ;;  %v87_v10 = vld [vmem:[%s446_s3 + $0x18] sm:$0xff] }
   0x4   :  { %64 = vmatpush.msra.mxu0 %v32_v1  ;;  %270 = vmatpush.msra.mxu3 %v32_v1  ;;  %v89_v8 = vld [vmem:[%s446_s3 + $0x28] sm:$0xff]  ;;  %v88_v9 = vld [vmem:[%s446_s3 + $0x20] sm:$0xff]  ;;  %v28_v11 = vld [vmem:[%s447_s0 + $0x10] sm:$0xff] }
   0x5   :  { %118 = vmatpush.msra.mxu1 %v90_v4  ;;  %274 = vmatpush.msra.mxu2 %v90_v4  ;;  %v29_v12 = vld [vmem:[%s447_s0 + $0x18] sm:$0xff]  ;;  %v86_v13 = vld [vmem:[%s446_s3 + $0x10] sm:$0xff]  ;;  %v85_v14 = vld [vmem:[%s446_s3 + $0x8] sm:$0xff] }
   0x6   :  { %65 = vmatpush.msra.mxu0 %v31_v2  ;;  %271 = vmatpush.msra.mxu3 %v31_v2  ;;  %v84_v15 = vld [vmem:[%s446_s3] sm:$0xff] }
   0x7   :  { %119 = vmatpush.msra.mxu1 %v89_v8  ;;  %275 = vmatpush.msra.mxu2 %v89_v8  ;;  %v282_v16 = vld [vmem:[%s448_s2] ss:$0 sm:$0xff]  ;;  %v287_v47 = vpop.eup %286 }
   0x8   :  { %66 = vmatpush.msra.mxu0 %v30_v5  ;;  %272 = vmatpush.msra.mxu3 %v30_v5  ;;  %v283_v29 = vld [vmem:[%s449_s4] ss:$0 sm:$0xff]  ;;  %v157_v48 = vmul.f32 32.0, %v287_v47  ;;  %vm161_vm2 = vweird.f32 %v287_v47 }
   0x9   :  { %261 = vmatmul.msk.f32.vlgmr.msra.gmra.mxu0 %vm38_vm0, %v26_v6  ;;  %262 = vmatmul.msk.f32.vlgmr.msra.gmra.mxu3 %vm38_vm0, %v27_v7 }
   0xa   :  { %120 = vmatpush.msra.mxu1 %v88_v9  ;;  %276 = vmatpush.msra.mxu2 %v88_v9  ;;  %v158_v49 = vsub.f32 1.0, %v157_v48 }
   0xc   :  { %121 = vmatpush.msra.mxu1 %v87_v10  ;;  %277 = vmatpush.msra.mxu2 %v87_v10  ;;  %v159_v50 = vmul.f32 %v287_v47, %v158_v49 }
   0xe   :  { %122 = vmatpush.msra.mxu1 %v86_v13  ;;  %278 = vmatpush.msra.mxu2 %v86_v13  ;;  %v160_v51 = vadd.f32 %v287_v47, %v159_v50 }
  0x10   :  { %123 = vmatpush.msra.mxu1 %v85_v14  ;;  %279 = vmatpush.msra.mxu2 %v85_v14  ;;  %v399_v52 = vsel %vm161_vm2, %v287_v47, %v160_v51 }
  0x11   :  { %263 = vmatmul.msk.f32.gmra.mxu3 %vm38_vm0, %v28_v11 }
  0x12   :  { %124 = vmatpush.msra.mxu1 %v84_v15  ;;  %280 = vmatpush.msra.mxu2 %v84_v15 }
  0x19   :  { %264 = vmatmul.msk.f32.gmra.mxu3 %vm38_vm0, %v29_v12 }
  0x86   :  { %v68_v17 = vpop.f32.mrf.mxu0 }
  0x87   :  { %v69_v18 = vadd.f32 %v282_v16, %v68_v17 }
  0x89   :  { %v80_v19 = vmax.f32 %v69_v18, 0.0 }
  0x8b   :  { %265 = vmatmul.msk.f32.vlgmr.msra.gmra.mxu1 %vm96_vm1, %v80_v19 }
  0x8c   :  { %v71_v20 = vpop.f32.mrf.mxu3 }
  0x8d   :  { %v72_v21 = vadd.f32 %v282_v16, %v71_v20 }
  0x8f   :  { %v81_v22 = vmax.f32 %v72_v21, 0.0 }
  0x93   :  { %266 = vmatmul.msk.f32.gmra.mxu1 %vm96_vm1, %v81_v22 }
  0x94   :  { %v74_v23 = vpop.f32.mrf.mxu3 }
  0x95   :  { %v75_v24 = vadd.f32 %v282_v16, %v74_v23 }
  0x97   :  { %v82_v25 = vmax.f32 %v75_v24, 0.0  ;;  %v284_v24 = vld [vmem:[%s450_s5] ss:$0 sm:$0xff] }
  0x99   :  { %267 = vmatmul.msk.f32.vlgmr.msra.gmra.mxu2 %vm96_vm1, %v82_v25 }
  0x9c   :  { %v77_v26 = vpop.f32.mrf.mxu3 }
  0x9d   :  { %v78_v27 = vadd.f32 %v282_v16, %v77_v26 }
  0x9f   :  { %v83_v28 = vmax.f32 %v78_v27, 0.0 }
  0xa1   :  { %268 = vmatmul.msk.f32.gmra.mxu2 %vm96_vm1, %v83_v28  ;;  %v285_v28 = vld [vmem:[%s451_s6] ss:$0 sm:$0xff] }
 0x108   :  { %v126_v30 = vpop.f32.mrf.mxu1 }
 0x109   :  { %v127_v31 = vadd.f32 %v283_v29, %v126_v30 }
 0x10b   :  { %v138_v32 = vadd.f32 %v127_v31, %v26_v6 }
 0x10d   :  { %v144_v33 = vsel %vm38_vm0, %v138_v32, 0.0 }
 0x10e   :  { %145 = vadd.xlane.f32.xlu0 %v144_v33 }
 0x110   :  { %v129_v34 = vpop.f32.mrf.mxu1 }
 0x111   :  { %v130_v35 = vadd.f32 %v283_v29, %v129_v34 }
 0x113   :  { %v139_v36 = vadd.f32 %v130_v35, %v27_v7 }
 0x115   :  { %v147_v37 = vsel %vm38_vm0, %v139_v36, 0.0 }
 0x116   :  { %148 = vadd.xlane.f32.xlu0 %v147_v37 }
 0x11c   :  { %v132_v38 = vpop.f32.mrf.mxu2 }
 0x11d   :  { %v133_v39 = vadd.f32 %v283_v29, %v132_v38 }
 0x11f   :  { %v140_v40 = vadd.f32 %v133_v39, %v28_v11 }
 0x121   :  { %v150_v41 = vsel %vm38_vm0, %v140_v40, 0.0 }
 0x122   :  { %151 = vadd.xlane.f32.xlu1 %v150_v41 }
 0x124   :  { %v135_v42 = vpop.f32.mrf.mxu2 }
 0x125   :  { %v136_v43 = vadd.f32 %v283_v29, %v135_v42 }
 0x127   :  { %v141_v44 = vadd.f32 %v136_v43, %v29_v12 }
 0x129   :  { %v153_v45 = vsel %vm38_vm0, %v141_v44, 0.0 }
 0x12a   :  { %154 = vadd.xlane.f32.xlu1 %v153_v45 }
 0x181   :  { %v146_v53 = vpop.xlane.xlu0 %145 }
 0x182   :  { %v163_v54 = vmul.f32 %v399_v52, %v146_v53 }
 0x184   :  { %v167_v55 = vsub.f32 %v138_v32, %v163_v54 }
 0x186   :  { %v171_v56 = vmul.f32 %v167_v55, %v167_v55 }
 0x188   :  { %v175_v57 = vsel %vm38_vm0, %v171_v56, 0.0 }
 0x189   :  { %176 = vadd.xlane.f32.xlu2 %v175_v57  ;;  %v149_v58 = vpop.xlane.xlu0 %148 }
 0x18a   :  { %v164_v59 = vmul.f32 %v399_v52, %v149_v58 }
 0x18c   :  { %v168_v60 = vsub.f32 %v139_v36, %v164_v59 }
 0x18e   :  { %v172_v61 = vmul.f32 %v168_v60, %v168_v60 }
 0x190   :  { %v178_v62 = vsel %vm38_vm0, %v172_v61, 0.0 }
 0x191   :  { %179 = vadd.xlane.f32.xlu2 %v178_v62 }
 0x195   :  { %v152_v63 = vpop.xlane.xlu1 %151 }
 0x196   :  { %v165_v0 = vmul.f32 %v399_v52, %v152_v63 }
 0x198   :  { %v406_v1 = vsub.f32 %v140_v40, %v165_v0 }
 0x19a   :  { %v173_v2 = vmul.f32 %v406_v1, %v406_v1 }
 0x19c   :  { %v181_v3 = vsel %vm38_vm0, %v173_v2, 0.0 }
 0x19d   :  { %v155_v4 = vpop.xlane.xlu1 %154  ;;  %182 = vadd.xlane.f32.xlu0 %v181_v3 }
 0x19e   :  { %v166_v5 = vmul.f32 %v399_v52, %v155_v4 }
 0x1a0   :  { %v412_v6 = vsub.f32 %v141_v44, %v166_v5 }
 0x1a2   :  { %v174_v7 = vmul.f32 %v412_v6, %v412_v6 }
 0x1a4   :  { %v184_v8 = vsel %vm38_vm0, %v174_v7, 0.0 }
 0x1a5   :  { %185 = vadd.xlane.f32.xlu1 %v184_v8 }
 0x1fc   :  { %v177_v9 = vpop.xlane.xlu2 %176 }
 0x1fd   :  { %v187_v10 = vmul.f32 %v177_v9, %v399_v52 }
 0x1ff   :  { %v191_v11 = vadd.f32 1e-05, %v187_v10 }
 0x201   :  { %288 = vrsqrt.f32 %v191_v11  ;;  %vm201_vm4 = vweird.f32 %v191_v11 }
 0x204   :  { %v180_v12 = vpop.xlane.xlu2 %179 }
 0x205   :  { %v188_v13 = vmul.f32 %v180_v12, %v399_v52 }
 0x207   :  { %v289_v14 = vpop.eup %288  ;;  %v192_v15 = vadd.f32 1e-05, %v188_v13 }
 0x208   :  { %v196_v16 = vmul.f32 %v289_v14, %v191_v11  ;;  %vm202_vm3 = vweird.f32 %v289_v14 }
 0x209   :  { %290 = vrsqrt.f32 %v192_v15  ;;  %vm203_vm5 = vmor %vm201_vm4, %vm202_vm3  ;;  %vm211_vm7 = vweird.f32 %v192_v15 }
 0x20a   :  { %v197_v17 = vmul.f32 %v289_v14, %v196_v16 }
 0x20c   :  { %v198_v18 = vmul.f32 0.5, %v197_v17 }
 0x20e   :  { %v199_v19 = vsub.f32 1.5, %v198_v18 }
 0x20f   :  { %v291_v20 = vpop.eup %290 }
 0x210   :  { %v200_v21 = vmul.f32 %v289_v14, %v199_v19  ;;  %v206_v22 = vmul.f32 %v291_v20, %v192_v15  ;;  %v183_v23 = vpop.xlane.xlu0 %182  ;;  %vm212_vm6 = vweird.f32 %v291_v20 }
 0x211   :  { %v189_v25 = vmul.f32 %v183_v23, %v399_v52  ;;  %vm213_vm8 = vmor %vm211_vm7, %vm212_vm6 }
 0x212   :  { %v204_v26 = vsel %vm203_vm5, %v289_v14, %v200_v21  ;;  %v207_v27 = vmul.f32 %v291_v20, %v206_v22 }
 0x213   :  { %v235_v29 = vmul.f32 %v204_v26, %v167_v55  ;;  %v193_v30 = vadd.f32 1e-05, %v189_v25 }
 0x214   :  { %v208_v31 = vmul.f32 0.5, %v207_v27 }
 0x215   :  { %v242_v32 = vmul.f32 %v284_v24, %v235_v29  ;;  %292 = vrsqrt.f32 %v193_v30  ;;  %vm221_vm10 = vweird.f32 %v193_v30 }
 0x216   :  { %v209_v33 = vsub.f32 1.5, %v208_v31 }
 0x217   :  { %v249_v34 = vadd.f32 %v285_v28, %v242_v32 }
 0x218   :  { %v210_v35 = vmul.f32 %v291_v20, %v209_v33  ;;  %v186_v36 = vpop.xlane.xlu1 %185 }
 0x219   :  { %253 = vst.msk [vmem:[%s452_s7] sm:$0xff] %vm38_vm0, %v249_v34  ;;  %v190_v37 = vmul.f32 %v186_v36, %v399_v52 }
 0x21a   :  { %v214_v38 = vsel %vm213_vm8, %v291_v20, %v210_v35 }
 0x21b   :  { %v293_v39 = vpop.eup %292  ;;  %v236_v40 = vmul.f32 %v214_v38, %v168_v60  ;;  %v194_v41 = vadd.f32 1e-05, %v190_v37 }
 0x21c   :  { %v216_v42 = vmul.f32 %v293_v39, %v193_v30  ;;  %vm222_vm9 = vweird.f32 %v293_v39 }
 0x21d   :  { %v243_v43 = vmul.f32 %v284_v24, %v236_v40  ;;  %294 = vrsqrt.f32 %v194_v41  ;;  %vm223_vm11 = vmor %vm221_vm10, %vm222_vm9  ;;  %vm231_vm13 = vweird.f32 %v194_v41 }
 0x21e   :  { %v217_v44 = vmul.f32 %v293_v39, %v216_v42 }
 0x21f   :  { %v250_v45 = vadd.f32 %v285_v28, %v243_v43 }
 0x220   :  { %v218_v46 = vmul.f32 0.5, %v217_v44 }
 0x221   :  { %254 = vst.msk [vmem:[%s452_s7 + $0x8] sm:$0xff] %vm38_vm0, %v250_v45 }
 0x222   :  { %v219_v47 = vsub.f32 1.5, %v218_v46 }
 0x223   :  { %v295_v48 = vpop.eup %294 }
 0x224   :  { %v220_v49 = vmul.f32 %v293_v39, %v219_v47  ;;  %v226_v50 = vmul.f32 %v295_v48, %v194_v41  ;;  %vm232_vm12 = vweird.f32 %v295_v48 }
 0x225   :  { %vm233_vm14 = vmor %vm231_vm13, %vm232_vm12 }
 0x226   :  { %v224_v51 = vsel %vm223_vm11, %v293_v39, %v220_v49  ;;  %v227_v52 = vmul.f32 %v295_v48, %v226_v50 }
 0x227   :  { %v237_v53 = vmul.f32 %v224_v51, %v406_v1 }
 0x228   :  { %v228_v54 = vmul.f32 0.5, %v227_v52 }
 0x229   :  { %v244_v55 = vmul.f32 %v284_v24, %v237_v53 }
 0x22a   :  { %v229_v56 = vsub.f32 1.5, %v228_v54 }
 0x22b   :  { %v251_v57 = vadd.f32 %v285_v28, %v244_v55 }
 0x22c   :  { %v230_v58 = vmul.f32 %v295_v48, %v229_v56 }
 0x22d   :  { %255 = vst.msk [vmem:[%s452_s7 + $0x10] sm:$0xff] %vm38_vm0, %v251_v57 }
 0x22e   :  { %v234_v59 = vsel %vm233_vm14, %v295_v48, %v230_v58 }
 0x22f   :  { %v238_v60 = vmul.f32 %v234_v59, %v412_v6 }
 0x231   :  { %v245_v61 = vmul.f32 %v284_v24, %v238_v60 }
 0x233   :  { %v252_v62 = vadd.f32 %v285_v28, %v245_v61 }
 0x235   :  { %256 = vst.msk [vmem:[%s452_s7 + $0x18] sm:$0xff] %vm38_vm0, %v252_v62 }

// kernel: run.6
= control target key start
LH: loop header
LB: loop body
LE: loop exit
PB: predicated region body
PF: predicated region fallthrough
CT: control target
= control target key end

     0   :  { %vm30_vm0 = vcmask 31744   ;;  %s4707_s1 = inlined_call_operand.vmem [shape: f32[4,32,4], index: 1, kind: input, shape index: {}]   ;;  %s4708_s0 = inlined_call_operand.vmem [shape: f32[4,32,4,8], index: 0, kind: input, shape index: {}]   ;;  %s4709_s3 = inlined_call_operand.vmem [shape: f32[4,8,32], index: 3, kind: input, shape index: {}]   ;;  %s4710_s4 = inlined_call_operand.vmem [shape: f32[1,32], index: 4, kind: input, shape index: {}]   ;;  %s4711_s2 = inlined_call_operand.vmem [shape: f32[32,32], index: 2, kind: input, shape index: {}]   ;;  %s4712_s5 = inlined_call_operand.vmem [shape: f32[1,32], index: 5, kind: input, shape index: {}]   ;;  %s4713_s6 = inlined_call_operand.vmem [shape: f32[1,32], index: 6, kind: input, shape index: {}]   ;;  %s4714_s7 = inlined_call_operand.vmem [shape: f32[32,32], index: 7, kind: output, shape index: {}]  }
   0x1   :  { %v28_v0 = vld [vmem:[%s4707_s1 + $0x10] sm:$0xff]  ;;  %v26_v1 = vld [vmem:[%s4707_s1] sm:$0xff]  ;;  %v3030_v2 = vld [vmem:[%s4707_s1 + $0x28] sm:$0xff] }
   0x2   :  { %v37_v3 = vsel %vm30_vm0, %v28_v0, -inf  ;;  %v31_v4 = vsel %vm30_vm0, %v26_v1, -inf  ;;  %v649_v5 = vsel %vm30_vm0, %v3030_v2, -inf  ;;  %v29_v6 = vld [vmem:[%s4707_s1 + $0x18] sm:$0xff]  ;;  %v27_v7 = vld [vmem:[%s4707_s1 + $0x8] sm:$0xff]  ;;  %v3031_v12 = vld [vmem:[%s4707_s1 + $0x30] sm:$0xff] }
   0x3   :  { %38 = vmax.xlane.f32.xlu1 %v37_v3  ;;  %32 = vmax.xlane.f32.xlu0 %v31_v4  ;;  %v3299_v8 = vld [vmem:[%s4707_s1 + $0x38] sm:$0xff]  ;;  %v40_v9 = vsel %vm30_vm0, %v29_v6, -inf  ;;  %v34_v10 = vsel %vm30_vm0, %v27_v7, -inf  ;;  %v3029_v13 = vld [vmem:[%s4707_s1 + $0x20] sm:$0xff]  ;;  %v652_v15 = vsel %vm30_vm0, %v3031_v12, -inf  ;;  %v3320_v18 = vld [vmem:[%s4707_s1 + $0x50] sm:$0xff] }
   0x4   :  { %650 = vmax.xlane.f32.xlu2 %v649_v5  ;;  %v655_v11 = vsel %vm30_vm0, %v3299_v8, -inf  ;;  %v3074_v14 = vld [vmem:[%s4707_s1 + $0x40] sm:$0xff]  ;;  %v646_v16 = vsel %vm30_vm0, %v3029_v13, -inf  ;;  %v3325_v19 = vld [vmem:[%s4707_s1 + $0x48] sm:$0xff]  ;;  %v3330_v20 = vld [vmem:[%s4707_s1 + $0x58] sm:$0xff]  ;;  %v1470_v21 = vsel %vm30_vm0, %v3320_v18, -inf }
   0x5   :  { %v1464_v17 = vsel %vm30_vm0, %v3074_v14, -inf  ;;  %v1467_v22 = vsel %vm30_vm0, %v3325_v19, -inf  ;;  %v1473_v23 = vsel %vm30_vm0, %v3330_v20, -inf }
   0xb   :  { %41 = vmax.xlane.f32.xlu1 %v40_v9  ;;  %35 = vmax.xlane.f32.xlu0 %v34_v10 }
   0xc   :  { %656 = vmax.xlane.f32.xlu2 %v655_v11 }
  0x13   :  { %653 = vmax.xlane.f32.xlu1 %v652_v15  ;;  %647 = vmax.xlane.f32.xlu0 %v646_v16 }
  0x14   :  { %1465 = vmax.xlane.f32.xlu2 %v1464_v17 }
  0x1b   :  { %1471 = vmax.xlane.f32.xlu0 %v1470_v21  ;;  %1468 = vmax.xlane.f32.xlu1 %v1467_v22  ;;  %v3115_v22 = vld [vmem:[%s4707_s1 + $0x60] sm:$0xff] }
  0x1c   :  { %1474 = vmax.xlane.f32.xlu2 %v1473_v23  ;;  %v3117_v23 = vld [vmem:[%s4707_s1 + $0x70] sm:$0xff] }
  0x76   :  { %v39_v24 = vpop.xlane.xlu1 %38  ;;  %v33_v25 = vpop.xlane.xlu0 %32 }
  0x77   :  { %v45_v26 = vsub.f32 %v28_v0, %v39_v24  ;;  %v43_v27 = vsub.f32 %v26_v1, %v33_v25  ;;  %v651_v28 = vpop.xlane.xlu2 %650  ;;  %v2181_v24 = vsel %vm30_vm0, %v3115_v22, -inf  ;;  %v2187_v25 = vsel %vm30_vm0, %v3117_v23, -inf }
  0x78   :  { %v659_v37 = vsub.f32 %v3030_v2, %v651_v28 }
  0x79   :  { %v51_v29 = vmul.f32 1.442695, %v45_v26  ;;  %v47_v30 = vmul.f32 1.442695, %v43_v27  ;;  %v3116_v26 = vld [vmem:[%s4707_s1 + $0x68] sm:$0xff] }
  0x7a   :  { %v664_v43 = vmul.f32 1.442695, %v659_v37  ;;  %v2184_v27 = vsel %vm30_vm0, %v3116_v26, -inf }
  0x7b   :  { %3163 = vpow2.f32 %v51_v29 }
  0x7c   :  { %3165 = vpow2.f32 %v47_v30 }
  0x7e   :  { %v42_v31 = vpop.xlane.xlu1 %41  ;;  %v36_v32 = vpop.xlane.xlu0 %35 }
  0x7f   :  { %v46_v33 = vsub.f32 %v29_v6, %v42_v31  ;;  %v44_v34 = vsub.f32 %v27_v7, %v36_v32  ;;  %v657_v35 = vpop.xlane.xlu2 %656 }
  0x80   :  { %v661_v54 = vsub.f32 %v3299_v8, %v657_v35 }
  0x81   :  { %v3338_v36 = vpop.eup %3163  ;;  %v53_v38 = vmul.f32 1.442695, %v46_v33  ;;  %v49_v39 = vmul.f32 1.442695, %v44_v34 }
  0x82   :  { %v3340_v40 = vpop.eup %3165  ;;  %v61_v41 = vsel %vm30_vm0, %v3338_v36, 0.0  ;;  %v668_v58 = vmul.f32 1.442695, %v661_v54 }
  0x83   :  { %3167 = vpow2.f32 %v53_v38  ;;  %62 = vadd.xlane.f32.xlu0 %v61_v41  ;;  %v55_v42 = vsel %vm30_vm0, %v3340_v40, 0.0 }
  0x84   :  { %3169 = vpow2.f32 %v49_v39  ;;  %56 = vadd.xlane.f32.xlu2 %v55_v42 }
  0x85   :  { %3171 = vpow2.f32 %v664_v43 }
  0x86   :  { %v654_v44 = vpop.xlane.xlu1 %653  ;;  %v648_v45 = vpop.xlane.xlu0 %647 }
  0x87   :  { %v660_v46 = vsub.f32 %v3031_v12, %v654_v44  ;;  %v658_v47 = vsub.f32 %v3029_v13, %v648_v45  ;;  %v1466_v48 = vpop.xlane.xlu2 %1465 }
  0x88   :  { %v1476_v49 = vsub.f32 %v3074_v14, %v1466_v48 }
  0x89   :  { %v3346_v50 = vpop.eup %3167  ;;  %v666_v51 = vmul.f32 1.442695, %v660_v46  ;;  %v662_v52 = vmul.f32 1.442695, %v658_v47 }
  0x8a   :  { %v3348_v53 = vpop.eup %3169  ;;  %v64_v55 = vsel %vm30_vm0, %v3346_v50, 0.0  ;;  %v1480_v57 = vmul.f32 1.442695, %v1476_v49 }
  0x8b   :  { %3173 = vpow2.f32 %v666_v51  ;;  %65 = vadd.xlane.f32.xlu1 %v64_v55  ;;  %v58_v56 = vsel %vm30_vm0, %v3348_v53, 0.0  ;;  %v3355_v61 = vpop.eup %3171  ;;  %v160_v55 = vlaneseq }
  0x8c   :  { %3175 = vpow2.f32 %v662_v52  ;;  %59 = vadd.xlane.f32.xlu2 %v58_v56  ;;  %v673_v5 = vsel %vm30_vm0, %v3355_v61, 0.0 }
  0x8d   :  { %3177 = vpow2.f32 %v1480_v57  ;;  %v161_v57 = vshrl.u32 %v160_v55, 7 }
  0x8e   :  { %v1472_v59 = vpop.xlane.xlu0 %1471  ;;  %v1469_v60 = vpop.xlane.xlu1 %1468  ;;  %3179 = vpow2.f32 %v668_v58 }
  0x8f   :  { %v1478_v62 = vsub.f32 %v3320_v18, %v1472_v59  ;;  %v1475_v63 = vpop.xlane.xlu2 %1474  ;;  %v1477_v1 = vsub.f32 %v3325_v19, %v1469_v60  ;;  %v3118_v18 = vld [vmem:[%s4707_s1 + $0x78] sm:$0xff]  ;;  %3158 = vset.pattern.permute.xlu2 %v161_v57  ;;  %3157 = vset.pattern.permute.xlu1 %v161_v57 }
  0x90   :  { %v1479_v0 = vsub.f32 %v3330_v20, %v1475_v63  ;;  %v2190_v21 = vsel %vm30_vm0, %v3118_v18, -inf  ;;  %3159 = vset.pattern.permute.xlu0 %v161_v57 }
  0x91   :  { %v3360_v2 = vpop.eup %3173  ;;  %v1484_v3 = vmul.f32 1.442695, %v1478_v62  ;;  %v1482_v9 = vmul.f32 1.442695, %v1477_v1 }
  0x92   :  { %v3362_v4 = vpop.eup %3175  ;;  %v676_v6 = vsel %vm30_vm0, %v3360_v2, 0.0  ;;  %v1486_v8 = vmul.f32 1.442695, %v1479_v0 }
  0x93   :  { %3181 = vpow2.f32 %v1484_v3  ;;  %674 = vadd.xlane.f32.xlu1 %v673_v5  ;;  %v670_v7 = vsel %vm30_vm0, %v3362_v4, 0.0  ;;  %v3370_v10 = vpop.eup %3177 }
  0x94   :  { %677 = vadd.xlane.f32.xlu2 %v676_v6  ;;  %671 = vadd.xlane.f32.xlu0 %v670_v7  ;;  %3183 = vpow2.f32 %v1486_v8  ;;  %v3372_v11 = vpop.eup %3179  ;;  %v1488_v12 = vsel %vm30_vm0, %v3370_v10, 0.0 }
  0x95   :  { %3185 = vpow2.f32 %v1482_v9  ;;  %v679_v15 = vsel %vm30_vm0, %v3372_v11, 0.0 }
  0x99   :  { %v3376_v13 = vpop.eup %3181 }
  0x9a   :  { %v1494_v14 = vsel %vm30_vm0, %v3376_v13, 0.0  ;;  %v3382_v16 = vpop.eup %3183 }
  0x9b   :  { %1489 = vadd.xlane.f32.xlu1 %v1488_v12  ;;  %v3384_v17 = vpop.eup %3185  ;;  %v1497_v19 = vsel %vm30_vm0, %v3382_v16, 0.0 }
  0x9c   :  { %680 = vadd.xlane.f32.xlu0 %v679_v15  ;;  %1495 = vadd.xlane.f32.xlu2 %v1494_v14  ;;  %v1491_v20 = vsel %vm30_vm0, %v3384_v17, 0.0 }
  0xa3   :  { %1498 = vadd.xlane.f32.xlu1 %v1497_v19 }
  0xa4   :  { %1492 = vadd.xlane.f32.xlu0 %v1491_v20  ;;  %2191 = vmax.xlane.f32.xlu2 %v2190_v21 }
  0xab   :  { %2182 = vmax.xlane.f32.xlu1 %v2181_v24 }
  0xac   :  { %2188 = vmax.xlane.f32.xlu0 %v2187_v25 }
  0xb3   :  { %2185 = vmax.xlane.f32.xlu1 %v2184_v27 }
  0xf6   :  { %v3408_v30 = vpop.xlane.xlu0 %62 }
  0xf7   :  { %v57_v28 = vpop.xlane.xlu2 %56  ;;  %vm102_vm10 = vweird.f32 %v3408_v30 }
  0xf8   :  { %3187 = vrcp.f32 %v57_v28  ;;  %vm72_vm1 = vweird.f32 %v57_v28  ;;  %v78_v8 = vand.u32 2147483648, %v57_v28  ;;  %v76_v12 = vand.u32 2147483647, %v57_v28 }
  0xfa   :  { %vm77_vm4 = vcmp.eq.f32.partialorder %v76_v12, 8.507059e+37 }
  0xfe   :  { %v3406_v29 = vpop.xlane.xlu1 %65  ;;  %v3188_v54 = vpop.eup %3187 }
  0xff   :  { %v3414_v33 = vpop.xlane.xlu2 %59  ;;  %v68_v58 = vmul.f32 %v3188_v54, %v57_v28  ;;  %vm73_vm2 = vweird.f32 %v3188_v54  ;;  %vm117_vm14 = vweird.f32 %v3406_v29 }
 0x100   :  { %vm74_vm3 = vmor %vm72_vm1, %vm73_vm2  ;;  %vm87_vm5 = vweird.f32 %v3414_v33 }
 0x101   :  { %v69_v0 = vsub.f32 1.0, %v68_v58 }
 0x103   :  { %v70_v6 = vmul.f32 %v3188_v54, %v69_v0  ;;  %v108_v0 = vand.u32 2147483648, %v3408_v30 }
 0x105   :  { %v71_v9 = vadd.f32 %v3188_v54, %v70_v6 }
 0x106   :  { %v3410_v31 = vpop.xlane.xlu1 %674 }
 0x107   :  { %v3412_v32 = vpop.xlane.xlu0 %671  ;;  %v3420_v37 = vpop.xlane.xlu2 %677  ;;  %v75_v19 = vsel %vm74_vm3, %v3188_v54, %v71_v9 }
 0x108   :  { %vm687_vm1 = vweird.f32 %v3412_v32 }
 0x10e   :  { %v3416_v34 = vpop.xlane.xlu1 %1489 }
 0x10f   :  { %v3418_v35 = vpop.xlane.xlu0 %680  ;;  %v3426_v41 = vpop.xlane.xlu2 %1495 }
 0x116   :  { %v3422_v38 = vpop.xlane.xlu1 %1498 }
 0x117   :  { %v3424_v39 = vpop.xlane.xlu0 %1492  ;;  %v2192_v47 = vpop.xlane.xlu2 %2191 }
 0x118   :  { %v2196_v52 = vsub.f32 %v3118_v18, %v2192_v47  ;;  %v79_v18 = vor.u32 1.1754944e-38, %v78_v8 }
 0x11a   :  { %v2203_v59 = vmul.f32 1.442695, %v2196_v52  ;;  %v80_v21 = vsel %vm77_vm4, %v79_v18, %v75_v19 }
 0x11e   :  { %v2183_v42 = vpop.xlane.xlu1 %2182 }
 0x11f   :  { %v2193_v43 = vsub.f32 %v3115_v22, %v2183_v42  ;;  %v2189_v44 = vpop.xlane.xlu0 %2188  ;;  %v91_v42 = vand.u32 2147483647, %v3414_v33 }
 0x120   :  { %v2195_v46 = vsub.f32 %v3117_v23, %v2189_v44  ;;  %v81_v23 = vmul.f32 %v3340_v40, %v80_v21 }
 0x121   :  { %v2197_v45 = vmul.f32 1.442695, %v2193_v43  ;;  %vm92_vm8 = vcmp.eq.f32.partialorder %v91_v42, 8.507059e+37 }
 0x122   :  { %v2201_v48 = vmul.f32 1.442695, %v2195_v46  ;;  %v173_v25 = vperm.slane %v81_v23, 2  ;;  %v159_v27 = vperm.slane %v81_v23, 0  ;;  %v194_v40 = vperm.slane %v81_v23, 5 }
 0x123   :  { %3189 = vpow2.f32 %v2197_v45  ;;  %v166_v45 = vperm.slane %v81_v23, 1  ;;  %v180_v47 = vperm.slane %v81_v23, 3  ;;  %v187_v54 = vperm.slane %v81_v23, 4 }
 0x124   :  { %3191 = vpow2.f32 %v2201_v48 }
 0x126   :  { %v2186_v49 = vpop.xlane.xlu1 %2185 }
 0x127   :  { %v2194_v51 = vsub.f32 %v3116_v26, %v2186_v49  ;;  %v93_v26 = vand.u32 2147483648, %v3414_v33 }
 0x129   :  { %v2199_v56 = vmul.f32 1.442695, %v2194_v51  ;;  %v3428_v60 = vpop.eup %3189  ;;  %v94_v43 = vor.u32 1.1754944e-38, %v93_v26  ;;  %v208_v51 = vperm.slane %v81_v23, 7 }
 0x12a   :  { %v2205_v62 = vsel %vm30_vm0, %v3428_v60, 0.0  ;;  %v3432_v63 = vpop.eup %3191 }
 0x12b   :  { %3193 = vpow2.f32 %v2199_v56  ;;  %2206 = vadd.xlane.f32.xlu1 %v2205_v62  ;;  %v2211_v1 = vsel %vm30_vm0, %v3432_v63, 0.0 }
 0x12c   :  { %3195 = vpow2.f32 %v2203_v59  ;;  %2212 = vadd.xlane.f32.xlu2 %v2211_v1  ;;  %v201_v59 = vperm.slane %v81_v23, 6 }
 0x12d   :  { %3197 = vrcp.f32 %v3414_v33 }
 0x12e   :  { %3199 = vrcp.f32 %v3408_v30 }
 0x12f   :  { %3201 = vrcp.f32 %v3406_v29 }
 0x130   :  { %3203 = vrcp.f32 %v3412_v32 }
 0x131   :  { %v3436_v3 = vpop.eup %3193  ;;  %3205 = vrcp.f32 %v3410_v31 }
 0x132   :  { %v2208_v5 = vsel %vm30_vm0, %v3436_v3, 0.0  ;;  %v3441_v7 = vpop.eup %3195  ;;  %3207 = vrcp.f32 %v3420_v37 }
 0x133   :  { %2209 = vadd.xlane.f32.xlu0 %v2208_v5  ;;  %v3198_v14 = vpop.eup %3197  ;;  %v2214_v15 = vsel %vm30_vm0, %v3441_v7, 0.0  ;;  %v109_v5 = vor.u32 1.1754944e-38, %v108_v0  ;;  %3209 = vrcp.f32 %v3416_v34 }
 0x134   :  { %v83_v20 = vmul.f32 %v3198_v14, %v3414_v33  ;;  %vm88_vm6 = vweird.f32 %v3198_v14  ;;  %v3200_v48 = vpop.eup %3199  ;;  %3211 = vrcp.f32 %v3418_v35 }
 0x135   :  { %vm89_vm7 = vmor %vm87_vm5, %vm88_vm6  ;;  %v98_v33 = vmul.f32 %v3200_v48, %v3408_v30  ;;  %vm103_vm9 = vweird.f32 %v3200_v48  ;;  %vm702_vm6 = vweird.f32 %v3410_v31  ;;  %3213 = vrcp.f32 %v3426_v41 }
 0x136   :  { %v84_v22 = vsub.f32 1.0, %v83_v20  ;;  %vm104_vm11 = vmor %vm102_vm10, %vm103_vm9  ;;  %3215 = vrcp.f32 %v3424_v39  ;;  %vm717_vm9 = vweird.f32 %v3420_v37 }
 0x137   :  { %v99_v55 = vsub.f32 1.0, %v98_v33  ;;  %3217 = vrcp.f32 %v3422_v38 }
 0x138   :  { %v85_v24 = vmul.f32 %v3198_v14, %v84_v22 }
 0x139   :  { %v100_v56 = vmul.f32 %v3200_v48, %v99_v55 }
 0x13a   :  { %v86_v28 = vadd.f32 %v3198_v14, %v85_v24 }
 0x13b   :  { %2215 = vadd.xlane.f32.xlu0 %v2214_v15  ;;  %v101_v62 = vadd.f32 %v3200_v48, %v100_v56  ;;  %v691_v56 = vand.u32 2147483647, %v3412_v32 }
 0x13c   :  { %v90_v44 = vsel %vm89_vm7, %v3198_v14, %v86_v28  ;;  %v3202_v14 = vpop.eup %3201  ;;  %v121_v28 = vand.u32 2147483647, %v3406_v29 }
 0x13d   :  { %v95_v46 = vsel %vm92_vm8, %v94_v43, %v90_v44  ;;  %v105_v1 = vsel %vm104_vm11, %v3200_v48, %v101_v62  ;;  %v113_v18 = vmul.f32 %v3202_v14, %v3406_v29  ;;  %vm118_vm13 = vweird.f32 %v3202_v14 }
 0x13e   :  { %v96_v49 = vmul.f32 %v3348_v53, %v95_v46  ;;  %v106_v53 = vand.u32 2147483647, %v3408_v30  ;;  %vm119_vm15 = vmor %vm117_vm14, %vm118_vm13  ;;  %vm122_vm0 = vcmp.eq.f32.partialorder %v121_v28, 8.507059e+37  ;;  %vm692_vm4 = vcmp.eq.f32.partialorder %v691_v56, 8.507059e+37 }
 0x13f   :  { %v114_v21 = vsub.f32 1.0, %v113_v18  ;;  %vm1505_vm13 = vweird.f32 %v3416_v34 }
 0x140   :  { %v215_v52 = vperm.slane %v96_v49, 0  ;;  %v229_v57 = vperm.slane %v96_v49, 2  ;;  %v236_v58 = vperm.slane %v96_v49, 3  ;;  %vm107_vm12 = vcmp.eq.f32.partialorder %v106_v53, 8.507059e+37 }
 0x141   :  { %v250_v6 = vperm.slane %v96_v49, 5  ;;  %v257_v8 = vperm.slane %v96_v49, 6  ;;  %v110_v9 = vsel %vm107_vm12, %v109_v5, %v105_v1  ;;  %v222_v12 = vperm.slane %v96_v49, 1 }
 0x142   :  { %v111_v15 = vmul.f32 %v3338_v36, %v110_v9  ;;  %v243_v20 = vperm.slane %v96_v49, 4  ;;  %v115_v22 = vmul.f32 %v3202_v14, %v114_v21  ;;  %v3204_v36 = vpop.eup %3203 }
 0x143   :  { %v683_v43 = vmul.f32 %v3204_v36, %v3412_v32  ;;  %vm688_vm2 = vweird.f32 %v3204_v36  ;;  %v3206_v53 = vpop.eup %3205 }
 0x144   :  { %178 = vperm.xlu1 %3157, %v173_v25   ;;  %164 = vperm.xlu2 %3158, %v159_v27   ;;  %v271_v19 = vperm.slane %v111_v15, 0  ;;  %v278_v30 = vperm.slane %v111_v15, 1  ;;  %v292_v23 = vperm.slane %v111_v15, 3  ;;  %v299_v24 = vperm.slane %v111_v15, 4  ;;  %vm689_vm3 = vmor %vm687_vm1, %vm688_vm2 }
 0x145   :  { %v264_v25 = vperm.slane %v96_v49, 7  ;;  %v116_v26 = vadd.f32 %v3202_v14, %v115_v22  ;;  %v123_v27 = vand.u32 2147483648, %v3406_v29  ;;  %v684_v48 = vsub.f32 1.0, %v683_v43 }
 0x146   :  { %vm703_vm5 = vweird.f32 %v3206_v53  ;;  %vm415_vm1 = vcmask 60416   ;;  %vm732_vm2 = vweird.f32 %v3418_v35 }
 0x147   :  { %v120_v42 = vsel %vm119_vm15, %v3202_v14, %v116_v26  ;;  %v124_v44 = vor.u32 1.1754944e-38, %v123_v27  ;;  %v685_v33 = vmul.f32 %v3204_v36, %v684_v48  ;;  %vm704_vm7 = vmor %vm702_vm6, %vm703_vm5  ;;  %vm1535_vm15 = vweird.f32 %v3426_v41 }
 0x149   :  { %v125_v46 = vsel %vm122_vm0, %v124_v44, %v120_v42  ;;  %v686_v55 = vadd.f32 %v3204_v36, %v685_v33 }
 0x14a   :  { %v126_v49 = vmul.f32 %v3346_v50, %v125_v46 }
 0x14b   :  { %v690_v50 = vsel %vm689_vm3, %v3204_v36, %v686_v55 }
 0x14c   :  { %199 = vperm.xlu1 %3157, %v194_v40   ;;  %185 = vperm.xlu2 %3158, %v180_v47   ;;  %v313_v40 = vperm.slane %v111_v15, 6  ;;  %v285_v47 = vperm.slane %v111_v15, 2  ;;  %v334_v29 = vperm.slane %v126_v49, 1  ;;  %v327_v0 = vperm.slane %v126_v49, 0 }
 0x14d   :  { %v376_v5 = vperm.slane %v126_v49, 7  ;;  %v369_v18 = vperm.slane %v126_v49, 6 }
 0x14f   :  { %171 = vperm.xlu0 %3159, %v166_v45   ;;  %v320_v45 = vperm.slane %v111_v15, 7 }
 0x154   :  { %213 = vperm.xlu1 %3157, %v208_v51   ;;  %192 = vperm.xlu2 %3158, %v187_v54   ;;  %v341_v51 = vperm.slane %v126_v49, 2  ;;  %v306_v54 = vperm.slane %v111_v15, 5  ;;  %v3479_v15 = vpop.eup %3207 }
 0x155   :  { %v713_v21 = vmul.f32 %v3479_v15, %v3420_v37  ;;  %v3486_v22 = vpop.eup %3209  ;;  %vm718_vm10 = vweird.f32 %v3479_v15 }
 0x156   :  { %v1501_v27 = vmul.f32 %v3486_v22, %v3416_v34  ;;  %vm3529_vm12 = vmor %vm717_vm9, %vm718_vm10  ;;  %vm1506_vm0 = vweird.f32 %v3486_v22  ;;  %vm1520_vm9 = vweird.f32 %v3424_v39 }
 0x157   :  { %220 = vperm.xlu0 %3159, %v215_v52   ;;  %v693_v52 = vand.u32 2147483648, %v3412_v32  ;;  %v698_v32 = vmul.f32 %v3206_v53, %v3410_v31  ;;  %v714_v36 = vsub.f32 1.0, %v713_v21  ;;  %v130_v21 = vld [vmem:[%s4708_s0 + $0xc] sm:$0xf]  ;;  %vm3576_vm5 = vmor %vm1505_vm13, %vm1506_vm0  ;;  %vm1291_vm13 = vcmask 1042434  }
 0x158   :  { %v1502_v48 = vsub.f32 1.0, %v1501_v27  ;;  %v738_v27 = vand.u32 2147483648, %v3418_v35  ;;  %vm1297_vm0 = vcmask 1045509  }
 0x159   :  { %v699_v9 = vsub.f32 1.0, %v698_v32 }
 0x15c   :  { %234 = vperm.xlu1 %3157, %v229_v57   ;;  %206 = vperm.xlu2 %3158, %v201_v59   ;;  %v694_v57 = vor.u32 1.1754944e-38, %v693_v52  ;;  %v362_v59 = vperm.slane %v126_v49, 5 }
 0x15e   :  { %v695_v62 = vsel %vm692_vm4, %v694_v57, %v690_v50  ;;  %v127_v57 = vld [vmem:[%s4708_s0] sm:$0xf] }
 0x15f   :  { %241 = vperm.xlu0 %3159, %v236_v58   ;;  %v355_v58 = vperm.slane %v126_v49, 4  ;;  %v3470_v1 = vmul.f32 %v3362_v4, %v695_v62 }
 0x161   :  { %v775_v4 = vperm.slane %v3470_v1, 0  ;;  %v803_v14 = vperm.slane %v3470_v1, 4  ;;  %v824_v28 = vperm.slane %v3470_v1, 7  ;;  %v782_v44 = vperm.slane %v3470_v1, 1 }
 0x162   :  { %v817_v50 = vperm.slane %v3470_v1, 6 }
 0x164   :  { %255 = vperm.xlu1 %3157, %v250_v6   ;;  %227 = vperm.xlu2 %3158, %v222_v12   ;;  %v789_v6 = vperm.slane %v3470_v1, 2  ;;  %v700_v12 = vmul.f32 %v3206_v53, %v699_v9  ;;  %v736_v9 = vand.u32 2147483647, %v3418_v35 }
 0x166   :  { %vm3567_vm4 = vcmp.eq.f32.partialorder %v736_v9, 8.507059e+37 }
 0x167   :  { %262 = vperm.xlu0 %3159, %v257_v8   ;;  %v348_v8 = vperm.slane %v126_v49, 3  ;;  %v723_v49 = vand.u32 2147483648, %v3420_v37 }
 0x169   :  { %v724_v62 = vor.u32 1.1754944e-38, %v723_v49 }
 0x16c   :  { %276 = vperm.xlu1 %3157, %v271_v19   ;;  %248 = vperm.xlu2 %3158, %v243_v20   ;;  %v701_v19 = vadd.f32 %v3206_v53, %v700_v12  ;;  %v708_v20 = vand.u32 2147483648, %v3410_v31 }
 0x16e   :  { %v709_v26 = vor.u32 1.1754944e-38, %v708_v20 }
 0x16f   :  { %283 = vperm.xlu0 %3159, %v278_v30   ;;  %v706_v30 = vand.u32 2147483647, %v3410_v31  ;;  %v796_v31 = vperm.slane %v3470_v1, 3 }
 0x171   :  { %vm707_vm8 = vcmp.eq.f32.partialorder %v706_v30, 8.507059e+37 }
 0x174   :  { %297 = vperm.xlu1 %3157, %v292_v23   ;;  %269 = vperm.xlu2 %3158, %v264_v25   ;;  %v3488_v23 = vpop.eup %3211 }
 0x175   :  { %v728_v43 = vmul.f32 %v3488_v23, %v3418_v35  ;;  %vm733_vm3 = vweird.f32 %v3488_v23 }
 0x177   :  { %304 = vperm.xlu0 %3159, %v299_v24   ;;  %v705_v24 = vsel %vm704_vm7, %v3206_v53, %v701_v19  ;;  %v729_v33 = vsub.f32 1.0, %v728_v43  ;;  %v810_v53 = vperm.slane %v3470_v1, 5  ;;  %vm3588_vm7 = vmor %vm732_vm2, %vm733_vm3  ;;  %vm1299_vm2 = vcmask 1046534  }
 0x178   :  { %v710_v42 = vsel %vm707_vm8, %v709_v26, %v705_v24  ;;  %vm1301_vm3 = vcmask 1047559  }
 0x179   :  { %v3505_v46 = vmul.f32 %v3355_v61, %v710_v42  ;;  %v739_v61 = vor.u32 1.1754944e-38, %v738_v27 }
 0x17c   :  { %318 = vperm.xlu1 %3157, %v313_v40   ;;  %290 = vperm.xlu2 %3158, %v285_v47   ;;  %v721_v40 = vand.u32 2147483647, %v3420_v37  ;;  %v715_v47 = vmul.f32 %v3479_v15, %v714_v36  ;;  %v1503_v37 = vmul.f32 %v3486_v22, %v1502_v48 }
 0x17e   :  { %vm3516_vm11 = vcmp.eq.f32.partialorder %v721_v40, 8.507059e+37  ;;  %v716_v56 = vadd.f32 %v3479_v15, %v715_v47  ;;  %v1504_v30 = vadd.f32 %v3486_v22, %v1503_v37  ;;  %v129_v37 = vld [vmem:[%s4708_s0 + $0x8] sm:$0xf] }
 0x17f   :  { %325 = vperm.xlu0 %3159, %v320_v45   ;;  %v3502_v45 = vpop.eup %3213 }
 0x180   :  { %v1531_v55 = vmul.f32 %v3502_v45, %v3426_v41  ;;  %v720_v19 = vsel %vm3529_vm12, %v3479_v15, %v716_v56  ;;  %v1508_v48 = vsel %vm3576_vm5, %v3486_v22, %v1504_v30  ;;  %vm1536_vm6 = vweird.f32 %v3502_v45 }
 0x181   :  { %v725_v42 = vsel %vm3516_vm11, %v724_v62, %v720_v19  ;;  %v831_v22 = vperm.slane %v3505_v46, 0  ;;  %vm3617_vm8 = vmor %vm1535_vm15, %vm1536_vm6  ;;  %vm4715_vm12 = vcmask 1041409   ;;  %vm1295_vm15 = vcmask 1044484  }
 0x184   :  { %339 = vperm.xlu1 %3157, %v334_v29   ;;  %311 = vperm.xlu2 %3158, %v306_v54   ;;  %v1509_v29 = vand.u32 2147483647, %v3416_v34  ;;  %v3514_v54 = vpop.eup %3215 }
 0x185   :  { %v3536_v32 = vpop.eup %3217  ;;  %v1516_v12 = vmul.f32 %v3514_v54, %v3424_v39  ;;  %vm1521_vm10 = vweird.f32 %v3514_v54 }
 0x186   :  { %vm3538_vm14 = vcmp.eq.f32.partialorder %v1509_v29, 8.507059e+37  ;;  %v1546_v15 = vmul.f32 %v3536_v32, %v3422_v38  ;;  %vm3652_vm11 = vmor %vm1520_vm9, %vm1521_vm10 }
 0x187   :  { %346 = vperm.xlu0 %3159, %v341_v51   ;;  %v1511_v51 = vand.u32 2147483648, %v3416_v34  ;;  %v838_v34 = vperm.slane %v3505_v46, 1 }
 0x18c   :  { %360 = vperm.xlu1 %3157, %v355_v58   ;;  %332 = vperm.xlu2 %3158, %v327_v0   ;;  %v845_v58 = vperm.slane %v3505_v46, 2  ;;  %v730_v0 = vmul.f32 %v3488_v23, %v729_v33  ;;  %v866_v33 = vperm.slane %v3505_v46, 5 }
 0x18e   :  { %v731_v24 = vadd.f32 %v3488_v23, %v730_v0 }
 0x18f   :  { %367 = vperm.xlu0 %3159, %v362_v59  }
 0x190   :  { %v735_v29 = vsel %vm3588_vm7, %v3488_v23, %v731_v24 }
 0x194   :  { %381 = vperm.xlu1 %3157, %v376_v5   ;;  %353 = vperm.xlu2 %3158, %v348_v8   ;;  %v1541_v8 = vand.u32 2147483648, %v3426_v41  ;;  %v131_v5 = vld [vmem:[%s4708_s0 + $0x10] sm:$0xf] }
 0x196   :  { %v3565_v26 = vor.u32 1.1754944e-38, %v1541_v8 }
 0x197   :  { %794 = vperm.xlu0 %3159, %v789_v6   ;;  %v1512_v6 = vor.u32 1.1754944e-38, %v1511_v51  ;;  %v1547_v51 = vsub.f32 1.0, %v1546_v15 }
 0x199   :  { %v1513_v23 = vsel %vm3538_vm14, %v1512_v6, %v1508_v48  ;;  %v1548_v6 = vmul.f32 %v3536_v32, %v1547_v51  ;;  %v128_v51 = vld [vmem:[%s4708_s0 + $0x4] sm:$0xf]  ;;  %vm1293_vm14 = vcmask 1043459  }
 0x19c   :  { %780 = vperm.xlu1 %3157, %v775_v4   ;;  %374 = vperm.xlu2 %3158, %v369_v18  }
 0x19e   :  { %v3555_v20 = vpop.xlane.xlu1 %2206 }
 0x19f   :  { %808 = vperm.xlu0 %3159, %v803_v14   ;;  %v3491_v25 = vpop.xlane.xlu2 %2212  ;;  %v1532_v14 = vsub.f32 1.0, %v1531_v55  ;;  %v1526_v55 = vand.u32 2147483648, %v3424_v39  ;;  %3219 = vrcp.f32 %v3555_v20  ;;  %vm2222_vm7 = vweird.f32 %v3555_v20 }
 0x1a1   :  { %v3639_v19 = vor.u32 1.1754944e-38, %v1526_v55 }
 0x1a4   :  { %801 = vperm.xlu1 %3157, %v796_v31   ;;  %787 = vperm.xlu2 %3158, %v782_v44   ;;  %v1517_v31 = vsub.f32 1.0, %v1516_v12  ;;  %v1533_v44 = vmul.f32 %v3502_v45, %v1532_v14  ;;  %v3634_v14 = vmul.f32 %v3370_v10, %v1513_v23 }
 0x1a6   :  { %v3546_v4 = vpop.xlane.xlu0 %2209  ;;  %v1518_v35 = vmul.f32 %v3514_v54, %v1517_v31 }
 0x1a7   :  { %829 = vperm.xlu0 %3159, %v824_v28   ;;  %v165_v52 = vpop.permute.xlu2 %164  ;;  %3221 = vrcp.f32 %v3546_v4 }
 0x1a8   :  { %v383_v18 = vmul.f32 %v165_v52, %v127_v57  ;;  %v3605_v57 = vmul.f32 %v3360_v2, %v725_v42  ;;  %v740_v2 = vsel %vm3567_vm4, %v739_v61, %v735_v29  ;;  %v859_v42 = vperm.slane %v3505_v46, 4  ;;  %v132_v29 = vld [vmem:[%s4708_s0 + $0x14] sm:$0xf] }
 0x1a9   :  { %v3646_v15 = vmul.f32 %v3372_v11, %v740_v2  ;;  %v3660_v11 = vadd.f32 %v3536_v32, %v1548_v6  ;;  %vm1324_vm4 = vcmask 64512   ;;  %3223 = vrcp.f32 %v3491_v25 }
 0x1aa   :  { %v416_v40 = vsel %vm415_vm1, %v383_v18, 0.0  ;;  %v3637_v18 = vadd.f32 %v3514_v54, %v1518_v35  ;;  %v887_v43 = vperm.slane %v3605_v57, 0  ;;  %v901_v23 = vperm.slane %v3605_v57, 2 }
 0x1ab   :  { %v417_v56 = vrot.slane %v416_v40, 4 }
 0x1ac   :  { %822 = vperm.xlu1 %3157, %v817_v50   ;;  %815 = vperm.xlu2 %3158, %v810_v53   ;;  %v3610_v50 = vadd.f32 %v3502_v45, %v1533_v44 }
 0x1ad   :  { %v418_v30 = vadd.f32 %v417_v56, %v416_v40  ;;  %v852_v40 = vperm.slane %v3505_v46, 3  ;;  %v133_v56 = vld [vmem:[%s4708_s0 + $0x18] sm:$0xf] }
 0x1ae   :  { %v3625_v0 = vpop.xlane.xlu0 %2215 }
 0x1af   :  { %850 = vperm.xlu0 %3159, %v845_v58   ;;  %v186_v28 = vpop.permute.xlu2 %185  ;;  %v419_v49 = vrot.slane %v418_v30, 2  ;;  %3225 = vrcp.f32 %v3625_v0 }
 0x1b0   :  { %v386_v47 = vmul.f32 %v186_v28, %v130_v21 }
 0x1b2   :  { %v437_v52 = vsel %vm415_vm1, %v386_v47, 0.0  ;;  %v873_v47 = vperm.slane %v3505_v46, 6 }
 0x1b3   :  { %v438_v62 = vrot.slane %v437_v52, 4 }
 0x1b4   :  { %843 = vperm.xlu1 %3157, %v838_v34   ;;  %836 = vperm.xlu2 %3158, %v831_v22   ;;  %v908_v22 = vperm.slane %v3605_v57, 3 }
 0x1b5   :  { %v439_v31 = vadd.f32 %v438_v62, %v437_v52  ;;  %v880_v52 = vperm.slane %v3505_v46, 7 }
 0x1b6   :  { %v179_v53 = vpop.permute.xlu1 %178 }
 0x1b7   :  { %871 = vperm.xlu0 %3159, %v866_v33   ;;  %v385_v12 = vmul.f32 %v179_v53, %v129_v37  ;;  %v193_v21 = vpop.permute.xlu2 %192  ;;  %v440_v35 = vrot.slane %v439_v31, 2 }
 0x1b8   :  { %v387_v27 = vmul.f32 %v193_v21, %v131_v5 }
 0x1b9   :  { %v430_v36 = vsel %vm415_vm1, %v385_v12, 0.0  ;;  %v420_v12 = vadd.f32 %v419_v49, %v418_v30  ;;  %v441_v24 = vadd.f32 %v440_v35, %v439_v31  ;;  %v134_v49 = vld [vmem:[%s4708_s0 + $0x1c] sm:$0xf] }
 0x1ba   :  { %v431_v28 = vrot.slane %v430_v36, 4  ;;  %v444_v44 = vsel %vm415_vm1, %v387_v27, 0.0 }
 0x1bb   :  { %v445_v33 = vrot.slane %v444_v44, 4 }
 0x1bc   :  { %v432_v34 = vadd.f32 %v431_v28, %v430_v36  ;;  %864 = vperm.xlu1 %3157, %v859_v42   ;;  %857 = vperm.xlu2 %3158, %v852_v40  }
 0x1bd   :  { %v446_v21 = vadd.f32 %v445_v33, %v444_v44 }
 0x1be   :  { %v200_v55 = vpop.permute.xlu1 %199  ;;  %v433_v53 = vrot.slane %v432_v34, 2 }
 0x1bf   :  { %892 = vperm.xlu0 %3159, %v887_v43   ;;  %v388_v5 = vmul.f32 %v200_v55, %v132_v29  ;;  %v207_v36 = vpop.permute.xlu2 %206  ;;  %v3692_v55 = vpop.eup %3219 }
 0x1c0   :  { %v389_v43 = vmul.f32 %v207_v36, %v133_v56  ;;  %v434_v30 = vadd.f32 %v433_v53, %v432_v34  ;;  %v135_v34 = vld [vmem:[%s4708_s0 + $0x20] sm:$0xf]  ;;  %vm2223_vm6 = vweird.f32 %v3692_v55 }
 0x1c1   :  { %v172_v37 = vpop.permute.xlu0 %171  ;;  %v451_v42 = vsel %vm415_vm1, %v388_v5, 0.0  ;;  %v447_v5 = vrot.slane %v446_v21, 2  ;;  %vm3833_vm9 = vmor %vm2222_vm7, %vm2223_vm6  ;;  %vm1550_vm7 = vweird.f32 %v3422_v38 }
 0x1c2   :  { %v384_v46 = vmul.f32 %v172_v37, %v128_v51  ;;  %v452_v1 = vrot.slane %v451_v42, 4  ;;  %v458_v44 = vsel %vm415_vm1, %v389_v43, 0.0  ;;  %v421_v37 = vrot.slane %v420_v12, 1 }
 0x1c3   :  { %v459_v35 = vrot.slane %v458_v44, 4  ;;  %v448_v8 = vadd.f32 %v447_v5, %v446_v21 }
 0x1c4   :  { %v423_v40 = vsel %vm415_vm1, %v384_v46, 0.0  ;;  %v453_v31 = vadd.f32 %v452_v1, %v451_v42  ;;  %885 = vperm.xlu1 %3157, %v880_v52   ;;  %878 = vperm.xlu2 %3158, %v873_v47   ;;  %v640_v46 = vld [vmem:[%s4709_s3] sm:$0xff]  ;;  %v3711_v1 = vmul.f32 %v3692_v55, %v3555_v20  ;;  %v442_v52 = vrot.slane %v441_v24, 1 }
 0x1c5   :  { %v424_v29 = vrot.slane %v423_v40, 4  ;;  %v460_v42 = vadd.f32 %v459_v35, %v458_v44  ;;  %v136_v47 = vld [vmem:[%s4708_s0 + $0x24] sm:$0xf]  ;;  %1445 = vmatpush.msra.mxu1 %v640_v46  ;;  %v422_v33 = vadd.f32 %v421_v37, %v420_v12  ;;  %v449_v12 = vrot.slane %v448_v8, 1 }
 0x1c6   :  { %v214_v48 = vpop.permute.xlu1 %213  ;;  %v443_v46 = vadd.f32 %v442_v52, %v441_v24  ;;  %v138_v24 = vld [vmem:[%s4708_s0 + $0x2c] sm:$0xf] }
 0x1c7   :  { %913 = vperm.xlu0 %3159, %v908_v22   ;;  %v425_v53 = vadd.f32 %v424_v29, %v423_v40  ;;  %v454_v22 = vrot.slane %v453_v31, 2  ;;  %v435_v29 = vrot.slane %v434_v30, 1  ;;  %v390_v36 = vmul.f32 %v214_v48, %v134_v49  ;;  %v228_v51 = vpop.permute.xlu2 %227 }
 0x1c8   :  { %v461_v56 = vrot.slane %v460_v42, 2  ;;  %v392_v44 = vmul.f32 %v228_v51, %v136_v47  ;;  %v4732_v51 = vperm.slane %v3605_v57, 6 }
 0x1c9   :  { %v221_v40 = vpop.permute.xlu0 %220  ;;  %v426_v9 = vrot.slane %v425_v53, 2  ;;  %v465_v58 = vsel %vm415_vm1, %v390_v36, 0.0  ;;  %v455_v62 = vadd.f32 %v454_v22, %v453_v31  ;;  %v436_v61 = vadd.f32 %v435_v29, %v434_v30 }
 0x1ca   :  { %v391_v43 = vmul.f32 %v221_v40, %v135_v34  ;;  %v466_v27 = vrot.slane %v465_v58, 4  ;;  %v479_v48 = vsel %vm415_vm1, %v392_v44, 0.0  ;;  %v462_v21 = vadd.f32 %v461_v56, %v460_v42  ;;  %v139_v34 = vld [vmem:[%s4708_s0 + $0x30] sm:$0xf] }
 0x1cb   :  { %v427_v28 = vadd.f32 %v426_v9, %v425_v53  ;;  %v480_v37 = vrot.slane %v479_v48, 4  ;;  %v137_v9 = vld [vmem:[%s4708_s0 + $0x28] sm:$0xf]  ;;  %v4733_v56 = vperm.slane %v3605_v57, 1 }
 0x1cc   :  { %v472_v35 = vsel %vm415_vm1, %v391_v43, 0.0  ;;  %v467_v49 = vadd.f32 %v466_v27, %v465_v58  ;;  %906 = vperm.xlu1 %3157, %v901_v23   ;;  %v456_v58 = vrot.slane %v455_v62, 1 }
 0x1cd   :  { %v473_v6 = vrot.slane %v472_v35, 4  ;;  %v428_v2 = vrot.slane %v427_v28, 1  ;;  %899 = vperm.xlu2 %3158, %v4733_v56   ;;  %v481_v27 = vadd.f32 %v480_v37, %v479_v48  ;;  %v450_v48 = vadd.f32 %v449_v12, %v448_v8  ;;  %v141_v12 = vld [vmem:[%s4708_s0 + $0x38] sm:$0xf] }
 0x1ce   :  { %v468_v23 = vrot.slane %v467_v49, 2  ;;  %v235_v31 = vpop.permute.xlu1 %234  ;;  %v4735_v8 = vperm.slane %v3646_v15, 1 }
 0x1cf   :  { %934 = vperm.xlu0 %3159, %v4732_v51   ;;  %v429_v30 = vadd.f32 %v428_v2, %v427_v28  ;;  %v474_v5 = vadd.f32 %v473_v6, %v472_v35  ;;  %v393_v2 = vmul.f32 %v235_v31, %v137_v9  ;;  %v463_v28 = vrot.slane %v462_v21, 1  ;;  %v249_v42 = vpop.permute.xlu2 %248 }
 0x1d0   :  { %v469_v52 = vadd.f32 %v468_v23, %v467_v49  ;;  %v482_v22 = vrot.slane %v481_v27, 2  ;;  %v395_v44 = vmul.f32 %v249_v42, %v139_v34  ;;  %v4736_v34 = vperm.slane %v3605_v57, 4  ;;  %v142_v42 = vld [vmem:[%s4708_s0 + $0x3c] sm:$0xf] }
 0x1d1   :  { %v242_v53 = vpop.permute.xlu0 %241  ;;  %v1394_v36 = vsel %vm4715_vm12, %v429_v30, %v422_v33  ;;  %v475_v43 = vrot.slane %v474_v5, 2  ;;  %v486_v29 = vsel %vm415_vm1, %v393_v2, 0.0 }
 0x1d2   :  { %v394_v6 = vmul.f32 %v242_v53, %v138_v24  ;;  %v1395_v47 = vsel %vm1291_vm13, %v436_v61, %v1394_v36  ;;  %v483_v37 = vadd.f32 %v482_v22, %v481_v27  ;;  %v487_v51 = vrot.slane %v486_v29, 4 }
 0x1d3   :  { %v476_v40 = vadd.f32 %v475_v43, %v474_v5  ;;  %v470_v33 = vrot.slane %v469_v52, 1  ;;  %v500_v9 = vsel %vm415_vm1, %v395_v44, 0.0  ;;  %v1396_v49 = vsel %vm1293_vm14, %v443_v46, %v1395_v47  ;;  %v140_v5 = vld [vmem:[%s4708_s0 + $0x34] sm:$0xf] }
 0x1d4   :  { %v493_v35 = vsel %vm415_vm1, %v394_v6, 0.0  ;;  %v488_v24 = vadd.f32 %v487_v51, %v486_v29  ;;  %v501_v30 = vrot.slane %v500_v9, 4  ;;  %v4734_v61 = vperm.slane %v3605_v57, 5 }
 0x1d5   :  { %v494_v56 = vrot.slane %v493_v35, 4  ;;  %v457_v27 = vadd.f32 %v456_v58, %v455_v62  ;;  %v464_v46 = vadd.f32 %v463_v28, %v462_v21  ;;  %v477_v31 = vrot.slane %v476_v40, 1  ;;  %920 = vperm.xlu2 %3158, %v4736_v34  }
 0x1d6   :  { %927 = vperm.xlu1 %3157, %v4734_v61   ;;  %v1397_v53 = vsel %vm1295_vm15, %v450_v48, %v1396_v49  ;;  %v484_v36 = vrot.slane %v483_v37, 1  ;;  %v489_v43 = vrot.slane %v488_v24, 2  ;;  %v502_v2 = vadd.f32 %v501_v30, %v500_v9  ;;  %v256_v22 = vpop.permute.xlu1 %255 }
 0x1d7   :  { %v495_v23 = vadd.f32 %v494_v56, %v493_v35  ;;  %955 = vperm.xlu0 %3159, %v4735_v8   ;;  %v396_v29 = vmul.f32 %v256_v22, %v140_v5  ;;  %v471_v44 = vadd.f32 %v470_v33, %v469_v52  ;;  %v1398_v62 = vsel %vm1297_vm0, %v457_v27, %v1397_v53  ;;  %v270_v51 = vpop.permute.xlu2 %269 }
 0x1d8   :  { %v490_v58 = vadd.f32 %v489_v43, %v488_v24  ;;  %v503_v28 = vrot.slane %v502_v2, 2  ;;  %v398_v56 = vmul.f32 %v270_v51, %v142_v42  ;;  %v1399_v9 = vsel %vm1299_vm2, %v464_v46, %v1398_v62 }
 0x1d9   :  { %v496_v6 = vrot.slane %v495_v23, 2  ;;  %v263_v47 = vpop.permute.xlu0 %262  ;;  %v507_v48 = vsel %vm415_vm1, %v396_v29, 0.0  ;;  %v478_v30 = vadd.f32 %v477_v31, %v476_v40  ;;  %v485_v52 = vadd.f32 %v484_v36, %v483_v37  ;;  %v143_v40 = vld [vmem:[%s4708_s0 + $0x40] sm:$0xf]  ;;  %v144_v37 = vld [vmem:[%s4708_s0 + $0x44] sm:$0xf] }
 0x1da   :  { %v397_v21 = vmul.f32 %v263_v47, %v141_v12  ;;  %v491_v61 = vrot.slane %v490_v58, 1  ;;  %v508_v5 = vrot.slane %v507_v48, 4  ;;  %v521_v33 = vsel %vm415_vm1, %v398_v56, 0.0 }
 0x1db   :  { %v497_v35 = vadd.f32 %v496_v6, %v495_v23  ;;  %v1400_v24 = vsel %vm1301_vm3, %v471_v44, %v1399_v9  ;;  %v504_v27 = vadd.f32 %v503_v28, %v502_v2  ;;  %v4737_v53 = vperm.slane %v3646_v15, 0 }
 0x1dc   :  { %v514_v49 = vsel %vm415_vm1, %v397_v21, 0.0  ;;  %v492_v23 = vadd.f32 %v491_v61, %v490_v58  ;;  %v509_v34 = vadd.f32 %v508_v5, %v507_v48  ;;  %3070 = vmatmul.msk.f32.vlgmr.msra.gmra.mxu1 %vm1324_vm4, %v1400_v24  ;;  %v1593_v46 = vperm.slane %v3634_v14, 0  ;;  %v145_v21 = vld [vmem:[%s4708_s0 + $0x48] sm:$0xf] }
 0x1dd   :  { %v498_v8 = vrot.slane %v497_v35, 1  ;;  %v515_v12 = vrot.slane %v514_v49, 4  ;;  %v522_v31 = vrot.slane %v521_v33, 4  ;;  %v4738_v43 = vperm.slane %v3605_v57, 7 }
 0x1de   :  { %948 = vperm.xlu1 %3157, %v4737_v53   ;;  %v4739_v2 = vperm.slane %v3646_v15, 4  ;;  %v1600_v6 = vperm.slane %v3634_v14, 1  ;;  %v1607_v22 = vperm.slane %v3634_v14, 2  ;;  %v2226_v42 = vand.u32 2147483647, %v3555_v20  ;;  %v277_v62 = vpop.permute.xlu1 %276 }
 0x1df   :  { %v516_v36 = vadd.f32 %v515_v12, %v514_v49  ;;  %941 = vperm.xlu2 %3158, %v4738_v43   ;;  %v1401_v47 = vsel %vm4715_vm12, %v485_v52, %v478_v30  ;;  %v499_v29 = vadd.f32 %v498_v8, %v497_v35  ;;  %v510_v44 = vrot.slane %v509_v34, 2  ;;  %v291_v5 = vpop.permute.xlu2 %290 }
 0x1e0   :  { %976 = vperm.xlu0 %3159, %v4739_v2   ;;  %v523_v58 = vadd.f32 %v522_v31, %v521_v33  ;;  %v399_v51 = vmul.f32 %v277_v62, %v143_v40  ;;  %v2219_v56 = vsub.f32 1.0, %v3711_v1  ;;  %v1402_v9 = vsel %vm1291_vm13, %v492_v23, %v1401_v47  ;;  %v146_v47 = vld [vmem:[%s4708_s0 + $0x4c] sm:$0xf] }
 0x1e1   :  { %v284_v57 = vpop.permute.xlu0 %283  ;;  %v517_v28 = vrot.slane %v516_v36, 2  ;;  %v505_v49 = vrot.slane %v504_v27, 1  ;;  %v511_v61 = vadd.f32 %v510_v44, %v509_v34  ;;  %v401_v52 = vmul.f32 %v291_v5, %v145_v21 }
 0x1e2   :  { %v400_v48 = vmul.f32 %v284_v57, %v144_v37  ;;  %v524_v30 = vrot.slane %v523_v58, 2  ;;  %v528_v8 = vsel %vm415_vm1, %v399_v51, 0.0  ;;  %v1403_v33 = vsel %vm1293_vm14, %v499_v29, %v1402_v9  ;;  %v147_v29 = vld [vmem:[%s4708_s0 + $0x50] sm:$0xf] }
 0x1e3   :  { %v518_v35 = vadd.f32 %v517_v28, %v516_v36  ;;  %v512_v24 = vrot.slane %v511_v61, 1  ;;  %v529_v12 = vrot.slane %v528_v8, 4  ;;  %v542_v1 = vsel %vm415_vm1, %v401_v52, 0.0 }
 0x1e4   :  { %v535_v53 = vsel %vm415_vm1, %v400_v48, 0.0  ;;  %v525_v40 = vadd.f32 %v524_v30, %v523_v58  ;;  %v506_v23 = vadd.f32 %v505_v49, %v504_v27  ;;  %v543_v2 = vrot.slane %v542_v1, 4  ;;  %v148_v49 = vld [vmem:[%s4708_s0 + $0x54] sm:$0xf] }
 0x1e5   :  { %v519_v37 = vrot.slane %v518_v35, 1  ;;  %v536_v31 = vrot.slane %v535_v53, 4  ;;  %v513_v43 = vadd.f32 %v512_v24, %v511_v61  ;;  %v530_v34 = vadd.f32 %v529_v12, %v528_v8 }
 0x1e6   :  { %v4740_v36 = vperm.slane %v3646_v15, 3  ;;  %v2228_v44 = vand.u32 2147483648, %v3555_v20  ;;  %v526_v62 = vrot.slane %v525_v40, 1  ;;  %v4741_v27 = vperm.slane %v3646_v15, 2  ;;  %v298_v9 = vpop.permute.xlu1 %297 }
 0x1e7   :  { %v520_v21 = vadd.f32 %v519_v37, %v518_v35  ;;  %v537_v57 = vadd.f32 %v536_v31, %v535_v53  ;;  %v4742_v58 = vperm.slane %v3646_v15, 7  ;;  %v2220_v28 = vmul.f32 %v3692_v55, %v2219_v56  ;;  %v312_v53 = vpop.permute.xlu2 %311 }
 0x1e8   :  { %969 = vperm.xlu1 %3157, %v4740_v36   ;;  %962 = vperm.xlu2 %3158, %v4741_v27   ;;  %v531_v51 = vrot.slane %v530_v34, 2  ;;  %v544_v48 = vadd.f32 %v543_v2, %v542_v1  ;;  %v1404_v5 = vsel %vm1295_vm15, %v506_v23, %v1403_v33  ;;  %v402_v35 = vmul.f32 %v298_v9, %v146_v47 }
 0x1e9   :  { %997 = vperm.xlu0 %3159, %v4742_v58   ;;  %v305_v61 = vpop.permute.xlu0 %304  ;;  %v538_v30 = vrot.slane %v537_v57, 2  ;;  %v1405_v52 = vsel %vm1297_vm0, %v513_v43, %v1404_v5  ;;  %v527_v37 = vadd.f32 %v526_v62, %v525_v40  ;;  %v404_v2 = vmul.f32 %v312_v53, %v148_v49 }
 0x1ea   :  { %v403_v8 = vmul.f32 %v305_v61, %v147_v29  ;;  %v532_v24 = vadd.f32 %v531_v51, %v530_v34  ;;  %v545_v12 = vrot.slane %v544_v48, 2  ;;  %v1406_v56 = vsel %vm1299_vm2, %v520_v21, %v1405_v52  ;;  %v150_v51 = vld [vmem:[%s4708_s0 + $0x5c] sm:$0xf] }
 0x1eb   :  { %v539_v1 = vadd.f32 %v538_v30, %v537_v57  ;;  %v549_v31 = vsel %vm415_vm1, %v402_v35, 0.0  ;;  %v4743_v27 = vand.u32 2147483647, %v3424_v39  ;;  %v2221_v23 = vadd.f32 %v3692_v55, %v2220_v28  ;;  %v149_v28 = vld [vmem:[%s4708_s0 + $0x58] sm:$0xf] }
 0x1ec   :  { %v556_v36 = vsel %vm415_vm1, %v403_v8, 0.0  ;;  %v550_v43 = vrot.slane %v549_v31, 4  ;;  %v563_v47 = vsel %vm415_vm1, %v404_v2, 0.0  ;;  %v1407_v29 = vsel %vm1301_vm3, %v527_v37, %v1406_v56 }
 0x1ed   :  { %vm3813_vm5 = vcmp.eq.f32.partialorder %v4743_v27, 8.507059e+37  ;;  %v557_v40 = vrot.slane %v556_v36, 4  ;;  %v540_v34 = vrot.slane %v539_v1, 1  ;;  %v533_v62 = vrot.slane %v532_v24, 1  ;;  %3071 = vmatmul.msk.f32.gmra.mxu1 %vm1324_vm4, %v1407_v29 }
 0x1ee   :  { %v546_v21 = vadd.f32 %v545_v12, %v544_v48  ;;  %v551_v39 = vadd.f32 %v550_v43, %v549_v31  ;;  %v564_v57 = vrot.slane %v563_v47, 4  ;;  %v4746_v58 = vperm.slane %v3646_v15, 6  ;;  %v319_v8 = vpop.permute.xlu1 %318  ;;  %v152_v48 = vld [vmem:[%s4708_s0 + $0x64] sm:$0xf] }
 0x1ef   :  { %vm3839_vm10 = vcmp.eq.f32.partialorder %v2226_v42, 8.507059e+37  ;;  %v2229_v49 = vor.u32 1.1754944e-38, %v2228_v44  ;;  %v558_v61 = vadd.f32 %v557_v40, %v556_v36  ;;  %v4751_v5 = vperm.slane %v3646_v15, 5  ;;  %v151_v44 = vld [vmem:[%s4708_s0 + $0x60] sm:$0xf]  ;;  %v333_v36 = vpop.permute.xlu2 %332 }
 0x1f0   :  { %990 = vperm.xlu1 %3157, %v4746_v58   ;;  %v1628_v30 = vperm.slane %v3634_v14, 5  ;;  %v2225_v35 = vsel %vm3833_vm9, %v3692_v55, %v2221_v23  ;;  %v552_v20 = vrot.slane %v551_v39, 2  ;;  %v565_v42 = vadd.f32 %v564_v57, %v563_v47 }
 0x1f1   :  { %983 = vperm.xlu2 %3158, %v4751_v5   ;;  %1598 = vperm.xlu0 %3159, %v1593_v46   ;;  %v326_v15 = vpop.permute.xlu0 %325  ;;  %v541_v52 = vadd.f32 %v540_v34, %v539_v1  ;;  %v559_v12 = vrot.slane %v558_v61, 2  ;;  %v405_v53 = vmul.f32 %v319_v8, %v149_v28  ;;  %v534_v37 = vadd.f32 %v533_v62, %v532_v24 }
 0x1f2   :  { %v406_v46 = vmul.f32 %v326_v15, %v150_v51  ;;  %v547_v56 = vrot.slane %v546_v21, 1  ;;  %v553_v31 = vadd.f32 %v552_v20, %v551_v39  ;;  %v566_v2 = vrot.slane %v565_v42, 2  ;;  %v3861_v39 = vpop.eup %3221 }
 0x1f3   :  { %v560_v55 = vadd.f32 %v559_v12, %v558_v61  ;;  %v570_v27 = vsel %vm415_vm1, %v405_v53, 0.0  ;;  %v407_v23 = vmul.f32 %v333_v36, %v151_v44  ;;  %v2230_v40 = vsel %vm3839_vm10, %v2229_v49, %v2225_v35  ;;  %v153_v49 = vld [vmem:[%s4708_s0 + $0x68] sm:$0xf] }
 0x1f4   :  { %v577_v43 = vsel %vm415_vm1, %v406_v46, 0.0  ;;  %v554_v47 = vrot.slane %v553_v31, 1  ;;  %v571_v29 = vrot.slane %v570_v27, 4  ;;  %v1408_v34 = vsel %vm4715_vm12, %v541_v52, %v534_v37 }
 0x1f5   :  { %v578_v1 = vrot.slane %v577_v43, 4  ;;  %v567_v57 = vadd.f32 %v566_v2, %v565_v42  ;;  %v561_v24 = vrot.slane %v560_v55, 1  ;;  %v584_v62 = vsel %vm415_vm1, %v407_v23, 0.0 }
 0x1f6   :  { %v548_v58 = vadd.f32 %v547_v56, %v546_v21  ;;  %v555_v28 = vadd.f32 %v554_v47, %v553_v31  ;;  %v572_v51 = vadd.f32 %v571_v29, %v570_v27  ;;  %v585_v9 = vrot.slane %v584_v62, 4 }
 0x1f7   :  { %v4752_v61 = vsel %vm3652_vm11, %v3514_v54, %v3637_v18  ;;  %v579_v5 = vadd.f32 %v578_v1, %v577_v43  ;;  %v1614_v35 = vperm.slane %v3634_v14, 3  ;;  %v3886_v20 = vmul.f32 %v3428_v60, %v2230_v40  ;;  %v340_v54 = vpop.permute.xlu1 %339  ;;  %v154_v18 = vld [vmem:[%s4708_s0 + $0x6c] sm:$0xf]  ;;  %v354_v12 = vpop.permute.xlu2 %353 }
 0x1f8   :  { %1612 = vperm.xlu1 %3157, %v1607_v22   ;;  %v3879_v21 = vsel %vm3813_vm5, %v3639_v19, %v4752_v61  ;;  %v1621_v22 = vperm.slane %v3634_v14, 4  ;;  %v562_v10 = vadd.f32 %v561_v24, %v560_v55  ;;  %v573_v42 = vrot.slane %v572_v51, 2 }
 0x1f9   :  { %1605 = vperm.xlu2 %3158, %v1600_v6   ;;  %1633 = vperm.xlu0 %3159, %v1628_v30   ;;  %v347_v19 = vpop.permute.xlu0 %346  ;;  %v1409_v33 = vsel %vm1291_vm13, %v548_v58, %v1408_v34  ;;  %v568_v8 = vrot.slane %v567_v57, 1  ;;  %v580_v6 = vrot.slane %v579_v5, 2  ;;  %v408_v30 = vmul.f32 %v340_v54, %v152_v48  ;;  %v156_v58 = vld [vmem:[%s4708_s0 + $0x74] sm:$0xf] }
 0x1fa   :  { %v409_v44 = vmul.f32 %v347_v19, %v153_v49  ;;  %v2233_v15 = vmul.f32 %v3861_v39, %v3546_v4  ;;  %v574_v52 = vadd.f32 %v573_v42, %v572_v51  ;;  %v586_v60 = vadd.f32 %v585_v9, %v584_v62  ;;  %v155_v62 = vld [vmem:[%s4708_s0 + $0x70] sm:$0xf] }
 0x1fb   :  { %v1410_v53 = vsel %vm1293_vm14, %v555_v28, %v1409_v33  ;;  %v581_v46 = vadd.f32 %v580_v6, %v579_v5  ;;  %v591_v37 = vsel %vm415_vm1, %v408_v30, 0.0  ;;  %v410_v56 = vmul.f32 %v354_v12, %v154_v18 }
 0x1fc   :  { %v598_v31 = vsel %vm415_vm1, %v409_v44, 0.0  ;;  %v575_v2 = vrot.slane %v574_v52, 1  ;;  %v592_v36 = vrot.slane %v591_v37, 4  ;;  %v1411_v27 = vsel %vm1295_vm15, %v562_v10, %v1410_v53  ;;  %v157_v10 = vld [vmem:[%s4708_s0 + $0x78] sm:$0xf] }
 0x1fd   :  { %v599_v55 = vrot.slane %v598_v31, 4  ;;  %v569_v23 = vadd.f32 %v568_v8, %v567_v57  ;;  %v582_v43 = vrot.slane %v581_v46, 1  ;;  %v605_v40 = vsel %vm415_vm1, %v410_v56, 0.0 }
 0x1fe   :  { %v2310_v47 = vperm.slane %v3886_v20, 0  ;;  %v2234_v29 = vsub.f32 1.0, %v2233_v15  ;;  %v576_v1 = vadd.f32 %v575_v2, %v574_v52  ;;  %v593_v34 = vadd.f32 %v592_v36, %v591_v37 }
 0x1ff   :  { %v606_v24 = vrot.slane %v605_v40, 4  ;;  %v4753_v57 = vand.u32 2147483648, %v3422_v38  ;;  %v600_v51 = vadd.f32 %v599_v55, %v598_v31  ;;  %v583_v9 = vadd.f32 %v582_v43, %v581_v46  ;;  %v375_v44 = vpop.permute.xlu2 %374 }
 0x200   :  { %1619 = vperm.xlu1 %3157, %v1614_v35   ;;  %v1412_v48 = vsel %vm1297_vm0, %v569_v23, %v1411_v27  ;;  %v587_v49 = vrot.slane %v586_v60, 2  ;;  %v594_v61 = vrot.slane %v593_v34, 2  ;;  %v361_v35 = vpop.permute.xlu1 %360  ;;  %v2235_v8 = vmul.f32 %v3861_v39, %v2234_v29 }
 0x201   :  { %v3908_v28 = vor.u32 1.1754944e-38, %v4753_v57  ;;  %1626 = vperm.xlu2 %3158, %v1621_v22   ;;  %2315 = vperm.xlu0 %3159, %v2310_v47   ;;  %v607_v5 = vadd.f32 %v606_v24, %v605_v40  ;;  %v368_v42 = vpop.permute.xlu0 %367  ;;  %v1413_v54 = vsel %vm1299_vm2, %v576_v1, %v1412_v48  ;;  %v601_v18 = vrot.slane %v600_v51, 2  ;;  %v3035_v1 = vld [vmem:[%s4708_s0 + $0x88] sm:$0xf] }
 0x202   :  { %v411_v19 = vmul.f32 %v361_v35, %v155_v62  ;;  %v412_v33 = vmul.f32 %v368_v42, %v156_v58  ;;  %v1414_v22 = vsel %vm1301_vm3, %v583_v9, %v1413_v54  ;;  %v2241_v6 = vand.u32 2147483647, %v3546_v4  ;;  %v3034_v9 = vld [vmem:[%s4708_s0 + $0x84] sm:$0xf] }
 0x203   :  { %v595_v30 = vadd.f32 %v594_v61, %v593_v34  ;;  %3072 = vmatmul.msk.f32.gmra.mxu1 %vm1324_vm4, %v1414_v22  ;;  %v1635_v15 = vperm.slane %v3634_v14, 6  ;;  %v602_v52 = vadd.f32 %v601_v18, %v600_v51  ;;  %v413_v53 = vmul.f32 %v375_v44, %v157_v10 }
 0x204   :  { %v612_v12 = vsel %vm415_vm1, %v411_v19, 0.0  ;;  %v619_v46 = vsel %vm415_vm1, %v412_v33, 0.0  ;;  %v588_v37 = vadd.f32 %v587_v49, %v586_v60  ;;  %v608_v56 = vrot.slane %v607_v5, 2  ;;  %v158_v60 = vld [vmem:[%s4708_s0 + $0x7c] sm:$0xf] }
 0x205   :  { %v613_v31 = vrot.slane %v612_v12, 4  ;;  %v620_v2 = vrot.slane %v619_v46, 4  ;;  %v2243_v36 = vand.u32 2147483648, %v3546_v4  ;;  %v626_v55 = vsel %vm415_vm1, %v413_v53, 0.0 }
 0x206   :  { %v2317_v27 = vperm.slane %v3886_v20, 1  ;;  %v2324_v23 = vperm.slane %v3886_v20, 2  ;;  %v3928_v43 = vmul.f32 %v3384_v17, %v3879_v21  ;;  %v596_v40 = vrot.slane %v595_v30, 1 }
 0x207   :  { %v614_v47 = vadd.f32 %v613_v31, %v612_v12  ;;  %v627_v29 = vrot.slane %v626_v55, 4  ;;  %v3937_v34 = vadd.f32 %v3861_v39, %v2235_v8  ;;  %vm2238_vm11 = vweird.f32 %v3861_v39  ;;  %v788_v19 = vpop.permute.xlu2 %787 }
 0x208   :  { %1640 = vperm.xlu1 %3157, %v1635_v15   ;;  %v603_v24 = vrot.slane %v602_v52, 1  ;;  %v621_v17 = vadd.f32 %v620_v2, %v619_v46  ;;  %v589_v21 = vrot.slane %v588_v37, 1  ;;  %v609_v62 = vadd.f32 %v608_v56, %v607_v5  ;;  %v382_v51 = vpop.permute.xlu1 %381 }
 0x209   :  { %2322 = vperm.xlu2 %3158, %v2317_v27   ;;  %2329 = vperm.xlu0 %3159, %v2324_v23   ;;  %v615_v58 = vrot.slane %v614_v47, 2  ;;  %v628_v57 = vadd.f32 %v627_v29, %v626_v55  ;;  %v795_v48 = vpop.permute.xlu0 %794  ;;  %v414_v61 = vmul.f32 %v382_v51, %v158_v60  ;;  %v2331_v10 = vperm.slane %v3886_v20, 3 }
 0x20a   :  { %v622_v49 = vrot.slane %v621_v17, 2  ;;  %v1001_v35 = vmul.f32 %v3035_v1, %v795_v48  ;;  %v597_v42 = vadd.f32 %v596_v40, %v595_v30  ;;  %v2352_v33 = vperm.slane %v3886_v20, 6  ;;  %v3037_v40 = vld [vmem:[%s4708_s0 + $0x90] sm:$0xf] }
 0x20b   :  { %v616_v54 = vadd.f32 %v615_v58, %v614_v47  ;;  %v629_v18 = vrot.slane %v628_v57, 2  ;;  %vm1551_vm5 = vweird.f32 %v3536_v32  ;;  %v604_v5 = vadd.f32 %v603_v24, %v602_v52 }
 0x20c   :  { %v623_v22 = vadd.f32 %v622_v49, %v621_v17  ;;  %v633_v8 = vsel %vm415_vm1, %v414_v61, 0.0  ;;  %v1000_v44 = vmul.f32 %v3034_v9, %v788_v19  ;;  %v4754_v15 = vand.u32 2147483647, %v3426_v41 }
 0x20d   :  { %v590_v53 = vadd.f32 %v589_v21, %v588_v37  ;;  %v610_v30 = vrot.slane %v609_v62, 1  ;;  %v617_v46 = vrot.slane %v616_v54, 1  ;;  %v634_v56 = vrot.slane %v633_v8, 4  ;;  %v3033_v37 = vld [vmem:[%s4708_s0 + $0x80] sm:$0xf] }
 0x20e   :  { %vm3949_vm6 = vcmp.eq.f32.partialorder %v4754_v15, 8.507059e+37  ;;  %v624_v31 = vrot.slane %v623_v22, 1  ;;  %v1038_v2 = vsel %vm415_vm1, %v1000_v44, 0.0  ;;  %v1045_v52 = vsel %vm415_vm1, %v1001_v35, 0.0 }
 0x20f   :  { %v2338_v55 = vperm.slane %v3886_v20, 4  ;;  %vm2237_vm9 = vweird.f32 %v3546_v4  ;;  %v1415_v41 = vsel %vm4715_vm12, %v597_v42, %v590_v53  ;;  %v630_v27 = vadd.f32 %v629_v18, %v628_v57 }
 0x210   :  { %v635_v23 = vadd.f32 %v634_v56, %v633_v8  ;;  %2357 = vperm.xlu1 %3157, %v2352_v33   ;;  %vm3967_vm10 = vcmp.eq.f32.partialorder %v2241_v6, 8.507059e+37  ;;  %v2244_v29 = vor.u32 1.1754944e-38, %v2243_v36  ;;  %v1416_v60 = vsel %vm1291_vm13, %v604_v5, %v1415_v41  ;;  %vm3974_vm12 = vmor %vm2237_vm9, %vm2238_vm11  ;;  %v781_v6 = vpop.permute.xlu1 %780  ;;  %v3038_v36 = vld [vmem:[%s4708_s0 + $0x94] sm:$0xf] }
 0x211   :  { %v1039_v1 = vrot.slane %v1038_v2, 4  ;;  %2336 = vperm.xlu2 %3158, %v2331_v10   ;;  %2343 = vperm.xlu0 %3159, %v2338_v55   ;;  %v611_v17 = vadd.f32 %v610_v30, %v609_v62  ;;  %v618_v21 = vadd.f32 %v617_v46, %v616_v54  ;;  %v1046_v4 = vrot.slane %v1045_v52, 4  ;;  %v809_v57 = vpop.permute.xlu0 %808  ;;  %v816_v62 = vpop.permute.xlu2 %815  ;;  %v3065_v30 = vld [vmem:[%s4709_s3 + $0x8] sm:$0xff] }
 0x212   :  { %v636_v58 = vrot.slane %v635_v23, 2  ;;  %v2240_v51 = vsel %vm3974_vm12, %v3861_v39, %v3937_v34  ;;  %v625_v9 = vadd.f32 %v624_v31, %v623_v22  ;;  %v999_v48 = vmul.f32 %v3033_v37, %v781_v6  ;;  %vm3999_vm12 = vmor %vm1550_vm7, %vm1551_vm5  ;;  %1348 = vmatpush.msra.mxu0 %v3065_v30 }
 0x213   :  { %v1003_v49 = vmul.f32 %v3037_v40, %v809_v57  ;;  %v631_v61 = vrot.slane %v630_v27, 1  ;;  %v2359_v10 = vperm.slane %v3886_v20, 7  ;;  %v1417_v42 = vsel %vm1293_vm14, %v611_v17, %v1416_v60 }
 0x214   :  { %v637_v35 = vadd.f32 %v636_v58, %v635_v23  ;;  %v1040_v54 = vadd.f32 %v1039_v1, %v1038_v2  ;;  %v1031_v18 = vsel %vm415_vm1, %v999_v48, 0.0  ;;  %v1004_v19 = vmul.f32 %v3038_v36, %v816_v62 }
 0x215   :  { %v1059_v33 = vsel %vm415_vm1, %v1003_v49, 0.0  ;;  %v1047_v8 = vadd.f32 %v1046_v4, %v1045_v52  ;;  %v1032_v44 = vrot.slane %v1031_v18, 4  ;;  %v1418_v39 = vsel %vm1295_vm15, %v618_v21, %v1417_v42 }
 0x216   :  { %v638_v5 = vrot.slane %v637_v35, 1  ;;  %v2245_v34 = vsel %vm3967_vm10, %v2244_v29, %v2240_v51  ;;  %v1642_v22 = vperm.slane %v3634_v14, 7  ;;  %v2345_v15 = vperm.slane %v3886_v20, 5  ;;  %v3036_v14 = vld [vmem:[%s4708_s0 + $0x8c] sm:$0xf] }
 0x217   :  { %v1419_v53 = vsel %vm1297_vm0, %v625_v9, %v1418_v39  ;;  %v632_v46 = vadd.f32 %v631_v61, %v630_v27  ;;  %v1033_v56 = vadd.f32 %v1032_v44, %v1031_v18  ;;  %v1066_v31 = vsel %vm415_vm1, %v1004_v19, 0.0  ;;  %v3040_v20 = vld [vmem:[%s4708_s0 + $0x9c] sm:$0xf]  ;;  %v3039_v18 = vld [vmem:[%s4708_s0 + $0x98] sm:$0xf] }
 0x218   :  { %v1060_v2 = vrot.slane %v1059_v33, 4  ;;  %2364 = vperm.xlu1 %3157, %v2359_v10   ;;  %v4763_v52 = vsel %vm3617_vm8, %v3502_v45, %v3610_v50  ;;  %v1553_v41 = vsel %vm3999_vm12, %v3536_v32, %v3660_v11  ;;  %v4764_v27 = vand.u32 2147483647, %v3422_v38  ;;  %v802_v12 = vpop.permute.xlu1 %801  ;;  %v3041_v32 = vld [vmem:[%s4708_s0 + $0xa0] sm:$0xf] }
 0x219   :  { %v1543_v55 = vsel %vm3949_vm6, %v3565_v26, %v4763_v52  ;;  %v1041_v37 = vrot.slane %v1040_v54, 2  ;;  %1647 = vperm.xlu2 %3158, %v1642_v22   ;;  %2350 = vperm.xlu0 %3159, %v2345_v15   ;;  %v639_v59 = vadd.f32 %v638_v5, %v637_v35  ;;  %v4029_v45 = vmul.f32 %v3436_v3, %v2245_v34  ;;  %v830_v11 = vpop.permute.xlu0 %829  ;;  %v837_v17 = vpop.permute.xlu2 %836  ;;  %v3043_v19 = vld [vmem:[%s4708_s0 + $0xa8] sm:$0xf]  ;;  %v3044_v15 = vld [vmem:[%s4708_s0 + $0xac] sm:$0xf] }
 0x21a   :  { %vm4024_vm11 = vcmp.eq.f32.partialorder %v4764_v27, 8.507059e+37  ;;  %v1048_v50 = vrot.slane %v1047_v8, 2  ;;  %v1034_v26 = vrot.slane %v1033_v56, 2  ;;  %v1420_v38 = vsel %vm1299_vm2, %v632_v46, %v1419_v53 }
 0x21b   :  { %v1067_v40 = vrot.slane %v1066_v31, 4  ;;  %v1002_v47 = vmul.f32 %v3036_v14, %v802_v12  ;;  %v1421_v29 = vsel %vm1301_vm3, %v639_v59, %v1420_v38  ;;  %v1006_v60 = vmul.f32 %v3040_v20, %v830_v11  ;;  %v4072_v38 = vpop.eup %3223 }
 0x21c   :  { %v1035_v1 = vadd.f32 %v1034_v26, %v1033_v56  ;;  %v1061_v24 = vadd.f32 %v1060_v2, %v1059_v33  ;;  %3073 = vmatmul.msk.f32.gmra.mxu1 %vm1324_vm4, %v1421_v29  ;;  %v1649_v3 = vperm.slane %v3928_v43, 0  ;;  %v1656_v21 = vperm.slane %v3928_v43, 1 }
 0x21d   :  { %v1042_v58 = vadd.f32 %v1041_v37, %v1040_v54  ;;  %v1052_v4 = vsel %vm415_vm1, %v1002_v47, 0.0  ;;  %v1007_v6 = vmul.f32 %v3041_v32, %v837_v17  ;;  %v1080_v36 = vsel %vm415_vm1, %v1006_v60, 0.0 }
 0x21e   :  { %v1049_v57 = vadd.f32 %v1048_v50, %v1047_v8  ;;  %v1053_v51 = vrot.slane %v1052_v4, 4  ;;  %v2366_v9 = vperm.slane %v4029_v45, 0  ;;  %v1663_v48 = vperm.slane %v3928_v43, 2 }
 0x21f   :  { %v1036_v49 = vrot.slane %v1035_v1, 1  ;;  %v1068_v61 = vadd.f32 %v1067_v40, %v1066_v31  ;;  %v1081_v35 = vrot.slane %v1080_v36, 4  ;;  %v1670_v62 = vperm.slane %v3928_v43, 3 }
 0x220   :  { %v4045_v10 = vmul.f32 %v3376_v13, %v1543_v55  ;;  %v1062_v42 = vrot.slane %v1061_v24, 2  ;;  %v1054_v54 = vadd.f32 %v1053_v51, %v1052_v4  ;;  %2371 = vperm.xlu1 %3157, %v2366_v9   ;;  %v1691_v33 = vperm.slane %v3928_v43, 6  ;;  %v823_v22 = vpop.permute.xlu1 %822 }
 0x221   :  { %v1043_v5 = vrot.slane %v1042_v58, 1  ;;  %v1087_v8 = vsel %vm415_vm1, %v1007_v6, 0.0  ;;  %v1082_v13 = vadd.f32 %v1081_v35, %v1080_v36  ;;  %1654 = vperm.xlu2 %3158, %v1649_v3   ;;  %1661 = vperm.xlu0 %3159, %v1656_v21   ;;  %v4059_v44 = vsel %vm4024_vm11, %v3908_v28, %v1553_v41  ;;  %v851_v53 = vpop.permute.xlu0 %850  ;;  %v858_v55 = vpop.permute.xlu2 %857  ;;  %v3042_v3 = vld [vmem:[%s4708_s0 + $0xa4] sm:$0xf]  ;;  %v3046_v21 = vld [vmem:[%s4708_s0 + $0xb4] sm:$0xf] }
 0x222   :  { %v1050_v39 = vrot.slane %v1049_v57, 1  ;;  %v1055_v34 = vrot.slane %v1054_v54, 2  ;;  %v1677_v46 = vperm.slane %v3928_v43, 4  ;;  %v1037_v56 = vadd.f32 %v1036_v49, %v1035_v1 }
 0x223   :  { %v1069_v31 = vrot.slane %v1068_v61, 2  ;;  %v1005_v2 = vmul.f32 %v3039_v18, %v823_v22  ;;  %v1009_v14 = vmul.f32 %v3043_v19, %v851_v53  ;;  %v1063_v28 = vadd.f32 %v1062_v42, %v1061_v24 }
 0x224   :  { %v1056_v20 = vadd.f32 %v1055_v34, %v1054_v54  ;;  %v1088_v52 = vrot.slane %v1087_v8, 4  ;;  %v1684_v41 = vperm.slane %v3928_v43, 5  ;;  %v1044_v27 = vadd.f32 %v1043_v5, %v1042_v58 }
 0x225   :  { %v1083_v23 = vrot.slane %v1082_v13, 2  ;;  %v1073_v37 = vsel %vm415_vm1, %v1005_v2, 0.0  ;;  %v1010_v59 = vmul.f32 %v3044_v15, %v858_v55  ;;  %v2380_v12 = vperm.slane %v4029_v45, 2 }
 0x226   :  { %v1057_v50 = vrot.slane %v1056_v20, 1  ;;  %v1074_v26 = vrot.slane %v1073_v37, 4  ;;  %v1712_v32 = vperm.slane %v4045_v10, 1  ;;  %v1051_v11 = vadd.f32 %v1050_v39, %v1049_v57 }
 0x227   :  { %vm4767_vm8 = vcmask 1041409   ;;  %v1070_v47 = vadd.f32 %v1069_v31, %v1068_v61  ;;  %v1101_v29 = vsel %vm415_vm1, %v1009_v14, 0.0  ;;  %v1064_v60 = vrot.slane %v1063_v28, 1  ;;  %v3047_v61 = vld [vmem:[%s4708_s0 + $0xb8] sm:$0xf] }
 0x228   :  { %v1290_v40 = vsel %vm4767_vm8, %v1044_v27, %v1037_v56  ;;  %v1058_v1 = vadd.f32 %v1057_v50, %v1056_v20  ;;  %v1089_v24 = vadd.f32 %v1088_v52, %v1087_v8  ;;  %v1075_v17 = vadd.f32 %v1074_v26, %v1073_v37  ;;  %2385 = vperm.xlu1 %3157, %v2380_v12   ;;  %v844_v49 = vpop.permute.xlu1 %843  ;;  %v3045_v37 = vld [vmem:[%s4708_s0 + $0xb0] sm:$0xf]  ;;  %vm4768_vm7 = vmmov %vm4767_vm8 }
 0x229   :  { %v1084_v58 = vadd.f32 %v1083_v23, %v1082_v13  ;;  %v1108_v4 = vsel %vm415_vm1, %v1010_v59, 0.0  ;;  %1668 = vperm.xlu2 %3158, %v1663_v48   ;;  %1675 = vperm.xlu0 %3159, %v1670_v62   ;;  %v1698_v6 = vperm.slane %v3928_v43, 7  ;;  %v1726_v36 = vperm.slane %v4045_v10, 3  ;;  %v872_v35 = vpop.permute.xlu0 %871  ;;  %v879_v39 = vpop.permute.xlu2 %878  ;;  %v3049_v59 = vld [vmem:[%s4708_s0 + $0xc0] sm:$0xf]  ;;  %vm4773_vm12 = vmmov %vm4768_vm7 }
 0x22a   :  { %v4087_v57 = vmul.f32 %v4072_v38, %v3491_v25  ;;  %v1076_v51 = vrot.slane %v1075_v17, 2  ;;  %v1102_v9 = vrot.slane %v1101_v29, 4  ;;  %v1292_v42 = vsel %vm1291_vm13, %v1051_v11, %v1290_v40 }
 0x22b   :  { %v1071_v48 = vrot.slane %v1070_v47, 1  ;;  %v1008_v62 = vmul.f32 %v3042_v3, %v844_v49  ;;  %v1012_v54 = vmul.f32 %v3046_v21, %v872_v35  ;;  %v1294_v18 = vsel %vm1293_vm14, %v1058_v1, %v1292_v42  ;;  %v3050_v1 = vld [vmem:[%s4708_s0 + $0xc4] sm:$0xf] }
 0x22c   :  { %v1065_v19 = vadd.f32 %v1064_v60, %v1063_v28  ;;  %v1090_v5 = vrot.slane %v1089_v24, 2  ;;  %v1077_v8 = vadd.f32 %v1076_v51, %v1075_v17  ;;  %v1109_v13 = vrot.slane %v1108_v4, 4 }
 0x22d   :  { %v1085_v34 = vrot.slane %v1084_v58, 1  ;;  %v1094_v22 = vsel %vm415_vm1, %v1008_v62, 0.0  ;;  %v1013_v15 = vmul.f32 %v3047_v61, %v879_v39  ;;  %v1122_v53 = vsel %vm415_vm1, %v1012_v54, 0.0 }
 0x22e   :  { %v1078_v30 = vrot.slane %v1077_v8, 1  ;;  %v1103_v56 = vadd.f32 %v1102_v9, %v1101_v29  ;;  %v1095_v31 = vrot.slane %v1094_v22, 4  ;;  %v1296_v2 = vsel %vm1295_vm15, %v1065_v19, %v1294_v18 }
 0x22f   :  { %v1072_v14 = vadd.f32 %v1071_v48, %v1070_v47  ;;  %v1129_v20 = vsel %vm415_vm1, %v1013_v15, 0.0  ;;  %v1123_v52 = vrot.slane %v1122_v53, 4  ;;  %v2373_v28 = vperm.slane %v4029_v45, 1 }
 0x230   :  { %v1079_v55 = vadd.f32 %v1078_v30, %v1077_v8  ;;  %v1110_v27 = vadd.f32 %v1109_v13, %v1108_v4  ;;  %v1096_v23 = vadd.f32 %v1095_v31, %v1094_v22  ;;  %1696 = vperm.xlu1 %3157, %v1691_v33   ;;  %v1705_v50 = vperm.slane %v4045_v10, 0  ;;  %v865_v60 = vpop.permute.xlu1 %864  ;;  %v3052_v30 = vld [vmem:[%s4708_s0 + $0xcc] sm:$0xf] }
 0x231   :  { %v2249_v26 = vsub.f32 1.0, %v4087_v57  ;;  %v1091_v12 = vadd.f32 %v1090_v5, %v1089_v24  ;;  %2378 = vperm.xlu2 %3158, %v2373_v28   ;;  %1682 = vperm.xlu0 %3159, %v1677_v46   ;;  %v1086_v11 = vadd.f32 %v1085_v34, %v1084_v58  ;;  %v1298_v33 = vsel %vm1297_vm0, %v1072_v14, %v1296_v2  ;;  %v893_v3 = vpop.permute.xlu0 %892  ;;  %v900_v51 = vpop.permute.xlu2 %899 }
 0x232   :  { %v1104_v40 = vrot.slane %v1103_v56, 2  ;;  %v1097_v47 = vrot.slane %v1096_v23, 2  ;;  %v1130_v29 = vrot.slane %v1129_v20, 4  ;;  %v1300_v17 = vsel %vm1299_vm2, %v1079_v55, %v1298_v33 }
 0x233   :  { %v1124_v21 = vadd.f32 %v1123_v52, %v1122_v53  ;;  %v1011_v24 = vmul.f32 %v3045_v37, %v865_v60  ;;  %v1302_v4 = vsel %vm1301_vm3, %v1086_v11, %v1300_v17  ;;  %v1015_v57 = vmul.f32 %v3049_v59, %v893_v3  ;;  %v3048_v53 = vld [vmem:[%s4708_s0 + $0xbc] sm:$0xf] }
 0x234   :  { %vm2252_vm5 = vweird.f32 %v3491_v25  ;;  %v1111_v46 = vrot.slane %v1110_v27, 2  ;;  %v1098_v58 = vadd.f32 %v1097_v47, %v1096_v23  ;;  %3066 = vmatmul.msk.f32.vlgmr.msra.gmra.mxu0 %vm1324_vm4, %v1302_v4  ;;  %v2401_v9 = vperm.slane %v4029_v45, 5 }
 0x235   :  { %v1092_v49 = vrot.slane %v1091_v12, 1  ;;  %v1115_v61 = vsel %vm415_vm1, %v1011_v24, 0.0  ;;  %v1016_v35 = vmul.f32 %v3050_v1, %v900_v51  ;;  %v1143_v42 = vsel %vm415_vm1, %v1015_v57, 0.0 }
 0x236   :  { %v1105_v48 = vadd.f32 %v1104_v40, %v1103_v56  ;;  %v1099_v62 = vrot.slane %v1098_v58, 1  ;;  %v1131_v54 = vadd.f32 %v1130_v29, %v1129_v20  ;;  %v1116_v18 = vrot.slane %v1115_v61, 4 }
 0x237   :  { %v2250_v19 = vmul.f32 %v4072_v38, %v2249_v26  ;;  %v1125_v5 = vrot.slane %v1124_v21, 2  ;;  %v1150_v8 = vsel %vm415_vm1, %v1016_v35, 0.0  ;;  %v2387_v13 = vperm.slane %v4029_v45, 3 }
 0x238   :  { %v1112_v39 = vadd.f32 %v1111_v46, %v1110_v27  ;;  %v1100_v34 = vadd.f32 %v1099_v62, %v1098_v58  ;;  %v1117_v22 = vadd.f32 %v1116_v18, %v1115_v61  ;;  %v1144_v15 = vrot.slane %v1143_v42, 4  ;;  %2406 = vperm.xlu1 %3157, %v2401_v9   ;;  %v886_v55 = vpop.permute.xlu1 %885  ;;  %v3053_v27 = vld [vmem:[%s4708_s0 + $0xd0] sm:$0xf] }
 0x239   :  { %vm2253_vm6 = vweird.f32 %v4072_v38  ;;  %v2256_v56 = vand.u32 2147483647, %v3491_v25  ;;  %v2258_v31 = vand.u32 2147483648, %v3491_v25  ;;  %v1151_v2 = vrot.slane %v1150_v8, 4  ;;  %1689 = vperm.xlu2 %3158, %v1684_v41   ;;  %2392 = vperm.xlu0 %3159, %v2387_v13   ;;  %v914_v23 = vpop.permute.xlu0 %913  ;;  %v921_v47 = vpop.permute.xlu2 %920  ;;  %v3051_v25 = vld [vmem:[%s4708_s0 + $0xc8] sm:$0xf] }
 0x23a   :  { %v1093_v14 = vadd.f32 %v1092_v49, %v1091_v12  ;;  %v1106_v20 = vrot.slane %v1105_v48, 1  ;;  %v1132_v52 = vrot.slane %v1131_v54, 2  ;;  %v1118_v28 = vrot.slane %v1117_v22, 2  ;;  %vm4153_vm10 = vmor %vm2252_vm5, %vm2253_vm6 }
 0x23b   :  { %v4140_v37 = vadd.f32 %v4072_v38, %v2250_v19  ;;  %v1126_v59 = vadd.f32 %v1125_v5, %v1124_v21  ;;  %v1014_v26 = vmul.f32 %v3048_v53, %v886_v55  ;;  %v1018_v11 = vmul.f32 %v3052_v30, %v914_v23  ;;  %vm4774_vm5 = vmmov %vm4768_vm7 }
 0x23c   :  { %v1113_v33 = vrot.slane %v1112_v39, 1  ;;  %v1303_v41 = vsel %vm4768_vm7, %v1100_v34, %v1093_v14  ;;  %v1119_v40 = vadd.f32 %v1118_v28, %v1117_v22  ;;  %v1145_v12 = vadd.f32 %v1144_v15, %v1143_v42  ;;  %v3056_v22 = vld [vmem:[%s4708_s0 + $0xdc] sm:$0xf] }
 0x23d   :  { %v1152_v29 = vadd.f32 %v1151_v2, %v1150_v8  ;;  %v1136_v60 = vsel %vm415_vm1, %v1014_v26, 0.0  ;;  %v1019_v1 = vmul.f32 %v3053_v27, %v921_v47  ;;  %v1164_v17 = vsel %vm415_vm1, %v1018_v11, 0.0  ;;  %v4182_v26 = vpop.eup %3225 }
 0x23e   :  { %vm4145_vm9 = vcmp.eq.f32.partialorder %v2256_v56, 8.507059e+37  ;;  %v1107_v24 = vadd.f32 %v1106_v20, %v1105_v48  ;;  %v1133_v21 = vadd.f32 %v1132_v52, %v1131_v54  ;;  %v1120_v4 = vrot.slane %v1119_v40, 1  ;;  %v3055_v48 = vld [vmem:[%s4708_s0 + $0xd8] sm:$0xf] }
 0x23f   :  { %v1137_v57 = vrot.slane %v1136_v60, 4  ;;  %v1127_v58 = vrot.slane %v1126_v59, 1  ;;  %v1171_v51 = vsel %vm415_vm1, %v1019_v1, 0.0  ;;  %v1165_v9 = vrot.slane %v1164_v17, 4  ;;  %v3058_v1 = vld [vmem:[%s4708_s0 + $0xe4] sm:$0xf] }
 0x240   :  { %v2394_v49 = vperm.slane %v4029_v45, 4  ;;  %v1121_v61 = vadd.f32 %v1120_v4, %v1119_v40  ;;  %v1146_v35 = vrot.slane %v1145_v12, 2  ;;  %1717 = vperm.xlu1 %3157, %v1712_v32   ;;  %v1304_v62 = vsel %vm1291_vm13, %v1107_v24, %v1303_v41  ;;  %v907_v34 = vpop.permute.xlu1 %906 }
 0x241   :  { %v1138_v42 = vadd.f32 %v1137_v57, %v1136_v60  ;;  %v2259_v54 = vor.u32 1.1754944e-38, %v2258_v31  ;;  %v1114_v18 = vadd.f32 %v1113_v33, %v1112_v39  ;;  %v1153_v19 = vrot.slane %v1152_v29, 2  ;;  %1703 = vperm.xlu0 %3159, %v1698_v6   ;;  %v935_v15 = vpop.permute.xlu0 %934  ;;  %v942_v2 = vpop.permute.xlu2 %941  ;;  %v3054_v60 = vld [vmem:[%s4708_s0 + $0xd4] sm:$0xf] }
 0x242   :  { %2399 = vperm.xlu2 %3158, %v2394_v49   ;;  %v2255_v32 = vsel %vm4153_vm10, %v4072_v38, %v4140_v37  ;;  %v1134_v5 = vrot.slane %v1133_v21, 1  ;;  %v1172_v13 = vrot.slane %v1171_v51, 4  ;;  %v1166_v39 = vadd.f32 %v1165_v9, %v1164_v17  ;;  %vm4780_vm10 = vmmov %vm4774_vm5 }
 0x243   :  { %v1139_v8 = vrot.slane %v1138_v42, 2  ;;  %v1017_v53 = vmul.f32 %v3051_v25, %v907_v34  ;;  %v1021_v30 = vmul.f32 %v3055_v48, %v935_v15  ;;  %v1305_v43 = vsel %vm1293_vm14, %v1114_v18, %v1304_v62 }
 0x244   :  { %v1128_v6 = vadd.f32 %v1127_v58, %v1126_v59  ;;  %v1147_v56 = vadd.f32 %v1146_v35, %v1145_v12  ;;  %v1306_v38 = vsel %vm1295_vm15, %v1121_v61, %v1305_v43  ;;  %v1154_v14 = vadd.f32 %v1153_v19, %v1152_v29 }
 0x245   :  { %v1140_v31 = vadd.f32 %v1139_v8, %v1138_v42  ;;  %v1157_v20 = vsel %vm415_vm1, %v1017_v53, 0.0  ;;  %v1022_v52 = vmul.f32 %v3056_v22, %v942_v2  ;;  %v1185_v28 = vsel %vm415_vm1, %v1021_v30, 0.0  ;;  %v3057_v2 = vld [vmem:[%s4708_s0 + $0xe0] sm:$0xf] }
 0x246   :  { %v1173_v27 = vadd.f32 %v1172_v13, %v1171_v51  ;;  %v1158_v23 = vrot.slane %v1157_v20, 4  ;;  %v1186_v37 = vrot.slane %v1185_v28, 4  ;;  %v1167_v11 = vrot.slane %v1166_v39, 2  ;;  %v3059_v51 = vld [vmem:[%s4708_s0 + $0xe8] sm:$0xf] }
 0x247   :  { %v1141_v55 = vrot.slane %v1140_v31, 1  ;;  %v1192_v59 = vsel %vm415_vm1, %v1022_v52, 0.0  ;;  %v2408_v33 = vperm.slane %v4029_v45, 6  ;;  %v1307_v41 = vsel %vm1297_vm0, %v1128_v6, %v1306_v38 }
 0x248   :  { %v1135_v40 = vadd.f32 %v1134_v5, %v1133_v21  ;;  %v1159_v12 = vadd.f32 %v1158_v23, %v1157_v20  ;;  %v1193_v47 = vrot.slane %v1192_v59, 4  ;;  %v1187_v29 = vadd.f32 %v1186_v37, %v1185_v28  ;;  %1731 = vperm.xlu1 %3157, %v1726_v36   ;;  %v928_v58 = vpop.permute.xlu1 %927 }
 0x249   :  { %v2260_v17 = vsel %vm4145_vm9, %v2259_v54, %v2255_v32  ;;  %v1155_v24 = vrot.slane %v1154_v14, 1  ;;  %v1148_v4 = vrot.slane %v1147_v56, 1  ;;  %1710 = vperm.xlu0 %3159, %v1705_v50   ;;  %v1142_v21 = vadd.f32 %v1141_v55, %v1140_v31  ;;  %v956_v49 = vpop.permute.xlu0 %955  ;;  %v963_v50 = vpop.permute.xlu2 %962  ;;  %vm4779_vm9 = vmmov %vm4774_vm5 }
 0x24a   :  { %2413 = vperm.xlu2 %3158, %v2408_v33   ;;  %v1174_v57 = vrot.slane %v1173_v27, 2  ;;  %v1160_v36 = vrot.slane %v1159_v12, 2  ;;  %v1194_v46 = vadd.f32 %v1193_v47, %v1192_v59  ;;  %v1308_v9 = vsel %vm1299_vm2, %v1135_v40, %v1307_v41 }
 0x24b   :  { %v1168_v3 = vadd.f32 %v1167_v11, %v1166_v39  ;;  %v1020_v61 = vmul.f32 %v3054_v60, %v928_v58  ;;  %v1309_v35 = vsel %vm1301_vm3, %v1142_v21, %v1308_v9  ;;  %v1024_v42 = vmul.f32 %v3058_v1, %v956_v49 }
 0x24c   :  { %v1161_v25 = vadd.f32 %v1160_v36, %v1159_v12  ;;  %v1188_v48 = vrot.slane %v1187_v29, 2  ;;  %3067 = vmatmul.msk.f32.gmra.mxu0 %vm1324_vm4, %v1309_v35  ;;  %v1733_v62 = vperm.slane %v4045_v10, 4  ;;  %v1719_v54 = vperm.slane %v4045_v10, 2  ;;  %v3060_v35 = vld [vmem:[%s4708_s0 + $0xec] sm:$0xf] }
 0x24d   :  { %v4208_v18 = vmul.f32 %v3432_v63, %v2260_v17  ;;  %v1195_v19 = vrot.slane %v1194_v46, 2  ;;  %v1178_v32 = vsel %vm415_vm1, %v1020_v61, 0.0  ;;  %v1025_v5 = vmul.f32 %v3059_v51, %v963_v50 }
 0x24e   :  { %v1149_v8 = vadd.f32 %v1148_v4, %v1147_v56  ;;  %v1162_v13 = vrot.slane %v1161_v25, 1  ;;  %v1179_v34 = vrot.slane %v1178_v32, 4  ;;  %v1206_v22 = vsel %vm415_vm1, %v1024_v42, 0.0 }
 0x24f   :  { %v1156_v15 = vadd.f32 %v1155_v24, %v1154_v14  ;;  %v1175_v39 = vadd.f32 %v1174_v57, %v1173_v27  ;;  %v1169_v53 = vrot.slane %v1168_v3, 1  ;;  %v2415_v30 = vperm.slane %v4029_v45, 7  ;;  %v3061_v45 = vld [vmem:[%s4708_s0 + $0xf0] sm:$0xf] }
 0x250   :  { %v1163_v43 = vadd.f32 %v1162_v13, %v1161_v25  ;;  %v1189_v6 = vadd.f32 %v1188_v48, %v1187_v29  ;;  %v1180_v31 = vadd.f32 %v1179_v34, %v1178_v32  ;;  %v1213_v63 = vsel %vm415_vm1, %v1025_v5, 0.0  ;;  %1738 = vperm.xlu1 %3157, %v1733_v62   ;;  %v949_v55 = vpop.permute.xlu1 %948  ;;  %v3064_v48 = vld [vmem:[%s4708_s0 + $0xfc] sm:$0xf] }
 0x251   :  { %v4219_v56 = vmul.f32 %v3382_v16, %v4059_v44  ;;  %v1196_v38 = vadd.f32 %v1195_v19, %v1194_v46  ;;  %v1207_v14 = vrot.slane %v1206_v22, 4  ;;  %1724 = vperm.xlu0 %3159, %v1719_v54   ;;  %v4226_v20 = vmul.f32 %v4182_v26, %v3625_v0  ;;  %v3062_v16 = vld [vmem:[%s4708_s0 + $0xf4] sm:$0xf]  ;;  %v984_v12 = vpop.permute.xlu2 %983 }
 0x252   :  { %2420 = vperm.xlu2 %3158, %v2415_v30   ;;  %v1310_v52 = vsel %vm4773_vm12, %v1156_v15, %v1149_v8  ;;  %v1181_v28 = vrot.slane %v1180_v31, 2  ;;  %v2443_v44 = vperm.slane %v4208_v18, 3  ;;  %v1176_v27 = vrot.slane %v1175_v39, 1  ;;  %v977_v59 = vpop.permute.xlu0 %976  ;;  %vm4781_vm12 = vmmov %vm4774_vm5 }
 0x253   :  { %v1311_v23 = vsel %vm1291_vm13, %v1163_v43, %v1310_v52  ;;  %v1214_v37 = vrot.slane %v1213_v63, 4  ;;  %v1023_v11 = vmul.f32 %v3057_v2, %v949_v55  ;;  %v1170_v33 = vadd.f32 %v1169_v53, %v1168_v3 }
 0x254   :  { %v1190_v41 = vrot.slane %v1189_v6, 1  ;;  %v1182_v40 = vadd.f32 %v1181_v28, %v1180_v31  ;;  %v1027_v47 = vmul.f32 %v3061_v45, %v977_v59  ;;  %v1197_v29 = vrot.slane %v1196_v38, 1 }
 0x255   :  { %v1208_v60 = vadd.f32 %v1207_v14, %v1206_v22  ;;  %v1199_v1 = vsel %vm415_vm1, %v1023_v11, 0.0  ;;  %v1028_v17 = vmul.f32 %v3062_v16, %v984_v12  ;;  %v1312_v57 = vsel %vm1293_vm14, %v1170_v33, %v1311_v23  ;;  %v3063_v33 = vld [vmem:[%s4708_s0 + $0xf8] sm:$0xf] }
 0x256   :  { %v1183_v24 = vrot.slane %v1182_v40, 1  ;;  %v1200_v4 = vrot.slane %v1199_v1, 4  ;;  %v1227_v21 = vsel %vm415_vm1, %v1027_v47, 0.0  ;;  %v1177_v36 = vadd.f32 %v1176_v27, %v1175_v39  ;;  %v3078_v47 = vld [vmem:[%s4708_s0 + $0x100] sm:$0xf] }
 0x257   :  { %v1215_v46 = vadd.f32 %v1214_v37, %v1213_v63  ;;  %v2422_v58 = vperm.slane %v4208_v18, 0  ;;  %v2429_v51 = vperm.slane %v4208_v18, 1  ;;  %v1234_v3 = vsel %vm415_vm1, %v1028_v17, 0.0 }
 0x258   :  { %v1184_v9 = vadd.f32 %v1183_v24, %v1182_v40  ;;  %v1201_v49 = vadd.f32 %v1200_v4, %v1199_v1  ;;  %v1228_v61 = vrot.slane %v1227_v21, 4  ;;  %2448 = vperm.xlu1 %3157, %v2443_v44   ;;  %v1191_v42 = vadd.f32 %v1190_v41, %v1189_v6  ;;  %v3082_v24 = vld [vmem:[%s4708_s0 + $0x110] sm:$0xf] }
 0x259   :  { %v1209_v25 = vrot.slane %v1208_v60, 2  ;;  %2434 = vperm.xlu0 %3159, %v2429_v51   ;;  %v1313_v50 = vsel %vm1295_vm15, %v1177_v36, %v1312_v57  ;;  %v1754_v62 = vperm.slane %v4045_v10, 7  ;;  %v2264_v54 = vsub.f32 1.0, %v4226_v20  ;;  %v1606_v43 = vpop.permute.xlu2 %1605 }
 0x25a   :  { %2427 = vperm.xlu2 %3158, %v2422_v58   ;;  %v1202_v19 = vrot.slane %v1201_v49, 2  ;;  %v970_v32 = vpop.permute.xlu1 %969  ;;  %v1198_v5 = vadd.f32 %v1197_v29, %v1196_v38  ;;  %v1314_v8 = vsel %vm1297_vm0, %v1184_v9, %v1313_v50  ;;  %v1216_v13 = vrot.slane %v1215_v46, 2  ;;  %v3079_v38 = vld [vmem:[%s4708_s0 + $0x104] sm:$0xf] }
 0x25b   :  { %v1235_v34 = vrot.slane %v1234_v3, 4  ;;  %v1026_v22 = vmul.f32 %v3060_v35, %v970_v32  ;;  %v998_v15 = vpop.permute.xlu0 %997  ;;  %v1315_v39 = vsel %vm1299_vm2, %v1191_v42, %v1314_v8  ;;  %v1229_v30 = vadd.f32 %v1228_v61, %v1227_v21 }
 0x25c   :  { %v1203_v53 = vadd.f32 %v1202_v19, %v1201_v49  ;;  %v1030_v6 = vmul.f32 %v3064_v48, %v998_v15  ;;  %v1316_v31 = vsel %vm1301_vm3, %v1198_v5, %v1315_v39  ;;  %v1210_v63 = vadd.f32 %v1209_v25, %v1208_v60  ;;  %v3080_v39 = vld [vmem:[%s4708_s0 + $0x108] sm:$0xf] }
 0x25d   :  { %v1220_v2 = vsel %vm415_vm1, %v1026_v22, 0.0  ;;  %3068 = vmatmul.msk.f32.gmra.mxu0 %vm1324_vm4, %v1316_v31  ;;  %v1740_v14 = vperm.slane %v4045_v10, 5  ;;  %v1747_v45 = vperm.slane %v4045_v10, 6  ;;  %v2265_v20 = vmul.f32 %v4182_v26, %v2264_v54 }
 0x25e   :  { %v1221_v52 = vrot.slane %v1220_v2, 4  ;;  %v1248_v28 = vsel %vm415_vm1, %v1030_v6, 0.0  ;;  %v2436_v55 = vperm.slane %v4208_v18, 2  ;;  %v1217_v16 = vadd.f32 %v1216_v13, %v1215_v46 }
 0x25f   :  { %v1204_v44 = vrot.slane %v1203_v53, 1  ;;  %v1236_v27 = vadd.f32 %v1235_v34, %v1234_v3  ;;  %v1249_v23 = vrot.slane %v1248_v28, 4  ;;  %v1230_v37 = vrot.slane %v1229_v30, 2 }
 0x260   :  { %v1222_v11 = vadd.f32 %v1221_v52, %v1220_v2  ;;  %v1818_v59 = vmul.f32 %v3079_v38, %v1606_v43  ;;  %1759 = vperm.xlu1 %3157, %v1754_v62   ;;  %v1761_v10 = vperm.slane %v4219_v56, 0  ;;  %vm2267_vm11 = vweird.f32 %v3625_v0 }
 0x261   :  { %v2271_v41 = vand.u32 2147483647, %v3625_v0  ;;  %v1211_v40 = vrot.slane %v1210_v63, 1  ;;  %v1250_v12 = vadd.f32 %v1249_v23, %v1248_v28  ;;  %1745 = vperm.xlu0 %3159, %v1740_v14   ;;  %v2266_v29 = vadd.f32 %v4182_v26, %v2265_v20  ;;  %v1627_v49 = vpop.permute.xlu2 %1626 }
 0x262   :  { %2441 = vperm.xlu2 %3158, %v2436_v55   ;;  %vm2268_vm8 = vweird.f32 %v4182_v26  ;;  %v2273_v60 = vand.u32 2147483648, %v3625_v0  ;;  %v1223_v1 = vrot.slane %v1222_v11, 2  ;;  %v991_v17 = vpop.permute.xlu1 %990  ;;  %v1218_v4 = vrot.slane %v1217_v16, 1 }
 0x263   :  { %v1205_v21 = vadd.f32 %v1204_v44, %v1203_v53  ;;  %v1237_v57 = vrot.slane %v1236_v27, 2  ;;  %v1029_v36 = vmul.f32 %v3063_v33, %v991_v17  ;;  %v1599_v46 = vpop.permute.xlu0 %1598  ;;  %v1231_v58 = vadd.f32 %v1230_v37, %v1229_v30  ;;  %vm4289_vm6 = vmor %vm2267_vm11, %vm2268_vm8 }
 0x264   :  { %v1224_v51 = vadd.f32 %v1223_v1, %v1222_v11  ;;  %v1856_v9 = vsel %vm415_vm1, %v1818_v59, 0.0  ;;  %v1817_v3 = vmul.f32 %v3078_v47, %v1599_v46  ;;  %v1212_v61 = vadd.f32 %v1211_v40, %v1210_v63  ;;  %v3083_v63 = vld [vmem:[%s4708_s0 + $0x114] sm:$0xf]  ;;  %v3120_v1 = vld [vmem:[%s4708_s0 + $0x184] sm:$0xf]  ;;  %vm4782_vm11 = vmmov %vm4774_vm5 }
 0x265   :  { %v1251_v35 = vrot.slane %v1250_v12, 2  ;;  %v1241_v42 = vsel %vm415_vm1, %v1029_v36, 0.0  ;;  %v1821_v25 = vmul.f32 %v3082_v24, %v1627_v49  ;;  %v2450_v54 = vperm.slane %v4208_v18, 4  ;;  %v3081_v46 = vld [vmem:[%s4708_s0 + $0x10c] sm:$0xf]  ;;  %vm4783_vm8 = vmmov %vm4774_vm5 }
 0x266   :  { %v1225_v48 = vrot.slane %v1224_v51, 1  ;;  %v1242_v50 = vrot.slane %v1241_v42, 4  ;;  %v1849_v62 = vsel %vm415_vm1, %v1817_v3, 0.0  ;;  %v1317_v19 = vsel %vm4774_vm5, %v1212_v61, %v1205_v21 }
 0x267   :  { %v1238_v32 = vadd.f32 %v1237_v57, %v1236_v27  ;;  %v1857_v5 = vrot.slane %v1856_v9, 4  ;;  %v1850_v8 = vrot.slane %v1849_v62, 4  ;;  %v1219_v13 = vadd.f32 %v1218_v4, %v1217_v16 }
 0x268   :  { %v1232_v34 = vrot.slane %v1231_v58, 1  ;;  %v1226_v22 = vadd.f32 %v1225_v48, %v1224_v51  ;;  %v1243_v15 = vadd.f32 %v1242_v50, %v1241_v42  ;;  %1766 = vperm.xlu1 %3157, %v1761_v10   ;;  %vm4293_vm7 = vcmp.eq.f32.partialorder %v2271_v41, 8.507059e+37 }
 0x269   :  { %v2274_v43 = vor.u32 1.1754944e-38, %v2273_v60  ;;  %v1252_v6 = vadd.f32 %v1251_v35, %v1250_v12  ;;  %v1877_v31 = vsel %vm415_vm1, %v1821_v25, 0.0  ;;  %2455 = vperm.xlu0 %3159, %v2450_v54   ;;  %v2270_v0 = vsel %vm4289_vm6, %v4182_v26, %v2266_v29  ;;  %v2323_v37 = vpop.permute.xlu2 %2322  ;;  %v3119_v25 = vld [vmem:[%s4708_s0 + $0x180] sm:$0xf]  ;;  %vm4784_vm6 = vmmov %vm4774_vm5 }
 0x26a   :  { %1752 = vperm.xlu2 %3158, %v1747_v45   ;;  %v1244_v2 = vrot.slane %v1243_v15, 2  ;;  %v1851_v38 = vadd.f32 %v1850_v8, %v1849_v62  ;;  %v1613_v14 = vpop.permute.xlu1 %1612  ;;  %v1318_v20 = vsel %vm1291_vm13, %v1219_v13, %v1317_v19  ;;  %v1239_v52 = vrot.slane %v1238_v32, 1 }
 0x26b   :  { %v1858_v28 = vadd.f32 %v1857_v5, %v1856_v9  ;;  %v1819_v55 = vmul.f32 %v3080_v39, %v1613_v14  ;;  %v1634_v16 = vpop.permute.xlu0 %1633  ;;  %v1319_v45 = vsel %vm1293_vm14, %v1226_v22, %v1318_v20  ;;  %v1233_v44 = vadd.f32 %v1232_v34, %v1231_v58 }
 0x26c   :  { %v1245_v27 = vadd.f32 %v1244_v2, %v1243_v15  ;;  %v1878_v23 = vrot.slane %v1877_v31, 4  ;;  %v1822_v11 = vmul.f32 %v3083_v63, %v1634_v16  ;;  %v2275_v59 = vsel %vm4293_vm7, %v2274_v43, %v2270_v0  ;;  %v3122_v0 = vld [vmem:[%s4708_s0 + $0x18c] sm:$0xf]  ;;  %v3084_v2 = vld [vmem:[%s4708_s0 + $0x118] sm:$0xf]  ;;  %vm4785_vm7 = vmmov %vm4774_vm5 }
 0x26d   :  { %v1253_v26 = vrot.slane %v1252_v6, 1  ;;  %v1863_v33 = vsel %vm415_vm1, %v1819_v55, 0.0  ;;  %v1775_v10 = vperm.slane %v4219_v56, 2  ;;  %v1852_v40 = vrot.slane %v1851_v38, 2 }
 0x26e   :  { %v1246_v41 = vrot.slane %v1245_v27, 1  ;;  %v1864_v12 = vrot.slane %v1863_v33, 4  ;;  %v1320_v47 = vsel %vm1295_vm15, %v1233_v44, %v1319_v45  ;;  %v1240_v29 = vadd.f32 %v1239_v52, %v1238_v32  ;;  %v3085_v45 = vld [vmem:[%s4708_s0 + $0x11c] sm:$0xf] }
 0x26f   :  { %v1859_v60 = vrot.slane %v1858_v28, 2  ;;  %v2457_v17 = vperm.slane %v4208_v18, 5  ;;  %v2464_v24 = vperm.slane %v4208_v18, 6  ;;  %v1879_v21 = vadd.f32 %v1878_v23, %v1877_v31  ;;  %v3110_v23 = vld [vmem:[%s4709_s3 + $0x10] sm:$0xff] }
 0x270   :  { %v1247_v4 = vadd.f32 %v1246_v41, %v1245_v27  ;;  %v1865_v57 = vadd.f32 %v1864_v12, %v1863_v33  ;;  %v1884_v36 = vsel %vm415_vm1, %v1822_v11, 0.0  ;;  %1780 = vperm.xlu1 %3157, %v1775_v10   ;;  %v4321_v58 = vmul.f32 %v3441_v7, %v2275_v59  ;;  %2158 = vmatpush.msra.mxu2 %v3110_v23 }
 0x271   :  { %2469 = vperm.xlu0 %3159, %v2464_v24   ;;  %v1254_v51 = vadd.f32 %v1253_v26, %v1252_v6  ;;  %v1321_v9 = vsel %vm1297_vm0, %v1240_v29, %v1320_v47  ;;  %v1853_v49 = vadd.f32 %v1852_v40, %v1851_v38  ;;  %v2535_v61 = vmul.f32 %v3120_v1, %v2323_v37  ;;  %v2337_v32 = vpop.permute.xlu2 %2336 }
 0x272   :  { %2462 = vperm.xlu2 %3158, %v2457_v17   ;;  %v1866_v3 = vrot.slane %v1865_v57, 2  ;;  %v1620_v35 = vpop.permute.xlu1 %1619  ;;  %v1322_v42 = vsel %vm1299_vm2, %v1247_v4, %v1321_v9  ;;  %v1860_v48 = vadd.f32 %v1859_v60, %v1858_v28  ;;  %v1885_v50 = vrot.slane %v1884_v36, 4 }
 0x273   :  { %v1820_v62 = vmul.f32 %v3081_v46, %v1620_v35  ;;  %v1323_v7 = vsel %vm1301_vm3, %v1254_v51, %v1322_v42  ;;  %v2316_v54 = vpop.permute.xlu0 %2315  ;;  %v1880_v19 = vrot.slane %v1879_v21, 2  ;;  %v1854_v34 = vrot.slane %v1853_v49, 1  ;;  %v3125_v42 = vld [vmem:[%s4708_s0 + $0x198] sm:$0xf] }
 0x274   :  { %3069 = vmatmul.msk.f32.gmra.mxu0 %vm1324_vm4, %v1323_v7  ;;  %v1867_v5 = vadd.f32 %v1866_v3, %v1865_v57  ;;  %v2534_v13 = vmul.f32 %v3119_v25, %v2316_v54  ;;  %v2573_v22 = vsel %vm415_vm1, %v2535_v61, 0.0  ;;  %v2485_v39 = vperm.slane %v4321_v58, 1 }
 0x275   :  { %v1870_v8 = vsel %vm415_vm1, %v1820_v62, 0.0  ;;  %v1861_v53 = vrot.slane %v1860_v48, 1  ;;  %v1886_v30 = vadd.f32 %v1885_v50, %v1884_v36  ;;  %v1768_v43 = vperm.slane %v4219_v56, 1  ;;  %v3123_v50 = vld [vmem:[%s4708_s0 + $0x190] sm:$0xf] }
 0x276   :  { %v1871_v15 = vrot.slane %v1870_v8, 4  ;;  %v2471_v6 = vperm.slane %v4208_v18, 7  ;;  %v1881_v31 = vadd.f32 %v1880_v19, %v1879_v21  ;;  %v1868_v38 = vrot.slane %v1867_v5, 1  ;;  %v3121_v18 = vld [vmem:[%s4708_s0 + $0x188] sm:$0xf] }
 0x277   :  { %v2574_v14 = vrot.slane %v2573_v22, 4  ;;  %v2566_v20 = vsel %vm415_vm1, %v2534_v13, 0.0  ;;  %v1782_v52 = vperm.slane %v4219_v56, 3  ;;  %v1855_v28 = vadd.f32 %v1854_v34, %v1853_v49 }
 0x278   :  { %v1872_v63 = vadd.f32 %v1871_v15, %v1870_v8  ;;  %2490 = vperm.xlu1 %3157, %v2485_v39   ;;  %v1796_v44 = vperm.slane %v4219_v56, 5  ;;  %v2478_v27 = vperm.slane %v4321_v58, 0  ;;  %v1862_v37 = vadd.f32 %v1861_v53, %v1860_v48 }
 0x279   :  { %2476 = vperm.xlu0 %3159, %v2471_v6   ;;  %v1887_v11 = vrot.slane %v1886_v30, 2  ;;  %v2537_v59 = vmul.f32 %v3122_v0, %v2337_v32  ;;  %v1882_v10 = vrot.slane %v1881_v31, 1  ;;  %v2567_v40 = vrot.slane %v2566_v20, 4  ;;  %v1648_v12 = vpop.permute.xlu2 %1647 }
 0x27a   :  { %1773 = vperm.xlu2 %3158, %v1768_v43   ;;  %v1873_v55 = vrot.slane %v1872_v63, 2  ;;  %v1641_v16 = vpop.permute.xlu1 %1640  ;;  %v1869_v29 = vadd.f32 %v1868_v38, %v1867_v5  ;;  %v2575_v60 = vadd.f32 %v2574_v14, %v2573_v22  ;;  %v1824_v17 = vmul.f32 %v3085_v45, %v1648_v12 }
 0x27b   :  { %v1823_v26 = vmul.f32 %v3084_v2, %v1641_v16  ;;  %v2330_v33 = vpop.permute.xlu0 %2329  ;;  %v2107_v24 = vsel %vm4779_vm9, %v1862_v37, %v1855_v28  ;;  %v1888_v36 = vadd.f32 %v1887_v11, %v1886_v30  ;;  %v2587_v46 = vsel %vm415_vm1, %v2537_v59, 0.0  ;;  %v3126_v37 = vld [vmem:[%s4708_s0 + $0x19c] sm:$0xf] }
 0x27c   :  { %v1874_v41 = vadd.f32 %v1873_v55, %v1872_v63  ;;  %v2536_v47 = vmul.f32 %v3121_v18, %v2330_v33  ;;  %v1898_v51 = vsel %vm415_vm1, %v1824_v17, 0.0  ;;  %v2568_v3 = vadd.f32 %v2567_v40, %v2566_v20  ;;  %v3124_v33 = vld [vmem:[%s4708_s0 + $0x194] sm:$0xf] }
 0x27d   :  { %v1891_v1 = vsel %vm415_vm1, %v1823_v26, 0.0  ;;  %v1899_v35 = vrot.slane %v1898_v51, 4  ;;  %v2108_v25 = vsel %vm1291_vm13, %v1869_v29, %v2107_v24  ;;  %v1789_v62 = vperm.slane %v4219_v56, 4  ;;  %v3086_v24 = vld [vmem:[%s4708_s0 + $0x120] sm:$0xf] }
 0x27e   :  { %v1875_v4 = vrot.slane %v1874_v41, 1  ;;  %v1892_v21 = vrot.slane %v1891_v1, 4  ;;  %v2580_v57 = vsel %vm415_vm1, %v2536_v47, 0.0  ;;  %v1883_v7 = vadd.f32 %v1882_v10, %v1881_v31  ;;  %v3151_v47 = vld [vmem:[%s4709_s3 + $0x18] sm:$0xff] }
 0x27f   :  { %v2581_v9 = vrot.slane %v2580_v57, 4  ;;  %v1900_v19 = vadd.f32 %v1899_v35, %v1898_v51  ;;  %v2576_v8 = vrot.slane %v2575_v60, 2  ;;  %v1889_v13 = vrot.slane %v1888_v36, 1  ;;  %2875 = vmatpush.msra.mxu3 %v3151_v47 }
 0x280   :  { %v1876_v49 = vadd.f32 %v1875_v4, %v1874_v41  ;;  %v1893_v61 = vadd.f32 %v1892_v21, %v1891_v1  ;;  %1801 = vperm.xlu1 %3157, %v1796_v44   ;;  %v2588_v34 = vrot.slane %v2587_v46, 4  ;;  %v2569_v39 = vrot.slane %v2568_v3, 2 }
 0x281   :  { %v2582_v48 = vadd.f32 %v2581_v9, %v2580_v57  ;;  %2483 = vperm.xlu0 %3159, %v2478_v27   ;;  %v1901_v30 = vrot.slane %v1900_v19, 2  ;;  %v1655_v43 = vpop.permute.xlu2 %1654  ;;  %v2506_v31 = vperm.slane %v4321_v58, 4  ;;  %v2492_v16 = vperm.slane %v4321_v58, 2 }
 0x282   :  { %1787 = vperm.xlu2 %3158, %v1782_v52   ;;  %v1894_v54 = vrot.slane %v1893_v61, 2  ;;  %v2358_v32 = vpop.permute.xlu1 %2357  ;;  %v2109_v5 = vsel %vm1293_vm14, %v1876_v49, %v2108_v25  ;;  %v1890_v52 = vadd.f32 %v1889_v13, %v1888_v36  ;;  %v2589_v28 = vadd.f32 %v2588_v34, %v2587_v46  ;;  %v3087_v13 = vld [vmem:[%s4708_s0 + $0x124] sm:$0xf] }
 0x283   :  { %v2540_v22 = vmul.f32 %v3125_v42, %v2358_v32  ;;  %v2344_v15 = vpop.permute.xlu0 %2343  ;;  %v2583_v63 = vrot.slane %v2582_v48, 2  ;;  %v2110_v2 = vsel %vm1295_vm15, %v1883_v7, %v2109_v5  ;;  %v1902_v14 = vadd.f32 %v1901_v30, %v1900_v19  ;;  %v3088_v19 = vld [vmem:[%s4708_s0 + $0x128] sm:$0xf]  ;;  %v3127_v30 = vld [vmem:[%s4708_s0 + $0x1a0] sm:$0xf] }
 0x284   :  { %v1895_v53 = vadd.f32 %v1894_v54, %v1893_v61  ;;  %v2538_v6 = vmul.f32 %v3123_v50, %v2344_v15  ;;  %v2577_v45 = vadd.f32 %v2576_v8, %v2575_v60  ;;  %v2570_v44 = vadd.f32 %v2569_v39, %v2568_v3 }
 0x285   :  { %v2608_v0 = vsel %vm415_vm1, %v2540_v22, 0.0  ;;  %v1903_v23 = vrot.slane %v1902_v14, 1  ;;  %v2584_v11 = vadd.f32 %v2583_v63, %v2582_v48  ;;  %v2111_v26 = vsel %vm1297_vm0, %v1890_v52, %v2110_v2 }
 0x286   :  { %v1896_v38 = vrot.slane %v1895_v53, 1  ;;  %v2609_v20 = vrot.slane %v2608_v0, 4  ;;  %v2594_v18 = vsel %vm415_vm1, %v2538_v6, 0.0  ;;  %v2590_v29 = vrot.slane %v2589_v28, 2 }
 0x287   :  { %v2595_v55 = vrot.slane %v2594_v18, 4  ;;  %v1904_v40 = vadd.f32 %v1903_v23, %v1902_v14  ;;  %v2520_v36 = vperm.slane %v4321_v58, 6  ;;  %v1803_v46 = vperm.slane %v4219_v56, 6 }
 0x288   :  { %v1897_v27 = vadd.f32 %v1896_v38, %v1895_v53  ;;  %2511 = vperm.xlu1 %3157, %v2506_v31   ;;  %v2610_v10 = vadd.f32 %v2609_v20, %v2608_v0  ;;  %v2578_v51 = vrot.slane %v2577_v45, 1  ;;  %v2571_v9 = vrot.slane %v2570_v44, 1 }
 0x289   :  { %v2596_v59 = vadd.f32 %v2595_v55, %v2594_v18  ;;  %2497 = vperm.xlu0 %3159, %v2492_v16   ;;  %v1669_v4 = vpop.permute.xlu2 %1668  ;;  %v2585_v49 = vrot.slane %v2584_v11, 1  ;;  %v2591_v48 = vadd.f32 %v2590_v29, %v2589_v28  ;;  %v1825_v50 = vmul.f32 %v3086_v24, %v1655_v43  ;;  %v3128_v28 = vld [vmem:[%s4708_s0 + $0x1a4] sm:$0xf] }
 0x28a   :  { %1794 = vperm.xlu2 %3158, %v1789_v62   ;;  %v2365_v41 = vpop.permute.xlu1 %2364  ;;  %v2112_v12 = vsel %vm1299_vm2, %v1897_v27, %v2111_v26  ;;  %v2611_v61 = vrot.slane %v2610_v10, 2  ;;  %v2499_v7 = vperm.slane %v4321_v58, 3  ;;  %v2579_v32 = vadd.f32 %v2578_v51, %v2577_v45 }
 0x28b   :  { %v2597_v60 = vrot.slane %v2596_v59, 2  ;;  %v2541_v1 = vmul.f32 %v3126_v37, %v2365_v41  ;;  %v2351_v17 = vpop.permute.xlu0 %2350  ;;  %v2113_v21 = vsel %vm1301_vm3, %v1904_v40, %v2112_v12  ;;  %v2572_v5 = vadd.f32 %v2571_v9, %v2570_v44  ;;  %v3089_v12 = vld [vmem:[%s4708_s0 + $0x12c] sm:$0xf] }
 0x28c   :  { %v2539_v57 = vmul.f32 %v3124_v33, %v2351_v17  ;;  %3111 = vmatmul.msk.f32.vlgmr.msra.gmra.mxu2 %vm1324_vm4, %v2113_v21  ;;  %v2586_v34 = vadd.f32 %v2585_v49, %v2584_v11  ;;  %v2612_v22 = vadd.f32 %v2611_v61, %v2610_v10  ;;  %v2592_v43 = vrot.slane %v2591_v48, 1  ;;  %v3129_v10 = vld [vmem:[%s4708_s0 + $0x1a8] sm:$0xf] }
 0x28d   :  { %v2615_v3 = vsel %vm415_vm1, %v2541_v1, 0.0  ;;  %v2598_v35 = vadd.f32 %v2597_v60, %v2596_v59  ;;  %v1905_v6 = vsel %vm415_vm1, %v1825_v50, 0.0  ;;  %v1827_v63 = vmul.f32 %v3088_v19, %v1669_v4  ;;  %v3091_v50 = vld [vmem:[%s4708_s0 + $0x134] sm:$0xf] }
 0x28e   :  { %v2616_v42 = vrot.slane %v2615_v3, 4  ;;  %v2601_v25 = vsel %vm415_vm1, %v2539_v57, 0.0  ;;  %v1810_v20 = vperm.slane %v4219_v56, 7  ;;  %v2824_v18 = vsel %vm4780_vm10, %v2579_v32, %v2572_v5 }
 0x28f   :  { %v2602_v62 = vrot.slane %v2601_v25, 4  ;;  %v2599_v15 = vrot.slane %v2598_v35, 1  ;;  %v2513_v16 = vperm.slane %v4321_v58, 5  ;;  %v2825_v45 = vsel %vm1291_vm13, %v2586_v34, %v2824_v18 }
 0x290   :  { %v2617_v54 = vadd.f32 %v2616_v42, %v2615_v3  ;;  %2525 = vperm.xlu1 %3157, %v2520_v36   ;;  %v2613_v44 = vrot.slane %v2612_v22, 1  ;;  %v1906_v27 = vrot.slane %v1905_v6, 4  ;;  %v2593_v37 = vadd.f32 %v2592_v43, %v2591_v48 }
 0x291   :  { %v2603_v8 = vadd.f32 %v2602_v62, %v2601_v25  ;;  %1808 = vperm.xlu0 %3159, %v1803_v46   ;;  %v2379_v38 = vpop.permute.xlu2 %2378  ;;  %v2600_v23 = vadd.f32 %v2599_v15, %v2598_v35  ;;  %v1919_v59 = vsel %vm415_vm1, %v1827_v63, 0.0  ;;  %v2527_v19 = vperm.slane %v4321_v58, 7 }
 0x292   :  { %2504 = vperm.xlu2 %3158, %v2499_v7   ;;  %v2618_v39 = vrot.slane %v2617_v54, 2  ;;  %v2372_v53 = vpop.permute.xlu1 %2371  ;;  %v2543_v26 = vmul.f32 %v3128_v28, %v2379_v38  ;;  %v2826_v47 = vsel %vm1293_vm14, %v2593_v37, %v2825_v45  ;;  %v2614_v29 = vadd.f32 %v2613_v44, %v2612_v22  ;;  %v3090_v22 = vld [vmem:[%s4708_s0 + $0x130] sm:$0xf] }
 0x293   :  { %v2604_v0 = vrot.slane %v2603_v8, 2  ;;  %v1662_v31 = vpop.permute.xlu0 %1661  ;;  %v2542_v55 = vmul.f32 %v3127_v30, %v2372_v53  ;;  %v1907_v60 = vadd.f32 %v1906_v27, %v1905_v6  ;;  %v1920_v1 = vrot.slane %v1919_v59, 4  ;;  %v3131_v53 = vld [vmem:[%s4708_s0 + $0x1b0] sm:$0xf] }
 0x294   :  { %v2619_v2 = vadd.f32 %v2618_v39, %v2617_v54  ;;  %v1826_v14 = vmul.f32 %v3087_v13, %v1662_v31  ;;  %v2827_v24 = vsel %vm1295_vm15, %v2600_v23, %v2826_v47  ;;  %v2629_v51 = vsel %vm415_vm1, %v2543_v26, 0.0  ;;  %v3132_v26 = vld [vmem:[%s4708_s0 + $0x1b4] sm:$0xf] }
 0x295   :  { %v2605_v52 = vadd.f32 %v2604_v0, %v2603_v8  ;;  %v2622_v40 = vsel %vm415_vm1, %v2542_v55, 0.0  ;;  %v1908_v25 = vrot.slane %v1907_v60, 2  ;;  %v1921_v48 = vadd.f32 %v1920_v1, %v1919_v59  ;;  %v3092_v8 = vld [vmem:[%s4708_s0 + $0x138] sm:$0xf] }
 0x296   :  { %v2620_v11 = vrot.slane %v2619_v2, 1  ;;  %v1912_v33 = vsel %vm415_vm1, %v1826_v14, 0.0  ;;  %v2623_v9 = vrot.slane %v2622_v40, 4  ;;  %v2630_v7 = vrot.slane %v2629_v51, 4 }
 0x297   :  { %v2606_v56 = vrot.slane %v2605_v52, 1  ;;  %v1913_v4 = vrot.slane %v1912_v33, 4  ;;  %v1909_v15 = vadd.f32 %v1908_v25, %v1907_v60  ;;  %v1922_v39 = vrot.slane %v1921_v48, 2  ;;  %v3133_v60 = vld [vmem:[%s4708_s0 + $0x1b8] sm:$0xf] }
 0x298   :  { %v2621_v36 = vadd.f32 %v2620_v11, %v2619_v2  ;;  %v2624_v32 = vadd.f32 %v2623_v9, %v2622_v40  ;;  %v2631_v30 = vadd.f32 %v2630_v7, %v2629_v51  ;;  %v3130_v40 = vld [vmem:[%s4708_s0 + $0x1ac] sm:$0xf] }
 0x299   :  { %v2607_v41 = vadd.f32 %v2606_v56, %v2605_v52  ;;  %2518 = vperm.xlu0 %3159, %v2513_v16   ;;  %v1690_v49 = vpop.permute.xlu2 %1689  ;;  %v1914_v54 = vadd.f32 %v1913_v4, %v1912_v33  ;;  %v1910_v52 = vrot.slane %v1909_v15, 1  ;;  %v1923_v28 = vadd.f32 %v1922_v39, %v1921_v48 }
 0x29a   :  { %1815 = vperm.xlu2 %3158, %v1810_v20   ;;  %v2386_v17 = vpop.permute.xlu1 %2385  ;;  %v1830_v13 = vmul.f32 %v3091_v50, %v1690_v49  ;;  %v2625_v0 = vrot.slane %v2624_v32, 2  ;;  %v2632_v45 = vrot.slane %v2631_v30, 2 }
 0x29b   :  { %v2544_v21 = vmul.f32 %v3129_v10, %v2386_v17  ;;  %v1676_v57 = vpop.permute.xlu0 %1675  ;;  %v2828_v46 = vsel %vm1297_vm0, %v2607_v41, %v2827_v24  ;;  %v1915_v43 = vrot.slane %v1914_v54, 2  ;;  %v1924_v47 = vrot.slane %v1923_v28, 1 }
 0x29c   :  { %v1828_v3 = vmul.f32 %v3089_v12, %v1676_v57  ;;  %v2829_v61 = vsel %vm1299_vm2, %v2614_v29, %v2828_v46  ;;  %v1940_v14 = vsel %vm415_vm1, %v1830_v13, 0.0  ;;  %v2626_v37 = vadd.f32 %v2625_v0, %v2624_v32  ;;  %v3134_v0 = vld [vmem:[%s4708_s0 + $0x1bc] sm:$0xf] }
 0x29d   :  { %v2636_v35 = vsel %vm415_vm1, %v2544_v21, 0.0  ;;  %v2830_v42 = vsel %vm1301_vm3, %v2621_v36, %v2829_v61  ;;  %v1916_v44 = vadd.f32 %v1915_v43, %v1914_v54  ;;  %v1941_v11 = vrot.slane %v1940_v14, 4 }
 0x29e   :  { %v1926_v62 = vsel %vm415_vm1, %v1828_v3, 0.0  ;;  %3152 = vmatmul.msk.f32.vlgmr.msra.gmra.mxu3 %vm1324_vm4, %v2830_v42  ;;  %v2637_v5 = vrot.slane %v2636_v35, 4  ;;  %v1911_v12 = vadd.f32 %v1910_v52, %v1909_v15  ;;  %v2633_v17 = vadd.f32 %v2632_v45, %v2631_v30 }
 0x29f   :  { %v1927_v34 = vrot.slane %v1926_v62, 4  ;;  %v1917_v24 = vrot.slane %v1916_v44, 1  ;;  %v2627_v36 = vrot.slane %v2626_v37, 1  ;;  %v1942_v46 = vadd.f32 %v1941_v11, %v1940_v14 }
 0x2a0   :  { %v2638_v31 = vadd.f32 %v2637_v5, %v2636_v35  ;;  %v2634_v7 = vrot.slane %v2633_v17, 1  ;;  %v1925_v5 = vadd.f32 %v1924_v47, %v1923_v28 }
 0x2a1   :  { %v2400_v2 = vpop.permute.xlu2 %2399  ;;  %v1928_v20 = vadd.f32 %v1927_v34, %v1926_v62  ;;  %v1918_v54 = vadd.f32 %v1917_v24, %v1916_v44 }
 0x2a2   :  { %2532 = vperm.xlu2 %3158, %v2527_v19   ;;  %v1697_v58 = vpop.permute.xlu1 %1696  ;;  %v2546_v18 = vmul.f32 %v3131_v53, %v2400_v2  ;;  %v2639_v59 = vrot.slane %v2638_v31, 2  ;;  %v2635_v2 = vadd.f32 %v2634_v7, %v2633_v17 }
 0x2a3   :  { %v1831_v6 = vmul.f32 %v3092_v8, %v1697_v58  ;;  %v1683_v63 = vpop.permute.xlu0 %1682  ;;  %v1929_v33 = vrot.slane %v1928_v20, 2  ;;  %v1943_v8 = vrot.slane %v1942_v46, 2  ;;  %v3093_v58 = vld [vmem:[%s4708_s0 + $0x13c] sm:$0xf]  ;;  %v2114_v14 = vsel %vm4781_vm12, %v1918_v54, %v1911_v12 }
 0x2a4   :  { %v1829_v38 = vmul.f32 %v3090_v22, %v1683_v63  ;;  %v2650_v27 = vsel %vm415_vm1, %v2546_v18, 0.0  ;;  %v2640_v51 = vadd.f32 %v2639_v59, %v2638_v31 }
 0x2a5   :  { %v1947_v55 = vsel %vm415_vm1, %v1831_v6, 0.0  ;;  %v2651_v56 = vrot.slane %v2650_v27, 4  ;;  %v1930_v3 = vadd.f32 %v1929_v33, %v1928_v20  ;;  %v1944_v52 = vadd.f32 %v1943_v8, %v1942_v46 }
 0x2a6   :  { %v1933_v16 = vsel %vm415_vm1, %v1829_v38, 0.0  ;;  %v1948_v10 = vrot.slane %v1947_v55, 4  ;;  %v2641_v22 = vrot.slane %v2640_v51, 1  ;;  %v2628_v38 = vadd.f32 %v2627_v36, %v2626_v37 }
 0x2a7   :  { %v1934_v23 = vrot.slane %v1933_v16, 4  ;;  %v2652_v29 = vadd.f32 %v2651_v56, %v2650_v27  ;;  %v1931_v15 = vrot.slane %v1930_v3, 1  ;;  %v1945_v47 = vrot.slane %v1944_v52, 1 }
 0x2a8   :  { %v1949_v61 = vadd.f32 %v1948_v10, %v1947_v55  ;;  %v2642_v44 = vadd.f32 %v2641_v22, %v2640_v51  ;;  %v2831_v12 = vsel %vm4782_vm11, %v2635_v2, %v2628_v38  ;;  %v3095_v51 = vld [vmem:[%s4708_s0 + $0x144] sm:$0xf] }
 0x2a9   :  { %v1935_v41 = vadd.f32 %v1934_v23, %v1933_v16  ;;  %v2414_v9 = vpop.permute.xlu2 %2413  ;;  %v2653_v25 = vrot.slane %v2652_v29, 2  ;;  %v1932_v27 = vadd.f32 %v1931_v15, %v1930_v3  ;;  %v3097_v15 = vld [vmem:[%s4708_s0 + $0x14c] sm:$0xf] }
 0x2aa   :  { %v2407_v1 = vpop.permute.xlu1 %2406  ;;  %v2548_v35 = vmul.f32 %v3133_v60, %v2414_v9  ;;  %v1950_v39 = vrot.slane %v1949_v61, 2 }
 0x2ab   :  { %v1936_v4 = vrot.slane %v1935_v41, 2  ;;  %v2547_v21 = vmul.f32 %v3132_v26, %v2407_v1  ;;  %v2393_v57 = vpop.permute.xlu0 %2392  ;;  %v2654_v30 = vadd.f32 %v2653_v25, %v2652_v29  ;;  %v2832_v1 = vsel %vm1291_vm13, %v2642_v44, %v2831_v12 }
 0x2ac   :  { %v2545_v49 = vmul.f32 %v3130_v40, %v2393_v57  ;;  %v2664_v19 = vsel %vm415_vm1, %v2548_v35, 0.0  ;;  %v1951_v56 = vadd.f32 %v1950_v39, %v1949_v61 }
 0x2ad   :  { %v2657_v42 = vsel %vm415_vm1, %v2547_v21, 0.0  ;;  %v1937_v48 = vadd.f32 %v1936_v4, %v1935_v41  ;;  %v2665_v13 = vrot.slane %v2664_v19, 4  ;;  %v2655_v59 = vrot.slane %v2654_v30, 1  ;;  %v3094_v4 = vld [vmem:[%s4708_s0 + $0x140] sm:$0xf] }
 0x2ae   :  { %v2658_v50 = vrot.slane %v2657_v42, 4  ;;  %v2643_v62 = vsel %vm415_vm1, %v2545_v49, 0.0  ;;  %v2115_v21 = vsel %vm1291_vm13, %v1925_v5, %v2114_v14  ;;  %v1952_v36 = vrot.slane %v1951_v56, 1 }
 0x2af   :  { %v2644_v32 = vrot.slane %v2643_v62, 4  ;;  %v1938_v43 = vrot.slane %v1937_v48, 1  ;;  %v2666_v6 = vadd.f32 %v2665_v13, %v2664_v19  ;;  %v2656_v57 = vadd.f32 %v2655_v59, %v2654_v30 }
 0x2b0   :  { %v2659_v34 = vadd.f32 %v2658_v50, %v2657_v42  ;;  %v2116_v49 = vsel %vm1293_vm14, %v1932_v27, %v2115_v21  ;;  %v1946_v19 = vadd.f32 %v1945_v47, %v1944_v52 }
 0x2b1   :  { %v2645_v53 = vadd.f32 %v2644_v32, %v2643_v62  ;;  %v2667_v28 = vrot.slane %v2666_v6, 2  ;;  %v2421_v16 = vpop.permute.xlu2 %2420  ;;  %v1939_v26 = vadd.f32 %v1938_v43, %v1937_v48 }
 0x2b2   :  { %v2660_v63 = vrot.slane %v2659_v34, 2  ;;  %v1718_v31 = vpop.permute.xlu1 %1717  ;;  %v2549_v11 = vmul.f32 %v3134_v0, %v2421_v16  ;;  %v3096_v0 = vld [vmem:[%s4708_s0 + $0x148] sm:$0xf] }
 0x2b3   :  { %v2646_v20 = vrot.slane %v2645_v53, 2  ;;  %v1704_v18 = vpop.permute.xlu0 %1703  ;;  %v2668_v10 = vadd.f32 %v2667_v28, %v2666_v6  ;;  %v2117_v25 = vsel %vm1295_vm15, %v1939_v26, %v2116_v49  ;;  %v1834_v32 = vmul.f32 %v3095_v51, %v1718_v31  ;;  %v3098_v6 = vld [vmem:[%s4708_s0 + $0x150] sm:$0xf] }
 0x2b4   :  { %v2661_v55 = vadd.f32 %v2660_v63, %v2659_v34  ;;  %v1832_v45 = vmul.f32 %v3093_v58, %v1704_v18  ;;  %v2671_v41 = vsel %vm415_vm1, %v2549_v11, 0.0  ;;  %v2118_v39 = vsel %vm1297_vm0, %v1946_v19, %v2117_v25  ;;  %v3101_v25 = vld [vmem:[%s4708_s0 + $0x15c] sm:$0xf]  ;;  %v3138_v19 = vld [vmem:[%s4708_s0 + $0x1cc] sm:$0xf] }
 0x2b5   :  { %v2647_v23 = vadd.f32 %v2646_v20, %v2645_v53  ;;  %v2672_v60 = vrot.slane %v2671_v41, 4  ;;  %v2669_v3 = vrot.slane %v2668_v10, 1  ;;  %v1953_v53 = vadd.f32 %v1952_v36, %v1951_v56  ;;  %v3137_v36 = vld [vmem:[%s4708_s0 + $0x1c8] sm:$0xf] }
 0x2b6   :  { %v1954_v33 = vsel %vm415_vm1, %v1832_v45, 0.0  ;;  %v2662_v29 = vrot.slane %v2661_v55, 1  ;;  %v1968_v43 = vsel %vm415_vm1, %v1834_v32, 0.0 }
 0x2b7   :  { %v2648_v37 = vrot.slane %v2647_v23, 1  ;;  %v1955_v40 = vrot.slane %v1954_v33, 4  ;;  %v2673_v46 = vadd.f32 %v2672_v60, %v2671_v41  ;;  %v2670_v34 = vadd.f32 %v2669_v3, %v2668_v10  ;;  %v3100_v41 = vld [vmem:[%s4708_s0 + $0x158] sm:$0xf] }
 0x2b8   :  { %v2663_v48 = vadd.f32 %v2662_v29, %v2661_v55  ;;  %v2119_v20 = vsel %vm1299_vm2, %v1953_v53, %v2118_v39  ;;  %v1969_v55 = vrot.slane %v1968_v43, 4 }
 0x2b9   :  { %v2649_v17 = vadd.f32 %v2648_v37, %v2647_v23  ;;  %v1956_v24 = vadd.f32 %v1955_v40, %v1954_v33  ;;  %v2674_v50 = vrot.slane %v2673_v46, 2  ;;  %v2428_v62 = vpop.permute.xlu2 %2427 }
 0x2ba   :  { %v1732_v9 = vpop.permute.xlu1 %1731  ;;  %v1970_v26 = vadd.f32 %v1969_v55, %v1968_v43 }
 0x2bb   :  { %v1957_v61 = vrot.slane %v1956_v24, 2  ;;  %v1711_v35 = vpop.permute.xlu0 %1710  ;;  %v2833_v42 = vsel %vm1293_vm14, %v2649_v17, %v2832_v1  ;;  %v2675_v8 = vadd.f32 %v2674_v50, %v2673_v46  ;;  %v1836_v2 = vmul.f32 %v3097_v15, %v1732_v9 }
 0x2bc   :  { %v1833_v7 = vmul.f32 %v3094_v4, %v1711_v35  ;;  %v2834_v54 = vsel %vm1295_vm15, %v2656_v57, %v2833_v42  ;;  %v1971_v60 = vrot.slane %v1970_v26, 2  ;;  %v3135_v4 = vld [vmem:[%s4708_s0 + $0x1c0] sm:$0xf] }
 0x2bd   :  { %v1958_v5 = vadd.f32 %v1957_v61, %v1956_v24  ;;  %v2835_v13 = vsel %vm1297_vm0, %v2663_v48, %v2834_v54  ;;  %v2676_v58 = vrot.slane %v2675_v8, 1  ;;  %v1982_v23 = vsel %vm415_vm1, %v1836_v2, 0.0  ;;  %v3136_v24 = vld [vmem:[%s4708_s0 + $0x1c4] sm:$0xf] }
 0x2be   :  { %v1961_v30 = vsel %vm415_vm1, %v1833_v7, 0.0  ;;  %v2836_v63 = vsel %vm1299_vm2, %v2670_v34, %v2835_v13  ;;  %v1983_v10 = vrot.slane %v1982_v23, 4  ;;  %v1972_v3 = vadd.f32 %v1971_v60, %v1970_v26  ;;  %v3099_v7 = vld [vmem:[%s4708_s0 + $0x154] sm:$0xf] }
 0x2bf   :  { %v1959_v22 = vrot.slane %v1958_v5, 1  ;;  %v2677_v14 = vadd.f32 %v2676_v58, %v2675_v8  ;;  %v1962_v18 = vrot.slane %v1961_v30, 4  ;;  %v2550_v61 = vmul.f32 %v3135_v4, %v2428_v62 }
 0x2c0   :  { %v1984_v21 = vadd.f32 %v1983_v10, %v1982_v23 }
 0x2c1   :  { %v1960_v31 = vadd.f32 %v1959_v22, %v1958_v5  ;;  %v2442_v16 = vpop.permute.xlu2 %2441  ;;  %v2837_v44 = vsel %vm1301_vm3, %v2677_v14, %v2836_v63  ;;  %v1963_v59 = vadd.f32 %v1962_v18, %v1961_v30  ;;  %v1973_v22 = vrot.slane %v1972_v3, 1 }
 0x2c2   :  { %v1739_v38 = vpop.permute.xlu1 %1738  ;;  %3153 = vmatmul.msk.f32.gmra.mxu3 %vm1324_vm4, %v2837_v44  ;;  %v1985_v48 = vrot.slane %v1984_v21, 2  ;;  %v2552_v50 = vmul.f32 %v3137_v36, %v2442_v16  ;;  %v2678_v15 = vsel %vm415_vm1, %v2550_v61, 0.0 }
 0x2c3   :  { %v1725_v52 = vpop.permute.xlu0 %1724  ;;  %v2120_v28 = vsel %vm1301_vm3, %v1960_v31, %v2119_v20  ;;  %v1837_v45 = vmul.f32 %v3098_v6, %v1739_v38  ;;  %v1964_v12 = vrot.slane %v1963_v59, 2  ;;  %v2679_v14 = vrot.slane %v2678_v15, 4 }
 0x2c4   :  { %v1835_v27 = vmul.f32 %v3096_v0, %v1725_v52  ;;  %3112 = vmatmul.msk.f32.gmra.mxu2 %vm1324_vm4, %v2120_v28  ;;  %v1986_v30 = vadd.f32 %v1985_v48, %v1984_v21  ;;  %v2692_v43 = vsel %vm415_vm1, %v2552_v50, 0.0  ;;  %v3140_v52 = vld [vmem:[%s4708_s0 + $0x1d4] sm:$0xf]  ;;  %v1974_v55 = vadd.f32 %v1973_v22, %v1972_v3 }
 0x2c5   :  { %v1989_v33 = vsel %vm415_vm1, %v1837_v45, 0.0  ;;  %v1965_v46 = vadd.f32 %v1964_v12, %v1963_v59  ;;  %v3139_v59 = vld [vmem:[%s4708_s0 + $0x1d0] sm:$0xf] }
 0x2c6   :  { %v1975_v11 = vsel %vm415_vm1, %v1835_v27, 0.0  ;;  %v1990_v47 = vrot.slane %v1989_v33, 4  ;;  %v1987_v44 = vrot.slane %v1986_v30, 1  ;;  %v2693_v27 = vrot.slane %v2692_v43, 4 }
 0x2c7   :  { %v1976_v56 = vrot.slane %v1975_v11, 4  ;;  %v1966_v5 = vrot.slane %v1965_v46, 1 }
 0x2c8   :  { %v1991_v51 = vadd.f32 %v1990_v47, %v1989_v33  ;;  %v1988_v21 = vadd.f32 %v1987_v44, %v1986_v30  ;;  %v3104_v44 = vld [vmem:[%s4708_s0 + $0x168] sm:$0xf] }
 0x2c9   :  { %v1977_v37 = vadd.f32 %v1976_v56, %v1975_v11  ;;  %v1753_v17 = vpop.permute.xlu2 %1752  ;;  %v1967_v20 = vadd.f32 %v1966_v5, %v1965_v46  ;;  %v3103_v5 = vld [vmem:[%s4708_s0 + $0x164] sm:$0xf] }
 0x2ca   :  { %v2449_v40 = vpop.permute.xlu1 %2448  ;;  %v1839_v57 = vmul.f32 %v3100_v41, %v1753_v17  ;;  %v1992_v62 = vrot.slane %v1991_v51, 2  ;;  %v2680_v41 = vadd.f32 %v2679_v14, %v2678_v15 }
 0x2cb   :  { %v2435_v29 = vpop.permute.xlu0 %2434  ;;  %v1978_v1 = vrot.slane %v1977_v37, 2  ;;  %v2553_v6 = vmul.f32 %v3138_v19, %v2449_v40  ;;  %v2121_v40 = vsel %vm4783_vm8, %v1974_v55, %v1967_v20  ;;  %v3141_v19 = vld [vmem:[%s4708_s0 + $0x1d8] sm:$0xf] }
 0x2cc   :  { %v2003_v9 = vsel %vm415_vm1, %v1839_v57, 0.0  ;;  %v2551_v49 = vmul.f32 %v3136_v24, %v2435_v29  ;;  %v1993_v18 = vadd.f32 %v1992_v62, %v1991_v51  ;;  %v2694_v57 = vadd.f32 %v2693_v27, %v2692_v43  ;;  %v3102_v62 = vld [vmem:[%s4708_s0 + $0x160] sm:$0xf] }
 0x2cd   :  { %v1979_v35 = vadd.f32 %v1978_v1, %v1977_v37  ;;  %v2004_v42 = vrot.slane %v2003_v9, 4  ;;  %v2699_v23 = vsel %vm415_vm1, %v2553_v6, 0.0 }
 0x2ce   :  { %v2685_v8 = vsel %vm415_vm1, %v2551_v49, 0.0  ;;  %v1994_v12 = vrot.slane %v1993_v18, 1  ;;  %v2700_v1 = vrot.slane %v2699_v23, 4  ;;  %v2695_v22 = vrot.slane %v2694_v57, 2 }
 0x2cf   :  { %v2005_v54 = vadd.f32 %v2004_v42, %v2003_v9  ;;  %v1980_v39 = vrot.slane %v1979_v35, 1  ;;  %v2686_v31 = vrot.slane %v2685_v8, 4 }
 0x2d0   :  { %v1995_v48 = vadd.f32 %v1994_v12, %v1993_v18  ;;  %v2701_v50 = vadd.f32 %v2700_v1, %v2699_v23 }
 0x2d1   :  { %v2463_v53 = vpop.permute.xlu2 %2462  ;;  %v2006_v0 = vrot.slane %v2005_v54, 2  ;;  %v1981_v16 = vadd.f32 %v1980_v39, %v1979_v35  ;;  %v2687_v26 = vadd.f32 %v2686_v31, %v2685_v8 }
 0x2d2   :  { %v1760_v32 = vpop.permute.xlu1 %1759  ;;  %v2555_v33 = vmul.f32 %v3140_v52, %v2463_v53  ;;  %v2702_v43 = vrot.slane %v2701_v50, 2  ;;  %v2696_v52 = vadd.f32 %v2695_v22, %v2694_v57 }
 0x2d3   :  { %v1840_v13 = vmul.f32 %v3101_v25, %v1760_v32  ;;  %v1746_v34 = vpop.permute.xlu0 %1745  ;;  %v2007_v56 = vadd.f32 %v2006_v0, %v2005_v54  ;;  %v2122_v60 = vsel %vm1291_vm13, %v1981_v16, %v2121_v40  ;;  %v2688_v51 = vrot.slane %v2687_v26, 2 }
 0x2d4   :  { %v1838_v58 = vmul.f32 %v3099_v7, %v1746_v34  ;;  %v2713_v9 = vsel %vm415_vm1, %v2555_v33, 0.0  ;;  %v2123_v42 = vsel %vm1293_vm14, %v1988_v21, %v2122_v60  ;;  %v2681_v25 = vrot.slane %v2680_v41, 2 }
 0x2d5   :  { %v2010_v63 = vsel %vm415_vm1, %v1840_v13, 0.0  ;;  %v2008_v46 = vrot.slane %v2007_v56, 1  ;;  %v2714_v7 = vrot.slane %v2713_v9, 4  ;;  %v2124_v34 = vsel %vm1295_vm15, %v1995_v48, %v2123_v42  ;;  %v3107_v48 = vld [vmem:[%s4708_s0 + $0x174] sm:$0xf] }
 0x2d6   :  { %v2011_v2 = vrot.slane %v2010_v63, 4  ;;  %v1996_v38 = vsel %vm415_vm1, %v1838_v58, 0.0  ;;  %v2689_v15 = vadd.f32 %v2688_v51, %v2687_v26  ;;  %v2682_v30 = vadd.f32 %v2681_v25, %v2680_v41 }
 0x2d7   :  { %v1997_v28 = vrot.slane %v1996_v38, 4  ;;  %v2009_v32 = vadd.f32 %v2008_v46, %v2007_v56  ;;  %v2715_v31 = vadd.f32 %v2714_v7, %v2713_v9  ;;  %v3142_v56 = vld [vmem:[%s4708_s0 + $0x1dc] sm:$0xf] }
 0x2d8   :  { %v2012_v45 = vadd.f32 %v2011_v2, %v2010_v63  ;;  %v2683_v16 = vrot.slane %v2682_v30, 1 }
 0x2d9   :  { %v1998_v11 = vadd.f32 %v1997_v28, %v1996_v38  ;;  %v1774_v24 = vpop.permute.xlu2 %1773  ;;  %v2690_v28 = vrot.slane %v2689_v15, 1  ;;  %v2716_v27 = vrot.slane %v2715_v31, 2 }
 0x2da   :  { %v2013_v10 = vrot.slane %v2012_v45, 2  ;;  %v1767_v37 = vpop.permute.xlu1 %1766  ;;  %v1842_v2 = vmul.f32 %v3103_v5, %v1774_v24  ;;  %v2684_v24 = vadd.f32 %v2683_v16, %v2682_v30  ;;  %v3146_v16 = vld [vmem:[%s4708_s0 + $0x1ec] sm:$0xf] }
 0x2db   :  { %v1999_v47 = vrot.slane %v1998_v11, 2  ;;  %v2456_v29 = vpop.permute.xlu0 %2455  ;;  %v1841_v38 = vmul.f32 %v3102_v62, %v1767_v37  ;;  %v2691_v37 = vadd.f32 %v2690_v28, %v2689_v15  ;;  %v2717_v21 = vadd.f32 %v2716_v27, %v2715_v31 }
 0x2dc   :  { %v2014_v17 = vadd.f32 %v2013_v10, %v2012_v45  ;;  %v2554_v4 = vmul.f32 %v3139_v59, %v2456_v29  ;;  %v2703_v45 = vadd.f32 %v2702_v43, %v2701_v50  ;;  %v2024_v23 = vsel %vm415_vm1, %v1842_v2, 0.0  ;;  %v3105_v29 = vld [vmem:[%s4708_s0 + $0x16c] sm:$0xf] }
 0x2dd   :  { %v2000_v36 = vadd.f32 %v1999_v47, %v1998_v11  ;;  %v2017_v11 = vsel %vm415_vm1, %v1841_v38, 0.0  ;;  %v2697_v10 = vrot.slane %v2696_v52, 1  ;;  %v2025_v12 = vrot.slane %v2024_v23, 4 }
 0x2de   :  { %v2706_v49 = vsel %vm415_vm1, %v2554_v4, 0.0  ;;  %v2015_v3 = vrot.slane %v2014_v17, 1  ;;  %v2018_v47 = vrot.slane %v2017_v11, 4  ;;  %v2704_v4 = vrot.slane %v2703_v45, 1 }
 0x2df   :  { %v2001_v61 = vrot.slane %v2000_v36, 1  ;;  %v2707_v35 = vrot.slane %v2706_v49, 4  ;;  %v2838_v51 = vsel %vm4774_vm5, %v2691_v37, %v2684_v24  ;;  %v2718_v7 = vrot.slane %v2717_v21, 1 }
 0x2e0   :  { %v2016_v53 = vadd.f32 %v2015_v3, %v2014_v17  ;;  %v2019_v42 = vadd.f32 %v2018_v47, %v2017_v11  ;;  %v2705_v50 = vadd.f32 %v2704_v4, %v2703_v45  ;;  %v3147_v47 = vld [vmem:[%s4708_s0 + $0x1f0] sm:$0xf] }
 0x2e1   :  { %v2002_v54 = vadd.f32 %v2001_v61, %v2000_v36  ;;  %v2708_v8 = vadd.f32 %v2707_v35, %v2706_v49  ;;  %v1788_v6 = vpop.permute.xlu2 %1787  ;;  %v3106_v49 = vld [vmem:[%s4708_s0 + $0x170] sm:$0xf]  ;;  %v2698_v61 = vadd.f32 %v2697_v10, %v2696_v52  ;;  %v2026_v35 = vadd.f32 %v2025_v12, %v2024_v23 }
 0x2e2   :  { %v1781_v13 = vpop.permute.xlu1 %1780  ;;  %v1844_v9 = vmul.f32 %v3105_v29, %v1788_v6  ;;  %v2020_v43 = vrot.slane %v2019_v42, 2  ;;  %v2719_v52 = vadd.f32 %v2718_v7, %v2717_v21 }
 0x2e3   :  { %v2470_v39 = vpop.permute.xlu0 %2469  ;;  %v2125_v58 = vsel %vm1297_vm0, %v2002_v54, %v2124_v34  ;;  %v2709_v20 = vrot.slane %v2708_v8, 2  ;;  %v1843_v60 = vmul.f32 %v3104_v44, %v1781_v13  ;;  %v2839_v34 = vsel %vm1291_vm13, %v2698_v61, %v2838_v51 }
 0x2e4   :  { %v2556_v63 = vmul.f32 %v3141_v19, %v2470_v39  ;;  %v2126_v0 = vsel %vm1299_vm2, %v2009_v32, %v2125_v58  ;;  %v3143_v19 = vld [vmem:[%s4708_s0 + $0x1e0] sm:$0xf]  ;;  %v2038_v22 = vsel %vm415_vm1, %v1844_v9, 0.0  ;;  %v2027_v30 = vrot.slane %v2026_v35, 2 }
 0x2e5   :  { %v2127_v14 = vsel %vm1301_vm3, %v2016_v53, %v2126_v0  ;;  %v2710_v26 = vadd.f32 %v2709_v20, %v2708_v8  ;;  %v2031_v25 = vsel %vm415_vm1, %v1843_v60, 0.0  ;;  %v3144_v8 = vld [vmem:[%s4708_s0 + $0x1e4] sm:$0xf]  ;;  %v2840_v2 = vsel %vm1293_vm14, %v2705_v50, %v2839_v34  ;;  %v3108_v34 = vld [vmem:[%s4708_s0 + $0x178] sm:$0xf] }
 0x2e6   :  { %v2720_v18 = vsel %vm415_vm1, %v2556_v63, 0.0  ;;  %3113 = vmatmul.msk.f32.gmra.mxu2 %vm1324_vm4, %v2127_v14  ;;  %v2032_v15 = vrot.slane %v2031_v25, 4  ;;  %v2039_v38 = vrot.slane %v2038_v22, 4  ;;  %v2028_v44 = vadd.f32 %v2027_v30, %v2026_v35 }
 0x2e7   :  { %v2721_v55 = vrot.slane %v2720_v18, 4  ;;  %v2711_v57 = vrot.slane %v2710_v26, 1  ;;  %v2021_v27 = vadd.f32 %v2020_v43, %v2019_v42 }
 0x2e8   :  { %v2033_v28 = vadd.f32 %v2032_v15, %v2031_v25  ;;  %v2040_v10 = vadd.f32 %v2039_v38, %v2038_v22 }
 0x2e9   :  { %v2722_v59 = vadd.f32 %v2721_v55, %v2720_v18  ;;  %v1795_v1 = vpop.permute.xlu2 %1794  ;;  %v2712_v32 = vadd.f32 %v2711_v57, %v2710_v26  ;;  %v2022_v4 = vrot.slane %v2021_v27, 1 }
 0x2ea   :  { %v2491_v33 = vpop.permute.xlu1 %2490  ;;  %v1845_v62 = vmul.f32 %v3106_v49, %v1795_v1  ;;  %v2034_v60 = vrot.slane %v2033_v28, 2 }
 0x2eb   :  { %v2723_v41 = vrot.slane %v2722_v59, 2  ;;  %v2477_v40 = vpop.permute.xlu0 %2476  ;;  %v2559_v0 = vmul.f32 %v3144_v8, %v2491_v33  ;;  %v2841_v18 = vsel %vm1295_vm15, %v2712_v32, %v2840_v2  ;;  %v3149_v32 = vld [vmem:[%s4708_s0 + $0x1f8] sm:$0xf]  ;;  %v2023_v15 = vadd.f32 %v2022_v4, %v2021_v27 }
 0x2ec   :  { %v2557_v17 = vmul.f32 %v3142_v56, %v2477_v40  ;;  %v2045_v20 = vsel %vm415_vm1, %v1845_v62, 0.0  ;;  %v3145_v56 = vld [vmem:[%s4708_s0 + $0x1e8] sm:$0xf]  ;;  %v2842_v33 = vsel %vm1297_vm0, %v2719_v52, %v2841_v18  ;;  %v3109_v40 = vld [vmem:[%s4708_s0 + $0x17c] sm:$0xf]  ;;  %v2035_v25 = vadd.f32 %v2034_v60, %v2033_v28 }
 0x2ed   :  { %v2724_v36 = vadd.f32 %v2723_v41, %v2722_v59  ;;  %v2046_v11 = vrot.slane %v2045_v20, 4  ;;  %v2741_v59 = vsel %vm415_vm1, %v2559_v0, 0.0  ;;  %v3148_v60 = vld [vmem:[%s4708_s0 + $0x1f4] sm:$0xf] }
 0x2ee   :  { %v2727_v46 = vsel %vm415_vm1, %v2557_v17, 0.0  ;;  %v2742_v21 = vrot.slane %v2741_v59, 4 }
 0x2ef   :  { %v2728_v3 = vrot.slane %v2727_v46, 4  ;;  %v2725_v5 = vrot.slane %v2724_v36, 1  ;;  %v2047_v51 = vadd.f32 %v2046_v11, %v2045_v20 }
 0x2f1   :  { %v2729_v54 = vadd.f32 %v2728_v3, %v2727_v46  ;;  %v2505_v6 = vpop.permute.xlu2 %2504  ;;  %v2726_v14 = vadd.f32 %v2725_v5, %v2724_v36  ;;  %v2029_v46 = vrot.slane %v2028_v44, 1  ;;  %v2041_v3 = vrot.slane %v2040_v10, 2 }
 0x2f2   :  { %v1802_v13 = vpop.permute.xlu1 %1801  ;;  %v2561_v37 = vmul.f32 %v3146_v16, %v2505_v6  ;;  %v2048_v5 = vrot.slane %v2047_v51, 2  ;;  %v2036_v6 = vrot.slane %v2035_v25, 1 }
 0x2f3   :  { %v2730_v39 = vrot.slane %v2729_v54, 2  ;;  %v1846_v53 = vmul.f32 %v3107_v48, %v1802_v13  ;;  %v2484_v58 = vpop.permute.xlu0 %2483  ;;  %v2843_v29 = vsel %vm1299_vm2, %v2726_v14, %v2842_v33  ;;  %v2030_v22 = vadd.f32 %v2029_v46, %v2028_v44 }
 0x2f4   :  { %v2558_v63 = vmul.f32 %v3143_v19, %v2484_v58  ;;  %v2755_v61 = vsel %vm415_vm1, %v2561_v37, 0.0  ;;  %v3150_v58 = vld [vmem:[%s4708_s0 + $0x1fc] sm:$0xf]  ;;  %v2042_v43 = vadd.f32 %v2041_v3, %v2040_v10  ;;  %v2049_v52 = vadd.f32 %v2048_v5, %v2047_v51 }
 0x2f5   :  { %v2731_v31 = vadd.f32 %v2730_v39, %v2729_v54  ;;  %v2052_v45 = vsel %vm415_vm1, %v1846_v53, 0.0  ;;  %v2743_v54 = vadd.f32 %v2742_v21, %v2741_v59  ;;  %v2756_v62 = vrot.slane %v2755_v61, 4 }
 0x2f6   :  { %v2734_v23 = vsel %vm415_vm1, %v2558_v63, 0.0  ;;  %v2053_v41 = vrot.slane %v2052_v45, 4  ;;  %v2043_v11 = vrot.slane %v2042_v43, 1 }
 0x2f7   :  { %v2732_v55 = vrot.slane %v2731_v31, 1  ;;  %v2735_v1 = vrot.slane %v2734_v23, 4  ;;  %v2744_v2 = vrot.slane %v2743_v54, 2  ;;  %v2757_v28 = vadd.f32 %v2756_v62, %v2755_v61 }
 0x2f8   :  { %v2054_v35 = vadd.f32 %v2053_v41, %v2052_v45  ;;  %v2044_v21 = vadd.f32 %v2043_v11, %v2042_v43 }
 0x2f9   :  { %v2733_v26 = vadd.f32 %v2732_v55, %v2731_v31  ;;  %v1816_v57 = vpop.permute.xlu2 %1815  ;;  %v2736_v48 = vadd.f32 %v2735_v1, %v2734_v23  ;;  %v2745_v33 = vadd.f32 %v2744_v2, %v2743_v54  ;;  %v2128_v1 = vsel %vm4784_vm6, %v2030_v22, %v2023_v15 }
 0x2fa   :  { %v2512_v12 = vpop.permute.xlu1 %2511  ;;  %v1848_v9 = vmul.f32 %v3109_v40, %v1816_v57  ;;  %v2055_v39 = vrot.slane %v2054_v35, 2  ;;  %v2037_v40 = vadd.f32 %v2036_v6, %v2035_v25 }
 0x2fb   :  { %v2498_v17 = vpop.permute.xlu0 %2497  ;;  %v2844_v24 = vsel %vm1301_vm3, %v2733_v26, %v2843_v29  ;;  %v2562_v49 = vmul.f32 %v3147_v47, %v2512_v12  ;;  %v2737_v63 = vrot.slane %v2736_v48, 2  ;;  %v2050_v12 = vrot.slane %v2049_v52, 1 }
 0x2fc   :  { %v2560_v36 = vmul.f32 %v3145_v56, %v2498_v17  ;;  %3154 = vmatmul.msk.f32.gmra.mxu3 %vm1324_vm4, %v2844_v24  ;;  %v2066_v50 = vsel %vm415_vm1, %v1848_v9, 0.0  ;;  %v2056_v45 = vadd.f32 %v2055_v39, %v2054_v35  ;;  %v2758_v47 = vrot.slane %v2757_v28, 2 }
 0x2fd   :  { %v2067_v19 = vrot.slane %v2066_v50, 4  ;;  %v2762_v8 = vsel %vm415_vm1, %v2562_v49, 0.0  ;;  %v2738_v59 = vadd.f32 %v2737_v63, %v2736_v48  ;;  %v2746_v9 = vrot.slane %v2745_v33, 1 }
 0x2fe   :  { %v2748_v42 = vsel %vm415_vm1, %v2560_v36, 0.0  ;;  %v2763_v38 = vrot.slane %v2762_v8, 4  ;;  %v2057_v17 = vrot.slane %v2056_v45, 1  ;;  %v2129_v35 = vsel %vm1291_vm13, %v2037_v40, %v2128_v1 }
 0x2ff   :  { %v2749_v7 = vrot.slane %v2748_v42, 4  ;;  %v2068_v53 = vadd.f32 %v2067_v19, %v2066_v50  ;;  %v2739_v57 = vrot.slane %v2738_v59, 1  ;;  %v2759_v25 = vadd.f32 %v2758_v47, %v2757_v28 }
 0x300   :  { %v2764_v10 = vadd.f32 %v2763_v38, %v2762_v8  ;;  %v2058_v50 = vadd.f32 %v2057_v17, %v2056_v45  ;;  %v2130_v15 = vsel %vm1293_vm14, %v2044_v21, %v2129_v35  ;;  %v2901_v17 = vld [vmem:[%s4711_s2] sm:$0xff] }
 0x301   :  { %v2750_v13 = vadd.f32 %v2749_v7, %v2748_v42  ;;  %v2533_v20 = vpop.permute.xlu2 %2532  ;;  %v2069_v44 = vrot.slane %v2068_v53, 2  ;;  %v2051_v42 = vadd.f32 %v2050_v12, %v2049_v52  ;;  %v2760_v39 = vrot.slane %v2759_v25, 1 }
 0x302   :  { %v2526_v30 = vpop.permute.xlu1 %2525  ;;  %v2565_v55 = vmul.f32 %v3150_v58, %v2533_v20  ;;  %v2765_v49 = vrot.slane %v2764_v10, 2 }
 0x303   :  { %v2564_v0 = vmul.f32 %v3149_v32, %v2526_v30  ;;  %v1809_v31 = vpop.permute.xlu0 %1808  ;;  %v2751_v14 = vrot.slane %v2750_v13, 2  ;;  %v2070_v24 = vadd.f32 %v2069_v44, %v2068_v53  ;;  %v2740_v32 = vadd.f32 %v2739_v57, %v2738_v59 }
 0x304   :  { %v1847_v18 = vmul.f32 %v3108_v34, %v1809_v31  ;;  %v2783_v56 = vsel %vm415_vm1, %v2565_v55, 0.0  ;;  %v2766_v34 = vadd.f32 %v2765_v49, %v2764_v10  ;;  %v2131_v30 = vsel %vm1295_vm15, %v2051_v42, %v2130_v15 }
 0x305   :  { %v2776_v16 = vsel %vm415_vm1, %v2564_v0, 0.0  ;;  %v2752_v37 = vadd.f32 %v2751_v14, %v2750_v13  ;;  %v2784_v41 = vrot.slane %v2783_v56, 4  ;;  %v2071_v7 = vrot.slane %v2070_v24, 1 }
 0x306   :  { %v2777_v27 = vrot.slane %v2776_v16, 4  ;;  %v2059_v23 = vsel %vm415_vm1, %v1847_v18, 0.0  ;;  %v2747_v13 = vadd.f32 %v2746_v9, %v2745_v33  ;;  %v2132_v63 = vsel %vm1297_vm0, %v2058_v50, %v2131_v30 }
 0x307   :  { %v2060_v26 = vrot.slane %v2059_v23, 4  ;;  %v2785_v36 = vadd.f32 %v2784_v41, %v2783_v56  ;;  %v2753_v3 = vrot.slane %v2752_v37, 1  ;;  %v2072_v6 = vadd.f32 %v2071_v7, %v2070_v24  ;;  %v1350_v56 = vpop.f32.mrf.mxu0 }
 0x308   :  { %v2778_v4 = vadd.f32 %v2777_v27, %v2776_v16  ;;  %v2845_v0 = vsel %vm4785_vm7, %v2747_v13, %v2740_v32  ;;  %v2767_v14 = vrot.slane %v2766_v34, 1  ;;  %v2761_v52 = vadd.f32 %v2760_v39, %v2759_v25 }
 0x309   :  { %v2061_v29 = vadd.f32 %v2060_v26, %v2059_v23  ;;  %v2786_v5 = vrot.slane %v2785_v36, 2  ;;  %v2754_v22 = vadd.f32 %v2753_v3, %v2752_v37  ;;  %v1447_v37 = vpop.f32.mrf.mxu1 }
 0x30a   :  { %v2779_v54 = vrot.slane %v2778_v4, 2  ;;  %v2768_v27 = vadd.f32 %v2767_v14, %v2766_v34  ;;  %v1448_v12 = vadd.f32 %v1447_v37, %v1350_v56 }
 0x30b   :  { %v2062_v46 = vrot.slane %v2061_v29, 2  ;;  %v2519_v51 = vpop.permute.xlu0 %2518  ;;  %v2787_v31 = vadd.f32 %v2786_v5, %v2785_v36  ;;  %v2846_v20 = vsel %vm1291_vm13, %v2754_v22, %v2845_v0 }
 0x30c   :  { %v2563_v61 = vmul.f32 %v3148_v60, %v2519_v51  ;;  %v2780_v43 = vadd.f32 %v2779_v54, %v2778_v4  ;;  %v2847_v44 = vsel %vm1293_vm14, %v2761_v52, %v2846_v20 }
 0x30d   :  { %v2063_v48 = vadd.f32 %v2062_v46, %v2061_v29  ;;  %v2788_v16 = vrot.slane %v2787_v31, 1  ;;  %v2848_v59 = vsel %vm1295_vm15, %v2768_v27, %v2847_v44  ;;  %v3160_v29 = vld [vmem:[%s4710_s4] ss:$0 sm:$0xff] }
 0x30e   :  { %v2769_v19 = vsel %vm415_vm1, %v2563_v61, 0.0  ;;  %v2781_v55 = vrot.slane %v2780_v43, 1  ;;  %vm2911_vm1 = vcmask 261120   ;;  %v2902_v61 = vld [vmem:[%s4711_s2 + $0x8] sm:$0xff] }
 0x30f   :  { %v2064_v62 = vrot.slane %v2063_v48, 1  ;;  %v2770_v8 = vrot.slane %v2769_v19, 4  ;;  %v2789_v26 = vadd.f32 %v2788_v16, %v2787_v31  ;;  %v2160_v41 = vpop.f32.mrf.mxu2  ;;  %v1353_v57 = vpop.f32.mrf.mxu0  ;;  %v2904_v16 = vld [vmem:[%s4711_s2 + $0x18] sm:$0xff] }
 0x310   :  { %v2782_v11 = vadd.f32 %v2781_v55, %v2780_v43  ;;  %v2172_v47 = vadd.f32 %v2160_v41, %v1448_v12 }
 0x311   :  { %v2065_v53 = vadd.f32 %v2064_v62, %v2063_v48  ;;  %v2771_v58 = vadd.f32 %v2770_v8, %v2769_v19  ;;  %v1450_v36 = vpop.f32.mrf.mxu1  ;;  %v2903_v62 = vld [vmem:[%s4711_s2 + $0x10] sm:$0xff]  ;;  %v3237_v8 = vmov 32.0  }
 0x312   :  { %v1451_v46 = vadd.f32 %v1450_v36, %v1353_v57  ;;  %3227 = vrcp.f32 %v3237_v8 }
 0x313   :  { %v2772_v2 = vrot.slane %v2771_v58, 2  ;;  %v2133_v38 = vsel %vm1299_vm2, %v2065_v53, %v2132_v63 }
 0x314   :  { %v2134_v18 = vsel %vm1301_vm3, %v2072_v6, %v2133_v38 }
 0x315   :  { %v2773_v28 = vadd.f32 %v2772_v2, %v2771_v58  ;;  %3114 = vmatmul.msk.f32.gmra.mxu2 %vm1324_vm4, %v2134_v18 }
 0x317   :  { %v2774_v45 = vrot.slane %v2773_v28, 1  ;;  %v1356_v48 = vpop.f32.mrf.mxu0 }
 0x318   :  { %v3228_v15 = vpop.eup %3227 }
 0x319   :  { %v2775_v23 = vadd.f32 %v2774_v45, %v2773_v28  ;;  %v1453_v50 = vpop.f32.mrf.mxu1  ;;  %v2925_v39 = vmul.f32 32.0, %v3228_v15  ;;  %vm2929_vm13 = vweird.f32 %v3228_v15 }
 0x31a   :  { %v1454_v54 = vadd.f32 %v1453_v50, %v1356_v48 }
 0x31b   :  { %v2849_v33 = vsel %vm1297_vm0, %v2775_v23, %v2848_v59  ;;  %v2926_v53 = vsub.f32 1.0, %v2925_v39 }
 0x31c   :  { %v2850_v10 = vsel %vm1299_vm2, %v2782_v11, %v2849_v33 }
 0x31d   :  { %v2851_v40 = vsel %vm1301_vm3, %v2789_v26, %v2850_v10  ;;  %v2927_v58 = vmul.f32 %v3228_v15, %v2926_v53 }
 0x31e   :  { %3155 = vmatmul.msk.f32.gmra.mxu3 %vm1324_vm4, %v2851_v40 }
 0x31f   :  { %v2928_v30 = vadd.f32 %v3228_v15, %v2927_v58  ;;  %v1359_v6 = vpop.f32.mrf.mxu0 }
 0x321   :  { %v2877_v60 = vpop.f32.mrf.mxu3  ;;  %v4657_v43 = vsel %vm2929_vm13, %v3228_v15, %v2928_v30  ;;  %v1456_v0 = vpop.f32.mrf.mxu1 }
 0x322   :  { %v2889_v1 = vadd.f32 %v2877_v60, %v2172_v47  ;;  %v1457_v38 = vadd.f32 %v1456_v0, %v1359_v6 }
 0x324   :  { %v2897_v24 = vadd.f32 %v3160_v29, %v2889_v1 }
 0x326   :  { %v2905_v4 = vadd.f32 %v2901_v17, %v2897_v24 }
 0x328   :  { %v2912_v21 = vsel %vm2911_vm1, %v2905_v4, 0.0 }
 0x329   :  { %2913 = vadd.xlane.f32.xlu0 %v2912_v21 }
 0x345   :  { %v2880_v49 = vpop.f32.mrf.mxu3 }
 0x347   :  { %v2163_v51 = vpop.f32.mrf.mxu2 }
 0x348   :  { %v2173_v9 = vadd.f32 %v2163_v51, %v1451_v46 }
 0x34a   :  { %v2890_v3 = vadd.f32 %v2880_v49, %v2173_v9  ;;  %v3161_v49 = vld [vmem:[%s4712_s5] ss:$0 sm:$0xff] }
 0x34c   :  { %v2898_v35 = vadd.f32 %v3160_v29, %v2890_v3 }
 0x34e   :  { %v2906_v42 = vadd.f32 %v2902_v61, %v2898_v35  ;;  %v3162_v61 = vld [vmem:[%s4713_s6] ss:$0 sm:$0xff] }
 0x350   :  { %v2915_v25 = vsel %vm2911_vm1, %v2906_v42, 0.0 }
 0x351   :  { %2916 = vadd.xlane.f32.xlu1 %v2915_v25 }
 0x369   :  { %v2166_v7 = vpop.f32.mrf.mxu2 }
 0x36a   :  { %v2174_v19 = vadd.f32 %v2166_v7, %v1454_v54 }
 0x37f   :  { %v2883_v32 = vpop.f32.mrf.mxu3 }
 0x380   :  { %v2891_v5 = vadd.f32 %v2883_v32, %v2174_v19 }
 0x382   :  { %v2899_v13 = vadd.f32 %v3160_v29, %v2891_v5 }
 0x384   :  { %v2907_v34 = vadd.f32 %v2903_v62, %v2899_v13 }
 0x386   :  { %v2918_v22 = vsel %vm2911_vm1, %v2907_v34, 0.0 }
 0x387   :  { %2919 = vadd.xlane.f32.xlu2 %v2918_v22 }
 0x398   :  { %v2169_v31 = vpop.f32.mrf.mxu2 }
 0x399   :  { %v2175_v20 = vadd.f32 %v2169_v31, %v1457_v38 }
 0x39c   :  { %v2914_v63 = vpop.xlane.xlu0 %2913 }
 0x39d   :  { %v2931_v2 = vmul.f32 %v4657_v43, %v2914_v63 }
 0x39f   :  { %v2935_v14 = vsub.f32 %v2905_v4, %v2931_v2 }
 0x3a1   :  { %v2886_v18 = vpop.f32.mrf.mxu3  ;;  %v2939_v52 = vmul.f32 %v2935_v14, %v2935_v14 }
 0x3a2   :  { %v2892_v28 = vadd.f32 %v2886_v18, %v2175_v20 }
 0x3a3   :  { %v2943_v55 = vsel %vm2911_vm1, %v2939_v52, 0.0 }
 0x3a4   :  { %v2900_v45 = vadd.f32 %v3160_v29, %v2892_v28  ;;  %2944 = vadd.xlane.f32.xlu1 %v2943_v55 }
 0x3a6   :  { %v2908_v44 = vadd.f32 %v2904_v16, %v2900_v45 }
 0x3a8   :  { %v2921_v27 = vsel %vm2911_vm1, %v2908_v44, 0.0 }
 0x3a9   :  { %2922 = vadd.xlane.f32.xlu0 %v2921_v27 }
 0x3c4   :  { %v2917_v23 = vpop.xlane.xlu1 %2916 }
 0x3c5   :  { %v2932_v11 = vmul.f32 %v4657_v43, %v2917_v23 }
 0x3c7   :  { %v2936_v59 = vsub.f32 %v2906_v42, %v2932_v11 }
 0x3c9   :  { %v2940_v56 = vmul.f32 %v2936_v59, %v2936_v59 }
 0x3cb   :  { %v2946_v26 = vsel %vm2911_vm1, %v2940_v56, 0.0 }
 0x3cc   :  { %2947 = vadd.xlane.f32.xlu2 %v2946_v26 }
 0x3fa   :  { %v2920_v33 = vpop.xlane.xlu2 %2919 }
 0x3fb   :  { %v2933_v10 = vmul.f32 %v4657_v43, %v2920_v33 }
 0x3fd   :  { %v4668_v37 = vsub.f32 %v2907_v34, %v2933_v10 }
 0x3ff   :  { %v2941_v41 = vmul.f32 %v4668_v37, %v4668_v37 }
 0x401   :  { %v2949_v40 = vsel %vm2911_vm1, %v2941_v41, 0.0 }
 0x402   :  { %2950 = vadd.xlane.f32.xlu0 %v2949_v40 }
 0x417   :  { %v2945_v12 = vpop.xlane.xlu1 %2944 }
 0x418   :  { %v2955_v47 = vmul.f32 %v2945_v12, %v4657_v43 }
 0x41a   :  { %v2959_v29 = vadd.f32 1e-05, %v2955_v47 }
 0x41c   :  { %3229 = vrsqrt.f32 %v2959_v29  ;;  %v2923_v60 = vpop.xlane.xlu0 %2922  ;;  %vm2969_vm15 = vweird.f32 %v2959_v29 }
 0x41d   :  { %v2934_v1 = vmul.f32 %v4657_v43, %v2923_v60 }
 0x41f   :  { %v4675_v17 = vsub.f32 %v2908_v44, %v2934_v1 }
 0x421   :  { %v2942_v24 = vmul.f32 %v4675_v17, %v4675_v17 }
 0x422   :  { %v3230_v4 = vpop.eup %3229 }
 0x423   :  { %v2964_v21 = vmul.f32 %v3230_v4, %v2959_v29  ;;  %v2952_v57 = vsel %vm2911_vm1, %v2942_v24, 0.0  ;;  %vm2970_vm14 = vweird.f32 %v3230_v4 }
 0x424   :  { %2953 = vadd.xlane.f32.xlu1 %v2952_v57  ;;  %vm2971_vm0 = vmor %vm2969_vm15, %vm2970_vm14 }
 0x425   :  { %v2965_v36 = vmul.f32 %v3230_v4, %v2964_v21 }
 0x427   :  { %v2966_v46 = vmul.f32 0.5, %v2965_v36 }
 0x429   :  { %v2967_v51 = vsub.f32 1.5, %v2966_v46 }
 0x42b   :  { %v2968_v9 = vmul.f32 %v3230_v4, %v2967_v51 }
 0x42d   :  { %v2972_v3 = vsel %vm2971_vm0, %v3230_v4, %v2968_v9 }
 0x42e   :  { %v3003_v35 = vmul.f32 %v2972_v3, %v2935_v14 }
 0x430   :  { %v3010_v42 = vmul.f32 %v3161_v49, %v3003_v35 }
 0x432   :  { %v3017_v25 = vadd.f32 %v3162_v61, %v3010_v42 }
 0x434   :  { %3021 = vst.msk [vmem:[%s4714_s7] sm:$0xff] %vm2911_vm1, %v3017_v25 }
 0x43f   :  { %v2948_v48 = vpop.xlane.xlu2 %2947 }
 0x440   :  { %v2956_v50 = vmul.f32 %v2948_v48, %v4657_v43 }
 0x442   :  { %v2960_v7 = vadd.f32 1e-05, %v2956_v50 }
 0x444   :  { %3231 = vrsqrt.f32 %v2960_v7  ;;  %vm2979_vm3 = vweird.f32 %v2960_v7 }
 0x44a   :  { %v3232_v54 = vpop.eup %3231 }
 0x44b   :  { %v2974_v19 = vmul.f32 %v3232_v54, %v2960_v7  ;;  %vm2980_vm2 = vweird.f32 %v3232_v54 }
 0x44c   :  { %vm2981_vm4 = vmor %vm2979_vm3, %vm2980_vm2 }
 0x44d   :  { %v2975_v32 = vmul.f32 %v3232_v54, %v2974_v19 }
 0x44f   :  { %v2976_v5 = vmul.f32 0.5, %v2975_v32 }
 0x451   :  { %v2977_v62 = vsub.f32 1.5, %v2976_v5 }
 0x453   :  { %v2978_v8 = vmul.f32 %v3232_v54, %v2977_v62 }
 0x455   :  { %v2982_v13 = vsel %vm2981_vm4, %v3232_v54, %v2978_v8 }
 0x456   :  { %v3004_v34 = vmul.f32 %v2982_v13, %v2936_v59 }
 0x458   :  { %v3011_v22 = vmul.f32 %v3161_v49, %v3004_v34 }
 0x45a   :  { %v3018_v15 = vadd.f32 %v3162_v61, %v3011_v22 }
 0x45c   :  { %3022 = vst.msk [vmem:[%s4714_s7 + $0x8] sm:$0xff] %vm2911_vm1, %v3018_v15 }
 0x475   :  { %v2951_v39 = vpop.xlane.xlu0 %2950 }
 0x476   :  { %v2957_v53 = vmul.f32 %v2951_v39, %v4657_v43 }
 0x478   :  { %v2961_v58 = vadd.f32 1e-05, %v2957_v53 }
 0x47a   :  { %3233 = vrsqrt.f32 %v2961_v58  ;;  %vm2989_vm10 = vweird.f32 %v2961_v58 }
 0x480   :  { %v3234_v30 = vpop.eup %3233 }
 0x481   :  { %v2984_v6 = vmul.f32 %v3234_v30, %v2961_v58  ;;  %vm2990_vm9 = vweird.f32 %v3234_v30 }
 0x482   :  { %vm2991_vm12 = vmor %vm2989_vm10, %vm2990_vm9 }
 0x483   :  { %v2985_v63 = vmul.f32 %v3234_v30, %v2984_v6 }
 0x485   :  { %v2986_v0 = vmul.f32 0.5, %v2985_v63 }
 0x487   :  { %v2987_v31 = vsub.f32 1.5, %v2986_v0 }
 0x489   :  { %v2988_v2 = vmul.f32 %v3234_v30, %v2987_v31 }
 0x48b   :  { %v2992_v38 = vsel %vm2991_vm12, %v3234_v30, %v2988_v2 }
 0x48c   :  { %v3005_v14 = vmul.f32 %v2992_v38, %v4668_v37 }
 0x48e   :  { %v3012_v20 = vmul.f32 %v3161_v49, %v3005_v14 }
 0x490   :  { %v3019_v18 = vadd.f32 %v3162_v61, %v3012_v20 }
 0x492   :  { %3023 = vst.msk [vmem:[%s4714_s7 + $0x10] sm:$0xff] %vm2911_vm1, %v3019_v18 }
 0x497   :  { %v2954_v52 = vpop.xlane.xlu1 %2953 }
 0x498   :  { %v2958_v28 = vmul.f32 %v2954_v52, %v4657_v43 }
 0x49a   :  { %v2962_v55 = vadd.f32 1e-05, %v2958_v28 }
 0x49c   :  { %3235 = vrsqrt.f32 %v2962_v55  ;;  %vm2999_vm8 = vweird.f32 %v2962_v55 }
 0x4a2   :  { %v3236_v16 = vpop.eup %3235 }
 0x4a3   :  { %v2994_v45 = vmul.f32 %v3236_v16, %v2962_v55  ;;  %vm3000_vm11 = vweird.f32 %v3236_v16 }
 0x4a4   :  { %vm3001_vm5 = vmor %vm2999_vm8, %vm3000_vm11 }
 0x4a5   :  { %v2995_v44 = vmul.f32 %v3236_v16, %v2994_v45 }
 0x4a7   :  { %v2996_v27 = vmul.f32 0.5, %v2995_v44 }
 0x4a9   :  { %v2997_v23 = vsub.f32 1.5, %v2996_v27 }
 0x4ab   :  { %v2998_v11 = vmul.f32 %v3236_v16, %v2997_v23 }
 0x4ad   :  { %v3002_v59 = vsel %vm3001_vm5, %v3236_v16, %v2998_v11 }
 0x4ae   :  { %v3006_v56 = vmul.f32 %v3002_v59, %v4675_v17 }
 0x4b0   :  { %v3013_v26 = vmul.f32 %v3161_v49, %v3006_v56 }
 0x4b2   :  { %v3020_v33 = vadd.f32 %v3162_v61, %v3013_v26 }
 0x4b4   :  { %3024 = vst.msk [vmem:[%s4714_s7 + $0x18] sm:$0xff] %vm2911_vm1, %v3020_v33 }

</bundles_post_ra>
